<compile_context>
chip_gen: v7x
topology: tpu7x:2x2x1
jax: 0.10.0
libtpu: 0.0.40
codegen_flags: <defaults>
</compile_context>

<pallas_src>
import jax
import jax.numpy as jnp
from jax import lax
from jax.experimental import pallas as pl
from jax.experimental.pallas import tpu as pltpu

EPS = 1e-5     # PyTorch GroupNorm default eps
LANE = 128     # TPU lane width


def _round_up(x, m):
    return (x + m - 1) // m * m


# --------------------------------------------------------------------------
# Fused kernel: [conv3x3 -> AdaGN(groups=1) -> ReLU] x 2, Bt samples per step
# --------------------------------------------------------------------------
def _make_block_kernel(H, W, Cin, F, Fp, Bt):
    HW = H * W
    inv_n = 1.0 / float(HW * F)   # GN stats over the *valid* F channels only

    def zero_slab_borders(slab_ref, C):
        # slab_ref: (3, H+2, W, C).  slab[dw][i, j, :] == zero-padded
        # source[i, j+dw, :].  Interiors are rewritten per sample; only the
        # border rows/columns need zeros (re-zeroed each grid step because the
        # scratch is per-core under megacore sharding).
        zrow = jnp.zeros((3, 1, W, C), jnp.bfloat16)
        slab_ref[:, 0:1, :, :] = zrow
        slab_ref[:, H + 1:H + 2, :, :] = zrow
        zcol = jnp.zeros((1, H + 2, 1, C), jnp.bfloat16)
        slab_ref[0:1, :, 0:1, :] = zcol          # dw=0 left pad column
        slab_ref[2:3, :, W - 1:W, :] = zcol      # dw=2 right pad column

    def write_slabs(slab_ref, img):
        # img: (H, W, C) bf16 — write the 3 dw-shifted interiors.
        slab_ref[1:2, 1:H + 1, :, :] = img[None]
        slab_ref[0:1, 1:H + 1, 1:W, :] = img[None, :, 0:W - 1, :]
        slab_ref[2:3, 1:H + 1, 0:W - 1, :] = img[None, :, 1:W, :]

    def tap(slab_ref, dh, dw, C):
        # Free view: dh is a leading-axis slice of the dw slab (layout-aligned).
        return slab_ref[dw:dw + 1, dh:dh + H, :, :].reshape(HW, C)

    def gn_affine_relu(acc, gamma, beta, ys_b, yb_b, chmask):
        # acc: (HW, Fp) f32; padded output channels are exactly 0.
        mean = jnp.sum(acc) * inv_n                     # pad cols contribute 0
        d = acc - mean
        var = jnp.sum(d * d * chmask) * inv_n           # centered 2nd pass
        rstd = lax.rsqrt(var + EPS)
        # Fold normalize + GN affine + AdaGN into one FMA, then ReLU.
        scale = gamma * (1.0 + ys_b) * rstd             # (Fp,)
        shift = beta * (1.0 + ys_b) + yb_b - mean * scale
        return jnp.maximum(acc * scale[None, :] + shift[None, :], 0.0)

    def kernel(x_ref, w1_ref, w2_ref, g1_ref, b1_ref, g2_ref, b2_ref,
               ys_ref, yb_ref, out_ref,
               slab1_ref, slab2_ref, col1_ref, acc_ref):
        zero_slab_borders(slab1_ref, Cin)
        zero_slab_borders(slab2_ref, Fp)

        # Valid-channel mask (1, Fp): excludes padded channels from variance.
        chmask = (lax.broadcasted_iota(jnp.int32, (1, Fp), 1) < F
                  ).astype(jnp.float32)
        gamma1 = g1_ref[0]
        beta1 = b1_ref[0]
        gamma2 = g2_ref[0]
        beta2 = b2_ref[0]

        for s in range(Bt):                       # static unroll over batch tile
            ys_b = ys_ref[s, 0]                   # (Fp,)
            yb_b = yb_ref[s, 0]

            # ---- stage 1: conv1 as a single im2col matmul (K = 9*Cin) ----
            write_slabs(slab1_ref, x_ref[s].astype(jnp.bfloat16))
            for k in range(9):
                dh, dw = divmod(k, 3)
                col1_ref[:, k * Cin:(k + 1) * Cin] = tap(slab1_ref, dh, dw, Cin)
            acc1 = jnp.dot(col1_ref[...], w1_ref[...],
                           preferred_element_type=jnp.float32)     # (HW, Fp)
            h1 = gn_affine_relu(acc1, gamma1, beta1, ys_b, yb_b, chmask)

            # ---- stage 2: conv2 as 9 per-tap matmuls (K = Fp each) ----
            write_slabs(slab2_ref, h1.reshape(H, W, Fp).astype(jnp.bfloat16))
            for k in range(9):
                dh, dw = divmod(k, 3)
                contrib = jnp.dot(tap(slab2_ref, dh, dw, Fp), w2_ref[k],
                                  preferred_element_type=jnp.float32)
                if k == 0:
                    acc_ref[...] = contrib
                else:
                    acc_ref[...] += contrib
            h2 = gn_affine_relu(acc_ref[...], gamma2, beta2, ys_b, yb_b, chmask)

            # Emit only the F valid channels (no padded-channel HBM writeback).
            out_ref[s] = h2[:, :F].astype(out_ref.dtype)

    return kernel


def fused_block(x_nhwc, w1, g1, b1, w2, g2, b2, ys, yb):
    """x_nhwc: (B,H,W,Cin).  w1: (F,Cin,3,3), w2: (F,F,3,3) in PyTorch OIHW.
    gamma/beta: (F,).  ys/yb: (B,F).  Returns (B,H,W,F) float32."""
    B, H, W, Cin = x_nhwc.shape
    F = w1.shape[0]
    Fp = _round_up(F, LANE)            # lane-dense padded channel dim (internal)
    pad = Fp - F
    HW = H * W

    # conv1 weights -> im2col row order (kh, kw, cin), padded out-dim, bf16.
    w1_t = jnp.transpose(w1, (2, 3, 1, 0)).reshape(9 * Cin, F)
    w1_t = jnp.pad(w1_t, ((0, 0), (0, pad))).astype(jnp.bfloat16)
    # conv2 weights -> per-tap layout (9, Fp, Fp), zero-padded both dims, bf16.
    w2_t = jnp.transpose(w2, (2, 3, 1, 0))                       # (3,3,F,F)
    w2_t = jnp.pad(w2_t, ((0, 0), (0, 0), (0, pad), (0, pad)))
    w2_t = w2_t.reshape(9, Fp, Fp).astype(jnp.bfloat16)

    # gamma/beta/yb zero-padded so padded channels stay exactly 0 through the
    # fused affine (keeps GN stats exact and the stage-2 input pad-clean).
    g1p = jnp.pad(g1, (0, pad)).reshape(1, Fp).astype(jnp.float32)
    b1p = jnp.pad(b1, (0, pad)).reshape(1, Fp).astype(jnp.float32)
    g2p = jnp.pad(g2, (0, pad)).reshape(1, Fp).astype(jnp.float32)
    b2p = jnp.pad(b2, (0, pad)).reshape(1, Fp).astype(jnp.float32)
    ysp = jnp.pad(ys, ((0, 0), (0, pad))).reshape(B, 1, Fp).astype(jnp.float32)
    ybp = jnp.pad(yb, ((0, 0), (0, pad))).reshape(B, 1, Fp).astype(jnp.float32)

    # --- batch tile Bt: amortize per-step overhead within a VMEM budget ----
    fixed_scratch = (3 * (H + 2) * W * Cin * 2          # stage-1 dw slabs bf16
                     + 3 * (H + 2) * W * Fp * 2         # stage-2 dw slabs bf16
                     + HW * 9 * Cin * 2                 # stage-1 im2col bf16
                     + HW * Fp * 4)                     # stage-2 f32 acc
    weight_bytes = (9 * Cin * Fp + 9 * Fp * Fp) * 2 + 4 * Fp * 4
    per_sample_io = H * W * Cin * 4 + HW * F * 4 + 2 * Fp * 4
    budget = 24 << 20
    Bt = 1
    for cand in range(min(B, 8), 0, -1):
        if B % cand == 0 and \
           fixed_scratch + 2 * (weight_bytes + cand * per_sample_io) <= budget:
            Bt = cand
            break
    est = fixed_scratch + 2 * (weight_bytes + Bt * per_sample_io)
    vmem_limit = int(min(max(2 * est + (8 << 20), 32 << 20), 64 << 20))

    kernel = _make_block_kernel(H, W, Cin, F, Fp, Bt)
    out = pl.pallas_call(
        kernel,
        out_shape=jax.ShapeDtypeStruct((B, HW, F), jnp.float32),
        grid=(B // Bt,),
        in_specs=[
            pl.BlockSpec((Bt, H, W, Cin), lambda g: (g, 0, 0, 0)),   # x
            pl.BlockSpec((9 * Cin, Fp), lambda g: (0, 0)),           # w1 (im2col)
            pl.BlockSpec((9, Fp, Fp), lambda g: (0, 0, 0)),          # w2 (taps)
            pl.BlockSpec((1, Fp), lambda g: (0, 0)),                 # gamma1
            pl.BlockSpec((1, Fp), lambda g: (0, 0)),                 # beta1
            pl.BlockSpec((1, Fp), lambda g: (0, 0)),                 # gamma2
            pl.BlockSpec((1, Fp), lambda g: (0, 0)),                 # beta2
            pl.BlockSpec((Bt, 1, Fp), lambda g: (g, 0, 0)),          # ys
            pl.BlockSpec((Bt, 1, Fp), lambda g: (g, 0, 0)),          # yb
        ],
        out_specs=pl.BlockSpec((Bt, HW, F), lambda g: (g, 0, 0)),
        scratch_shapes=[
            pltpu.VMEM((3, H + 2, W, Cin), jnp.bfloat16),   # stage-1 dw slabs
            pltpu.VMEM((3, H + 2, W, Fp), jnp.bfloat16),    # stage-2 dw slabs
            pltpu.VMEM((HW, 9 * Cin), jnp.bfloat16),        # stage-1 im2col
            pltpu.VMEM((HW, Fp), jnp.float32),              # stage-2 f32 acc
        ],
        compiler_params=pltpu.CompilerParams(
            dimension_semantics=("parallel",),
            vmem_limit_bytes=vmem_limit),
    )(x_nhwc, w1_t, w2_t, g1p, b1p, g2p, b2p, ysp, ybp)
    return out.reshape(B, H, W, F)


# --------------------------------------------------------------------------
# _Block parameters + forward (wrapper mirrors the PyTorch module)
# --------------------------------------------------------------------------
def init_block_params(key, in_channels, features,
                      is_time_embed=False, is_cls_embed=False):
    k1, k2, k3, k4 = jax.random.split(key, 4)
    p = {
        "conv1_w": 0.1 * jax.random.normal(k1, (features, in_channels, 3, 3),
                                           jnp.float32),
        "conv2_w": 0.1 * jax.random.normal(k2, (features, features, 3, 3),
                                           jnp.float32),
        "gamma1": jnp.ones((features,), jnp.float32),
        "beta1": jnp.zeros((features,), jnp.float32),
        "gamma2": jnp.ones((features,), jnp.float32),
        "beta2": jnp.zeros((features,), jnp.float32),
    }
    if is_time_embed:
        p["time_w"] = 0.1 * jax.random.normal(k3, (features, 1), jnp.float32)
        p["time_b"] = jnp.zeros((features,), jnp.float32)
    if is_cls_embed:
        p["cls_w"] = 0.1 * jax.random.normal(k4, (features, 1), jnp.float32)
        p["cls_b"] = jnp.zeros((features,), jnp.float32)
    return p


def block_forward(params, x_nchw, t, c, *, is_time_embed, is_cls_embed):
    B = x_nchw.shape[0]
    F = params["conv1_w"].shape[0]
    # time / class embeddings (tiny 1->F linears; glue, not the hot path)
    if is_time_embed:
        ys = t @ params["time_w"].T + params["time_b"]        # (B, F)
    else:
        ys = jnp.zeros((B, F), jnp.float32)                   # self.zero
    if is_cls_embed:
        yb = c @ params["cls_w"].T + params["cls_b"]          # (B, F)
    else:
        yb = jnp.zeros((B, F), jnp.float32)                   # self.zero

    # NCHW -> NHWC (channels on the lane dim); hoist to the model boundary if
    # surrounding layers can run NHWC.
    x = jnp.transpose(x_nchw, (0, 2, 3, 1))
    h = fused_block(x, params["conv1_w"], params["gamma1"], params["beta1"],
                    params["conv2_w"], params["gamma2"], params["beta2"],
                    ys, yb)
    return jnp.transpose(h, (0, 3, 1, 2))                     # NHWC -> NCHW


# --------------------------------------------------------------------------
# Pure-JAX reference (for correctness check only)
# --------------------------------------------------------------------------
def _ref_conv(x_nhwc, w_oihw):
    w_hwio = jnp.transpose(w_oihw, (2, 3, 1, 0))
    return lax.conv_general_dilated(
        x_nhwc, w_hwio, (1, 1), "SAME",
        dimension_numbers=("NHWC", "HWIO", "NHWC"))


def _ref_adagn_relu(y, gamma, beta, ys, yb):
    mean = jnp.mean(y, axis=(1, 2, 3), keepdims=True)
    var = jnp.mean((y - mean) ** 2, axis=(1, 2, 3), keepdims=True)
    h = (y - mean) * lax.rsqrt(var + EPS)
    h = h * gamma.reshape(1, 1, 1, -1) + beta.reshape(1, 1, 1, -1)
    h = h * (1.0 + ys[:, None, None, :]) + yb[:, None, None, :]
    return jnp.maximum(h, 0.0)


def block_forward_ref(params, x_nchw, t, c, *, is_time_embed, is_cls_embed):
    B = x_nchw.shape[0]
    F = params["conv1_w"].shape[0]
    ys = (t @ params["time_w"].T + params["time_b"]) if is_time_embed \
        else jnp.zeros((B, F), jnp.float32)
    yb = (c @ params["cls_w"].T + params["cls_b"]) if is_cls_embed \
        else jnp.zeros((B, F), jnp.float32)
    x = jnp.transpose(x_nchw, (0, 2, 3, 1))
    h = _ref_adagn_relu(_ref_conv(x, params["conv1_w"]),
                        params["gamma1"], params["beta1"], ys, yb)
    h = _ref_adagn_relu(_ref_conv(h, params["conv2_w"]),
                        params["gamma2"], params["beta2"], ys, yb)
    return jnp.transpose(h, (0, 3, 1, 2))


# --------------------------------------------------------------------------
if __name__ == "__main__":
    B, Cin, Fch, H, W = 2, 4, 8, 16, 16
    is_time_embed, is_cls_embed = True, True

    key = jax.random.PRNGKey(0)
    kx, kt, kc, kp = jax.random.split(key, 4)
    x = jax.random.normal(kx, (B, Cin, H, W), jnp.float32)    # NCHW like torch
    t = jax.random.normal(kt, (B, 1), jnp.float32)
    c = jax.random.normal(kc, (B, 1), jnp.float32)
    params = init_block_params(kp, Cin, Fch, is_time_embed, is_cls_embed)

    out = block_forward(params, x, t, c,
                        is_time_embed=is_time_embed,
                        is_cls_embed=is_cls_embed)
    out = jax.block_until_ready(out)

    ref = block_forward_ref(params, x, t, c,
                            is_time_embed=is_time_embed,
                            is_cls_embed=is_cls_embed)
    assert out.shape == (B, Fch, H, W), out.shape
    # bf16 MXU operands (f32 accumulation) vs the all-f32 reference.
    max_err = float(jnp.max(jnp.abs(out - ref)))
    assert jnp.allclose(out, ref, rtol=5e-2, atol=5e-2), max_err

    print("KERNEL_OK")
</pallas_src>

<mosaic_0001>
module attributes {stable_mosaic.version = 11 : i64} {
  func.func @kernel(%arg0: i32, %arg1: memref<2x16x16x4xf32, #tpu.memory_space<vmem>>, %arg2: memref<36x128xbf16, #tpu.memory_space<vmem>>, %arg3: memref<9x128x128xbf16, #tpu.memory_space<vmem>>, %arg4: memref<1x128xf32, #tpu.memory_space<vmem>>, %arg5: memref<1x128xf32, #tpu.memory_space<vmem>>, %arg6: memref<1x128xf32, #tpu.memory_space<vmem>>, %arg7: memref<1x128xf32, #tpu.memory_space<vmem>>, %arg8: memref<2x1x128xf32, #tpu.memory_space<vmem>>, %arg9: memref<2x1x128xf32, #tpu.memory_space<vmem>>, %arg10: memref<2x256x8xf32, #tpu.memory_space<vmem>>, %arg11: memref<3x18x16x4xbf16, #tpu.memory_space<vmem>>, %arg12: memref<3x18x16x128xbf16, #tpu.memory_space<vmem>>, %arg13: memref<256x36xbf16, #tpu.memory_space<vmem>>, %arg14: memref<256x128xf32, #tpu.memory_space<vmem>>) attributes {dimension_semantics = [#tpu.dimension_semantics<parallel>], iteration_bounds = array<i64: 1>, scalar_prefetch = 0 : i64, scratch_operands = 4 : i64, tpu.core_type = #tpu.core_type<tc>, window_params = [{transform_indices = @transform_0, window_bounds = array<i64: 2, 16, 16, 4>}, {pipeline_mode = #tpu.pipeline_mode<synchronous>, transform_indices = @transform_1, window_bounds = array<i64: 36, 128>}, {pipeline_mode = #tpu.pipeline_mode<synchronous>, transform_indices = @transform_2, window_bounds = array<i64: 9, 128, 128>}, {pipeline_mode = #tpu.pipeline_mode<synchronous>, transform_indices = @transform_3, window_bounds = array<i64: 1, 128>}, {pipeline_mode = #tpu.pipeline_mode<synchronous>, transform_indices = @transform_4, window_bounds = array<i64: 1, 128>}, {pipeline_mode = #tpu.pipeline_mode<synchronous>, transform_indices = @transform_5, window_bounds = array<i64: 1, 128>}, {pipeline_mode = #tpu.pipeline_mode<synchronous>, transform_indices = @transform_6, window_bounds = array<i64: 1, 128>}, {transform_indices = @transform_7, window_bounds = array<i64: 2, 1, 128>}, {transform_indices = @transform_8, window_bounds = array<i64: 2, 1, 128>}, {transform_indices = @transform_9, window_bounds = array<i64: 2, 256, 8>}]} {
    %cst = arith.constant 0.000000e+00 : bf16
    %0 = vector.broadcast %cst : bf16 to vector<3x1x16x4xbf16>
    %c0 = arith.constant 0 : index
    %c0_0 = arith.constant 0 : index
    %c0_1 = arith.constant 0 : index
    %c0_2 = arith.constant 0 : index
    %1 = vector.load %arg11[%c0, %c0_0, %c0_1, %c0_2] : memref<3x18x16x4xbf16, #tpu.memory_space<vmem>>, vector<3x1x16x4xbf16>
    tpu.vector_store %arg11[%c0, %c0_0, %c0_1, %c0_2], %0 {strides = array<i32>} : memref<3x18x16x4xbf16, #tpu.memory_space<vmem>>, vector<3x1x16x4xbf16>,
    %c0_3 = arith.constant 0 : index
    %c17 = arith.constant 17 : index
    %c0_4 = arith.constant 0 : index
    %c0_5 = arith.constant 0 : index
    %2 = vector.load %arg11[%c0_3, %c17, %c0_4, %c0_5] : memref<3x18x16x4xbf16, #tpu.memory_space<vmem>>, vector<3x1x16x4xbf16>
    tpu.vector_store %arg11[%c0_3, %c17, %c0_4, %c0_5], %0 {strides = array<i32>} : memref<3x18x16x4xbf16, #tpu.memory_space<vmem>>, vector<3x1x16x4xbf16>,
    %cst_6 = arith.constant 0.000000e+00 : bf16
    %3 = vector.broadcast %cst_6 : bf16 to vector<1x18x1x4xbf16>
    %c0_7 = arith.constant 0 : index
    %c0_8 = arith.constant 0 : index
    %c0_9 = arith.constant 0 : index
    %c0_10 = arith.constant 0 : index
    %4 = vector.load %arg11[%c0_7, %c0_8, %c0_9, %c0_10] : memref<3x18x16x4xbf16, #tpu.memory_space<vmem>>, vector<1x18x1x4xbf16>
    tpu.vector_store %arg11[%c0_7, %c0_8, %c0_9, %c0_10], %3 {strides = array<i32>} : memref<3x18x16x4xbf16, #tpu.memory_space<vmem>>, vector<1x18x1x4xbf16>,
    %c2 = arith.constant 2 : index
    %c0_11 = arith.constant 0 : index
    %c15 = arith.constant 15 : index
    %c0_12 = arith.constant 0 : index
    %5 = vector.load %arg11[%c2, %c0_11, %c15, %c0_12] : memref<3x18x16x4xbf16, #tpu.memory_space<vmem>>, vector<1x18x1x4xbf16>
    tpu.vector_store %arg11[%c2, %c0_11, %c15, %c0_12], %3 {strides = array<i32>} : memref<3x18x16x4xbf16, #tpu.memory_space<vmem>>, vector<1x18x1x4xbf16>,
    %cst_13 = arith.constant 0.000000e+00 : bf16
    %6 = vector.broadcast %cst_13 : bf16 to vector<3x1x16x128xbf16>
    %c0_14 = arith.constant 0 : index
    %c0_15 = arith.constant 0 : index
    %c0_16 = arith.constant 0 : index
    %c0_17 = arith.constant 0 : index
    %7 = vector.load %arg12[%c0_14, %c0_15, %c0_16, %c0_17] : memref<3x18x16x128xbf16, #tpu.memory_space<vmem>>, vector<3x1x16x128xbf16>
    tpu.vector_store %arg12[%c0_14, %c0_15, %c0_16, %c0_17], %6 {strides = array<i32>} : memref<3x18x16x128xbf16, #tpu.memory_space<vmem>>, vector<3x1x16x128xbf16>,
    %c0_18 = arith.constant 0 : index
    %c17_19 = arith.constant 17 : index
    %c0_20 = arith.constant 0 : index
    %c0_21 = arith.constant 0 : index
    %8 = vector.load %arg12[%c0_18, %c17_19, %c0_20, %c0_21] : memref<3x18x16x128xbf16, #tpu.memory_space<vmem>>, vector<3x1x16x128xbf16>
    tpu.vector_store %arg12[%c0_18, %c17_19, %c0_20, %c0_21], %6 {strides = array<i32>} : memref<3x18x16x128xbf16, #tpu.memory_space<vmem>>, vector<3x1x16x128xbf16>,
    %cst_22 = arith.constant 0.000000e+00 : bf16
    %9 = vector.broadcast %cst_22 : bf16 to vector<1x18x1x128xbf16>
    %c0_23 = arith.constant 0 : index
    %c0_24 = arith.constant 0 : index
    %c0_25 = arith.constant 0 : index
    %c0_26 = arith.constant 0 : index
    %10 = vector.load %arg12[%c0_23, %c0_24, %c0_25, %c0_26] : memref<3x18x16x128xbf16, #tpu.memory_space<vmem>>, vector<1x18x1x128xbf16>
    tpu.vector_store %arg12[%c0_23, %c0_24, %c0_25, %c0_26], %9 {strides = array<i32>} : memref<3x18x16x128xbf16, #tpu.memory_space<vmem>>, vector<1x18x1x128xbf16>,
    %c2_27 = arith.constant 2 : index
    %c0_28 = arith.constant 0 : index
    %c15_29 = arith.constant 15 : index
    %c0_30 = arith.constant 0 : index
    %11 = vector.load %arg12[%c2_27, %c0_28, %c15_29, %c0_30] : memref<3x18x16x128xbf16, #tpu.memory_space<vmem>>, vector<1x18x1x128xbf16>
    tpu.vector_store %arg12[%c2_27, %c0_28, %c15_29, %c0_30], %9 {strides = array<i32>} : memref<3x18x16x128xbf16, #tpu.memory_space<vmem>>, vector<1x18x1x128xbf16>,
    %12 = tpu.iota {dimensions = array<i32: 1>} : vector<1x128xi32>
    %c8_i32 = arith.constant 8 : i32
    %13 = vector.broadcast %c8_i32 : i32 to vector<1x128xi32>
    %14 = arith.cmpi slt, %12, %13 : vector<1x128xi32>
    %15 = arith.extui %14 : vector<1x128xi1> to vector<1x128xi32>
    %16 = arith.sitofp %15 : vector<1x128xi32> to vector<1x128xf32>
    %c0_31 = arith.constant 0 : index
    %c0_32 = arith.constant 0 : index
    %17 = vector.load %arg4[%c0_31, %c0_32] : memref<1x128xf32, #tpu.memory_space<vmem>>, vector<1x128xf32>
    %18 = vector.shape_cast %17 : vector<1x128xf32> to vector<128xf32>
    %c0_33 = arith.constant 0 : index
    %c0_34 = arith.constant 0 : index
    %19 = vector.load %arg5[%c0_33, %c0_34] : memref<1x128xf32, #tpu.memory_space<vmem>>, vector<1x128xf32>
    %20 = vector.shape_cast %19 : vector<1x128xf32> to vector<128xf32>
    %c0_35 = arith.constant 0 : index
    %c0_36 = arith.constant 0 : index
    %21 = vector.load %arg6[%c0_35, %c0_36] : memref<1x128xf32, #tpu.memory_space<vmem>>, vector<1x128xf32>
    %22 = vector.shape_cast %21 : vector<1x128xf32> to vector<128xf32>
    %c0_37 = arith.constant 0 : index
    %c0_38 = arith.constant 0 : index
    %23 = vector.load %arg7[%c0_37, %c0_38] : memref<1x128xf32, #tpu.memory_space<vmem>>, vector<1x128xf32>
    %24 = vector.shape_cast %23 : vector<1x128xf32> to vector<128xf32>
    %c0_39 = arith.constant 0 : index
    %c0_40 = arith.constant 0 : index
    %c0_41 = arith.constant 0 : index
    %25 = vector.load %arg8[%c0_39, %c0_40, %c0_41] : memref<2x1x128xf32, #tpu.memory_space<vmem>>, vector<1x1x128xf32>
    %26 = vector.shape_cast %25 : vector<1x1x128xf32> to vector<128xf32>
    %c0_42 = arith.constant 0 : index
    %c0_43 = arith.constant 0 : index
    %c0_44 = arith.constant 0 : index
    %27 = vector.load %arg9[%c0_42, %c0_43, %c0_44] : memref<2x1x128xf32, #tpu.memory_space<vmem>>, vector<1x1x128xf32>
    %28 = vector.shape_cast %27 : vector<1x1x128xf32> to vector<128xf32>
    %c0_45 = arith.constant 0 : index
    %c0_46 = arith.constant 0 : index
    %c0_47 = arith.constant 0 : index
    %c0_48 = arith.constant 0 : index
    %29 = vector.load %arg1[%c0_45, %c0_46, %c0_47, %c0_48] : memref<2x16x16x4xf32, #tpu.memory_space<vmem>>, vector<1x16x16x4xf32>
    %30 = vector.shape_cast %29 : vector<1x16x16x4xf32> to vector<16x16x4xf32>
    %31 = arith.truncf %30 : vector<16x16x4xf32> to vector<16x16x4xbf16>
    %32 = vector.shape_cast %31 : vector<16x16x4xbf16> to vector<1x16x16x4xbf16>
    %c1 = arith.constant 1 : index
    %c1_49 = arith.constant 1 : index
    %c0_50 = arith.constant 0 : index
    %c0_51 = arith.constant 0 : index
    %33 = vector.load %arg11[%c1, %c1_49, %c0_50, %c0_51] : memref<3x18x16x4xbf16, #tpu.memory_space<vmem>>, vector<1x16x16x4xbf16>
    tpu.vector_store %arg11[%c1, %c1_49, %c0_50, %c0_51], %32 {strides = array<i32>} : memref<3x18x16x4xbf16, #tpu.memory_space<vmem>>, vector<1x16x16x4xbf16>,
    %34 = vector.extract_strided_slice %31 {offsets = [0, 0, 0], sizes = [16, 15, 4], strides = [1, 1, 1]} : vector<16x16x4xbf16> to vector<16x15x4xbf16>
    %35 = vector.shape_cast %34 : vector<16x15x4xbf16> to vector<1x16x15x4xbf16>
    %c0_52 = arith.constant 0 : index
    %c1_53 = arith.constant 1 : index
    %c1_54 = arith.constant 1 : index
    %c0_55 = arith.constant 0 : index
    %36 = vector.load %arg11[%c0_52, %c1_53, %c1_54, %c0_55] : memref<3x18x16x4xbf16, #tpu.memory_space<vmem>>, vector<1x16x15x4xbf16>
    tpu.vector_store %arg11[%c0_52, %c1_53, %c1_54, %c0_55], %35 {strides = array<i32>} : memref<3x18x16x4xbf16, #tpu.memory_space<vmem>>, vector<1x16x15x4xbf16>,
    %37 = vector.extract_strided_slice %31 {offsets = [0, 1, 0], sizes = [16, 15, 4], strides = [1, 1, 1]} : vector<16x16x4xbf16> to vector<16x15x4xbf16>
    %38 = vector.shape_cast %37 : vector<16x15x4xbf16> to vector<1x16x15x4xbf16>
    %c2_56 = arith.constant 2 : index
    %c1_57 = arith.constant 1 : index
    %c0_58 = arith.constant 0 : index
    %c0_59 = arith.constant 0 : index
    %39 = vector.load %arg11[%c2_56, %c1_57, %c0_58, %c0_59] : memref<3x18x16x4xbf16, #tpu.memory_space<vmem>>, vector<1x16x15x4xbf16>
    tpu.vector_store %arg11[%c2_56, %c1_57, %c0_58, %c0_59], %38 {strides = array<i32>} : memref<3x18x16x4xbf16, #tpu.memory_space<vmem>>, vector<1x16x15x4xbf16>,
    %c0_60 = arith.constant 0 : index
    %c0_61 = arith.constant 0 : index
    %c0_62 = arith.constant 0 : index
    %c0_63 = arith.constant 0 : index
    %40 = vector.load %arg11[%c0_60, %c0_61, %c0_62, %c0_63] : memref<3x18x16x4xbf16, #tpu.memory_space<vmem>>, vector<1x16x16x4xbf16>
    %41 = vector.shape_cast %40 : vector<1x16x16x4xbf16> to vector<256x4xbf16>
    %c0_64 = arith.constant 0 : index
    %c0_65 = arith.constant 0 : index
    %42 = vector.load %arg13[%c0_64, %c0_65] : memref<256x36xbf16, #tpu.memory_space<vmem>>, vector<256x4xbf16>
    tpu.vector_store %arg13[%c0_64, %c0_65], %41 {strides = array<i32>} : memref<256x36xbf16, #tpu.memory_space<vmem>>, vector<256x4xbf16>,
    %c1_66 = arith.constant 1 : index
    %c0_67 = arith.constant 0 : index
    %c0_68 = arith.constant 0 : index
    %c0_69 = arith.constant 0 : index
    %43 = vector.load %arg11[%c1_66, %c0_67, %c0_68, %c0_69] : memref<3x18x16x4xbf16, #tpu.memory_space<vmem>>, vector<1x16x16x4xbf16>
    %44 = vector.shape_cast %43 : vector<1x16x16x4xbf16> to vector<256x4xbf16>
    %c0_70 = arith.constant 0 : index
    %c4 = arith.constant 4 : index
    %45 = vector.load %arg13[%c0_70, %c4] : memref<256x36xbf16, #tpu.memory_space<vmem>>, vector<256x4xbf16>
    tpu.vector_store %arg13[%c0_70, %c4], %44 {strides = array<i32>} : memref<256x36xbf16, #tpu.memory_space<vmem>>, vector<256x4xbf16>,
    %c2_71 = arith.constant 2 : index
    %c0_72 = arith.constant 0 : index
    %c0_73 = arith.constant 0 : index
    %c0_74 = arith.constant 0 : index
    %46 = vector.load %arg11[%c2_71, %c0_72, %c0_73, %c0_74] : memref<3x18x16x4xbf16, #tpu.memory_space<vmem>>, vector<1x16x16x4xbf16>
    %47 = vector.shape_cast %46 : vector<1x16x16x4xbf16> to vector<256x4xbf16>
    %c0_75 = arith.constant 0 : index
    %c8 = arith.constant 8 : index
    %48 = vector.load %arg13[%c0_75, %c8] : memref<256x36xbf16, #tpu.memory_space<vmem>>, vector<256x4xbf16>
    tpu.vector_store %arg13[%c0_75, %c8], %47 {strides = array<i32>} : memref<256x36xbf16, #tpu.memory_space<vmem>>, vector<256x4xbf16>,
    %c0_76 = arith.constant 0 : index
    %c1_77 = arith.constant 1 : index
    %c0_78 = arith.constant 0 : index
    %c0_79 = arith.constant 0 : index
    %49 = vector.load %arg11[%c0_76, %c1_77, %c0_78, %c0_79] : memref<3x18x16x4xbf16, #tpu.memory_space<vmem>>, vector<1x16x16x4xbf16>
    %50 = vector.shape_cast %49 : vector<1x16x16x4xbf16> to vector<256x4xbf16>
    %c0_80 = arith.constant 0 : index
    %c12 = arith.constant 12 : index
    %51 = vector.load %arg13[%c0_80, %c12] : memref<256x36xbf16, #tpu.memory_space<vmem>>, vector<256x4xbf16>
    tpu.vector_store %arg13[%c0_80, %c12], %50 {strides = array<i32>} : memref<256x36xbf16, #tpu.memory_space<vmem>>, vector<256x4xbf16>,
    %c1_81 = arith.constant 1 : index
    %c1_82 = arith.constant 1 : index
    %c0_83 = arith.constant 0 : index
    %c0_84 = arith.constant 0 : index
    %52 = vector.load %arg11[%c1_81, %c1_82, %c0_83, %c0_84] : memref<3x18x16x4xbf16, #tpu.memory_space<vmem>>, vector<1x16x16x4xbf16>
    %53 = vector.shape_cast %52 : vector<1x16x16x4xbf16> to vector<256x4xbf16>
    %c0_85 = arith.constant 0 : index
    %c16 = arith.constant 16 : index
    %54 = vector.load %arg13[%c0_85, %c16] : memref<256x36xbf16, #tpu.memory_space<vmem>>, vector<256x4xbf16>
    tpu.vector_store %arg13[%c0_85, %c16], %53 {strides = array<i32>} : memref<256x36xbf16, #tpu.memory_space<vmem>>, vector<256x4xbf16>,
    %c2_86 = arith.constant 2 : index
    %c1_87 = arith.constant 1 : index
    %c0_88 = arith.constant 0 : index
    %c0_89 = arith.constant 0 : index
    %55 = vector.load %arg11[%c2_86, %c1_87, %c0_88, %c0_89] : memref<3x18x16x4xbf16, #tpu.memory_space<vmem>>, vector<1x16x16x4xbf16>
    %56 = vector.shape_cast %55 : vector<1x16x16x4xbf16> to vector<256x4xbf16>
    %c0_90 = arith.constant 0 : index
    %c20 = arith.constant 20 : index
    %57 = vector.load %arg13[%c0_90, %c20] : memref<256x36xbf16, #tpu.memory_space<vmem>>, vector<256x4xbf16>
    tpu.vector_store %arg13[%c0_90, %c20], %56 {strides = array<i32>} : memref<256x36xbf16, #tpu.memory_space<vmem>>, vector<256x4xbf16>,
    %c0_91 = arith.constant 0 : index
    %c2_92 = arith.constant 2 : index
    %c0_93 = arith.constant 0 : index
    %c0_94 = arith.constant 0 : index
    %58 = vector.load %arg11[%c0_91, %c2_92, %c0_93, %c0_94] : memref<3x18x16x4xbf16, #tpu.memory_space<vmem>>, vector<1x16x16x4xbf16>
    %59 = vector.shape_cast %58 : vector<1x16x16x4xbf16> to vector<256x4xbf16>
    %c0_95 = arith.constant 0 : index
    %c24 = arith.constant 24 : index
    %60 = vector.load %arg13[%c0_95, %c24] : memref<256x36xbf16, #tpu.memory_space<vmem>>, vector<256x4xbf16>
    tpu.vector_store %arg13[%c0_95, %c24], %59 {strides = array<i32>} : memref<256x36xbf16, #tpu.memory_space<vmem>>, vector<256x4xbf16>,
    %c1_96 = arith.constant 1 : index
    %c2_97 = arith.constant 2 : index
    %c0_98 = arith.constant 0 : index
    %c0_99 = arith.constant 0 : index
    %61 = vector.load %arg11[%c1_96, %c2_97, %c0_98, %c0_99] : memref<3x18x16x4xbf16, #tpu.memory_space<vmem>>, vector<1x16x16x4xbf16>
    %62 = vector.shape_cast %61 : vector<1x16x16x4xbf16> to vector<256x4xbf16>
    %c0_100 = arith.constant 0 : index
    %c28 = arith.constant 28 : index
    %63 = vector.load %arg13[%c0_100, %c28] : memref<256x36xbf16, #tpu.memory_space<vmem>>, vector<256x4xbf16>
    tpu.vector_store %arg13[%c0_100, %c28], %62 {strides = array<i32>} : memref<256x36xbf16, #tpu.memory_space<vmem>>, vector<256x4xbf16>,
    %c2_101 = arith.constant 2 : index
    %c2_102 = arith.constant 2 : index
    %c0_103 = arith.constant 0 : index
    %c0_104 = arith.constant 0 : index
    %64 = vector.load %arg11[%c2_101, %c2_102, %c0_103, %c0_104] : memref<3x18x16x4xbf16, #tpu.memory_space<vmem>>, vector<1x16x16x4xbf16>
    %65 = vector.shape_cast %64 : vector<1x16x16x4xbf16> to vector<256x4xbf16>
    %c0_105 = arith.constant 0 : index
    %c32 = arith.constant 32 : index
    %66 = vector.load %arg13[%c0_105, %c32] : memref<256x36xbf16, #tpu.memory_space<vmem>>, vector<256x4xbf16>
    tpu.vector_store %arg13[%c0_105, %c32], %65 {strides = array<i32>} : memref<256x36xbf16, #tpu.memory_space<vmem>>, vector<256x4xbf16>,
    %c0_106 = arith.constant 0 : index
    %c0_107 = arith.constant 0 : index
    %67 = vector.load %arg13[%c0_106, %c0_107] : memref<256x36xbf16, #tpu.memory_space<vmem>>, vector<256x36xbf16>
    %c0_108 = arith.constant 0 : index
    %c0_109 = arith.constant 0 : index
    %68 = vector.load %arg2[%c0_108, %c0_109] : memref<36x128xbf16, #tpu.memory_space<vmem>>, vector<36x128xbf16>
    %cst_110 = arith.constant dense<0.000000e+00> : vector<256x128xf32>
    %69 = tpu.matmul %67, %68, %cst_110 {dimension_numbers = #tpu.dot_dimension_numbers<[1], [0], [0], [1], [0, 0, 1, 1], [], []>} : vector<256x36xbf16>, vector<36x128xbf16>, vector<256x128xf32> -> vector<256x128xf32>
    %70 = vector.shape_cast %69 : vector<256x128xf32> to vector<1x256x128xf32>
    %cst_111 = arith.constant dense<0.000000e+00> : vector<1xf32>
    %71 = vector.multi_reduction <add>, %70, %cst_111 [1, 2] : vector<1x256x128xf32> to vector<1xf32>
    %72 = vector.shape_cast %71 : vector<1xf32> to vector<1x1x1xf32>
    %73 = vector.extract %72[0, 0, 0] : f32 from vector<1x1x1xf32>
    %cst_112 = arith.constant 4.8828125E-4 : f32
    %74 = arith.mulf %73, %cst_112 : f32
    %75 = vector.broadcast %74 : f32 to vector<256x128xf32>
    %76 = arith.subf %69, %75 : vector<256x128xf32>
    %77 = arith.mulf %76, %76 : vector<256x128xf32>
    %78 = vector.broadcast %16 : vector<1x128xf32> to vector<256x128xf32>
    %79 = arith.mulf %77, %78 : vector<256x128xf32>
    %80 = vector.shape_cast %79 : vector<256x128xf32> to vector<1x256x128xf32>
    %cst_113 = arith.constant dense<0.000000e+00> : vector<1xf32>
    %81 = vector.multi_reduction <add>, %80, %cst_113 [1, 2] : vector<1x256x128xf32> to vector<1xf32>
    %82 = vector.shape_cast %81 : vector<1xf32> to vector<1x1x1xf32>
    %83 = vector.extract %82[0, 0, 0] : f32 from vector<1x1x1xf32>
    %cst_114 = arith.constant 4.8828125E-4 : f32
    %84 = arith.mulf %83, %cst_114 : f32
    %cst_115 = arith.constant 9.99999974E-6 : f32
    %85 = arith.addf %84, %cst_115 : f32
    %86 = math.rsqrt %85 : f32
    %cst_116 = arith.constant 1.000000e+00 : f32
    %87 = vector.broadcast %cst_116 : f32 to vector<128xf32>
    %88 = arith.addf %87, %26 : vector<128xf32>
    %89 = arith.mulf %18, %88 : vector<128xf32>
    %90 = vector.broadcast %86 : f32 to vector<128xf32>
    %91 = arith.mulf %89, %90 : vector<128xf32>
    %cst_117 = arith.constant 1.000000e+00 : f32
    %92 = vector.broadcast %cst_117 : f32 to vector<128xf32>
    %93 = arith.addf %92, %26 : vector<128xf32>
    %94 = arith.mulf %20, %93 : vector<128xf32>
    %95 = arith.addf %94, %28 : vector<128xf32>
    %96 = vector.broadcast %74 : f32 to vector<128xf32>
    %97 = arith.mulf %96, %91 : vector<128xf32>
    %98 = arith.subf %95, %97 : vector<128xf32>
    %99 = vector.shape_cast %91 : vector<128xf32> to vector<1x128xf32>
    %100 = vector.broadcast %99 : vector<1x128xf32> to vector<256x128xf32>
    %101 = arith.mulf %69, %100 : vector<256x128xf32>
    %102 = vector.shape_cast %98 : vector<128xf32> to vector<1x128xf32>
    %103 = vector.broadcast %102 : vector<1x128xf32> to vector<256x128xf32>
    %104 = arith.addf %101, %103 : vector<256x128xf32>
    %cst_118 = arith.constant 0.000000e+00 : f32
    %105 = vector.broadcast %cst_118 : f32 to vector<256x128xf32>
    %106 = arith.maximumf %104, %105 : vector<256x128xf32>
    %107 = vector.shape_cast %106 : vector<256x128xf32> to vector<16x16x128xf32>
    %108 = arith.truncf %107 : vector<16x16x128xf32> to vector<16x16x128xbf16>
    %109 = vector.shape_cast %108 : vector<16x16x128xbf16> to vector<1x16x16x128xbf16>
    %c1_119 = arith.constant 1 : index
    %c1_120 = arith.constant 1 : index
    %c0_121 = arith.constant 0 : index
    %c0_122 = arith.constant 0 : index
    %110 = vector.load %arg12[%c1_119, %c1_120, %c0_121, %c0_122] : memref<3x18x16x128xbf16, #tpu.memory_space<vmem>>, vector<1x16x16x128xbf16>
    tpu.vector_store %arg12[%c1_119, %c1_120, %c0_121, %c0_122], %109 {strides = array<i32>} : memref<3x18x16x128xbf16, #tpu.memory_space<vmem>>, vector<1x16x16x128xbf16>,
    %111 = vector.extract_strided_slice %108 {offsets = [0, 0, 0], sizes = [16, 15, 128], strides = [1, 1, 1]} : vector<16x16x128xbf16> to vector<16x15x128xbf16>
    %112 = vector.shape_cast %111 : vector<16x15x128xbf16> to vector<1x16x15x128xbf16>
    %c0_123 = arith.constant 0 : index
    %c1_124 = arith.constant 1 : index
    %c1_125 = arith.constant 1 : index
    %c0_126 = arith.constant 0 : index
    %113 = vector.load %arg12[%c0_123, %c1_124, %c1_125, %c0_126] : memref<3x18x16x128xbf16, #tpu.memory_space<vmem>>, vector<1x16x15x128xbf16>
    tpu.vector_store %arg12[%c0_123, %c1_124, %c1_125, %c0_126], %112 {strides = array<i32>} : memref<3x18x16x128xbf16, #tpu.memory_space<vmem>>, vector<1x16x15x128xbf16>,
    %114 = vector.extract_strided_slice %108 {offsets = [0, 1, 0], sizes = [16, 15, 128], strides = [1, 1, 1]} : vector<16x16x128xbf16> to vector<16x15x128xbf16>
    %115 = vector.shape_cast %114 : vector<16x15x128xbf16> to vector<1x16x15x128xbf16>
    %c2_127 = arith.constant 2 : index
    %c1_128 = arith.constant 1 : index
    %c0_129 = arith.constant 0 : index
    %c0_130 = arith.constant 0 : index
    %116 = vector.load %arg12[%c2_127, %c1_128, %c0_129, %c0_130] : memref<3x18x16x128xbf16, #tpu.memory_space<vmem>>, vector<1x16x15x128xbf16>
    tpu.vector_store %arg12[%c2_127, %c1_128, %c0_129, %c0_130], %115 {strides = array<i32>} : memref<3x18x16x128xbf16, #tpu.memory_space<vmem>>, vector<1x16x15x128xbf16>,
    %c0_131 = arith.constant 0 : index
    %c0_132 = arith.constant 0 : index
    %c0_133 = arith.constant 0 : index
    %c0_134 = arith.constant 0 : index
    %117 = vector.load %arg12[%c0_131, %c0_132, %c0_133, %c0_134] : memref<3x18x16x128xbf16, #tpu.memory_space<vmem>>, vector<1x16x16x128xbf16>
    %118 = vector.shape_cast %117 : vector<1x16x16x128xbf16> to vector<256x128xbf16>
    %c0_135 = arith.constant 0 : index
    %c0_136 = arith.constant 0 : index
    %c0_137 = arith.constant 0 : index
    %119 = vector.load %arg3[%c0_135, %c0_136, %c0_137] : memref<9x128x128xbf16, #tpu.memory_space<vmem>>, vector<1x128x128xbf16>
    %120 = vector.shape_cast %119 : vector<1x128x128xbf16> to vector<128x128xbf16>
    %cst_138 = arith.constant dense<0.000000e+00> : vector<256x128xf32>
    %121 = tpu.matmul %118, %120, %cst_138 {dimension_numbers = #tpu.dot_dimension_numbers<[1], [0], [0], [1], [0, 0, 1, 1], [], []>} : vector<256x128xbf16>, vector<128x128xbf16>, vector<256x128xf32> -> vector<256x128xf32>
    %c0_139 = arith.constant 0 : index
    %c0_140 = arith.constant 0 : index
    %122 = vector.load %arg14[%c0_139, %c0_140] : memref<256x128xf32, #tpu.memory_space<vmem>>, vector<256x128xf32>
    tpu.vector_store %arg14[%c0_139, %c0_140], %121 {strides = array<i32>} : memref<256x128xf32, #tpu.memory_space<vmem>>, vector<256x128xf32>,
    %c1_141 = arith.constant 1 : index
    %c0_142 = arith.constant 0 : index
    %c0_143 = arith.constant 0 : index
    %c0_144 = arith.constant 0 : index
    %123 = vector.load %arg12[%c1_141, %c0_142, %c0_143, %c0_144] : memref<3x18x16x128xbf16, #tpu.memory_space<vmem>>, vector<1x16x16x128xbf16>
    %124 = vector.shape_cast %123 : vector<1x16x16x128xbf16> to vector<256x128xbf16>
    %c1_145 = arith.constant 1 : index
    %c0_146 = arith.constant 0 : index
    %c0_147 = arith.constant 0 : index
    %125 = vector.load %arg3[%c1_145, %c0_146, %c0_147] : memref<9x128x128xbf16, #tpu.memory_space<vmem>>, vector<1x128x128xbf16>
    %126 = vector.shape_cast %125 : vector<1x128x128xbf16> to vector<128x128xbf16>
    %cst_148 = arith.constant dense<0.000000e+00> : vector<256x128xf32>
    %127 = tpu.matmul %124, %126, %cst_148 {dimension_numbers = #tpu.dot_dimension_numbers<[1], [0], [0], [1], [0, 0, 1, 1], [], []>} : vector<256x128xbf16>, vector<128x128xbf16>, vector<256x128xf32> -> vector<256x128xf32>
    %c0_149 = arith.constant 0 : index
    %c0_150 = arith.constant 0 : index
    %128 = vector.load %arg14[%c0_149, %c0_150] : memref<256x128xf32, #tpu.memory_space<vmem>>, vector<256x128xf32>
    %129 = arith.addf %128, %127 : vector<256x128xf32>
    %c0_151 = arith.constant 0 : index
    %c0_152 = arith.constant 0 : index
    %130 = vector.load %arg14[%c0_151, %c0_152] : memref<256x128xf32, #tpu.memory_space<vmem>>, vector<256x128xf32>
    tpu.vector_store %arg14[%c0_151, %c0_152], %129 {strides = array<i32>} : memref<256x128xf32, #tpu.memory_space<vmem>>, vector<256x128xf32>,
    %c2_153 = arith.constant 2 : index
    %c0_154 = arith.constant 0 : index
    %c0_155 = arith.constant 0 : index
    %c0_156 = arith.constant 0 : index
    %131 = vector.load %arg12[%c2_153, %c0_154, %c0_155, %c0_156] : memref<3x18x16x128xbf16, #tpu.memory_space<vmem>>, vector<1x16x16x128xbf16>
    %132 = vector.shape_cast %131 : vector<1x16x16x128xbf16> to vector<256x128xbf16>
    %c2_157 = arith.constant 2 : index
    %c0_158 = arith.constant 0 : index
    %c0_159 = arith.constant 0 : index
    %133 = vector.load %arg3[%c2_157, %c0_158, %c0_159] : memref<9x128x128xbf16, #tpu.memory_space<vmem>>, vector<1x128x128xbf16>
    %134 = vector.shape_cast %133 : vector<1x128x128xbf16> to vector<128x128xbf16>
    %cst_160 = arith.constant dense<0.000000e+00> : vector<256x128xf32>
    %135 = tpu.matmul %132, %134, %cst_160 {dimension_numbers = #tpu.dot_dimension_numbers<[1], [0], [0], [1], [0, 0, 1, 1], [], []>} : vector<256x128xbf16>, vector<128x128xbf16>, vector<256x128xf32> -> vector<256x128xf32>
    %c0_161 = arith.constant 0 : index
    %c0_162 = arith.constant 0 : index
    %136 = vector.load %arg14[%c0_161, %c0_162] : memref<256x128xf32, #tpu.memory_space<vmem>>, vector<256x128xf32>
    %137 = arith.addf %136, %135 : vector<256x128xf32>
    %c0_163 = arith.constant 0 : index
    %c0_164 = arith.constant 0 : index
    %138 = vector.load %arg14[%c0_163, %c0_164] : memref<256x128xf32, #tpu.memory_space<vmem>>, vector<256x128xf32>
    tpu.vector_store %arg14[%c0_163, %c0_164], %137 {strides = array<i32>} : memref<256x128xf32, #tpu.memory_space<vmem>>, vector<256x128xf32>,
    %c0_165 = arith.constant 0 : index
    %c1_166 = arith.constant 1 : index
    %c0_167 = arith.constant 0 : index
    %c0_168 = arith.constant 0 : index
    %139 = vector.load %arg12[%c0_165, %c1_166, %c0_167, %c0_168] : memref<3x18x16x128xbf16, #tpu.memory_space<vmem>>, vector<1x16x16x128xbf16>
    %140 = vector.shape_cast %139 : vector<1x16x16x128xbf16> to vector<256x128xbf16>
    %c3 = arith.constant 3 : index
    %c0_169 = arith.constant 0 : index
    %c0_170 = arith.constant 0 : index
    %141 = vector.load %arg3[%c3, %c0_169, %c0_170] : memref<9x128x128xbf16, #tpu.memory_space<vmem>>, vector<1x128x128xbf16>
    %142 = vector.shape_cast %141 : vector<1x128x128xbf16> to vector<128x128xbf16>
    %cst_171 = arith.constant dense<0.000000e+00> : vector<256x128xf32>
    %143 = tpu.matmul %140, %142, %cst_171 {dimension_numbers = #tpu.dot_dimension_numbers<[1], [0], [0], [1], [0, 0, 1, 1], [], []>} : vector<256x128xbf16>, vector<128x128xbf16>, vector<256x128xf32> -> vector<256x128xf32>
    %c0_172 = arith.constant 0 : index
    %c0_173 = arith.constant 0 : index
    %144 = vector.load %arg14[%c0_172, %c0_173] : memref<256x128xf32, #tpu.memory_space<vmem>>, vector<256x128xf32>
    %145 = arith.addf %144, %143 : vector<256x128xf32>
    %c0_174 = arith.constant 0 : index
    %c0_175 = arith.constant 0 : index
    %146 = vector.load %arg14[%c0_174, %c0_175] : memref<256x128xf32, #tpu.memory_space<vmem>>, vector<256x128xf32>
    tpu.vector_store %arg14[%c0_174, %c0_175], %145 {strides = array<i32>} : memref<256x128xf32, #tpu.memory_space<vmem>>, vector<256x128xf32>,
    %c1_176 = arith.constant 1 : index
    %c1_177 = arith.constant 1 : index
    %c0_178 = arith.constant 0 : index
    %c0_179 = arith.constant 0 : index
    %147 = vector.load %arg12[%c1_176, %c1_177, %c0_178, %c0_179] : memref<3x18x16x128xbf16, #tpu.memory_space<vmem>>, vector<1x16x16x128xbf16>
    %148 = vector.shape_cast %147 : vector<1x16x16x128xbf16> to vector<256x128xbf16>
    %c4_180 = arith.constant 4 : index
    %c0_181 = arith.constant 0 : index
    %c0_182 = arith.constant 0 : index
    %149 = vector.load %arg3[%c4_180, %c0_181, %c0_182] : memref<9x128x128xbf16, #tpu.memory_space<vmem>>, vector<1x128x128xbf16>
    %150 = vector.shape_cast %149 : vector<1x128x128xbf16> to vector<128x128xbf16>
    %cst_183 = arith.constant dense<0.000000e+00> : vector<256x128xf32>
    %151 = tpu.matmul %148, %150, %cst_183 {dimension_numbers = #tpu.dot_dimension_numbers<[1], [0], [0], [1], [0, 0, 1, 1], [], []>} : vector<256x128xbf16>, vector<128x128xbf16>, vector<256x128xf32> -> vector<256x128xf32>
    %c0_184 = arith.constant 0 : index
    %c0_185 = arith.constant 0 : index
    %152 = vector.load %arg14[%c0_184, %c0_185] : memref<256x128xf32, #tpu.memory_space<vmem>>, vector<256x128xf32>
    %153 = arith.addf %152, %151 : vector<256x128xf32>
    %c0_186 = arith.constant 0 : index
    %c0_187 = arith.constant 0 : index
    %154 = vector.load %arg14[%c0_186, %c0_187] : memref<256x128xf32, #tpu.memory_space<vmem>>, vector<256x128xf32>
    tpu.vector_store %arg14[%c0_186, %c0_187], %153 {strides = array<i32>} : memref<256x128xf32, #tpu.memory_space<vmem>>, vector<256x128xf32>,
    %c2_188 = arith.constant 2 : index
    %c1_189 = arith.constant 1 : index
    %c0_190 = arith.constant 0 : index
    %c0_191 = arith.constant 0 : index
    %155 = vector.load %arg12[%c2_188, %c1_189, %c0_190, %c0_191] : memref<3x18x16x128xbf16, #tpu.memory_space<vmem>>, vector<1x16x16x128xbf16>
    %156 = vector.shape_cast %155 : vector<1x16x16x128xbf16> to vector<256x128xbf16>
    %c5 = arith.constant 5 : index
    %c0_192 = arith.constant 0 : index
    %c0_193 = arith.constant 0 : index
    %157 = vector.load %arg3[%c5, %c0_192, %c0_193] : memref<9x128x128xbf16, #tpu.memory_space<vmem>>, vector<1x128x128xbf16>
    %158 = vector.shape_cast %157 : vector<1x128x128xbf16> to vector<128x128xbf16>
    %cst_194 = arith.constant dense<0.000000e+00> : vector<256x128xf32>
    %159 = tpu.matmul %156, %158, %cst_194 {dimension_numbers = #tpu.dot_dimension_numbers<[1], [0], [0], [1], [0, 0, 1, 1], [], []>} : vector<256x128xbf16>, vector<128x128xbf16>, vector<256x128xf32> -> vector<256x128xf32>
    %c0_195 = arith.constant 0 : index
    %c0_196 = arith.constant 0 : index
    %160 = vector.load %arg14[%c0_195, %c0_196] : memref<256x128xf32, #tpu.memory_space<vmem>>, vector<256x128xf32>
    %161 = arith.addf %160, %159 : vector<256x128xf32>
    %c0_197 = arith.constant 0 : index
    %c0_198 = arith.constant 0 : index
    %162 = vector.load %arg14[%c0_197, %c0_198] : memref<256x128xf32, #tpu.memory_space<vmem>>, vector<256x128xf32>
    tpu.vector_store %arg14[%c0_197, %c0_198], %161 {strides = array<i32>} : memref<256x128xf32, #tpu.memory_space<vmem>>, vector<256x128xf32>,
    %c0_199 = arith.constant 0 : index
    %c2_200 = arith.constant 2 : index
    %c0_201 = arith.constant 0 : index
    %c0_202 = arith.constant 0 : index
    %163 = vector.load %arg12[%c0_199, %c2_200, %c0_201, %c0_202] : memref<3x18x16x128xbf16, #tpu.memory_space<vmem>>, vector<1x16x16x128xbf16>
    %164 = vector.shape_cast %163 : vector<1x16x16x128xbf16> to vector<256x128xbf16>
    %c6 = arith.constant 6 : index
    %c0_203 = arith.constant 0 : index
    %c0_204 = arith.constant 0 : index
    %165 = vector.load %arg3[%c6, %c0_203, %c0_204] : memref<9x128x128xbf16, #tpu.memory_space<vmem>>, vector<1x128x128xbf16>
    %166 = vector.shape_cast %165 : vector<1x128x128xbf16> to vector<128x128xbf16>
    %cst_205 = arith.constant dense<0.000000e+00> : vector<256x128xf32>
    %167 = tpu.matmul %164, %166, %cst_205 {dimension_numbers = #tpu.dot_dimension_numbers<[1], [0], [0], [1], [0, 0, 1, 1], [], []>} : vector<256x128xbf16>, vector<128x128xbf16>, vector<256x128xf32> -> vector<256x128xf32>
    %c0_206 = arith.constant 0 : index
    %c0_207 = arith.constant 0 : index
    %168 = vector.load %arg14[%c0_206, %c0_207] : memref<256x128xf32, #tpu.memory_space<vmem>>, vector<256x128xf32>
    %169 = arith.addf %168, %167 : vector<256x128xf32>
    %c0_208 = arith.constant 0 : index
    %c0_209 = arith.constant 0 : index
    %170 = vector.load %arg14[%c0_208, %c0_209] : memref<256x128xf32, #tpu.memory_space<vmem>>, vector<256x128xf32>
    tpu.vector_store %arg14[%c0_208, %c0_209], %169 {strides = array<i32>} : memref<256x128xf32, #tpu.memory_space<vmem>>, vector<256x128xf32>,
    %c1_210 = arith.constant 1 : index
    %c2_211 = arith.constant 2 : index
    %c0_212 = arith.constant 0 : index
    %c0_213 = arith.constant 0 : index
    %171 = vector.load %arg12[%c1_210, %c2_211, %c0_212, %c0_213] : memref<3x18x16x128xbf16, #tpu.memory_space<vmem>>, vector<1x16x16x128xbf16>
    %172 = vector.shape_cast %171 : vector<1x16x16x128xbf16> to vector<256x128xbf16>
    %c7 = arith.constant 7 : index
    %c0_214 = arith.constant 0 : index
    %c0_215 = arith.constant 0 : index
    %173 = vector.load %arg3[%c7, %c0_214, %c0_215] : memref<9x128x128xbf16, #tpu.memory_space<vmem>>, vector<1x128x128xbf16>
    %174 = vector.shape_cast %173 : vector<1x128x128xbf16> to vector<128x128xbf16>
    %cst_216 = arith.constant dense<0.000000e+00> : vector<256x128xf32>
    %175 = tpu.matmul %172, %174, %cst_216 {dimension_numbers = #tpu.dot_dimension_numbers<[1], [0], [0], [1], [0, 0, 1, 1], [], []>} : vector<256x128xbf16>, vector<128x128xbf16>, vector<256x128xf32> -> vector<256x128xf32>
    %c0_217 = arith.constant 0 : index
    %c0_218 = arith.constant 0 : index
    %176 = vector.load %arg14[%c0_217, %c0_218] : memref<256x128xf32, #tpu.memory_space<vmem>>, vector<256x128xf32>
    %177 = arith.addf %176, %175 : vector<256x128xf32>
    %c0_219 = arith.constant 0 : index
    %c0_220 = arith.constant 0 : index
    %178 = vector.load %arg14[%c0_219, %c0_220] : memref<256x128xf32, #tpu.memory_space<vmem>>, vector<256x128xf32>
    tpu.vector_store %arg14[%c0_219, %c0_220], %177 {strides = array<i32>} : memref<256x128xf32, #tpu.memory_space<vmem>>, vector<256x128xf32>,
    %c2_221 = arith.constant 2 : index
    %c2_222 = arith.constant 2 : index
    %c0_223 = arith.constant 0 : index
    %c0_224 = arith.constant 0 : index
    %179 = vector.load %arg12[%c2_221, %c2_222, %c0_223, %c0_224] : memref<3x18x16x128xbf16, #tpu.memory_space<vmem>>, vector<1x16x16x128xbf16>
    %180 = vector.shape_cast %179 : vector<1x16x16x128xbf16> to vector<256x128xbf16>
    %c8_225 = arith.constant 8 : index
    %c0_226 = arith.constant 0 : index
    %c0_227 = arith.constant 0 : index
    %181 = vector.load %arg3[%c8_225, %c0_226, %c0_227] : memref<9x128x128xbf16, #tpu.memory_space<vmem>>, vector<1x128x128xbf16>
    %182 = vector.shape_cast %181 : vector<1x128x128xbf16> to vector<128x128xbf16>
    %cst_228 = arith.constant dense<0.000000e+00> : vector<256x128xf32>
    %183 = tpu.matmul %180, %182, %cst_228 {dimension_numbers = #tpu.dot_dimension_numbers<[1], [0], [0], [1], [0, 0, 1, 1], [], []>} : vector<256x128xbf16>, vector<128x128xbf16>, vector<256x128xf32> -> vector<256x128xf32>
    %c0_229 = arith.constant 0 : index
    %c0_230 = arith.constant 0 : index
    %184 = vector.load %arg14[%c0_229, %c0_230] : memref<256x128xf32, #tpu.memory_space<vmem>>, vector<256x128xf32>
    %185 = arith.addf %184, %183 : vector<256x128xf32>
    %c0_231 = arith.constant 0 : index
    %c0_232 = arith.constant 0 : index
    %186 = vector.load %arg14[%c0_231, %c0_232] : memref<256x128xf32, #tpu.memory_space<vmem>>, vector<256x128xf32>
    tpu.vector_store %arg14[%c0_231, %c0_232], %185 {strides = array<i32>} : memref<256x128xf32, #tpu.memory_space<vmem>>, vector<256x128xf32>,
    %c0_233 = arith.constant 0 : index
    %c0_234 = arith.constant 0 : index
    %187 = vector.load %arg14[%c0_233, %c0_234] : memref<256x128xf32, #tpu.memory_space<vmem>>, vector<256x128xf32>
    %188 = vector.shape_cast %187 : vector<256x128xf32> to vector<1x256x128xf32>
    %cst_235 = arith.constant dense<0.000000e+00> : vector<1xf32>
    %189 = vector.multi_reduction <add>, %188, %cst_235 [1, 2] : vector<1x256x128xf32> to vector<1xf32>
    %190 = vector.shape_cast %189 : vector<1xf32> to vector<1x1x1xf32>
    %191 = vector.extract %190[0, 0, 0] : f32 from vector<1x1x1xf32>
    %cst_236 = arith.constant 4.8828125E-4 : f32
    %192 = arith.mulf %191, %cst_236 : f32
    %193 = vector.broadcast %192 : f32 to vector<256x128xf32>
    %194 = arith.subf %187, %193 : vector<256x128xf32>
    %195 = arith.mulf %194, %194 : vector<256x128xf32>
    %196 = vector.broadcast %16 : vector<1x128xf32> to vector<256x128xf32>
    %197 = arith.mulf %195, %196 : vector<256x128xf32>
    %198 = vector.shape_cast %197 : vector<256x128xf32> to vector<1x256x128xf32>
    %cst_237 = arith.constant dense<0.000000e+00> : vector<1xf32>
    %199 = vector.multi_reduction <add>, %198, %cst_237 [1, 2] : vector<1x256x128xf32> to vector<1xf32>
    %200 = vector.shape_cast %199 : vector<1xf32> to vector<1x1x1xf32>
    %201 = vector.extract %200[0, 0, 0] : f32 from vector<1x1x1xf32>
    %cst_238 = arith.constant 4.8828125E-4 : f32
    %202 = arith.mulf %201, %cst_238 : f32
    %cst_239 = arith.constant 9.99999974E-6 : f32
    %203 = arith.addf %202, %cst_239 : f32
    %204 = math.rsqrt %203 : f32
    %cst_240 = arith.constant 1.000000e+00 : f32
    %205 = vector.broadcast %cst_240 : f32 to vector<128xf32>
    %206 = arith.addf %205, %26 : vector<128xf32>
    %207 = arith.mulf %22, %206 : vector<128xf32>
    %208 = vector.broadcast %204 : f32 to vector<128xf32>
    %209 = arith.mulf %207, %208 : vector<128xf32>
    %cst_241 = arith.constant 1.000000e+00 : f32
    %210 = vector.broadcast %cst_241 : f32 to vector<128xf32>
    %211 = arith.addf %210, %26 : vector<128xf32>
    %212 = arith.mulf %24, %211 : vector<128xf32>
    %213 = arith.addf %212, %28 : vector<128xf32>
    %214 = vector.broadcast %192 : f32 to vector<128xf32>
    %215 = arith.mulf %214, %209 : vector<128xf32>
    %216 = arith.subf %213, %215 : vector<128xf32>
    %217 = vector.shape_cast %209 : vector<128xf32> to vector<1x128xf32>
    %218 = vector.broadcast %217 : vector<1x128xf32> to vector<256x128xf32>
    %219 = arith.mulf %187, %218 : vector<256x128xf32>
    %220 = vector.shape_cast %216 : vector<128xf32> to vector<1x128xf32>
    %221 = vector.broadcast %220 : vector<1x128xf32> to vector<256x128xf32>
    %222 = arith.addf %219, %221 : vector<256x128xf32>
    %cst_242 = arith.constant 0.000000e+00 : f32
    %223 = vector.broadcast %cst_242 : f32 to vector<256x128xf32>
    %224 = arith.maximumf %222, %223 : vector<256x128xf32>
    %225 = vector.extract_strided_slice %224 {offsets = [0, 0], sizes = [256, 8], strides = [1, 1]} : vector<256x128xf32> to vector<256x8xf32>
    %c0_243 = arith.constant 0 : index
    %c0_244 = arith.constant 0 : index
    %c0_245 = arith.constant 0 : index
    %226 = vector.load %arg10[%c0_243, %c0_244, %c0_245] : memref<2x256x8xf32, #tpu.memory_space<vmem>>, vector<1x256x8xf32>
    %227 = vector.shape_cast %226 : vector<1x256x8xf32> to vector<256x8xf32>
    %228 = vector.shape_cast %225 : vector<256x8xf32> to vector<1x256x8xf32>
    tpu.vector_store %arg10[%c0_243, %c0_244, %c0_245], %228 {strides = array<i32>} : memref<2x256x8xf32, #tpu.memory_space<vmem>>, vector<1x256x8xf32>,
    %c1_246 = arith.constant 1 : index
    %c0_247 = arith.constant 0 : index
    %c0_248 = arith.constant 0 : index
    %229 = vector.load %arg8[%c1_246, %c0_247, %c0_248] : memref<2x1x128xf32, #tpu.memory_space<vmem>>, vector<1x1x128xf32>
    %230 = vector.shape_cast %229 : vector<1x1x128xf32> to vector<128xf32>
    %c1_249 = arith.constant 1 : index
    %c0_250 = arith.constant 0 : index
    %c0_251 = arith.constant 0 : index
    %231 = vector.load %arg9[%c1_249, %c0_250, %c0_251] : memref<2x1x128xf32, #tpu.memory_space<vmem>>, vector<1x1x128xf32>
    %232 = vector.shape_cast %231 : vector<1x1x128xf32> to vector<128xf32>
    %c1_252 = arith.constant 1 : index
    %c0_253 = arith.constant 0 : index
    %c0_254 = arith.constant 0 : index
    %c0_255 = arith.constant 0 : index
    %233 = vector.load %arg1[%c1_252, %c0_253, %c0_254, %c0_255] : memref<2x16x16x4xf32, #tpu.memory_space<vmem>>, vector<1x16x16x4xf32>
    %234 = vector.shape_cast %233 : vector<1x16x16x4xf32> to vector<16x16x4xf32>
    %235 = arith.truncf %234 : vector<16x16x4xf32> to vector<16x16x4xbf16>
    %236 = vector.shape_cast %235 : vector<16x16x4xbf16> to vector<1x16x16x4xbf16>
    %c1_256 = arith.constant 1 : index
    %c1_257 = arith.constant 1 : index
    %c0_258 = arith.constant 0 : index
    %c0_259 = arith.constant 0 : index
    %237 = vector.load %arg11[%c1_256, %c1_257, %c0_258, %c0_259] : memref<3x18x16x4xbf16, #tpu.memory_space<vmem>>, vector<1x16x16x4xbf16>
    tpu.vector_store %arg11[%c1_256, %c1_257, %c0_258, %c0_259], %236 {strides = array<i32>} : memref<3x18x16x4xbf16, #tpu.memory_space<vmem>>, vector<1x16x16x4xbf16>,
    %238 = vector.extract_strided_slice %235 {offsets = [0, 0, 0], sizes = [16, 15, 4], strides = [1, 1, 1]} : vector<16x16x4xbf16> to vector<16x15x4xbf16>
    %239 = vector.shape_cast %238 : vector<16x15x4xbf16> to vector<1x16x15x4xbf16>
    %c0_260 = arith.constant 0 : index
    %c1_261 = arith.constant 1 : index
    %c1_262 = arith.constant 1 : index
    %c0_263 = arith.constant 0 : index
    %240 = vector.load %arg11[%c0_260, %c1_261, %c1_262, %c0_263] : memref<3x18x16x4xbf16, #tpu.memory_space<vmem>>, vector<1x16x15x4xbf16>
    tpu.vector_store %arg11[%c0_260, %c1_261, %c1_262, %c0_263], %239 {strides = array<i32>} : memref<3x18x16x4xbf16, #tpu.memory_space<vmem>>, vector<1x16x15x4xbf16>,
    %241 = vector.extract_strided_slice %235 {offsets = [0, 1, 0], sizes = [16, 15, 4], strides = [1, 1, 1]} : vector<16x16x4xbf16> to vector<16x15x4xbf16>
    %242 = vector.shape_cast %241 : vector<16x15x4xbf16> to vector<1x16x15x4xbf16>
    %c2_264 = arith.constant 2 : index
    %c1_265 = arith.constant 1 : index
    %c0_266 = arith.constant 0 : index
    %c0_267 = arith.constant 0 : index
    %243 = vector.load %arg11[%c2_264, %c1_265, %c0_266, %c0_267] : memref<3x18x16x4xbf16, #tpu.memory_space<vmem>>, vector<1x16x15x4xbf16>
    tpu.vector_store %arg11[%c2_264, %c1_265, %c0_266, %c0_267], %242 {strides = array<i32>} : memref<3x18x16x4xbf16, #tpu.memory_space<vmem>>, vector<1x16x15x4xbf16>,
    %c0_268 = arith.constant 0 : index
    %c0_269 = arith.constant 0 : index
    %c0_270 = arith.constant 0 : index
    %c0_271 = arith.constant 0 : index
    %244 = vector.load %arg11[%c0_268, %c0_269, %c0_270, %c0_271] : memref<3x18x16x4xbf16, #tpu.memory_space<vmem>>, vector<1x16x16x4xbf16>
    %245 = vector.shape_cast %244 : vector<1x16x16x4xbf16> to vector<256x4xbf16>
    %c0_272 = arith.constant 0 : index
    %c0_273 = arith.constant 0 : index
    %246 = vector.load %arg13[%c0_272, %c0_273] : memref<256x36xbf16, #tpu.memory_space<vmem>>, vector<256x4xbf16>
    tpu.vector_store %arg13[%c0_272, %c0_273], %245 {strides = array<i32>} : memref<256x36xbf16, #tpu.memory_space<vmem>>, vector<256x4xbf16>,
    %c1_274 = arith.constant 1 : index
    %c0_275 = arith.constant 0 : index
    %c0_276 = arith.constant 0 : index
    %c0_277 = arith.constant 0 : index
    %247 = vector.load %arg11[%c1_274, %c0_275, %c0_276, %c0_277] : memref<3x18x16x4xbf16, #tpu.memory_space<vmem>>, vector<1x16x16x4xbf16>
    %248 = vector.shape_cast %247 : vector<1x16x16x4xbf16> to vector<256x4xbf16>
    %c0_278 = arith.constant 0 : index
    %c4_279 = arith.constant 4 : index
    %249 = vector.load %arg13[%c0_278, %c4_279] : memref<256x36xbf16, #tpu.memory_space<vmem>>, vector<256x4xbf16>
    tpu.vector_store %arg13[%c0_278, %c4_279], %248 {strides = array<i32>} : memref<256x36xbf16, #tpu.memory_space<vmem>>, vector<256x4xbf16>,
    %c2_280 = arith.constant 2 : index
    %c0_281 = arith.constant 0 : index
    %c0_282 = arith.constant 0 : index
    %c0_283 = arith.constant 0 : index
    %250 = vector.load %arg11[%c2_280, %c0_281, %c0_282, %c0_283] : memref<3x18x16x4xbf16, #tpu.memory_space<vmem>>, vector<1x16x16x4xbf16>
    %251 = vector.shape_cast %250 : vector<1x16x16x4xbf16> to vector<256x4xbf16>
    %c0_284 = arith.constant 0 : index
    %c8_285 = arith.constant 8 : index
    %252 = vector.load %arg13[%c0_284, %c8_285] : memref<256x36xbf16, #tpu.memory_space<vmem>>, vector<256x4xbf16>
    tpu.vector_store %arg13[%c0_284, %c8_285], %251 {strides = array<i32>} : memref<256x36xbf16, #tpu.memory_space<vmem>>, vector<256x4xbf16>,
    %c0_286 = arith.constant 0 : index
    %c1_287 = arith.constant 1 : index
    %c0_288 = arith.constant 0 : index
    %c0_289 = arith.constant 0 : index
    %253 = vector.load %arg11[%c0_286, %c1_287, %c0_288, %c0_289] : memref<3x18x16x4xbf16, #tpu.memory_space<vmem>>, vector<1x16x16x4xbf16>
    %254 = vector.shape_cast %253 : vector<1x16x16x4xbf16> to vector<256x4xbf16>
    %c0_290 = arith.constant 0 : index
    %c12_291 = arith.constant 12 : index
    %255 = vector.load %arg13[%c0_290, %c12_291] : memref<256x36xbf16, #tpu.memory_space<vmem>>, vector<256x4xbf16>
    tpu.vector_store %arg13[%c0_290, %c12_291], %254 {strides = array<i32>} : memref<256x36xbf16, #tpu.memory_space<vmem>>, vector<256x4xbf16>,
    %c1_292 = arith.constant 1 : index
    %c1_293 = arith.constant 1 : index
    %c0_294 = arith.constant 0 : index
    %c0_295 = arith.constant 0 : index
    %256 = vector.load %arg11[%c1_292, %c1_293, %c0_294, %c0_295] : memref<3x18x16x4xbf16, #tpu.memory_space<vmem>>, vector<1x16x16x4xbf16>
    %257 = vector.shape_cast %256 : vector<1x16x16x4xbf16> to vector<256x4xbf16>
    %c0_296 = arith.constant 0 : index
    %c16_297 = arith.constant 16 : index
    %258 = vector.load %arg13[%c0_296, %c16_297] : memref<256x36xbf16, #tpu.memory_space<vmem>>, vector<256x4xbf16>
    tpu.vector_store %arg13[%c0_296, %c16_297], %257 {strides = array<i32>} : memref<256x36xbf16, #tpu.memory_space<vmem>>, vector<256x4xbf16>,
    %c2_298 = arith.constant 2 : index
    %c1_299 = arith.constant 1 : index
    %c0_300 = arith.constant 0 : index
    %c0_301 = arith.constant 0 : index
    %259 = vector.load %arg11[%c2_298, %c1_299, %c0_300, %c0_301] : memref<3x18x16x4xbf16, #tpu.memory_space<vmem>>, vector<1x16x16x4xbf16>
    %260 = vector.shape_cast %259 : vector<1x16x16x4xbf16> to vector<256x4xbf16>
    %c0_302 = arith.constant 0 : index
    %c20_303 = arith.constant 20 : index
    %261 = vector.load %arg13[%c0_302, %c20_303] : memref<256x36xbf16, #tpu.memory_space<vmem>>, vector<256x4xbf16>
    tpu.vector_store %arg13[%c0_302, %c20_303], %260 {strides = array<i32>} : memref<256x36xbf16, #tpu.memory_space<vmem>>, vector<256x4xbf16>,
    %c0_304 = arith.constant 0 : index
    %c2_305 = arith.constant 2 : index
    %c0_306 = arith.constant 0 : index
    %c0_307 = arith.constant 0 : index
    %262 = vector.load %arg11[%c0_304, %c2_305, %c0_306, %c0_307] : memref<3x18x16x4xbf16, #tpu.memory_space<vmem>>, vector<1x16x16x4xbf16>
    %263 = vector.shape_cast %262 : vector<1x16x16x4xbf16> to vector<256x4xbf16>
    %c0_308 = arith.constant 0 : index
    %c24_309 = arith.constant 24 : index
    %264 = vector.load %arg13[%c0_308, %c24_309] : memref<256x36xbf16, #tpu.memory_space<vmem>>, vector<256x4xbf16>
    tpu.vector_store %arg13[%c0_308, %c24_309], %263 {strides = array<i32>} : memref<256x36xbf16, #tpu.memory_space<vmem>>, vector<256x4xbf16>,
    %c1_310 = arith.constant 1 : index
    %c2_311 = arith.constant 2 : index
    %c0_312 = arith.constant 0 : index
    %c0_313 = arith.constant 0 : index
    %265 = vector.load %arg11[%c1_310, %c2_311, %c0_312, %c0_313] : memref<3x18x16x4xbf16, #tpu.memory_space<vmem>>, vector<1x16x16x4xbf16>
    %266 = vector.shape_cast %265 : vector<1x16x16x4xbf16> to vector<256x4xbf16>
    %c0_314 = arith.constant 0 : index
    %c28_315 = arith.constant 28 : index
    %267 = vector.load %arg13[%c0_314, %c28_315] : memref<256x36xbf16, #tpu.memory_space<vmem>>, vector<256x4xbf16>
    tpu.vector_store %arg13[%c0_314, %c28_315], %266 {strides = array<i32>} : memref<256x36xbf16, #tpu.memory_space<vmem>>, vector<256x4xbf16>,
    %c2_316 = arith.constant 2 : index
    %c2_317 = arith.constant 2 : index
    %c0_318 = arith.constant 0 : index
    %c0_319 = arith.constant 0 : index
    %268 = vector.load %arg11[%c2_316, %c2_317, %c0_318, %c0_319] : memref<3x18x16x4xbf16, #tpu.memory_space<vmem>>, vector<1x16x16x4xbf16>
    %269 = vector.shape_cast %268 : vector<1x16x16x4xbf16> to vector<256x4xbf16>
    %c0_320 = arith.constant 0 : index
    %c32_321 = arith.constant 32 : index
    %270 = vector.load %arg13[%c0_320, %c32_321] : memref<256x36xbf16, #tpu.memory_space<vmem>>, vector<256x4xbf16>
    tpu.vector_store %arg13[%c0_320, %c32_321], %269 {strides = array<i32>} : memref<256x36xbf16, #tpu.memory_space<vmem>>, vector<256x4xbf16>,
    %c0_322 = arith.constant 0 : index
    %c0_323 = arith.constant 0 : index
    %271 = vector.load %arg13[%c0_322, %c0_323] : memref<256x36xbf16, #tpu.memory_space<vmem>>, vector<256x36xbf16>
    %c0_324 = arith.constant 0 : index
    %c0_325 = arith.constant 0 : index
    %272 = vector.load %arg2[%c0_324, %c0_325] : memref<36x128xbf16, #tpu.memory_space<vmem>>, vector<36x128xbf16>
    %cst_326 = arith.constant dense<0.000000e+00> : vector<256x128xf32>
    %273 = tpu.matmul %271, %272, %cst_326 {dimension_numbers = #tpu.dot_dimension_numbers<[1], [0], [0], [1], [0, 0, 1, 1], [], []>} : vector<256x36xbf16>, vector<36x128xbf16>, vector<256x128xf32> -> vector<256x128xf32>
    %274 = vector.shape_cast %273 : vector<256x128xf32> to vector<1x256x128xf32>
    %cst_327 = arith.constant dense<0.000000e+00> : vector<1xf32>
    %275 = vector.multi_reduction <add>, %274, %cst_327 [1, 2] : vector<1x256x128xf32> to vector<1xf32>
    %276 = vector.shape_cast %275 : vector<1xf32> to vector<1x1x1xf32>
    %277 = vector.extract %276[0, 0, 0] : f32 from vector<1x1x1xf32>
    %cst_328 = arith.constant 4.8828125E-4 : f32
    %278 = arith.mulf %277, %cst_328 : f32
    %279 = vector.broadcast %278 : f32 to vector<256x128xf32>
    %280 = arith.subf %273, %279 : vector<256x128xf32>
    %281 = arith.mulf %280, %280 : vector<256x128xf32>
    %282 = vector.broadcast %16 : vector<1x128xf32> to vector<256x128xf32>
    %283 = arith.mulf %281, %282 : vector<256x128xf32>
    %284 = vector.shape_cast %283 : vector<256x128xf32> to vector<1x256x128xf32>
    %cst_329 = arith.constant dense<0.000000e+00> : vector<1xf32>
    %285 = vector.multi_reduction <add>, %284, %cst_329 [1, 2] : vector<1x256x128xf32> to vector<1xf32>
    %286 = vector.shape_cast %285 : vector<1xf32> to vector<1x1x1xf32>
    %287 = vector.extract %286[0, 0, 0] : f32 from vector<1x1x1xf32>
    %cst_330 = arith.constant 4.8828125E-4 : f32
    %288 = arith.mulf %287, %cst_330 : f32
    %cst_331 = arith.constant 9.99999974E-6 : f32
    %289 = arith.addf %288, %cst_331 : f32
    %290 = math.rsqrt %289 : f32
    %cst_332 = arith.constant 1.000000e+00 : f32
    %291 = vector.broadcast %cst_332 : f32 to vector<128xf32>
    %292 = arith.addf %291, %230 : vector<128xf32>
    %293 = arith.mulf %18, %292 : vector<128xf32>
    %294 = vector.broadcast %290 : f32 to vector<128xf32>
    %295 = arith.mulf %293, %294 : vector<128xf32>
    %cst_333 = arith.constant 1.000000e+00 : f32
    %296 = vector.broadcast %cst_333 : f32 to vector<128xf32>
    %297 = arith.addf %296, %230 : vector<128xf32>
    %298 = arith.mulf %20, %297 : vector<128xf32>
    %299 = arith.addf %298, %232 : vector<128xf32>
    %300 = vector.broadcast %278 : f32 to vector<128xf32>
    %301 = arith.mulf %300, %295 : vector<128xf32>
    %302 = arith.subf %299, %301 : vector<128xf32>
    %303 = vector.shape_cast %295 : vector<128xf32> to vector<1x128xf32>
    %304 = vector.broadcast %303 : vector<1x128xf32> to vector<256x128xf32>
    %305 = arith.mulf %273, %304 : vector<256x128xf32>
    %306 = vector.shape_cast %302 : vector<128xf32> to vector<1x128xf32>
    %307 = vector.broadcast %306 : vector<1x128xf32> to vector<256x128xf32>
    %308 = arith.addf %305, %307 : vector<256x128xf32>
    %cst_334 = arith.constant 0.000000e+00 : f32
    %309 = vector.broadcast %cst_334 : f32 to vector<256x128xf32>
    %310 = arith.maximumf %308, %309 : vector<256x128xf32>
    %311 = vector.shape_cast %310 : vector<256x128xf32> to vector<16x16x128xf32>
    %312 = arith.truncf %311 : vector<16x16x128xf32> to vector<16x16x128xbf16>
    %313 = vector.shape_cast %312 : vector<16x16x128xbf16> to vector<1x16x16x128xbf16>
    %c1_335 = arith.constant 1 : index
    %c1_336 = arith.constant 1 : index
    %c0_337 = arith.constant 0 : index
    %c0_338 = arith.constant 0 : index
    %314 = vector.load %arg12[%c1_335, %c1_336, %c0_337, %c0_338] : memref<3x18x16x128xbf16, #tpu.memory_space<vmem>>, vector<1x16x16x128xbf16>
    tpu.vector_store %arg12[%c1_335, %c1_336, %c0_337, %c0_338], %313 {strides = array<i32>} : memref<3x18x16x128xbf16, #tpu.memory_space<vmem>>, vector<1x16x16x128xbf16>,
    %315 = vector.extract_strided_slice %312 {offsets = [0, 0, 0], sizes = [16, 15, 128], strides = [1, 1, 1]} : vector<16x16x128xbf16> to vector<16x15x128xbf16>
    %316 = vector.shape_cast %315 : vector<16x15x128xbf16> to vector<1x16x15x128xbf16>
    %c0_339 = arith.constant 0 : index
    %c1_340 = arith.constant 1 : index
    %c1_341 = arith.constant 1 : index
    %c0_342 = arith.constant 0 : index
    %317 = vector.load %arg12[%c0_339, %c1_340, %c1_341, %c0_342] : memref<3x18x16x128xbf16, #tpu.memory_space<vmem>>, vector<1x16x15x128xbf16>
    tpu.vector_store %arg12[%c0_339, %c1_340, %c1_341, %c0_342], %316 {strides = array<i32>} : memref<3x18x16x128xbf16, #tpu.memory_space<vmem>>, vector<1x16x15x128xbf16>,
    %318 = vector.extract_strided_slice %312 {offsets = [0, 1, 0], sizes = [16, 15, 128], strides = [1, 1, 1]} : vector<16x16x128xbf16> to vector<16x15x128xbf16>
    %319 = vector.shape_cast %318 : vector<16x15x128xbf16> to vector<1x16x15x128xbf16>
    %c2_343 = arith.constant 2 : index
    %c1_344 = arith.constant 1 : index
    %c0_345 = arith.constant 0 : index
    %c0_346 = arith.constant 0 : index
    %320 = vector.load %arg12[%c2_343, %c1_344, %c0_345, %c0_346] : memref<3x18x16x128xbf16, #tpu.memory_space<vmem>>, vector<1x16x15x128xbf16>
    tpu.vector_store %arg12[%c2_343, %c1_344, %c0_345, %c0_346], %319 {strides = array<i32>} : memref<3x18x16x128xbf16, #tpu.memory_space<vmem>>, vector<1x16x15x128xbf16>,
    %c0_347 = arith.constant 0 : index
    %c0_348 = arith.constant 0 : index
    %c0_349 = arith.constant 0 : index
    %c0_350 = arith.constant 0 : index
    %321 = vector.load %arg12[%c0_347, %c0_348, %c0_349, %c0_350] : memref<3x18x16x128xbf16, #tpu.memory_space<vmem>>, vector<1x16x16x128xbf16>
    %322 = vector.shape_cast %321 : vector<1x16x16x128xbf16> to vector<256x128xbf16>
    %c0_351 = arith.constant 0 : index
    %c0_352 = arith.constant 0 : index
    %c0_353 = arith.constant 0 : index
    %323 = vector.load %arg3[%c0_351, %c0_352, %c0_353] : memref<9x128x128xbf16, #tpu.memory_space<vmem>>, vector<1x128x128xbf16>
    %324 = vector.shape_cast %323 : vector<1x128x128xbf16> to vector<128x128xbf16>
    %cst_354 = arith.constant dense<0.000000e+00> : vector<256x128xf32>
    %325 = tpu.matmul %322, %324, %cst_354 {dimension_numbers = #tpu.dot_dimension_numbers<[1], [0], [0], [1], [0, 0, 1, 1], [], []>} : vector<256x128xbf16>, vector<128x128xbf16>, vector<256x128xf32> -> vector<256x128xf32>
    %c0_355 = arith.constant 0 : index
    %c0_356 = arith.constant 0 : index
    %326 = vector.load %arg14[%c0_355, %c0_356] : memref<256x128xf32, #tpu.memory_space<vmem>>, vector<256x128xf32>
    tpu.vector_store %arg14[%c0_355, %c0_356], %325 {strides = array<i32>} : memref<256x128xf32, #tpu.memory_space<vmem>>, vector<256x128xf32>,
    %c1_357 = arith.constant 1 : index
    %c0_358 = arith.constant 0 : index
    %c0_359 = arith.constant 0 : index
    %c0_360 = arith.constant 0 : index
    %327 = vector.load %arg12[%c1_357, %c0_358, %c0_359, %c0_360] : memref<3x18x16x128xbf16, #tpu.memory_space<vmem>>, vector<1x16x16x128xbf16>
    %328 = vector.shape_cast %327 : vector<1x16x16x128xbf16> to vector<256x128xbf16>
    %c1_361 = arith.constant 1 : index
    %c0_362 = arith.constant 0 : index
    %c0_363 = arith.constant 0 : index
    %329 = vector.load %arg3[%c1_361, %c0_362, %c0_363] : memref<9x128x128xbf16, #tpu.memory_space<vmem>>, vector<1x128x128xbf16>
    %330 = vector.shape_cast %329 : vector<1x128x128xbf16> to vector<128x128xbf16>
    %cst_364 = arith.constant dense<0.000000e+00> : vector<256x128xf32>
    %331 = tpu.matmul %328, %330, %cst_364 {dimension_numbers = #tpu.dot_dimension_numbers<[1], [0], [0], [1], [0, 0, 1, 1], [], []>} : vector<256x128xbf16>, vector<128x128xbf16>, vector<256x128xf32> -> vector<256x128xf32>
    %c0_365 = arith.constant 0 : index
    %c0_366 = arith.constant 0 : index
    %332 = vector.load %arg14[%c0_365, %c0_366] : memref<256x128xf32, #tpu.memory_space<vmem>>, vector<256x128xf32>
    %333 = arith.addf %332, %331 : vector<256x128xf32>
    %c0_367 = arith.constant 0 : index
    %c0_368 = arith.constant 0 : index
    %334 = vector.load %arg14[%c0_367, %c0_368] : memref<256x128xf32, #tpu.memory_space<vmem>>, vector<256x128xf32>
    tpu.vector_store %arg14[%c0_367, %c0_368], %333 {strides = array<i32>} : memref<256x128xf32, #tpu.memory_space<vmem>>, vector<256x128xf32>,
    %c2_369 = arith.constant 2 : index
    %c0_370 = arith.constant 0 : index
    %c0_371 = arith.constant 0 : index
    %c0_372 = arith.constant 0 : index
    %335 = vector.load %arg12[%c2_369, %c0_370, %c0_371, %c0_372] : memref<3x18x16x128xbf16, #tpu.memory_space<vmem>>, vector<1x16x16x128xbf16>
    %336 = vector.shape_cast %335 : vector<1x16x16x128xbf16> to vector<256x128xbf16>
    %c2_373 = arith.constant 2 : index
    %c0_374 = arith.constant 0 : index
    %c0_375 = arith.constant 0 : index
    %337 = vector.load %arg3[%c2_373, %c0_374, %c0_375] : memref<9x128x128xbf16, #tpu.memory_space<vmem>>, vector<1x128x128xbf16>
    %338 = vector.shape_cast %337 : vector<1x128x128xbf16> to vector<128x128xbf16>
    %cst_376 = arith.constant dense<0.000000e+00> : vector<256x128xf32>
    %339 = tpu.matmul %336, %338, %cst_376 {dimension_numbers = #tpu.dot_dimension_numbers<[1], [0], [0], [1], [0, 0, 1, 1], [], []>} : vector<256x128xbf16>, vector<128x128xbf16>, vector<256x128xf32> -> vector<256x128xf32>
    %c0_377 = arith.constant 0 : index
    %c0_378 = arith.constant 0 : index
    %340 = vector.load %arg14[%c0_377, %c0_378] : memref<256x128xf32, #tpu.memory_space<vmem>>, vector<256x128xf32>
    %341 = arith.addf %340, %339 : vector<256x128xf32>
    %c0_379 = arith.constant 0 : index
    %c0_380 = arith.constant 0 : index
    %342 = vector.load %arg14[%c0_379, %c0_380] : memref<256x128xf32, #tpu.memory_space<vmem>>, vector<256x128xf32>
    tpu.vector_store %arg14[%c0_379, %c0_380], %341 {strides = array<i32>} : memref<256x128xf32, #tpu.memory_space<vmem>>, vector<256x128xf32>,
    %c0_381 = arith.constant 0 : index
    %c1_382 = arith.constant 1 : index
    %c0_383 = arith.constant 0 : index
    %c0_384 = arith.constant 0 : index
    %343 = vector.load %arg12[%c0_381, %c1_382, %c0_383, %c0_384] : memref<3x18x16x128xbf16, #tpu.memory_space<vmem>>, vector<1x16x16x128xbf16>
    %344 = vector.shape_cast %343 : vector<1x16x16x128xbf16> to vector<256x128xbf16>
    %c3_385 = arith.constant 3 : index
    %c0_386 = arith.constant 0 : index
    %c0_387 = arith.constant 0 : index
    %345 = vector.load %arg3[%c3_385, %c0_386, %c0_387] : memref<9x128x128xbf16, #tpu.memory_space<vmem>>, vector<1x128x128xbf16>
    %346 = vector.shape_cast %345 : vector<1x128x128xbf16> to vector<128x128xbf16>
    %cst_388 = arith.constant dense<0.000000e+00> : vector<256x128xf32>
    %347 = tpu.matmul %344, %346, %cst_388 {dimension_numbers = #tpu.dot_dimension_numbers<[1], [0], [0], [1], [0, 0, 1, 1], [], []>} : vector<256x128xbf16>, vector<128x128xbf16>, vector<256x128xf32> -> vector<256x128xf32>
    %c0_389 = arith.constant 0 : index
    %c0_390 = arith.constant 0 : index
    %348 = vector.load %arg14[%c0_389, %c0_390] : memref<256x128xf32, #tpu.memory_space<vmem>>, vector<256x128xf32>
    %349 = arith.addf %348, %347 : vector<256x128xf32>
    %c0_391 = arith.constant 0 : index
    %c0_392 = arith.constant 0 : index
    %350 = vector.load %arg14[%c0_391, %c0_392] : memref<256x128xf32, #tpu.memory_space<vmem>>, vector<256x128xf32>
    tpu.vector_store %arg14[%c0_391, %c0_392], %349 {strides = array<i32>} : memref<256x128xf32, #tpu.memory_space<vmem>>, vector<256x128xf32>,
    %c1_393 = arith.constant 1 : index
    %c1_394 = arith.constant 1 : index
    %c0_395 = arith.constant 0 : index
    %c0_396 = arith.constant 0 : index
    %351 = vector.load %arg12[%c1_393, %c1_394, %c0_395, %c0_396] : memref<3x18x16x128xbf16, #tpu.memory_space<vmem>>, vector<1x16x16x128xbf16>
    %352 = vector.shape_cast %351 : vector<1x16x16x128xbf16> to vector<256x128xbf16>
    %c4_397 = arith.constant 4 : index
    %c0_398 = arith.constant 0 : index
    %c0_399 = arith.constant 0 : index
    %353 = vector.load %arg3[%c4_397, %c0_398, %c0_399] : memref<9x128x128xbf16, #tpu.memory_space<vmem>>, vector<1x128x128xbf16>
    %354 = vector.shape_cast %353 : vector<1x128x128xbf16> to vector<128x128xbf16>
    %cst_400 = arith.constant dense<0.000000e+00> : vector<256x128xf32>
    %355 = tpu.matmul %352, %354, %cst_400 {dimension_numbers = #tpu.dot_dimension_numbers<[1], [0], [0], [1], [0, 0, 1, 1], [], []>} : vector<256x128xbf16>, vector<128x128xbf16>, vector<256x128xf32> -> vector<256x128xf32>
    %c0_401 = arith.constant 0 : index
    %c0_402 = arith.constant 0 : index
    %356 = vector.load %arg14[%c0_401, %c0_402] : memref<256x128xf32, #tpu.memory_space<vmem>>, vector<256x128xf32>
    %357 = arith.addf %356, %355 : vector<256x128xf32>
    %c0_403 = arith.constant 0 : index
    %c0_404 = arith.constant 0 : index
    %358 = vector.load %arg14[%c0_403, %c0_404] : memref<256x128xf32, #tpu.memory_space<vmem>>, vector<256x128xf32>
    tpu.vector_store %arg14[%c0_403, %c0_404], %357 {strides = array<i32>} : memref<256x128xf32, #tpu.memory_space<vmem>>, vector<256x128xf32>,
    %c2_405 = arith.constant 2 : index
    %c1_406 = arith.constant 1 : index
    %c0_407 = arith.constant 0 : index
    %c0_408 = arith.constant 0 : index
    %359 = vector.load %arg12[%c2_405, %c1_406, %c0_407, %c0_408] : memref<3x18x16x128xbf16, #tpu.memory_space<vmem>>, vector<1x16x16x128xbf16>
    %360 = vector.shape_cast %359 : vector<1x16x16x128xbf16> to vector<256x128xbf16>
    %c5_409 = arith.constant 5 : index
    %c0_410 = arith.constant 0 : index
    %c0_411 = arith.constant 0 : index
    %361 = vector.load %arg3[%c5_409, %c0_410, %c0_411] : memref<9x128x128xbf16, #tpu.memory_space<vmem>>, vector<1x128x128xbf16>
    %362 = vector.shape_cast %361 : vector<1x128x128xbf16> to vector<128x128xbf16>
    %cst_412 = arith.constant dense<0.000000e+00> : vector<256x128xf32>
    %363 = tpu.matmul %360, %362, %cst_412 {dimension_numbers = #tpu.dot_dimension_numbers<[1], [0], [0], [1], [0, 0, 1, 1], [], []>} : vector<256x128xbf16>, vector<128x128xbf16>, vector<256x128xf32> -> vector<256x128xf32>
    %c0_413 = arith.constant 0 : index
    %c0_414 = arith.constant 0 : index
    %364 = vector.load %arg14[%c0_413, %c0_414] : memref<256x128xf32, #tpu.memory_space<vmem>>, vector<256x128xf32>
    %365 = arith.addf %364, %363 : vector<256x128xf32>
    %c0_415 = arith.constant 0 : index
    %c0_416 = arith.constant 0 : index
    %366 = vector.load %arg14[%c0_415, %c0_416] : memref<256x128xf32, #tpu.memory_space<vmem>>, vector<256x128xf32>
    tpu.vector_store %arg14[%c0_415, %c0_416], %365 {strides = array<i32>} : memref<256x128xf32, #tpu.memory_space<vmem>>, vector<256x128xf32>,
    %c0_417 = arith.constant 0 : index
    %c2_418 = arith.constant 2 : index
    %c0_419 = arith.constant 0 : index
    %c0_420 = arith.constant 0 : index
    %367 = vector.load %arg12[%c0_417, %c2_418, %c0_419, %c0_420] : memref<3x18x16x128xbf16, #tpu.memory_space<vmem>>, vector<1x16x16x128xbf16>
    %368 = vector.shape_cast %367 : vector<1x16x16x128xbf16> to vector<256x128xbf16>
    %c6_421 = arith.constant 6 : index
    %c0_422 = arith.constant 0 : index
    %c0_423 = arith.constant 0 : index
    %369 = vector.load %arg3[%c6_421, %c0_422, %c0_423] : memref<9x128x128xbf16, #tpu.memory_space<vmem>>, vector<1x128x128xbf16>
    %370 = vector.shape_cast %369 : vector<1x128x128xbf16> to vector<128x128xbf16>
    %cst_424 = arith.constant dense<0.000000e+00> : vector<256x128xf32>
    %371 = tpu.matmul %368, %370, %cst_424 {dimension_numbers = #tpu.dot_dimension_numbers<[1], [0], [0], [1], [0, 0, 1, 1], [], []>} : vector<256x128xbf16>, vector<128x128xbf16>, vector<256x128xf32> -> vector<256x128xf32>
    %c0_425 = arith.constant 0 : index
    %c0_426 = arith.constant 0 : index
    %372 = vector.load %arg14[%c0_425, %c0_426] : memref<256x128xf32, #tpu.memory_space<vmem>>, vector<256x128xf32>
    %373 = arith.addf %372, %371 : vector<256x128xf32>
    %c0_427 = arith.constant 0 : index
    %c0_428 = arith.constant 0 : index
    %374 = vector.load %arg14[%c0_427, %c0_428] : memref<256x128xf32, #tpu.memory_space<vmem>>, vector<256x128xf32>
    tpu.vector_store %arg14[%c0_427, %c0_428], %373 {strides = array<i32>} : memref<256x128xf32, #tpu.memory_space<vmem>>, vector<256x128xf32>,
    %c1_429 = arith.constant 1 : index
    %c2_430 = arith.constant 2 : index
    %c0_431 = arith.constant 0 : index
    %c0_432 = arith.constant 0 : index
    %375 = vector.load %arg12[%c1_429, %c2_430, %c0_431, %c0_432] : memref<3x18x16x128xbf16, #tpu.memory_space<vmem>>, vector<1x16x16x128xbf16>
    %376 = vector.shape_cast %375 : vector<1x16x16x128xbf16> to vector<256x128xbf16>
    %c7_433 = arith.constant 7 : index
    %c0_434 = arith.constant 0 : index
    %c0_435 = arith.constant 0 : index
    %377 = vector.load %arg3[%c7_433, %c0_434, %c0_435] : memref<9x128x128xbf16, #tpu.memory_space<vmem>>, vector<1x128x128xbf16>
    %378 = vector.shape_cast %377 : vector<1x128x128xbf16> to vector<128x128xbf16>
    %cst_436 = arith.constant dense<0.000000e+00> : vector<256x128xf32>
    %379 = tpu.matmul %376, %378, %cst_436 {dimension_numbers = #tpu.dot_dimension_numbers<[1], [0], [0], [1], [0, 0, 1, 1], [], []>} : vector<256x128xbf16>, vector<128x128xbf16>, vector<256x128xf32> -> vector<256x128xf32>
    %c0_437 = arith.constant 0 : index
    %c0_438 = arith.constant 0 : index
    %380 = vector.load %arg14[%c0_437, %c0_438] : memref<256x128xf32, #tpu.memory_space<vmem>>, vector<256x128xf32>
    %381 = arith.addf %380, %379 : vector<256x128xf32>
    %c0_439 = arith.constant 0 : index
    %c0_440 = arith.constant 0 : index
    %382 = vector.load %arg14[%c0_439, %c0_440] : memref<256x128xf32, #tpu.memory_space<vmem>>, vector<256x128xf32>
    tpu.vector_store %arg14[%c0_439, %c0_440], %381 {strides = array<i32>} : memref<256x128xf32, #tpu.memory_space<vmem>>, vector<256x128xf32>,
    %c2_441 = arith.constant 2 : index
    %c2_442 = arith.constant 2 : index
    %c0_443 = arith.constant 0 : index
    %c0_444 = arith.constant 0 : index
    %383 = vector.load %arg12[%c2_441, %c2_442, %c0_443, %c0_444] : memref<3x18x16x128xbf16, #tpu.memory_space<vmem>>, vector<1x16x16x128xbf16>
    %384 = vector.shape_cast %383 : vector<1x16x16x128xbf16> to vector<256x128xbf16>
    %c8_445 = arith.constant 8 : index
    %c0_446 = arith.constant 0 : index
    %c0_447 = arith.constant 0 : index
    %385 = vector.load %arg3[%c8_445, %c0_446, %c0_447] : memref<9x128x128xbf16, #tpu.memory_space<vmem>>, vector<1x128x128xbf16>
    %386 = vector.shape_cast %385 : vector<1x128x128xbf16> to vector<128x128xbf16>
    %cst_448 = arith.constant dense<0.000000e+00> : vector<256x128xf32>
    %387 = tpu.matmul %384, %386, %cst_448 {dimension_numbers = #tpu.dot_dimension_numbers<[1], [0], [0], [1], [0, 0, 1, 1], [], []>} : vector<256x128xbf16>, vector<128x128xbf16>, vector<256x128xf32> -> vector<256x128xf32>
    %c0_449 = arith.constant 0 : index
    %c0_450 = arith.constant 0 : index
    %388 = vector.load %arg14[%c0_449, %c0_450] : memref<256x128xf32, #tpu.memory_space<vmem>>, vector<256x128xf32>
    %389 = arith.addf %388, %387 : vector<256x128xf32>
    %c0_451 = arith.constant 0 : index
    %c0_452 = arith.constant 0 : index
    %390 = vector.load %arg14[%c0_451, %c0_452] : memref<256x128xf32, #tpu.memory_space<vmem>>, vector<256x128xf32>
    tpu.vector_store %arg14[%c0_451, %c0_452], %389 {strides = array<i32>} : memref<256x128xf32, #tpu.memory_space<vmem>>, vector<256x128xf32>,
    %c0_453 = arith.constant 0 : index
    %c0_454 = arith.constant 0 : index
    %391 = vector.load %arg14[%c0_453, %c0_454] : memref<256x128xf32, #tpu.memory_space<vmem>>, vector<256x128xf32>
    %392 = vector.shape_cast %391 : vector<256x128xf32> to vector<1x256x128xf32>
    %cst_455 = arith.constant dense<0.000000e+00> : vector<1xf32>
    %393 = vector.multi_reduction <add>, %392, %cst_455 [1, 2] : vector<1x256x128xf32> to vector<1xf32>
    %394 = vector.shape_cast %393 : vector<1xf32> to vector<1x1x1xf32>
    %395 = vector.extract %394[0, 0, 0] : f32 from vector<1x1x1xf32>
    %cst_456 = arith.constant 4.8828125E-4 : f32
    %396 = arith.mulf %395, %cst_456 : f32
    %397 = vector.broadcast %396 : f32 to vector<256x128xf32>
    %398 = arith.subf %391, %397 : vector<256x128xf32>
    %399 = arith.mulf %398, %398 : vector<256x128xf32>
    %400 = vector.broadcast %16 : vector<1x128xf32> to vector<256x128xf32>
    %401 = arith.mulf %399, %400 : vector<256x128xf32>
    %402 = vector.shape_cast %401 : vector<256x128xf32> to vector<1x256x128xf32>
    %cst_457 = arith.constant dense<0.000000e+00> : vector<1xf32>
    %403 = vector.multi_reduction <add>, %402, %cst_457 [1, 2] : vector<1x256x128xf32> to vector<1xf32>
    %404 = vector.shape_cast %403 : vector<1xf32> to vector<1x1x1xf32>
    %405 = vector.extract %404[0, 0, 0] : f32 from vector<1x1x1xf32>
    %cst_458 = arith.constant 4.8828125E-4 : f32
    %406 = arith.mulf %405, %cst_458 : f32
    %cst_459 = arith.constant 9.99999974E-6 : f32
    %407 = arith.addf %406, %cst_459 : f32
    %408 = math.rsqrt %407 : f32
    %cst_460 = arith.constant 1.000000e+00 : f32
    %409 = vector.broadcast %cst_460 : f32 to vector<128xf32>
    %410 = arith.addf %409, %230 : vector<128xf32>
    %411 = arith.mulf %22, %410 : vector<128xf32>
    %412 = vector.broadcast %408 : f32 to vector<128xf32>
    %413 = arith.mulf %411, %412 : vector<128xf32>
    %cst_461 = arith.constant 1.000000e+00 : f32
    %414 = vector.broadcast %cst_461 : f32 to vector<128xf32>
    %415 = arith.addf %414, %230 : vector<128xf32>
    %416 = arith.mulf %24, %415 : vector<128xf32>
    %417 = arith.addf %416, %232 : vector<128xf32>
    %418 = vector.broadcast %396 : f32 to vector<128xf32>
    %419 = arith.mulf %418, %413 : vector<128xf32>
    %420 = arith.subf %417, %419 : vector<128xf32>
    %421 = vector.shape_cast %413 : vector<128xf32> to vector<1x128xf32>
    %422 = vector.broadcast %421 : vector<1x128xf32> to vector<256x128xf32>
    %423 = arith.mulf %391, %422 : vector<256x128xf32>
    %424 = vector.shape_cast %420 : vector<128xf32> to vector<1x128xf32>
    %425 = vector.broadcast %424 : vector<1x128xf32> to vector<256x128xf32>
    %426 = arith.addf %423, %425 : vector<256x128xf32>
    %cst_462 = arith.constant 0.000000e+00 : f32
    %427 = vector.broadcast %cst_462 : f32 to vector<256x128xf32>
    %428 = arith.maximumf %426, %427 : vector<256x128xf32>
    %429 = vector.extract_strided_slice %428 {offsets = [0, 0], sizes = [256, 8], strides = [1, 1]} : vector<256x128xf32> to vector<256x8xf32>
    %c1_463 = arith.constant 1 : index
    %c0_464 = arith.constant 0 : index
    %c0_465 = arith.constant 0 : index
    %430 = vector.load %arg10[%c1_463, %c0_464, %c0_465] : memref<2x256x8xf32, #tpu.memory_space<vmem>>, vector<1x256x8xf32>
    %431 = vector.shape_cast %430 : vector<1x256x8xf32> to vector<256x8xf32>
    %432 = vector.shape_cast %429 : vector<256x8xf32> to vector<1x256x8xf32>
    tpu.vector_store %arg10[%c1_463, %c0_464, %c0_465], %432 {strides = array<i32>} : memref<2x256x8xf32, #tpu.memory_space<vmem>>, vector<1x256x8xf32>,
    return
  }
  func.func @transform_0(%arg0: i32) -> (i32, i32, i32, i32) {
    %c0_i32 = arith.constant 0 : i32
    %c0_i32_0 = arith.constant 0 : i32
    %c0_i32_1 = arith.constant 0 : i32
    %c0_i32_2 = arith.constant 0 : i32
    return %arg0, %c0_i32, %c0_i32_0, %c0_i32_1 : i32, i32, i32, i32
  }
  func.func @transform_1(%arg0: i32) -> (i32, i32) {
    %c0_i32 = arith.constant 0 : i32
    %c0_i32_0 = arith.constant 0 : i32
    %c0_i32_1 = arith.constant 0 : i32
    return %c0_i32, %c0_i32_0 : i32, i32
  }
  func.func @transform_2(%arg0: i32) -> (i32, i32, i32) {
    %c0_i32 = arith.constant 0 : i32
    %c0_i32_0 = arith.constant 0 : i32
    %c0_i32_1 = arith.constant 0 : i32
    %c0_i32_2 = arith.constant 0 : i32
    return %c0_i32, %c0_i32_0, %c0_i32_1 : i32, i32, i32
  }
  func.func @transform_3(%arg0: i32) -> (i32, i32) {
    %c0_i32 = arith.constant 0 : i32
    %c0_i32_0 = arith.constant 0 : i32
    %c0_i32_1 = arith.constant 0 : i32
    return %c0_i32, %c0_i32_0 : i32, i32
  }
  func.func @transform_4(%arg0: i32) -> (i32, i32) {
    %c0_i32 = arith.constant 0 : i32
    %c0_i32_0 = arith.constant 0 : i32
    %c0_i32_1 = arith.constant 0 : i32
    return %c0_i32, %c0_i32_0 : i32, i32
  }
  func.func @transform_5(%arg0: i32) -> (i32, i32) {
    %c0_i32 = arith.constant 0 : i32
    %c0_i32_0 = arith.constant 0 : i32
    %c0_i32_1 = arith.constant 0 : i32
    return %c0_i32, %c0_i32_0 : i32, i32
  }
  func.func @transform_6(%arg0: i32) -> (i32, i32) {
    %c0_i32 = arith.constant 0 : i32
    %c0_i32_0 = arith.constant 0 : i32
    %c0_i32_1 = arith.constant 0 : i32
    return %c0_i32, %c0_i32_0 : i32, i32
  }
  func.func @transform_7(%arg0: i32) -> (i32, i32, i32) {
    %c0_i32 = arith.constant 0 : i32
    %c0_i32_0 = arith.constant 0 : i32
    %c0_i32_1 = arith.constant 0 : i32
    return %arg0, %c0_i32, %c0_i32_0 : i32, i32, i32
  }
  func.func @transform_8(%arg0: i32) -> (i32, i32, i32) {
    %c0_i32 = arith.constant 0 : i32
    %c0_i32_0 = arith.constant 0 : i32
    %c0_i32_1 = arith.constant 0 : i32
    return %arg0, %c0_i32, %c0_i32_0 : i32, i32, i32
  }
  func.func @transform_9(%arg0: i32) -> (i32, i32, i32) {
    %c0_i32 = arith.constant 0 : i32
    %c0_i32_0 = arith.constant 0 : i32
    %c0_i32_1 = arith.constant 0 : i32
    return %arg0, %c0_i32, %c0_i32_0 : i32, i32, i32
  }
}

</mosaic_0001>

<bundles_post_ra>
// kernel: tpu_custom_call.1
= control target key start
LH: loop header
LB: loop body
LE: loop exit
PB: predicated region body
PF: predicated region fallthrough
CT: control target
= control target key end

     0   :  { %vm18138_vm0 = vcmask 31744   ;;  %vm99_vm1 = vcmask 31751   ;;  %v13619_v0 = vmov 0   ;;  %vm100_vm2 = vsmask.f32 7966  ;;  %s13620_s23 = smov 4   ;;  %s18121_s0 = inlined_call_operand.vmem [shape: f32[2,16,16,4], index: 0, kind: input, shape index: {}]   ;;  %s18122_s1 = inlined_call_operand.vmem [shape: bf16[36,128], index: 1, kind: input, shape index: {}]   ;;  %s18123_s2 = inlined_call_operand.vmem [shape: bf16[9,128,128], index: 2, kind: input, shape index: {}]   ;;  %s18124_s7 = inlined_call_operand.vmem [shape: f32[2,1,128], index: 7, kind: input, shape index: {}]   ;;  %s18125_s3 = inlined_call_operand.vmem [shape: f32[1,128], index: 3, kind: input, shape index: {}]   ;;  %s18126_s4 = inlined_call_operand.vmem [shape: f32[1,128], index: 4, kind: input, shape index: {}]   ;;  %s18127_s8 = inlined_call_operand.vmem [shape: f32[2,1,128], index: 8, kind: input, shape index: {}]   ;;  %s18128_s5 = inlined_call_operand.vmem [shape: f32[1,128], index: 5, kind: input, shape index: {}]   ;;  %s18129_s6 = inlined_call_operand.vmem [shape: f32[1,128], index: 6, kind: input, shape index: {}]   ;;  %s18130_s9 = inlined_call_operand.vmem [shape: f32[2,256,8], index: 9, kind: output, shape index: {}]  }
   0x1   :  { %35 = vst.msk [vmem:[#allocation2 + $0x90] sm:$0xff] %vm18138_vm0, %v13619_v0  ;;  %34 = vst.msk [vmem:[#allocation2] sm:$0xff] %vm18138_vm0, %v13619_v0  ;;  %v287_v1 = vld [vmem:[%s18121_s0] sm:$0xff]  ;;  %v288_v2 = vld [vmem:[%s18121_s0 + $0x8] sm:$0xff]  ;;  %vm41_vm3 = vcmask 24576   ;;  %s13621_s17 = smov 16  }
   0x2   :  { %36 = vst.msk [vmem:[#allocation2 + $0x120] sm:$0xff] %vm18138_vm0, %v13619_v0  ;;  %38 = vst.msk [vmem:[#allocation2 + $0x88] sm:$0xff] %vm18138_vm0, %v13619_v0  ;;  %v289_v3 = vld [vmem:[%s18121_s0 + $0x10] sm:$0xff]  ;;  %v319_v4 = vpack.c.bf16 %v288_v2, %v287_v1  ;;  %v290_v5 = vld [vmem:[%s18121_s0 + $0x18] sm:$0xff]  ;;  %vm42_vm4 = vsmask.f32 256 }
   0x3   :  { %39 = vst.msk [vmem:[#allocation2 + $0x118] sm:$0xff] %vm18138_vm0, %v13619_v0  ;;  %40 = vst.msk [vmem:[#allocation2 + $0x1a8] sm:$0xff] %vm18138_vm0, %v13619_v0  ;;  %v11196_v6 = vld [vmem:[%s18121_s0 + $0x100] sm:$0xff]  ;;  %v11197_v7 = vld [vmem:[%s18121_s0 + $0x108] sm:$0xff]  ;;  %v13703_v8 = vpack.c.bf16 %v290_v5, %v289_v3  ;;  %vm482_vm6 = vsmask.f32 7938 }
   0x4   :  { %156 = vst [vmem:[#allocation3] sm:$0xff] %v13619_v0  ;;  %157 = vst [vmem:[#allocation3 + $0x90] sm:$0xff] %v13619_v0  ;;  %v13705_v9 = vpack.c.bf16 %v11197_v7, %v11196_v6  ;;  %v47_v11 = vld [vmem:[#allocation2 + $0x8] sm:$0x1]  ;;  %v105_v12 = vld [vmem:[#allocation2 + $0x128] sm:$0x80] }
   0x5   :  { %158 = vst [vmem:[#allocation3 + $0x120] sm:$0xff] %v13619_v0  ;;  %160 = vst [vmem:[#allocation3 + $0x88] sm:$0xff] %v13619_v0  ;;  %v353_v13 = vshrl.u32 %v319_v4, 16  ;;  %v356_v14 = vshll.u32 %v319_v4, 16  ;;  %vm18139_vm8 = vsmask.f32 7424 }
   0x6   :  { %162 = vst [vmem:[#allocation3 + $0x1a8] sm:$0xff] %v13619_v0  ;;  %vm13709_vm5 = vmand %vm99_vm1, %vm100_vm2  ;;  %v360_v17 = vshrl.u32 %v13703_v8, 16  ;;  %v363_v18 = vshll.u32 %v13703_v8, 16  ;;  %v5716_v19 = vshrl.u32 %v13705_v9, 16  ;;  %v5719_v20 = vshll.u32 %v13705_v9, 16  ;;  %v291_v32 = vld [vmem:[%s18121_s0 + $0x20] sm:$0xff] }
   0x7   :  { %336 = vst.msk [vmem:[#allocation2 + $0x98] sm:$0xff] %vm18138_vm0, %v319_v4  ;;  %vm13716_vm7 = vmand %vm41_vm3, %vm42_vm4  ;;  %v106_v16 = vsel %vm13709_vm5, 0, %v105_v12  ;;  %v50_v21 = vld [vmem:[#allocation2 + $0x10] sm:$0x1]  ;;  %v355_v23 = vrot.slane %v353_v13, 7  ;;  %v532_v25 = vrot.slane %v356_v14, 1 }
   0x8   :  { %337 = vst.msk [vmem:[#allocation2 + $0xa0] sm:$0xff] %vm18138_vm0, %v13703_v8  ;;  %107 = vst [vmem:[#allocation2 + $0x128] sm:$0x80] %v106_v16  ;;  %v48_v22 = vsel %vm13716_vm7, 0, %v47_v11  ;;  %v51_v26 = vsel %vm13716_vm7, 0, %v50_v21  ;;  %v362_v27 = vrot.slane %v360_v17, 7 }
   0x9   :  { %vm13732_vm9 = vmand %vm18138_vm0, %vm482_vm6  ;;  %v534_v28 = vrot.slane %v363_v18, 1  ;;  %49 = vst [vmem:[#allocation2 + $0x8] sm:$0x1] %v48_v22  ;;  %v5891_v30 = vrot.slane %v5719_v20, 1  ;;  %v108_v31 = vld [vmem:[#allocation2 + $0x130] sm:$0x80]  ;;  %v533_v38 = vor.u32 %v532_v25, %v353_v13  ;;  %v358_v50 = vor.u32 %v356_v14, %v355_v23 }
   0xa   :  { %vm13740_vm10 = vmand %vm18138_vm0, %vm18139_vm8  ;;  %52 = vst [vmem:[#allocation2 + $0x10] sm:$0x1] %v51_v26  ;;  %v664_v33 = vld [vmem:[#allocation2 + $0x90] sm:$0xff]  ;;  %v102_v34 = vld [vmem:[#allocation2 + $0x120] sm:$0x80]  ;;  %v109_v35 = vsel %vm13709_vm5, 0, %v108_v31  ;;  %v365_v51 = vor.u32 %v363_v18, %v362_v27 }
   0xb   :  { %v53_v36 = vld [vmem:[#allocation2 + $0x18] sm:$0x1]  ;;  %696 = vrot.lane.b32.xlu0 %v664_v33, %s13620_s23  ;;  %v103_v37 = vsel %vm13709_vm5, 0, %v102_v34  ;;  %110 = vst [vmem:[#allocation2 + $0x130] sm:$0x80] %v109_v35  ;;  %v292_v39 = vld [vmem:[%s18121_s0 + $0x28] sm:$0xff]  ;;  %v5892_v42 = vor.u32 %v5891_v30, %v5716_v19  ;;  %v535_v58 = vor.u32 %v534_v28, %v360_v17 }
   0xc   :  { %v111_v40 = vld [vmem:[#allocation2 + $0x138] sm:$0x80]  ;;  %v11198_v41 = vld [vmem:[%s18121_s0 + $0x110] sm:$0xff]  ;;  %104 = vst [vmem:[#allocation2 + $0x120] sm:$0x80] %v103_v37  ;;  %v54_v43 = vsel %vm13716_vm7, 0, %v53_v36  ;;  %v321_v44 = vpack.c.bf16 %v292_v39, %v291_v32 }
   0xd   :  { %v112_v45 = vsel %vm13709_vm5, 0, %v111_v40  ;;  %v11199_v46 = vld [vmem:[%s18121_s0 + $0x118] sm:$0xff]  ;;  %v11200_v47 = vld [vmem:[%s18121_s0 + $0x120] sm:$0xff]  ;;  %v11201_v48 = vld [vmem:[%s18121_s0 + $0x128] sm:$0xff]  ;;  %55 = vst [vmem:[#allocation2 + $0x18] sm:$0x1] %v54_v43 }
   0xe   :  { %v665_v49 = vld [vmem:[#allocation2 + $0x98] sm:$0xff]  ;;  %113 = vst [vmem:[#allocation2 + $0x138] sm:$0x80] %v112_v45  ;;  %v13775_v52 = vpack.c.bf16 %v11199_v46, %v11198_v41  ;;  %v13777_v53 = vpack.c.bf16 %v11201_v48, %v11200_v47  ;;  %v56_v54 = vld [vmem:[#allocation2 + $0x20] sm:$0x1]  ;;  %v293_v55 = vld [vmem:[%s18121_s0 + $0x30] sm:$0xff] }
   0xf   :  { %v13782_v56 = vld [vmem:[#allocation2 + $0xa0] sm:$0xff]  ;;  %5699 = vst.msk [vmem:[#allocation2 + $0x98] sm:$0xff] %vm18138_vm0, %v13705_v9  ;;  %v583_v57 = vld [vmem:[#allocation2 + $0x128] sm:$0xff]  ;;  %v367_v59 = vshrl.u32 %v321_v44, 16  ;;  %v370_v60 = vshll.u32 %v321_v44, 16  ;;  %338 = vst.msk [vmem:[#allocation2 + $0xa8] sm:$0xff] %vm18138_vm0, %v321_v44  ;;  %698 = vrot.lane.b32.xlu0 %v665_v49, %s13620_s23 }
  0x10   :  { %v57_v61 = vsel %vm13716_vm7, 0, %v56_v54  ;;  %v294_v62 = vld [vmem:[%s18121_s0 + $0x38] sm:$0xff]  ;;  %989 = vrot.lane.b32.xlu1 %v13782_v56, %s13621_s17  ;;  %v13797_v63 = vsel %vm13740_vm10, %v533_v38, %v583_v57  ;;  %5700 = vst.msk [vmem:[#allocation2 + $0xa0] sm:$0xff] %vm18138_vm0, %v13775_v52  ;;  %v5726_v0 = vshll.u32 %v13775_v52, 16  ;;  %v5723_v1 = vshrl.u32 %v13775_v52, 16  ;;  %v484_v3 = vld [vmem:[#allocation2 + $0x8] sm:$0xff] }
  0x11   :  { %v5733_v2 = vshll.u32 %v13777_v53, 16  ;;  %58 = vst [vmem:[#allocation2 + $0x20] sm:$0x1] %v57_v61  ;;  %v5940_v4 = vsel %vm13740_vm10, %v5892_v42, %v13797_v63  ;;  %v487_v5 = vld [vmem:[#allocation2 + $0x10] sm:$0xff]  ;;  %v369_v6 = vrot.slane %v367_v59, 7  ;;  %v536_v7 = vrot.slane %v370_v60, 1 }
  0x12   :  { %v322_v8 = vpack.c.bf16 %v294_v62, %v293_v55  ;;  %v114_v11 = vld [vmem:[#allocation2 + $0x140] sm:$0x80]  ;;  %v13809_v12 = vsel %vm13732_vm9, %v358_v50, %v484_v3  ;;  %5941 = vst [vmem:[#allocation2 + $0x128] sm:$0xff] %v5940_v4  ;;  %v13813_v13 = vsel %vm13732_vm9, %v365_v51, %v487_v5  ;;  %v5893_v14 = vrot.slane %v5726_v0, 1  ;;  %v59_v17 = vld [vmem:[#allocation2 + $0x28] sm:$0x1] }
  0x13   :  { %v5730_v16 = vshrl.u32 %v13777_v53, 16  ;;  %v295_v18 = vld [vmem:[%s18121_s0 + $0x40] sm:$0xff]  ;;  %v296_v21 = vld [vmem:[%s18121_s0 + $0x48] sm:$0xff]  ;;  %v586_v22 = vld [vmem:[#allocation2 + $0x130] sm:$0xff]  ;;  %v372_v23 = vor.u32 %v370_v60, %v369_v6  ;;  %v537_v25 = vor.u32 %v536_v7, %v367_v59  ;;  %648 = vst.msk [vmem:[#allocation4 + $0x8] sm:$0xff] %vm18138_vm0, %v13809_v12  ;;  %987 = vrot.lane.b32.xlu0 %v665_v49, %s13621_s17  ;;  %v5895_v34 = vrot.slane %v5733_v2, 1 }
  0x14   :  { %v374_v26 = vshrl.u32 %v322_v8, 16  ;;  %v377_v27 = vshll.u32 %v322_v8, 16  ;;  %339 = vst.msk [vmem:[#allocation2 + $0xb0] sm:$0xff] %vm18138_vm0, %v322_v8  ;;  %v117_v28 = vld [vmem:[#allocation2 + $0x148] sm:$0x80]  ;;  %v11202_v30 = vld [vmem:[%s18121_s0 + $0x130] sm:$0xff]  ;;  %v13835_v32 = vsel %vm13740_vm10, %v535_v58, %v586_v22  ;;  %v5894_v33 = vor.u32 %v5893_v14, %v5723_v1 }
  0x15   :  { %649 = vst.msk [vmem:[#allocation4 + $0x10] sm:$0xff] %vm18138_vm0, %v13813_v13  ;;  %v761_v31 = vld [vmem:[#allocation2 + $0x120] sm:$0xff]  ;;  %v115_v35 = vsel %vm13709_vm5, 0, %v114_v11  ;;  %v11203_v36 = vld [vmem:[%s18121_s0 + $0x138] sm:$0xff]  ;;  %s13622_s29 = smov 8   ;;  %v60_v42 = vsel %vm13716_vm7, 0, %v59_v17  ;;  %v323_v43 = vpack.c.bf16 %v296_v21, %v295_v18  ;;  %v5896_v49 = vor.u32 %v5895_v34, %v5730_v16 }
  0x16   :  { %v11204_v37 = vld [vmem:[%s18121_s0 + $0x140] sm:$0xff]  ;;  %793 = vrot.lane.b32.xlu1 %v761_v31, %s13622_s29  ;;  %v490_v38 = vld [vmem:[#allocation2 + $0x18] sm:$0xff]  ;;  %v376_v40 = vrot.slane %v374_v26, 7  ;;  %116 = vst [vmem:[#allocation2 + $0x140] sm:$0x80] %v115_v35  ;;  %v538_v41 = vrot.slane %v377_v27, 1  ;;  %v5943_v48 = vsel %vm13740_vm10, %v5894_v33, %v13835_v32  ;;  %v13888_v3 = vpack.c.bf16 %v11203_v36, %v11202_v30 }
  0x17   :  { %v589_v39 = vld [vmem:[#allocation2 + $0x138] sm:$0xff]  ;;  %v11205_v44 = vld [vmem:[%s18121_s0 + $0x148] sm:$0xff]  ;;  %v13857_v45 = vsel %vm13732_vm9, %v372_v23, %v490_v38  ;;  %61 = vst [vmem:[#allocation2 + $0x28] sm:$0x1] %v60_v42  ;;  %v62_v50 = vld [vmem:[#allocation2 + $0x30] sm:$0x1] }
  0x18   :  { %v13859_v46 = vld [vmem:[#allocation2 + $0xa8] sm:$0xff]  ;;  %v13863_v47 = vsel %vm13740_vm10, %v537_v25, %v589_v39  ;;  %5944 = vst [vmem:[#allocation2 + $0x130] sm:$0xff] %v5943_v48  ;;  %v379_v51 = vor.u32 %v377_v27, %v376_v40  ;;  %v493_v54 = vld [vmem:[#allocation2 + $0x20] sm:$0xff]  ;;  %v539_v55 = vor.u32 %v538_v41, %v374_v26  ;;  %v381_v57 = vshrl.u32 %v323_v43, 16  ;;  %340 = vst.msk [vmem:[#allocation2 + $0xb8] sm:$0xff] %vm18138_vm0, %v323_v43  ;;  %s13623_s15 = smov 12  }
  0x19   :  { %5701 = vst.msk [vmem:[#allocation2 + $0xa8] sm:$0xff] %vm18138_vm0, %v13777_v53  ;;  %v384_v58 = vshll.u32 %v323_v43, 16  ;;  %v297_v59 = vld [vmem:[%s18121_s0 + $0x50] sm:$0xff]  ;;  %v298_v60 = vld [vmem:[%s18121_s0 + $0x58] sm:$0xff]  ;;  %650 = vst.msk [vmem:[#allocation4 + $0x18] sm:$0xff] %vm18138_vm0, %v13857_v45  ;;  %890 = vrot.lane.b32.xlu0 %v13809_v12, %s13623_s15  ;;  %v5946_v61 = vsel %vm13740_vm10, %v5896_v49, %v13863_v47  ;;  %v118_v62 = vsel %vm13709_vm5, 0, %v117_v28  ;;  %v13890_v4 = vpack.c.bf16 %v11205_v44, %v11204_v37 }
  0x1a   :  { %v120_v5 = vld [vmem:[#allocation2 + $0x150] sm:$0x80]  ;;  %v65_v6 = vld [vmem:[#allocation2 + $0x38] sm:$0x1]  ;;  %795 = vrot.lane.b32.xlu1 %v13797_v63, %s13622_s29  ;;  %v13896_v7 = vsel %vm13732_vm9, %v379_v51, %v493_v54  ;;  %5947 = vst [vmem:[#allocation2 + $0x138] sm:$0xff] %v5946_v61  ;;  %v383_v8 = vrot.slane %v381_v57, 7  ;;  %v13912_v26 = vpack.c.bf16 %v298_v60, %v297_v59 }
  0x1b   :  { %119 = vst [vmem:[#allocation2 + $0x148] sm:$0x80] %v118_v62  ;;  %v540_v11 = vrot.slane %v384_v58, 1  ;;  %v63_v14 = vsel %vm13716_vm7, 0, %v62_v50  ;;  %v299_v17 = vld [vmem:[%s18121_s0 + $0x60] sm:$0xff]  ;;  %v300_v18 = vld [vmem:[%s18121_s0 + $0x68] sm:$0xff] }
  0x1c   :  { %495 = vst [vmem:[#allocation2 + $0x20] sm:$0xff] %v13896_v7  ;;  %v13907_v21 = vld [vmem:[#allocation2 + $0xb0] sm:$0xff]  ;;  %v5740_v22 = vshll.u32 %v13888_v3, 16  ;;  %v5737_v23 = vshrl.u32 %v13888_v3, 16  ;;  %v5747_v25 = vshll.u32 %v13890_v4, 16  ;;  %v386_v28 = vor.u32 %v384_v58, %v383_v8  ;;  %v11207_v35 = vld [vmem:[%s18121_s0 + $0x158] sm:$0xff] }
  0x1d   :  { %64 = vst [vmem:[#allocation2 + $0x30] sm:$0x1] %v63_v14  ;;  %v123_v27 = vld [vmem:[#allocation2 + $0x158] sm:$0x80]  ;;  %v541_v30 = vor.u32 %v540_v11, %v381_v57  ;;  %5702 = vst.msk [vmem:[#allocation2 + $0xb0] sm:$0xff] %vm18138_vm0, %v13888_v3  ;;  %v5744_v31 = vshrl.u32 %v13890_v4, 16  ;;  %v325_v44 = vpack.c.bf16 %v300_v18, %v299_v17 }
  0x1e   :  { %v121_v33 = vsel %vm13709_vm5, 0, %v120_v5  ;;  %v11206_v34 = vld [vmem:[%s18121_s0 + $0x150] sm:$0xff]  ;;  %s13624_s26 = smov 20   ;;  %v592_v36 = vld [vmem:[#allocation2 + $0x140] sm:$0xff]  ;;  %v5897_v37 = vrot.slane %v5740_v22, 1  ;;  %v388_v38 = vshrl.u32 %v13912_v26, 16  ;;  %892 = vrot.lane.b32.xlu1 %v13813_v13, %s13623_s15 }
  0x1f   :  { %1084 = vrot.lane.b32.xlu0 %v13797_v63, %s13624_s26  ;;  %v391_v39 = vshll.u32 %v13912_v26, 16  ;;  %341 = vst.msk [vmem:[#allocation2 + $0xc0] sm:$0xff] %vm18138_vm0, %v13912_v26  ;;  %v5899_v40 = vrot.slane %v5747_v25, 1  ;;  %122 = vst [vmem:[#allocation2 + $0x150] sm:$0x80] %v121_v33  ;;  %v11208_v41 = vld [vmem:[%s18121_s0 + $0x160] sm:$0xff]  ;;  %v13942_v63 = vsel %vm13740_vm10, %v539_v55, %v592_v36  ;;  %v13965_v62 = vpack.c.bf16 %v11207_v35, %v11206_v34 }
  0x20   :  { %v496_v42 = vld [vmem:[#allocation2 + $0x28] sm:$0xff]  ;;  %v66_v43 = vsel %vm13716_vm7, 0, %v65_v6  ;;  %v124_v48 = vsel %vm13709_vm5, 0, %v123_v27  ;;  %v68_v50 = vld [vmem:[#allocation2 + $0x40] sm:$0x1]  ;;  %v13955_v54 = vld [vmem:[#allocation2 + $0xb8] sm:$0xff]  ;;  %v5898_v55 = vor.u32 %v5897_v37, %v5737_v23 }
  0x21   :  { %v11209_v49 = vld [vmem:[%s18121_s0 + $0x168] sm:$0xff]  ;;  %v13953_v51 = vsel %vm13732_vm9, %v386_v28, %v496_v42  ;;  %v390_v57 = vrot.slane %v388_v38, 7  ;;  %v5900_v58 = vor.u32 %v5899_v40, %v5744_v31  ;;  %67 = vst [vmem:[#allocation2 + $0x38] sm:$0x1] %v66_v43  ;;  %125 = vst [vmem:[#allocation2 + $0x158] sm:$0x80] %v124_v48 }
  0x22   :  { %498 = vst [vmem:[#allocation2 + $0x28] sm:$0xff] %v13953_v51  ;;  %5703 = vst.msk [vmem:[#allocation2 + $0xb8] sm:$0xff] %vm18138_vm0, %v13890_v4  ;;  %v542_v59 = vrot.slane %v391_v39, 1  ;;  %v395_v60 = vshrl.u32 %v325_v44, 16  ;;  %v398_v61 = vshll.u32 %v325_v44, 16  ;;  %v301_v5 = vld [vmem:[%s18121_s0 + $0x70] sm:$0xff]  ;;  %v5949_v8 = vsel %vm13740_vm10, %v5898_v55, %v13942_v63  ;;  %1086 = vrot.lane.b32.xlu1 %v13835_v32, %s13624_s26 }
  0x23   :  { %342 = vst.msk [vmem:[#allocation2 + $0xc8] sm:$0xff] %vm18138_vm0, %v325_v44  ;;  %652 = vst.msk [vmem:[#allocation4 + $0x28] sm:$0xff] %vm18138_vm0, %v13953_v51  ;;  %s13625_s13 = smov 24   ;;  %v595_v6 = vld [vmem:[#allocation2 + $0x148] sm:$0xff]  ;;  %v393_v11 = vor.u32 %v391_v39, %v390_v57  ;;  %v13977_v14 = vpack.c.bf16 %v11209_v49, %v11208_v41  ;;  %v69_v17 = vsel %vm13716_vm7, 0, %v68_v50  ;;  %v302_v18 = vld [vmem:[%s18121_s0 + $0x78] sm:$0xff] }
  0x24   :  { %1182 = vrot.lane.b32.xlu0 %v13813_v13, %s13625_s13  ;;  %v44_v26 = vld [vmem:[#allocation2] sm:$0x1]  ;;  %v13988_v27 = vsel %vm13740_vm10, %v541_v30, %v595_v6  ;;  %5950 = vst [vmem:[#allocation2 + $0x140] sm:$0xff] %v5949_v8  ;;  %v499_v28 = vld [vmem:[#allocation2 + $0x30] sm:$0xff]  ;;  %v397_v33 = vrot.slane %v395_v60, 7  ;;  %v544_v34 = vrot.slane %v398_v61, 1  ;;  %v543_v40 = vor.u32 %v542_v59, %v388_v38 }
  0x25   :  { %70 = vst [vmem:[#allocation2 + $0x40] sm:$0x1] %v69_v17  ;;  %v126_v35 = vld [vmem:[#allocation2 + $0x160] sm:$0x80]  ;;  %v5718_v36 = vrot.slane %v5716_v19, 7  ;;  %v13994_v37 = vsel %vm13732_vm9, %v393_v11, %v499_v28  ;;  %v5952_v39 = vsel %vm13740_vm10, %v5900_v58, %v13988_v27  ;;  %v5754_v30 = vshll.u32 %v13965_v62, 16 }
  0x26   :  { %v71_v41 = vld [vmem:[#allocation2 + $0x48] sm:$0x1]  ;;  %501 = vst [vmem:[#allocation2 + $0x30] sm:$0xff] %v13994_v37  ;;  %5953 = vst [vmem:[#allocation2 + $0x148] sm:$0xff] %v5952_v39  ;;  %v14001_v42 = vld [vmem:[#allocation2 + $0xc0] sm:$0xff]  ;;  %v400_v44 = vor.u32 %v398_v61, %v397_v33  ;;  %v5751_v19 = vshrl.u32 %v13965_v62, 16  ;;  %v326_v49 = vpack.c.bf16 %v302_v18, %v301_v5  ;;  %v545_v57 = vor.u32 %v544_v34, %v395_v60 }
  0x27   :  { %v598_v43 = vld [vmem:[#allocation2 + $0x150] sm:$0xff]  ;;  %v18133_v48 = vshll.u32 %v13977_v14, 16  ;;  %v303_v50 = vld [vmem:[%s18121_s0 + $0x80] sm:$0xff]  ;;  %v304_v38 = vld [vmem:[%s18121_s0 + $0x88] sm:$0xff]  ;;  %s13626_s25 = smov 28   ;;  %5704 = vst.msk [vmem:[#allocation2 + $0xc0] sm:$0xff] %vm18138_vm0, %v13965_v62  ;;  %1184 = vrot.lane.b32.xlu1 %v13857_v45, %s13625_s13 }
  0x28   :  { %v13437_v55 = vld [vmem:[%s18122_s1] sm:$0xff]   ;;  %1280 = vrot.lane.b32.xlu0 %v13782_v56, %s13626_s25  ;;  %v5901_v58 = vrot.slane %v5754_v30, 1  ;;  %v18135_v59 = vshrl.u32 %v13977_v14, 16  ;;  %v45_v61 = vsel %vm13716_vm7, 0, %v44_v26  ;;  %v129_v5 = vld [vmem:[#allocation2 + $0x168] sm:$0x80]  ;;  %v14035_v28 = vsel %vm13740_vm10, %v543_v40, %v598_v43 }
  0x29   :  { %v13438_v6 = vld [vmem:[%s18122_s1 + $0x8] sm:$0xff]   ;;  %v502_v60 = vld [vmem:[#allocation2 + $0x38] sm:$0xff]  ;;  %v402_v11 = vshrl.u32 %v326_v49, 16  ;;  %v405_v17 = vshll.u32 %v326_v49, 16  ;;  %343 = vst.msk [vmem:[#allocation2 + $0xd0] sm:$0xff] %vm18138_vm0, %v326_v49  ;;  %v5903_v18 = vrot.slane %v18133_v48, 1  ;;  %11949 = vmatprep.subr.bf16.mxu1 %v13437_v55  ;;  %v5721_v49 = vor.u32 %v5719_v20, %v5718_v36 }
  0x2a   :  { %v601_v8 = vld [vmem:[#allocation2 + $0x158] sm:$0xff]  ;;  %46 = vst [vmem:[#allocation2] sm:$0x1] %v45_v61  ;;  %v127_v26 = vsel %vm13709_vm5, 0, %v126_v35  ;;  %v14039_v33 = vsel %vm13732_vm9, %v400_v44, %v502_v60  ;;  %v14041_v34 = vld [vmem:[#allocation2 + $0xc8] sm:$0xff]  ;;  %v5902_v39 = vor.u32 %v5901_v58, %v5751_v19  ;;  %v11210_v35 = vld [vmem:[%s18121_s0 + $0x170] sm:$0xff]  ;;  %11950 = vmatpush3.bf16.msra.mxu1 %v13437_v55  ;;  %v327_v61 = vpack.c.bf16 %v304_v38, %v303_v50 }
  0x2b   :  { %128 = vst [vmem:[#allocation2 + $0x160] sm:$0x80] %v127_v26  ;;  %504 = vst [vmem:[#allocation2 + $0x38] sm:$0xff] %v14039_v33  ;;  %v404_v40 = vrot.slane %v402_v11, 7  ;;  %v5904_v43 = vor.u32 %v5903_v18, %v18135_v59  ;;  %v546_v44 = vrot.slane %v405_v17, 1  ;;  %v72_v58 = vsel %vm13716_vm7, 0, %v71_v41  ;;  %11951 = vmatprep.subr.bf16.mxu1 %v13438_v6  ;;  %1282 = vrot.lane.b32.xlu1 %v13859_v46, %s13626_s25 }
  0x2c   :  { %5705 = vst.msk [vmem:[#allocation2 + $0xc8] sm:$0xff] %vm18138_vm0, %v13977_v14  ;;  %v11211_v9 = vld [vmem:[%s18121_s0 + $0x178] sm:$0xff]  ;;  %s13627_s14 = smov 32   ;;  %v14064_v20 = vsel %vm13740_vm10, %v545_v57, %v601_v8  ;;  %v5955_v36 = vsel %vm13740_vm10, %v5902_v39, %v14035_v28  ;;  %v505_v55 = vld [vmem:[#allocation2 + $0x40] sm:$0xff]  ;;  %v5844_v41 = vsel %vm13732_vm9, %v5721_v49, %v13809_v12  ;;  %73 = vst [vmem:[#allocation2 + $0x48] sm:$0x1] %v72_v58 }
  0x2d   :  { %1378 = vrot.lane.b32.xlu0 %v13835_v32, %s13627_s14  ;;  %5956 = vst [vmem:[#allocation2 + $0x150] sm:$0xff] %v5955_v36  ;;  %v407_v60 = vor.u32 %v405_v17, %v404_v40  ;;  %v5958_v57 = vsel %vm13740_vm10, %v5904_v43, %v14064_v20  ;;  %5845 = vst [vmem:[#allocation2 + $0x8] sm:$0xff] %v5844_v41  ;;  %v130_v8 = vsel %vm13709_vm5, 0, %v129_v5  ;;  %v11212_v18 = vld [vmem:[%s18121_s0 + $0x180] sm:$0xff]  ;;  %v11213_v12 = vld [vmem:[%s18121_s0 + $0x188] sm:$0xff]  ;;  %v409_v17 = vshrl.u32 %v327_v61, 16 }
  0x2e   :  { %v74_v50 = vld [vmem:[#allocation2 + $0x50] sm:$0x1]  ;;  %5959 = vst [vmem:[#allocation2 + $0x158] sm:$0xff] %v5958_v57  ;;  %v547_v38 = vor.u32 %v546_v44, %v402_v11  ;;  %v412_v26 = vshll.u32 %v327_v61, 16  ;;  %344 = vst.msk [vmem:[#allocation2 + $0xd8] sm:$0xff] %vm18138_vm0, %v327_v61  ;;  %v14086_v39 = vpack.c.bf16 %v11211_v9, %v11210_v35  ;;  %v306_v49 = vld [vmem:[%s18121_s0 + $0x98] sm:$0xff]  ;;  %11952 = vmatpush3.bf16.msra.mxu1 %v13438_v6 }
  0x2f   :  { %131 = vst [vmem:[#allocation2 + $0x168] sm:$0x80] %v130_v8  ;;  %v305_v5 = vld [vmem:[%s18121_s0 + $0x90] sm:$0xff]  ;;  %v14096_v40 = vsel %vm13732_vm9, %v407_v60, %v505_v55  ;;  %v411_v44 = vrot.slane %v409_v17, 7  ;;  %700 = vrot.lane.b32.xlu1 %v13782_v56, %s13620_s23  ;;  %v14109_v36 = vpack.c.bf16 %v11213_v12, %v11212_v18  ;;  %v75_v55 = vsel %vm13716_vm7, 0, %v74_v50  ;;  %v5855_v3 = vld [vmem:[#allocation2 + $0x28] sm:$0xff] }
  0x30   :  { %v132_v11 = vld [vmem:[#allocation2 + $0x170] sm:$0x80]  ;;  %507 = vst [vmem:[#allocation2 + $0x40] sm:$0xff] %v14096_v40  ;;  %v548_v58 = vrot.slane %v412_v26, 1  ;;  %v18131_v9 = vshll.u32 %v14086_v39, 16  ;;  %v14113_v41 = vpack.c.bf16 %v306_v49, %v305_v5  ;;  %v18132_v57 = vshrl.u32 %v14086_v39, 16 }
  0x31   :  { %1380 = vrot.lane.b32.xlu0 %v13863_v47, %s13627_s14  ;;  %v14101_v35 = vld [vmem:[#allocation2 + $0xd0] sm:$0xff]  ;;  %v631_v43 = vld [vmem:[#allocation2] sm:$0xff]  ;;  %v414_v60 = vor.u32 %v412_v26, %v411_v44  ;;  %76 = vst [vmem:[#allocation2 + $0x50] sm:$0x1] %v75_v55  ;;  %v18134_v50 = vshll.u32 %v14109_v36, 16  ;;  %vm18137_vm11 = vcmask 1041408  }
  0x32   :  { %647 = vst.msk [vmem:[#allocation4] sm:$0xff] %vm18138_vm0, %v631_v43  ;;  %v604_v6 = vld [vmem:[#allocation2 + $0x160] sm:$0xff]  ;;  %5706 = vst.msk [vmem:[#allocation2 + $0xd0] sm:$0xff] %vm18138_vm0, %v14086_v39  ;;  %v13439_v61 = vld [vmem:[%s18122_s1 + $0x10] ss:$0 sps:$4 sm:$0x33]   ;;  %v549_v12 = vor.u32 %v548_v58, %v409_v17 }
  0x33   :  { %v14120_v56 = vsel %vm13740_vm10, %v547_v38, %v604_v6  ;;  %v5905_v8 = vrot.slane %v18131_v9, 1  ;;  %v508_v18 = vld [vmem:[#allocation2 + $0x48] sm:$0xff]  ;;  %v416_v5 = vshrl.u32 %v14113_v41, 16  ;;  %v419_v49 = vshll.u32 %v14113_v41, 16  ;;  %345 = vst.msk [vmem:[#allocation2 + $0xe0] sm:$0xff] %vm18138_vm0, %v14113_v41  ;;  %v307_v26 = vld [vmem:[%s18121_s0 + $0xa0] sm:$0xff]  ;;  %702 = vrot.lane.b32.xlu1 %v13859_v46, %s13620_s23  ;;  %13401 = vmatprep.subr.msk.bf16.mxu1 %vm18137_vm11, %v13439_v61 }
  0x34   :  { %v77_v38 = vld [vmem:[#allocation2 + $0x58] sm:$0x1]  ;;  %v308_v43 = vld [vmem:[%s18121_s0 + $0xa8] sm:$0xff]  ;;  %v14140_v17 = vsel %vm13732_vm9, %v414_v60, %v508_v18  ;;  %v5725_v58 = vrot.slane %v5723_v1, 7  ;;  %v133_v6 = vsel %vm13709_vm5, 0, %v132_v11  ;;  %v5907_v1 = vrot.slane %v18134_v50, 1 }
  0x35   :  { %797 = vrot.lane.b32.xlu0 %v13835_v32, %s13622_s29  ;;  %v5906_v44 = vor.u32 %v5905_v8, %v18132_v57  ;;  %v135_v55 = vld [vmem:[#allocation2 + $0x178] sm:$0x80]  ;;  %510 = vst [vmem:[#allocation2 + $0x48] sm:$0xff] %v14140_v17  ;;  %v418_v60 = vrot.slane %v416_v5, 7  ;;  %v5772_v8 = vshrl.u32 %v14109_v36, 16  ;;  %v550_v57 = vrot.slane %v419_v49, 1 }
  0x36   :  { %v14151_v32 = vld [vmem:[#allocation2 + $0xd8] sm:$0xff]  ;;  %v607_v9 = vld [vmem:[#allocation2 + $0x168] sm:$0xff]  ;;  %134 = vst [vmem:[#allocation2 + $0x170] sm:$0x80] %v133_v6  ;;  %v5728_v18 = vor.u32 %v5726_v0, %v5725_v58  ;;  %v5732_v48 = vrot.slane %v5730_v16, 7  ;;  %v11214_v6 = vld [vmem:[%s18121_s0 + $0x190] sm:$0xff] }
  0x37   :  { %v5961_v11 = vsel %vm13740_vm10, %v5906_v44, %v14120_v56  ;;  %5707 = vst.msk [vmem:[#allocation2 + $0xd8] sm:$0xff] %vm18138_vm0, %v14109_v36  ;;  %v11215_v44 = vld [vmem:[%s18121_s0 + $0x198] sm:$0xff]  ;;  %v14176_v50 = vsel %vm13740_vm10, %v549_v12, %v607_v9  ;;  %v421_v52 = vor.u32 %v419_v49, %v418_v60  ;;  %v5908_v0 = vor.u32 %v5907_v1, %v5772_v8  ;;  %v80_v49 = vld [vmem:[#allocation2 + $0x60] sm:$0x1]  ;;  %v11218_v4 = vld [vmem:[%s18121_s0 + $0x1b0] sm:$0xff] }
  0x38   :  { %5962 = vst [vmem:[#allocation2 + $0x160] sm:$0xff] %v5961_v11  ;;  %v1530_v58 = vsel %vm18137_vm11, %v13439_v61, 0  ;;  %v5847_v16 = vsel %vm13732_vm9, %v5728_v18, %v13813_v13  ;;  %v5735_v59 = vor.u32 %v5733_v2, %v5732_v48  ;;  %v78_v9 = vsel %vm13716_vm7, 0, %v77_v38  ;;  %v309_v61 = vld [vmem:[%s18121_s0 + $0xb0] sm:$0xff]  ;;  %v310_v60 = vld [vmem:[%s18121_s0 + $0xb8] sm:$0xff]  ;;  %799 = vrot.lane.b32.xlu1 %v13863_v47, %s13622_s29 }
  0x39   :  { %894 = vrot.lane.b32.xlu0 %v13857_v45, %s13623_s15  ;;  %11954 = vmatpush3.bf16.msra.mxu1 %v1530_v58  ;;  %v329_v12 = vpack.c.bf16 %v308_v43, %v307_v26  ;;  %v511_v13 = vld [vmem:[#allocation2 + $0x50] sm:$0xff]  ;;  %v5964_v53 = vsel %vm13740_vm10, %v5908_v0, %v14176_v50  ;;  %5848 = vst [vmem:[#allocation2 + $0x10] sm:$0xff] %v5847_v16  ;;  %79 = vst [vmem:[#allocation2 + $0x58] sm:$0x1] %v78_v9  ;;  %v136_v2 = vsel %vm13709_vm5, 0, %v135_v55  ;;  %v11216_v0 = vld [vmem:[%s18121_s0 + $0x1a0] sm:$0xff] }
  0x3a   :  { %v14203_v48 = vpack.c.bf16 %v11215_v44, %v11214_v6  ;;  %v14207_v38 = vsel %vm13732_vm9, %v421_v52, %v511_v13  ;;  %5965 = vst [vmem:[#allocation2 + $0x168] sm:$0xff] %v5964_v53  ;;  %v14209_v26 = vld [vmem:[#allocation2 + $0xe0] sm:$0xff]  ;;  %v5850_v43 = vsel %vm13732_vm9, %v5735_v59, %v13857_v45  ;;  %137 = vst [vmem:[#allocation2 + $0x178] sm:$0x80] %v136_v2  ;;  %v81_v6 = vsel %vm13716_vm7, 0, %v80_v49  ;;  %v11217_v58 = vld [vmem:[%s18121_s0 + $0x1a8] sm:$0xff] }
  0x3b   :  { %v423_v1 = vshrl.u32 %v329_v12, 16  ;;  %v426_v11 = vshll.u32 %v329_v12, 16  ;;  %346 = vst.msk [vmem:[#allocation2 + $0xe8] sm:$0xff] %vm18138_vm0, %v329_v12  ;;  %v138_v18 = vld [vmem:[#allocation2 + $0x180] sm:$0x80]  ;;  %513 = vst [vmem:[#allocation2 + $0x50] sm:$0xff] %v14207_v38  ;;  %v14221_v44 = vpack.c.bf16 %v310_v60, %v309_v61  ;;  %v551_v45 = vor.u32 %v550_v57, %v416_v5 }
  0x3c   :  { %5851 = vst [vmem:[#allocation2 + $0x18] sm:$0xff] %v5850_v43  ;;  %5708 = vst.msk [vmem:[#allocation2 + $0xe0] sm:$0xff] %vm18138_vm0, %v14203_v48  ;;  %v5782_v55 = vshll.u32 %v14203_v48, 16  ;;  %v139_v16 = vsel %vm13709_vm5, 0, %v138_v18  ;;  %896 = vrot.lane.b32.xlu1 %v13896_v7, %s13623_s15  ;;  %v5779_v41 = vshrl.u32 %v14203_v48, 16  ;;  %v14240_v5 = vpack.c.bf16 %v11217_v58, %v11216_v0  ;;  %v311_v43 = vld [vmem:[%s18121_s0 + $0xc0] sm:$0xff] }
  0x3d   :  { %991 = vrot.lane.b32.xlu0 %v13859_v46, %s13621_s17  ;;  %v425_v59 = vrot.slane %v423_v1, 7  ;;  %v552_v52 = vrot.slane %v426_v11, 1  ;;  %82 = vst [vmem:[#allocation2 + $0x60] sm:$0x1] %v81_v6  ;;  %v610_v46 = vld [vmem:[#allocation2 + $0x170] sm:$0xff]  ;;  %v430_v9 = vshrl.u32 %v14221_v44, 16 }
  0x3e   :  { %v5909_v57 = vrot.slane %v5782_v55, 1  ;;  %347 = vst.msk [vmem:[#allocation2 + $0xf0] sm:$0xff] %vm18138_vm0, %v14221_v44  ;;  %140 = vst [vmem:[#allocation2 + $0x180] sm:$0x80] %v139_v16  ;;  %v433_v49 = vshll.u32 %v14221_v44, 16  ;;  %v5789_v13 = vshll.u32 %v14240_v5, 16  ;;  %v14263_v18 = vsel %vm13740_vm10, %v551_v45, %v610_v46 }
  0x3f   :  { %v428_v12 = vor.u32 %v426_v11, %v425_v59  ;;  %v83_v61 = vld [vmem:[#allocation2 + $0x68] sm:$0x1]  ;;  %v432_v53 = vrot.slane %v430_v9, 7  ;;  %v553_v59 = vor.u32 %v552_v52, %v423_v1  ;;  %v5786_v0 = vshrl.u32 %v14240_v5, 16  ;;  %v635_v46 = vld [vmem:[#allocation2 + $0x20] sm:$0xff] }
  0x40   :  { %v5910_v60 = vor.u32 %v5909_v57, %v5779_v41  ;;  %v84_v2 = vsel %vm13716_vm7, 0, %v83_v61  ;;  %v312_v11 = vld [vmem:[%s18121_s0 + $0xc8] sm:$0xff]  ;;  %v514_v6 = vld [vmem:[#allocation2 + $0x58] sm:$0xff]  ;;  %993 = vrot.lane.b32.xlu1 %v13907_v21, %s13621_s17  ;;  %v5911_v52 = vrot.slane %v5789_v13, 1  ;;  %651 = vst.msk [vmem:[#allocation4 + $0x20] sm:$0xff] %vm18138_vm0, %v635_v46  ;;  %v18283_v62 = vshrl.u32 %v13977_v14, 16 }
  0x41   :  { %1088 = vrot.lane.b32.xlu0 %v13863_v47, %s13624_s26  ;;  %85 = vst [vmem:[#allocation2 + $0x68] sm:$0x1] %v84_v2  ;;  %v14266_v58 = vpack.c.bf16 %v312_v11, %v311_v43  ;;  %v14272_v16 = vsel %vm13732_vm9, %v428_v12, %v514_v6  ;;  %v613_v47 = vld [vmem:[#allocation2 + $0x178] sm:$0xff]  ;;  %v435_v1 = vor.u32 %v433_v49, %v432_v53  ;;  %v5739_v53 = vrot.slane %v5737_v23, 7 }
  0x42   :  { %v14274_v57 = vld [vmem:[#allocation2 + $0xe8] sm:$0xff]  ;;  %v5967_v45 = vsel %vm13740_vm10, %v5910_v60, %v14263_v18  ;;  %658 = vst.msk [vmem:[#allocation4 + $0x58] sm:$0xff] %vm18138_vm0, %v14272_v16  ;;  %v5912_v60 = vor.u32 %v5911_v52, %v5786_v0  ;;  %v14297_v2 = vsel %vm13740_vm10, %v553_v59, %v613_v47  ;;  %v5746_v52 = vrot.slane %v5744_v31, 7 }
  0x43   :  { %5968 = vst [vmem:[#allocation2 + $0x170] sm:$0xff] %v5967_v45  ;;  %5709 = vst.msk [vmem:[#allocation2 + $0xe8] sm:$0xff] %vm18138_vm0, %v14240_v5  ;;  %v437_v61 = vshrl.u32 %v14266_v58, 16  ;;  %v440_v6 = vshll.u32 %v14266_v58, 16  ;;  %v5742_v23 = vor.u32 %v5740_v22, %v5739_v53  ;;  %v141_v59 = vld [vmem:[#allocation2 + $0x188] sm:$0x80] }
  0x44   :  { %348 = vst.msk [vmem:[#allocation2 + $0xf8] sm:$0xff] %vm18138_vm0, %v14266_v58  ;;  %v517_v12 = vld [vmem:[#allocation2 + $0x60] sm:$0xff]  ;;  %1090 = vrot.lane.b32.xlu1 %v13942_v63, %s13624_s26  ;;  %v142_v45 = vsel %vm13709_vm5, 0, %v141_v59  ;;  %v313_v59 = vld [vmem:[%s18121_s0 + $0xd0] sm:$0xff]  ;;  %vm744_vm12 = vcmask 64544   ;;  %v18285_v15 = vshrl.u32 %v14086_v39, 16 }
  0x45   :  { %1186 = vrot.lane.b32.xlu0 %v13896_v7, %s13625_s13  ;;  %v14301_v43 = vsel %vm13732_vm9, %v435_v1, %v517_v12  ;;  %v439_v11 = vrot.slane %v437_v61, 7  ;;  %v5970_v7 = vsel %vm13740_vm10, %v5912_v60, %v14297_v2  ;;  %v5853_v1 = vsel %vm13732_vm9, %v5742_v23, %v635_v46  ;;  %143 = vst [vmem:[#allocation2 + $0x188] sm:$0x80] %v142_v45 }
  0x46   :  { %659 = vst.msk [vmem:[#allocation4 + $0x60] sm:$0xff] %vm18138_vm0, %v14301_v43  ;;  %5971 = vst [vmem:[#allocation2 + $0x178] sm:$0xff] %v5970_v7  ;;  %v5749_v46 = vor.u32 %v5747_v25, %v5746_v52  ;;  %v554_v60 = vrot.slane %v433_v49, 1  ;;  %v11219_v25 = vld [vmem:[%s18121_s0 + $0x1b8] sm:$0xff]  ;;  %v86_v7 = vld [vmem:[#allocation2 + $0x70] sm:$0x1] }
  0x47   :  { %v442_v47 = vor.u32 %v440_v6, %v439_v11  ;;  %5854 = vst [vmem:[#allocation2 + $0x20] sm:$0xff] %v5853_v1  ;;  %v14351_v53 = vpack.c.bf16 %v11219_v25, %v11218_v4  ;;  %v14353_v11 = vld [vmem:[#allocation2 + $0xf0] sm:$0xff]  ;;  %v87_v23 = vsel %vm13716_vm7, 0, %v86_v7  ;;  %v616_v1 = vld [vmem:[#allocation2 + $0x180] sm:$0xff]  ;;  %vm841_vm13 = vcmask 97344  }
  0x48   :  { %v520_v12 = vld [vmem:[#allocation2 + $0x68] sm:$0xff]  ;;  %1188 = vrot.lane.b32.xlu1 %v13953_v51, %s13625_s13  ;;  %v5856_v31 = vsel %vm13732_vm9, %v5749_v46, %v5855_v3  ;;  %88 = vst [vmem:[#allocation2 + $0x70] sm:$0x1] %v87_v23  ;;  %v11220_v7 = vld [vmem:[%s18121_s0 + $0x1c0] sm:$0xff]  ;;  %vm938_vm14 = vcmask 130144   ;;  %vm1035_vm15 = vcmask 162944  }
  0x49   :  { %1284 = vrot.lane.b32.xlu0 %v13907_v21, %s13626_s25  ;;  %v14327_v22 = vsel %vm13732_vm9, %v442_v47, %v520_v12  ;;  %5857 = vst [vmem:[#allocation2 + $0x28] sm:$0xff] %v5856_v31  ;;  %5710 = vst.msk [vmem:[#allocation2 + $0xf0] sm:$0xff] %vm18138_vm0, %v14351_v53  ;;  %v5796_v49 = vshll.u32 %v14351_v53, 16  ;;  %v555_v47 = vor.u32 %v554_v60, %v430_v9  ;;  %v5793_v52 = vshrl.u32 %v14351_v53, 16  ;;  %v144_v60 = vld [vmem:[#allocation2 + $0x190] sm:$0x80] }
  0x4a   :  { %660 = vst.msk [vmem:[#allocation4 + $0x68] sm:$0xff] %vm18138_vm0, %v14327_v22  ;;  %v145_v25 = vsel %vm13709_vm5, 0, %v144_v60  ;;  %v11221_v23 = vld [vmem:[%s18121_s0 + $0x1c8] sm:$0xff]  ;;  %vm1132_vm1 = vcmask 195744   ;;  %vm1230_vm3 = vcmask 228544   ;;  %vm220_vm11 = vcmask 1047559  }
  0x4b   :  { %v5913_v12 = vrot.slane %v5796_v49, 1  ;;  %v14386_v44 = vsel %vm13740_vm10, %v555_v47, %v616_v1  ;;  %146 = vst [vmem:[#allocation2 + $0x190] sm:$0x80] %v145_v25  ;;  %v14420_v47 = vld [vmem:[#allocation2 + $0xf8] sm:$0xff]  ;;  %vm14880_vm8 = vmand %vm220_vm11, %vm100_vm2 }
  0x4c   :  { %1286 = vrot.lane.b32.xlu1 %v13955_v54, %s13626_s25  ;;  %v89_v1 = vld [vmem:[#allocation2 + $0x78] sm:$0x1]  ;;  %v619_v60 = vld [vmem:[#allocation2 + $0x188] sm:$0xff] }
  0x4d   :  { %1382 = vrot.lane.b32.xlu0 %v13942_v63, %s13627_s14 }
  0x4f   :  { %v523_v4 = vld [vmem:[#allocation2 + $0x70] sm:$0xff] }
  0x50   :  { %704 = vrot.lane.b32.xlu1 %v13907_v21, %s13620_s23  ;;  %v314_v21 = vld [vmem:[%s18121_s0 + $0xd8] sm:$0xff] }
  0x51   :  { %1384 = vrot.lane.b32.xlu0 %v13988_v27, %s13627_s14  ;;  %v14370_v45 = vpack.c.bf16 %v314_v21, %v313_v59  ;;  %v556_v21 = vrot.slane %v440_v6, 1  ;;  %v316_v6 = vld [vmem:[%s18121_s0 + $0xe8] sm:$0xff] }
  0x53   :  { %v444_v3 = vshrl.u32 %v14370_v45, 16  ;;  %349 = vst.msk [vmem:[#allocation2 + $0x100] sm:$0xff] %vm18138_vm0, %v14370_v45  ;;  %v447_v46 = vshll.u32 %v14370_v45, 16 }
  0x54   :  { %706 = vrot.lane.b32.xlu1 %v13955_v54, %s13620_s23 }
  0x55   :  { %801 = vrot.lane.b32.xlu0 %v13942_v63, %s13622_s29  ;;  %v5914_v63 = vor.u32 %v5913_v12, %v5793_v52  ;;  %v446_v9 = vrot.slane %v444_v3, 7  ;;  %v90_v12 = vsel %vm13716_vm7, 0, %v89_v1 }
  0x56   :  { %91 = vst [vmem:[#allocation2 + $0x78] sm:$0x1] %v90_v12  ;;  %v147_v12 = vld [vmem:[#allocation2 + $0x198] sm:$0x80] }
  0x57   :  { %v5973_v31 = vsel %vm13740_vm10, %v5914_v63, %v14386_v44  ;;  %v315_v63 = vld [vmem:[%s18121_s0 + $0xe0] sm:$0xff] }
  0x58   :  { %803 = vrot.lane.b32.xlu1 %v13988_v27, %s13622_s29  ;;  %5974 = vst [vmem:[#allocation2 + $0x180] sm:$0xff] %v5973_v31  ;;  %v14435_v31 = vpack.c.bf16 %v316_v6, %v315_v63  ;;  %v638_v63 = vld [vmem:[#allocation2 + $0x38] sm:$0xff] }
  0x59   :  { %898 = vrot.lane.b32.xlu0 %v13953_v51, %s13623_s15  ;;  %v449_v51 = vor.u32 %v447_v46, %v446_v9  ;;  %654 = vst.msk [vmem:[#allocation4 + $0x38] sm:$0xff] %vm18138_vm0, %v638_v63 }
  0x5a   :  { %350 = vst.msk [vmem:[#allocation2 + $0x108] sm:$0xff] %vm18138_vm0, %v14435_v31 }
  0x5b   :  { %v14410_v59 = vsel %vm13732_vm9, %v449_v51, %v523_v4  ;;  %v557_v51 = vor.u32 %v556_v21, %v437_v61  ;;  %v454_v21 = vshll.u32 %v14435_v31, 16 }
  0x5c   :  { %900 = vrot.lane.b32.xlu1 %v13994_v37, %s13623_s15  ;;  %661 = vst.msk [vmem:[#allocation4 + $0x70] sm:$0xff] %vm18138_vm0, %v14410_v59 }
  0x5d   :  { %995 = vrot.lane.b32.xlu0 %v13955_v54, %s13621_s17  ;;  %v14416_v54 = vpack.c.bf16 %v11221_v23, %v11220_v7  ;;  %v637_v7 = vld [vmem:[#allocation2 + $0x30] sm:$0xff]  ;;  %v5753_v23 = vrot.slane %v5751_v19, 7  ;;  %v14461_v1 = vsel %vm13740_vm10, %v557_v51, %v619_v60  ;;  %v526_v60 = vld [vmem:[#allocation2 + $0x78] sm:$0xff] }
  0x5e   :  { %653 = vst.msk [vmem:[#allocation4 + $0x30] sm:$0xff] %vm18138_vm0, %v637_v7 }
  0x5f   :  { %5711 = vst.msk [vmem:[#allocation2 + $0xf8] sm:$0xff] %vm18138_vm0, %v14416_v54  ;;  %v5803_v9 = vshll.u32 %v14416_v54, 16  ;;  %v5800_v4 = vshrl.u32 %v14416_v54, 16  ;;  %v5756_v19 = vor.u32 %v5754_v30, %v5753_v23  ;;  %v5760_v30 = vrot.slane %v18283_v62, 7 }
  0x60   :  { %997 = vrot.lane.b32.xlu1 %v14001_v42, %s13621_s17  ;;  %v558_v62 = vrot.slane %v447_v46, 1 }
  0x61   :  { %1092 = vrot.lane.b32.xlu0 %v13988_v27, %s13624_s26  ;;  %v5915_v25 = vrot.slane %v5803_v9, 1  ;;  %v451_v27 = vshrl.u32 %v14435_v31, 16  ;;  %v5859_v51 = vsel %vm13732_vm9, %v5756_v19, %v637_v7  ;;  %v18284_v7 = vshll.u32 %v13977_v14, 16  ;;  %v11222_v14 = vld [vmem:[%s18121_s0 + $0x1d0] sm:$0xff]  ;;  %v11223_v19 = vld [vmem:[%s18121_s0 + $0x1d8] sm:$0xff] }
  0x62   :  { %5860 = vst [vmem:[#allocation2 + $0x30] sm:$0xff] %v5859_v51  ;;  %v318_v51 = vld [vmem:[%s18121_s0 + $0xf8] sm:$0xff] }
  0x63   :  { %v5916_v58 = vor.u32 %v5915_v25, %v5800_v4  ;;  %v453_v61 = vrot.slane %v451_v27, 7  ;;  %v148_v25 = vsel %vm13709_vm5, 0, %v147_v12  ;;  %v14505_v12 = vpack.c.bf16 %v11223_v19, %v11222_v14  ;;  %v95_v14 = vld [vmem:[#allocation2 + $0x88] sm:$0x1] }
  0x64   :  { %1094 = vrot.lane.b32.xlu1 %v14035_v28, %s13624_s26  ;;  %149 = vst [vmem:[#allocation2 + $0x198] sm:$0x80] %v148_v25  ;;  %v317_v25 = vld [vmem:[%s18121_s0 + $0xf0] sm:$0xff]  ;;  %v11225_v19 = vld [vmem:[%s18121_s0 + $0x1e8] sm:$0xff] }
  0x65   :  { %1190 = vrot.lane.b32.xlu0 %v13994_v37, %s13625_s13  ;;  %v5976_v37 = vsel %vm13740_vm10, %v5916_v58, %v14461_v1  ;;  %v456_v6 = vor.u32 %v454_v21, %v453_v61  ;;  %v5763_v58 = vor.u32 %v18284_v7, %v5760_v30  ;;  %v5810_v30 = vshll.u32 %v14505_v12, 16 }
  0x66   :  { %5977 = vst [vmem:[#allocation2 + $0x188] sm:$0xff] %v5976_v37  ;;  %v14507_v37 = vld [vmem:[#allocation2 + $0x100] sm:$0xff]  ;;  %v5807_v7 = vshrl.u32 %v14505_v12, 16 }
  0x67   :  { %v14481_v23 = vsel %vm13732_vm9, %v456_v6, %v526_v60  ;;  %v5862_v61 = vsel %vm13732_vm9, %v5763_v58, %v638_v63  ;;  %v92_v63 = vld [vmem:[#allocation2 + $0x80] sm:$0x1]  ;;  %5712 = vst.msk [vmem:[#allocation2 + $0x100] sm:$0xff] %vm18138_vm0, %v14505_v12  ;;  %v622_v60 = vld [vmem:[#allocation2 + $0x190] sm:$0xff]  ;;  %v5917_v46 = vrot.slane %v5810_v30, 1 }
  0x68   :  { %1192 = vrot.lane.b32.xlu1 %v14039_v33, %s13625_s13  ;;  %662 = vst.msk [vmem:[#allocation4 + $0x78] sm:$0xff] %vm18138_vm0, %v14481_v23  ;;  %5863 = vst [vmem:[#allocation2 + $0x38] sm:$0xff] %v5862_v61  ;;  %v93_v6 = vsel %vm13716_vm7, 0, %v92_v63  ;;  %v150_v58 = vld [vmem:[#allocation2 + $0x1a0] sm:$0x80]  ;;  %v96_v63 = vsel %vm13716_vm7, 0, %v95_v14 }
  0x69   :  { %1288 = vrot.lane.b32.xlu0 %v14001_v42, %s13626_s25  ;;  %94 = vst [vmem:[#allocation2 + $0x80] sm:$0x1] %v93_v6  ;;  %v151_v61 = vsel %vm13709_vm5, 0, %v150_v58  ;;  %v560_v6 = vrot.slane %v454_v21, 1  ;;  %97 = vst [vmem:[#allocation2 + $0x88] sm:$0x1] %v96_v63 }
  0x6a   :  { %152 = vst [vmem:[#allocation2 + $0x1a0] sm:$0x80] %v151_v61  ;;  %v18286_v58 = vshll.u32 %v14086_v39, 16  ;;  %v5774_v39 = vrot.slane %v5772_v8, 7  ;;  %vm1426_vm7 = vcmask 294144  }
  0x6b   :  { %v625_v14 = vld [vmem:[#allocation2 + $0x198] sm:$0xff] }
  0x6c   :  { %1290 = vrot.lane.b32.xlu1 %v14041_v34, %s13626_s25 }
  0x6d   :  { %1386 = vrot.lane.b32.xlu0 %v14035_v28, %s13627_s14 }
  0x70   :  { %708 = vrot.lane.b32.xlu1 %v14001_v42, %s13620_s23  ;;  %v14521_v42 = vpack.c.bf16 %v318_v51, %v317_v25  ;;  %v14570_v51 = vld [vmem:[#allocation2 + $0x108] sm:$0xff] }
  0x71   :  { %1388 = vrot.lane.b32.xlu0 %v14064_v20, %s13627_s14 }
  0x72   :  { %351 = vst.msk [vmem:[#allocation2 + $0x110] sm:$0xff] %vm18138_vm0, %v14521_v42  ;;  %v458_v21 = vshrl.u32 %v14521_v42, 16  ;;  %v461_v63 = vshll.u32 %v14521_v42, 16  ;;  %v11226_v42 = vld [vmem:[%s18121_s0 + $0x1f0] sm:$0xff] }
  0x74   :  { %710 = vrot.lane.b32.xlu1 %v14041_v34, %s13620_s23 }
  0x75   :  { %805 = vrot.lane.b32.xlu0 %v14035_v28, %s13622_s29  ;;  %v559_v28 = vor.u32 %v558_v62, %v444_v3  ;;  %v639_v62 = vld [vmem:[#allocation2 + $0x40] sm:$0xff] }
  0x76   :  { %655 = vst.msk [vmem:[#allocation4 + $0x40] sm:$0xff] %vm18138_vm0, %v639_v62 }
  0x77   :  { %v14549_v45 = vsel %vm13740_vm10, %v559_v28, %v622_v60  ;;  %v5767_v28 = vrot.slane %v18285_v15, 7 }
  0x78   :  { %807 = vrot.lane.b32.xlu1 %v14064_v20, %s13622_s29 }
  0x79   :  { %902 = vrot.lane.b32.xlu0 %v14039_v33, %s13623_s15  ;;  %v5918_v33 = vor.u32 %v5917_v46, %v5807_v7  ;;  %v561_v46 = vor.u32 %v560_v6, %v451_v27  ;;  %v5770_v61 = vor.u32 %v18286_v58, %v5767_v28  ;;  %v153_v27 = vld [vmem:[#allocation2 + $0x1a8] sm:$0x80]  ;;  %v460_v6 = vrot.slane %v458_v21, 7 }
  0x7a   :  { %v154_v8 = vsel %vm13709_vm5, 0, %v153_v27  ;;  %v562_v28 = vrot.slane %v461_v63, 1  ;;  %v18287_v58 = vshll.u32 %v14109_v36, 16  ;;  %vm1328_vm5 = vcmask 261344  }
  0x7b   :  { %v5979_v3 = vsel %vm13740_vm10, %v5918_v33, %v14549_v45  ;;  %v5865_v31 = vsel %vm13732_vm9, %v5770_v61, %v639_v62  ;;  %v11227_v62 = vld [vmem:[%s18121_s0 + $0x1f8] sm:$0xff]  ;;  %v14616_v15 = vsel %vm13740_vm10, %v561_v46, %v625_v14  ;;  %155 = vst [vmem:[#allocation2 + $0x1a8] sm:$0x80] %v154_v8  ;;  %v463_v36 = vor.u32 %v461_v63, %v460_v6  ;;  %v628_v8 = vld [vmem:[#allocation2 + $0x1a0] sm:$0xff] }
  0x7c   :  { %904 = vrot.lane.b32.xlu1 %v14096_v40, %s13623_s15  ;;  %5980 = vst [vmem:[#allocation2 + $0x190] sm:$0xff] %v5979_v3  ;;  %5866 = vst [vmem:[#allocation2 + $0x40] sm:$0xff] %v5865_v31  ;;  %v5777_v61 = vor.u32 %v18287_v58, %v5774_v39  ;;  %v14620_v31 = vld [vmem:[#allocation2 + $0x110] sm:$0xff]  ;;  %v529_v39 = vld [vmem:[#allocation2 + $0x80] sm:$0xff] }
  0x7d   :  { %999 = vrot.lane.b32.xlu0 %v14041_v34, %s13621_s17  ;;  %v11224_v34 = vld [vmem:[%s18121_s0 + $0x1e0] sm:$0xff] }
  0x7e   :  { %v14568_v25 = vpack.c.bf16 %v11225_v19, %v11224_v34  ;;  %v640_v19 = vld [vmem:[#allocation2 + $0x48] sm:$0xff] }
  0x7f   :  { %656 = vst.msk [vmem:[#allocation4 + $0x48] sm:$0xff] %vm18138_vm0, %v640_v19 }
  0x80   :  { %1001 = vrot.lane.b32.xlu1 %v14101_v35, %s13621_s17  ;;  %5713 = vst.msk [vmem:[#allocation2 + $0x108] sm:$0xff] %vm18138_vm0, %v14568_v25  ;;  %v18136_v60 = vshll.u32 %v14568_v25, 16  ;;  %v5814_v34 = vshrl.u32 %v14568_v25, 16 }
  0x81   :  { %1096 = vrot.lane.b32.xlu0 %v14064_v20, %s13624_s26  ;;  %v697_v20 = vpop.permute.xlu0 %696 }
  0x82   :  { %745 = vst.msk [vmem:[#allocation4] sm:$0xff] %vm744_vm12, %v697_v20  ;;  %v14588_v3 = vpop.permute.xlu1 %989 }
  0x84   :  { %1098 = vrot.lane.b32.xlu1 %v14120_v56, %s13624_s26 }
  0x85   :  { %1194 = vrot.lane.b32.xlu0 %v14096_v40, %s13625_s13  ;;  %v699_v33 = vpop.permute.xlu0 %698  ;;  %v5919_v40 = vrot.slane %v18136_v60, 1  ;;  %v5868_v60 = vsel %vm13732_vm9, %v5777_v61, %v640_v19 }
  0x86   :  { %746 = vst.msk [vmem:[#allocation4 + $0x8] sm:$0xff] %vm744_vm12, %v699_v33  ;;  %v5698_v33 = vpack.c.bf16 %v11227_v62, %v11226_v42  ;;  %5869 = vst [vmem:[#allocation2 + $0x48] sm:$0xff] %v5868_v60  ;;  %v14640_v60 = vsel %vm13732_vm9, %v463_v36, %v529_v39 }
  0x87   :  { %v5920_v20 = vor.u32 %v5919_v40, %v5814_v34 }
  0x88   :  { %1196 = vrot.lane.b32.xlu1 %v14140_v17, %s13625_s13  ;;  %v794_v27 = vpop.permute.xlu1 %793  ;;  %v5821_v46 = vshrl.u32 %v5698_v33, 16  ;;  %v5824_v14 = vshll.u32 %v5698_v33, 16  ;;  %5714 = vst.msk [vmem:[#allocation2 + $0x110] sm:$0xff] %vm18138_vm0, %v5698_v33 }
  0x89   :  { %1292 = vrot.lane.b32.xlu0 %v14101_v35, %s13626_s25  ;;  %v988_v40 = vpop.permute.xlu0 %987  ;;  %v5982_v10 = vsel %vm13740_vm10, %v5920_v20, %v14616_v15  ;;  %842 = vst.msk [vmem:[#allocation4] sm:$0xff] %vm841_vm13, %v794_v27  ;;  %v563_v20 = vor.u32 %v562_v28, %v458_v21 }
  0x8a   :  { %5983 = vst [vmem:[#allocation2 + $0x198] sm:$0xff] %v5982_v10  ;;  %v5823_v42 = vrot.slane %v5821_v46, 7  ;;  %v5921_v19 = vrot.slane %v5824_v14, 1 }
  0x8b   :  { %v14646_v63 = vsel %vm13740_vm10, %v563_v20, %v628_v8 }
  0x8c   :  { %1294 = vrot.lane.b32.xlu1 %v14151_v32, %s13626_s25  ;;  %v796_v58 = vpop.permute.xlu1 %795  ;;  %v5826_v61 = vor.u32 %v5824_v14, %v5823_v42  ;;  %v5922_v21 = vor.u32 %v5921_v19, %v5821_v46  ;;  %v641_v46 = vld [vmem:[#allocation2 + $0x50] sm:$0xff]  ;;  %v5781_v14 = vrot.slane %v5779_v41, 7 }
  0x8d   :  { %1390 = vrot.lane.b32.xlu0 %v14120_v56, %s13627_s14  ;;  %v891_v62 = vpop.permute.xlu0 %890  ;;  %843 = vst.msk [vmem:[#allocation4 + $0x8] sm:$0xff] %vm841_vm13, %v796_v58 }
  0x8e   :  { %939 = vst.msk [vmem:[#allocation4] sm:$0xff] %vm938_vm14, %v891_v62  ;;  %v5889_v6 = vsel %vm13732_vm9, %v5826_v61, %v14640_v60  ;;  %v5985_v33 = vsel %vm13740_vm10, %v5922_v21, %v14646_v63  ;;  %vm1479_vm10 = vcmask 293888  }
  0x8f   :  { %1036 = vst.msk [vmem:[#allocation4] sm:$0xff] %vm1035_vm15, %v988_v40  ;;  %5890 = vst [vmem:[#allocation2 + $0x80] sm:$0xff] %v5889_v6 }
  0x90   :  { %712 = vrot.lane.b32.xlu1 %v14101_v35, %s13620_s23  ;;  %v893_v40 = vpop.permute.xlu1 %892  ;;  %5986 = vst [vmem:[#allocation2 + $0x1a0] sm:$0xff] %v5985_v33  ;;  %657 = vst.msk [vmem:[#allocation4 + $0x50] sm:$0xff] %vm18138_vm0, %v641_v46 }
  0x91   :  { %1392 = vrot.lane.b32.xlu0 %v14176_v50, %s13627_s14  ;;  %v1085_v28 = vpop.permute.xlu0 %1084  ;;  %940 = vst.msk [vmem:[#allocation4 + $0x8] sm:$0xff] %vm938_vm14, %v893_v40 }
  0x92   :  { %1133 = vst.msk [vmem:[#allocation4] sm:$0xff] %vm1132_vm1, %v1085_v28 }
  0x93   :  { %1037 = vst.msk [vmem:[#allocation4 + $0x8] sm:$0xff] %vm1035_vm15, %v14588_v3 }
  0x94   :  { %714 = vrot.lane.b32.xlu1 %v14151_v32, %s13620_s23  ;;  %v1087_v29 = vpop.permute.xlu1 %1086 }
  0x95   :  { %809 = vrot.lane.b32.xlu0 %v14120_v56, %s13622_s29  ;;  %1134 = vst.msk [vmem:[#allocation4 + $0x8] sm:$0xff] %vm1132_vm1, %v1087_v29  ;;  %v5802_v29 = vrot.slane %v5800_v4, 7 }
  0x96   :  { %v1183_v35 = vpop.permute.xlu0 %1182 }
  0x97   :  { %1231 = vst.msk [vmem:[#allocation4] sm:$0xff] %vm1230_vm3, %v1183_v35  ;;  %v5805_v53 = vor.u32 %v5803_v9, %v5802_v29  ;;  %v1361_v29 = vld [vmem:[#allocation2 + $0x1a8] sm:$0xff] }
  0x98   :  { %811 = vrot.lane.b32.xlu1 %v14176_v50, %s13622_s29 }
  0x99   :  { %906 = vrot.lane.b32.xlu0 %v14140_v17, %s13623_s15  ;;  %v1185_v3 = vpop.permute.xlu1 %1184  ;;  %v5880_v4 = vsel %vm13732_vm9, %v5805_v53, %v14327_v22 }
  0x9a   :  { %v1281_v56 = vpop.permute.xlu0 %1280  ;;  %1232 = vst.msk [vmem:[#allocation4 + $0x8] sm:$0xff] %vm1230_vm3, %v1185_v3  ;;  %5881 = vst [vmem:[#allocation2 + $0x68] sm:$0xff] %v5880_v4 }
  0x9b   :  { %1329 = vst.msk [vmem:[#allocation4] sm:$0xff] %vm1328_vm5, %v1281_v56 }
  0x9c   :  { %908 = vrot.lane.b32.xlu1 %v14207_v38, %s13623_s15 }
  0x9d   :  { %1003 = vrot.lane.b32.xlu0 %v14151_v32, %s13621_s17  ;;  %v1283_v17 = vpop.permute.xlu1 %1282 }
  0x9e   :  { %1330 = vst.msk [vmem:[#allocation4 + $0x8] sm:$0xff] %vm1328_vm5, %v1283_v17 }
  0x9f   :  { %v1379_v10 = vpop.permute.xlu0 %1378 }
  0xa0   :  { %1427 = vst.msk [vmem:[#allocation4] sm:$0xff] %vm1426_vm7, %v1379_v10  ;;  %1005 = vrot.lane.b32.xlu1 %v14209_v26, %s13621_s17 }
  0xa1   :  { %1100 = vrot.lane.b32.xlu0 %v14176_v50, %s13624_s26  ;;  %v701_v32 = vpop.permute.xlu1 %700  ;;  %v5784_v50 = vor.u32 %v5782_v55, %v5781_v14 }
  0xa2   :  { %747 = vst.msk [vmem:[#allocation4 + $0x10] sm:$0xff] %vm744_vm12, %v701_v32 }
  0xa3   :  { %v1381_v27 = vpop.permute.xlu0 %1380  ;;  %v5871_v41 = vsel %vm13732_vm9, %v5784_v50, %v641_v46  ;;  %v5816_v50 = vrot.slane %v5814_v34, 7 }
  0xa4   :  { %1428 = vst.msk [vmem:[#allocation4 + $0x8] sm:$0xff] %vm1426_vm7, %v1381_v27  ;;  %1102 = vrot.lane.b32.xlu1 %v14263_v18, %s13624_s26  ;;  %5872 = vst [vmem:[#allocation2 + $0x50] sm:$0xff] %v5871_v41 }
  0xa5   :  { %1198 = vrot.lane.b32.xlu0 %v14207_v38, %s13625_s13  ;;  %v703_v20 = vpop.permute.xlu1 %702  ;;  %v5788_v38 = vrot.slane %v5786_v0, 7 }
  0xa6   :  { %748 = vst.msk [vmem:[#allocation4 + $0x18] sm:$0xff] %vm744_vm12, %v703_v20  ;;  %v18288_v20 = vshll.u32 %v14568_v25, 16 }
  0xa7   :  { %v798_v36 = vpop.permute.xlu0 %797  ;;  %v1443_v39 = vld [vmem:[#allocation4] sm:$0xff]  ;;  %v5791_v48 = vor.u32 %v5789_v13, %v5788_v38 }
  0xa8   :  { %844 = vst.msk [vmem:[#allocation4 + $0x10] sm:$0xff] %vm841_vm13, %v798_v36  ;;  %11955 = vmatprep.mubr.msk.bf16.mxu1 %vm1479_vm10, %v1443_v39  ;;  %1200 = vrot.lane.b32.xlu1 %v14272_v16, %s13625_s13  ;;  %v5819_v41 = vor.u32 %v18288_v20, %v5816_v50 }
  0xa9   :  { %1296 = vrot.lane.b32.xlu0 %v14209_v26, %s13626_s25  ;;  %v5874_v0 = vsel %vm13732_vm9, %v5791_v48, %v14272_v16 }
  0xaa   :  { %v800_v19 = vpop.permute.xlu1 %799  ;;  %5875 = vst [vmem:[#allocation2 + $0x58] sm:$0xff] %v5874_v0  ;;  %v5886_v12 = vsel %vm13732_vm9, %v5819_v41, %v14481_v23 }
  0xab   :  { %v895_v55 = vpop.permute.xlu0 %894  ;;  %v1444_v42 = vld [vmem:[#allocation4 + $0x8] sm:$0xff]  ;;  %845 = vst.msk [vmem:[#allocation4 + $0x18] sm:$0xff] %vm841_vm13, %v800_v19  ;;  %5887 = vst [vmem:[#allocation2 + $0x78] sm:$0xff] %v5886_v12 }
  0xac   :  { %941 = vst.msk [vmem:[#allocation4 + $0x10] sm:$0xff] %vm938_vm14, %v895_v55  ;;  %11956 = vmatmul.mubr.msk.bf16.vlgmr.msra.gmra.mrb[0].mxu1 %vm1479_vm10, %v1444_v42  ;;  %1298 = vrot.lane.b32.xlu1 %v14274_v57, %s13626_s25 }
  0xad   :  { %1394 = vrot.lane.b32.xlu0 %v14263_v18, %s13627_s14 }
  0xae   :  { %v897_v13 = vpop.permute.xlu1 %896 }
  0xaf   :  { %v992_v5 = vpop.permute.xlu0 %991  ;;  %942 = vst.msk [vmem:[#allocation4 + $0x18] sm:$0xff] %vm938_vm14, %v897_v13  ;;  %v228_v13 = vld [vmem:[#allocation3 + $0x130] sm:$0x80] }
  0xb0   :  { %1038 = vst.msk [vmem:[#allocation4 + $0x10] sm:$0xff] %vm1035_vm15, %v992_v5  ;;  %716 = vrot.lane.b32.xlu1 %v14209_v26, %s13620_s23 }
  0xb1   :  { %1396 = vrot.lane.b32.xlu0 %v14297_v2, %s13627_s14 }
  0xb2   :  { %v994_v8 = vpop.permute.xlu1 %993 }
  0xb3   :  { %v1089_v62 = vpop.permute.xlu0 %1088  ;;  %1039 = vst.msk [vmem:[#allocation4 + $0x18] sm:$0xff] %vm1035_vm15, %v994_v8 }
  0xb4   :  { %1135 = vst.msk [vmem:[#allocation4 + $0x10] sm:$0xff] %vm1132_vm1, %v1089_v62  ;;  %718 = vrot.lane.b32.xlu1 %v14274_v57, %s13620_s23  ;;  %v168_v62 = vld [vmem:[#allocation3 + $0x8] sm:$0x1] }
  0xb5   :  { %813 = vrot.lane.b32.xlu0 %v14263_v18, %s13622_s29 }
  0xb6   :  { %v1091_v61 = vpop.permute.xlu1 %1090 }
  0xb7   :  { %v1187_v58 = vpop.permute.xlu0 %1186  ;;  %1136 = vst.msk [vmem:[#allocation4 + $0x18] sm:$0xff] %vm1132_vm1, %v1091_v61 }
  0xb8   :  { %1233 = vst.msk [vmem:[#allocation4 + $0x10] sm:$0xff] %vm1230_vm3, %v1187_v58  ;;  %815 = vrot.lane.b32.xlu1 %v14297_v2, %s13622_s29 }
  0xb9   :  { %910 = vrot.lane.b32.xlu0 %v14272_v16, %s13623_s15 }
  0xba   :  { %v1189_v21 = vpop.permute.xlu1 %1188 }
  0xbb   :  { %v1285_v26 = vpop.permute.xlu0 %1284  ;;  %1234 = vst.msk [vmem:[#allocation4 + $0x18] sm:$0xff] %vm1230_vm3, %v1189_v21 }
  0xbc   :  { %1331 = vst.msk [vmem:[#allocation4 + $0x10] sm:$0xff] %vm1328_vm5, %v1285_v26  ;;  %912 = vrot.lane.b32.xlu1 %v14301_v43, %s13623_s15  ;;  %v225_v26 = vld [vmem:[#allocation3 + $0x128] sm:$0x80] }
  0xbd   :  { %1007 = vrot.lane.b32.xlu0 %v14274_v57, %s13621_s17  ;;  %v5795_v57 = vrot.slane %v5793_v52, 7 }
  0xbe   :  { %v1287_v6 = vpop.permute.xlu1 %1286 }
  0xbf   :  { %v1383_v18 = vpop.permute.xlu0 %1382  ;;  %1332 = vst.msk [vmem:[#allocation4 + $0x18] sm:$0xff] %vm1328_vm5, %v1287_v6  ;;  %v226_v6 = vsel %vm14880_vm8, 0, %v225_v26 }
  0xc0   :  { %1429 = vst.msk [vmem:[#allocation4 + $0x10] sm:$0xff] %vm1426_vm7, %v1383_v18  ;;  %1009 = vrot.lane.b32.xlu1 %v14353_v11, %s13621_s17  ;;  %v229_v18 = vsel %vm14880_vm8, 0, %v228_v13  ;;  %227 = vst [vmem:[#allocation3 + $0x128] sm:$0x80] %v226_v6 }
  0xc1   :  { %1104 = vrot.lane.b32.xlu0 %v14297_v2, %s13624_s26  ;;  %v5798_v2 = vor.u32 %v5796_v49, %v5795_v57  ;;  %230 = vst [vmem:[#allocation3 + $0x130] sm:$0x80] %v229_v18 }
  0xc2   :  { %v705_v28 = vpop.permute.xlu1 %704 }
  0xc3   :  { %v1385_v16 = vpop.permute.xlu0 %1384  ;;  %749 = vst.msk [vmem:[#allocation4 + $0x20] sm:$0xff] %vm744_vm12, %v705_v28  ;;  %v5877_v52 = vsel %vm13732_vm9, %v5798_v2, %v14301_v43  ;;  %v1165_v28 = vld [vmem:[#allocation2 + $0x88] sm:$0xff] }
  0xc4   :  { %1430 = vst.msk [vmem:[#allocation4 + $0x18] sm:$0xff] %vm1426_vm7, %v1385_v16  ;;  %1106 = vrot.lane.b32.xlu1 %v14386_v44, %s13624_s26  ;;  %5878 = vst [vmem:[#allocation2 + $0x60] sm:$0xff] %v5877_v52 }
  0xc5   :  { %1202 = vrot.lane.b32.xlu0 %v14301_v43, %s13625_s13 }
  0xc6   :  { %v707_v35 = vpop.permute.xlu1 %706 }
  0xc7   :  { %v802_v33 = vpop.permute.xlu0 %801  ;;  %v1445_v40 = vld [vmem:[#allocation4 + $0x10] sm:$0xff]  ;;  %750 = vst.msk [vmem:[#allocation4 + $0x28] sm:$0xff] %vm744_vm12, %v707_v35 }
  0xc8   :  { %846 = vst.msk [vmem:[#allocation4 + $0x20] sm:$0xff] %vm841_vm13, %v802_v33  ;;  %11959 = vmatprep.mubr.msk.bf16.mxu1 %vm1479_vm10, %v1445_v40  ;;  %1204 = vrot.lane.b32.xlu1 %v14327_v22, %s13625_s13  ;;  %v1263_v40 = vld [vmem:[#allocation2 + $0x118] sm:$0xff] }
  0xc9   :  { %1300 = vrot.lane.b32.xlu0 %v14353_v11, %s13626_s25 }
  0xca   :  { %v804_v43 = vpop.permute.xlu1 %803 }
  0xcb   :  { %v899_v49 = vpop.permute.xlu0 %898  ;;  %v1446_v56 = vld [vmem:[#allocation4 + $0x18] sm:$0xff]  ;;  %847 = vst.msk [vmem:[#allocation4 + $0x28] sm:$0xff] %vm841_vm13, %v804_v43 }
  0xcc   :  { %943 = vst.msk [vmem:[#allocation4 + $0x20] sm:$0xff] %vm938_vm14, %v899_v49  ;;  %11960 = vmatmul.mubr.msk.bf16.gmra.mrb[4].mxu1 %vm1479_vm10, %v1446_v56  ;;  %1302 = vrot.lane.b32.xlu1 %v14420_v47, %s13626_s25 }
  0xcd   :  { %1398 = vrot.lane.b32.xlu0 %v14386_v44, %s13627_s14 }
  0xce   :  { %v901_v9 = vpop.permute.xlu1 %900 }
  0xcf   :  { %v996_v54 = vpop.permute.xlu0 %995  ;;  %944 = vst.msk [vmem:[#allocation4 + $0x28] sm:$0xff] %vm938_vm14, %v901_v9 }
  0xd0   :  { %1040 = vst.msk [vmem:[#allocation4 + $0x20] sm:$0xff] %vm1035_vm15, %v996_v54  ;;  %720 = vrot.lane.b32.xlu1 %v14353_v11, %s13620_s23 }
  0xd1   :  { %1400 = vrot.lane.b32.xlu0 %v14461_v1, %s13627_s14 }
  0xd2   :  { %v998_v10 = vpop.permute.xlu1 %997 }
  0xd3   :  { %v1093_v3 = vpop.permute.xlu0 %1092  ;;  %1041 = vst.msk [vmem:[#allocation4 + $0x28] sm:$0xff] %vm1035_vm15, %v998_v10  ;;  %v234_v10 = vld [vmem:[#allocation3 + $0x140] sm:$0x80] }
  0xd4   :  { %1137 = vst.msk [vmem:[#allocation4 + $0x20] sm:$0xff] %vm1132_vm1, %v1093_v3  ;;  %722 = vrot.lane.b32.xlu1 %v14420_v47, %s13620_s23  ;;  %v177_v3 = vld [vmem:[#allocation3 + $0x20] sm:$0x1] }
  0xd5   :  { %817 = vrot.lane.b32.xlu0 %v14386_v44, %s13622_s29 }
  0xd6   :  { %v1095_v27 = vpop.permute.xlu1 %1094 }
  0xd7   :  { %v1191_v17 = vpop.permute.xlu0 %1190  ;;  %1138 = vst.msk [vmem:[#allocation4 + $0x28] sm:$0xff] %vm1132_vm1, %v1095_v27 }
  0xd8   :  { %1235 = vst.msk [vmem:[#allocation4 + $0x20] sm:$0xff] %vm1230_vm3, %v1191_v17  ;;  %819 = vrot.lane.b32.xlu1 %v14461_v1, %s13622_s29  ;;  %v174_v17 = vld [vmem:[#allocation3 + $0x18] sm:$0x1] }
  0xd9   :  { %914 = vrot.lane.b32.xlu0 %v14327_v22, %s13623_s15 }
  0xda   :  { %v1193_v46 = vpop.permute.xlu1 %1192 }
  0xdb   :  { %v1289_v11 = vpop.permute.xlu0 %1288  ;;  %1236 = vst.msk [vmem:[#allocation4 + $0x28] sm:$0xff] %vm1230_vm3, %v1193_v46 }
  0xdc   :  { %1333 = vst.msk [vmem:[#allocation4 + $0x20] sm:$0xff] %vm1328_vm5, %v1289_v11  ;;  %916 = vrot.lane.b32.xlu1 %v14410_v59, %s13623_s15  ;;  %v235_v11 = vsel %vm14880_vm8, 0, %v234_v10 }
  0xdd   :  { %1011 = vrot.lane.b32.xlu0 %v14420_v47, %s13621_s17  ;;  %v5809_v47 = vrot.slane %v5807_v7, 7  ;;  %236 = vst [vmem:[#allocation3 + $0x140] sm:$0x80] %v235_v11 }
  0xde   :  { %v1291_v32 = vpop.permute.xlu1 %1290 }
  0xdf   :  { %v1387_v44 = vpop.permute.xlu0 %1386  ;;  %1334 = vst.msk [vmem:[#allocation4 + $0x28] sm:$0xff] %vm1328_vm5, %v1291_v32 }
  0xe0   :  { %1431 = vst.msk [vmem:[#allocation4 + $0x20] sm:$0xff] %vm1426_vm7, %v1387_v44  ;;  %1013 = vrot.lane.b32.xlu1 %v14507_v37, %s13621_s17  ;;  %v231_v44 = vld [vmem:[#allocation3 + $0x138] sm:$0x80] }
  0xe1   :  { %1108 = vrot.lane.b32.xlu0 %v14461_v1, %s13624_s26  ;;  %v5812_v1 = vor.u32 %v5810_v30, %v5809_v47 }
  0xe2   :  { %v709_v14 = vpop.permute.xlu1 %708 }
  0xe3   :  { %v1389_v22 = vpop.permute.xlu0 %1388  ;;  %751 = vst.msk [vmem:[#allocation4 + $0x30] sm:$0xff] %vm744_vm12, %v709_v14  ;;  %v5883_v34 = vsel %vm13732_vm9, %v5812_v1, %v14410_v59  ;;  %vm163_vm9 = vcmask 1040384  }
  0xe4   :  { %1432 = vst.msk [vmem:[#allocation4 + $0x28] sm:$0xff] %vm1426_vm7, %v1389_v22  ;;  %1110 = vrot.lane.b32.xlu1 %v14549_v45, %s13624_s26  ;;  %5884 = vst [vmem:[#allocation2 + $0x70] sm:$0xff] %v5883_v34  ;;  %v232_v22 = vsel %vm14880_vm8, 0, %v231_v44 }
  0xe5   :  { %1206 = vrot.lane.b32.xlu0 %v14410_v59, %s13625_s13  ;;  %vm14873_vm0 = vmand %vm163_vm9, %vm42_vm4  ;;  %233 = vst [vmem:[#allocation3 + $0x138] sm:$0x80] %v232_v22  ;;  %vm2154_vm4 = vcmask 1047552  }
  0xe6   :  { %v711_v7 = vpop.permute.xlu1 %710  ;;  %v169_v61 = vsel %vm14873_vm0, 0, %v168_v62  ;;  %v178_v27 = vsel %vm14873_vm0, 0, %v177_v3  ;;  %v175_v46 = vsel %vm14873_vm0, 0, %v174_v17  ;;  %vm15445_vm11 = vmand %vm2154_vm4, %vm482_vm6  ;;  %vm18330_vm6 = vsmask.f32 7424 }
  0xe7   :  { %v806_v36 = vpop.permute.xlu0 %805  ;;  %v1447_v39 = vld [vmem:[#allocation4 + $0x20] sm:$0xff]  ;;  %752 = vst.msk [vmem:[#allocation4 + $0x38] sm:$0xff] %vm744_vm12, %v711_v7  ;;  %170 = vst [vmem:[#allocation3 + $0x8] sm:$0x1] %v169_v61 }
  0xe8   :  { %848 = vst.msk [vmem:[#allocation4 + $0x30] sm:$0xff] %vm841_vm13, %v806_v36  ;;  %11963 = vmatprep.mubr.msk.bf16.mxu1 %vm1479_vm10, %v1447_v39  ;;  %1208 = vrot.lane.b32.xlu1 %v14481_v23, %s13625_s13  ;;  %179 = vst [vmem:[#allocation3 + $0x20] sm:$0x1] %v178_v27 }
  0xe9   :  { %1304 = vrot.lane.b32.xlu0 %v14507_v37, %s13626_s25  ;;  %176 = vst [vmem:[#allocation3 + $0x18] sm:$0x1] %v175_v46  ;;  %vm15619_vm9 = vmand %vm2154_vm4, %vm18330_vm6 }
  0xea   :  { %v808_v38 = vpop.permute.xlu1 %807 }
  0xeb   :  { %v903_v30 = vpop.permute.xlu0 %902  ;;  %v1448_v25 = vld [vmem:[#allocation4 + $0x28] sm:$0xff]  ;;  %849 = vst.msk [vmem:[#allocation4 + $0x38] sm:$0xff] %vm841_vm13, %v808_v38 }
  0xec   :  { %945 = vst.msk [vmem:[#allocation4 + $0x30] sm:$0xff] %vm938_vm14, %v903_v30  ;;  %11964 = vmatmul.mubr.msk.bf16.gmra.mrb[8].mxu1 %vm1479_vm10, %v1448_v25  ;;  %1306 = vrot.lane.b32.xlu1 %v14570_v51, %s13626_s25 }
  0xed   :  { %1402 = vrot.lane.b32.xlu0 %v14549_v45, %s13627_s14 }
  0xee   :  { %v905_v59 = vpop.permute.xlu1 %904 }
  0xef   :  { %v1000_v24 = vpop.permute.xlu0 %999  ;;  %946 = vst.msk [vmem:[#allocation4 + $0x38] sm:$0xff] %vm938_vm14, %v905_v59 }
  0xf0   :  { %1042 = vst.msk [vmem:[#allocation4 + $0x30] sm:$0xff] %vm1035_vm15, %v1000_v24  ;;  %724 = vrot.lane.b32.xlu1 %v14507_v37, %s13620_s23 }
  0xf1   :  { %1404 = vrot.lane.b32.xlu0 %v14616_v15, %s13627_s14 }
  0xf2   :  { %v1002_v55 = vpop.permute.xlu1 %1001 }
  0xf3   :  { %v1097_v48 = vpop.permute.xlu0 %1096  ;;  %1043 = vst.msk [vmem:[#allocation4 + $0x38] sm:$0xff] %vm1035_vm15, %v1002_v55  ;;  %v183_v55 = vld [vmem:[#allocation3 + $0x30] sm:$0x1] }
  0xf4   :  { %1139 = vst.msk [vmem:[#allocation4 + $0x30] sm:$0xff] %vm1132_vm1, %v1097_v48  ;;  %726 = vrot.lane.b32.xlu1 %v14570_v51, %s13620_s23 }
  0xf5   :  { %821 = vrot.lane.b32.xlu0 %v14549_v45, %s13622_s29 }
  0xf6   :  { %v1099_v19 = vpop.permute.xlu1 %1098 }
  0xf7   :  { %v1195_v42 = vpop.permute.xlu0 %1194  ;;  %1140 = vst.msk [vmem:[#allocation4 + $0x38] sm:$0xff] %vm1132_vm1, %v1099_v19  ;;  %v180_v19 = vld [vmem:[#allocation3 + $0x28] sm:$0x1] }
  0xf8   :  { %1237 = vst.msk [vmem:[#allocation4 + $0x30] sm:$0xff] %vm1230_vm3, %v1195_v42  ;;  %823 = vrot.lane.b32.xlu1 %v14616_v15, %s13622_s29  ;;  %v240_v42 = vld [vmem:[#allocation3 + $0x150] sm:$0x80] }
  0xf9   :  { %918 = vrot.lane.b32.xlu0 %v14481_v23, %s13623_s15  ;;  %v171_v23 = vld [vmem:[#allocation3 + $0x10] sm:$0x1] }
  0xfa   :  { %v1197_v0 = vpop.permute.xlu1 %1196  ;;  %v172_v58 = vsel %vm14873_vm0, 0, %v171_v23 }
  0xfb   :  { %v1293_v37 = vpop.permute.xlu0 %1292  ;;  %1238 = vst.msk [vmem:[#allocation4 + $0x38] sm:$0xff] %vm1230_vm3, %v1197_v0  ;;  %173 = vst [vmem:[#allocation3 + $0x10] sm:$0x1] %v172_v58  ;;  %v241_v0 = vsel %vm14880_vm8, 0, %v240_v42  ;;  %v249_v42 = vld [vmem:[#allocation3 + $0x168] sm:$0x80] }
  0xfc   :  { %1335 = vst.msk [vmem:[#allocation4 + $0x30] sm:$0xff] %vm1328_vm5, %v1293_v37  ;;  %920 = vrot.lane.b32.xlu1 %v14640_v60, %s13623_s15  ;;  %v184_v37 = vsel %vm14873_vm0, 0, %v183_v55  ;;  %242 = vst [vmem:[#allocation3 + $0x150] sm:$0x80] %v241_v0 }
  0xfd   :  { %1015 = vrot.lane.b32.xlu0 %v14570_v51, %s13621_s17  ;;  %v18289_v51 = vmov 0  ;;  %185 = vst [vmem:[#allocation3 + $0x30] sm:$0x1] %v184_v37  ;;  %v250_v37 = vsel %vm14880_vm8, 0, %v249_v42 }
  0xfe   :  { %v1295_v5 = vpop.permute.xlu1 %1294  ;;  %v18290_v51 = vsel %vm14873_vm0, 4294967295, %v18289_v51  ;;  %251 = vst [vmem:[#allocation3 + $0x168] sm:$0x80] %v250_v37 }
  0xff   :  { %v1391_v45 = vpop.permute.xlu0 %1390  ;;  %1336 = vst.msk [vmem:[#allocation4 + $0x38] sm:$0xff] %vm1328_vm5, %v1295_v5  ;;  %18291 = vst [vmem:[#allocation6_spill] sm:$0xff] %v18290_v51  ;;  %v237_v5 = vld [vmem:[#allocation3 + $0x148] sm:$0x80] }
 0x100   :  { %1433 = vst.msk [vmem:[#allocation4 + $0x30] sm:$0xff] %vm1426_vm7, %v1391_v45  ;;  %1017 = vrot.lane.b32.xlu1 %v14620_v31, %s13621_s17  ;;  %v181_v45 = vsel %vm14873_vm0, 0, %v180_v19  ;;  %v238_v13 = vsel %vm14880_vm8, 0, %v237_v5 }
 0x101   :  { %1112 = vrot.lane.b32.xlu0 %v14616_v15, %s13624_s26  ;;  %182 = vst [vmem:[#allocation3 + $0x28] sm:$0x1] %v181_v45  ;;  %239 = vst [vmem:[#allocation3 + $0x148] sm:$0x80] %v238_v13  ;;  %v6418_v15 = vld [vmem:[#allocation2 + $0x1a0] sm:$0xff] }
 0x102   :  { %v713_v21 = vpop.permute.xlu1 %712 }
 0x103   :  { %v1393_v8 = vpop.permute.xlu0 %1392  ;;  %753 = vst.msk [vmem:[#allocation4 + $0x40] sm:$0xff] %vm744_vm12, %v713_v21 }
 0x104   :  { %1434 = vst.msk [vmem:[#allocation4 + $0x38] sm:$0xff] %vm1426_vm7, %v1393_v8  ;;  %1114 = vrot.lane.b32.xlu1 %v14646_v63, %s13624_s26 }
 0x105   :  { %1210 = vrot.lane.b32.xlu0 %v14640_v60, %s13625_s13 }
 0x106   :  { %v715_v2 = vpop.permute.xlu1 %714 }
 0x107   :  { %v810_v16 = vpop.permute.xlu0 %809  ;;  %v1449_v57 = vld [vmem:[#allocation4 + $0x30] sm:$0xff]  ;;  %754 = vst.msk [vmem:[#allocation4 + $0x48] sm:$0xff] %vm744_vm12, %v715_v2 }
 0x108   :  { %850 = vst.msk [vmem:[#allocation4 + $0x40] sm:$0xff] %vm841_vm13, %v810_v16  ;;  %11967 = vmatprep.mubr.msk.bf16.mxu1 %vm1479_vm10, %v1449_v57  ;;  %1212 = vrot.lane.b32.xlu1 %v1165_v28, %s13625_s13 }
 0x109   :  { %1308 = vrot.lane.b32.xlu0 %v14620_v31, %s13626_s25 }
 0x10a   :  { %v812_v35 = vpop.permute.xlu1 %811 }
 0x10b   :  { %v907_v60 = vpop.permute.xlu0 %906  ;;  %v1450_v33 = vld [vmem:[#allocation4 + $0x38] sm:$0xff]  ;;  %851 = vst.msk [vmem:[#allocation4 + $0x48] sm:$0xff] %vm841_vm13, %v812_v35 }
 0x10c   :  { %947 = vst.msk [vmem:[#allocation4 + $0x40] sm:$0xff] %vm938_vm14, %v907_v60  ;;  %11968 = vmatmul.mubr.msk.bf16.gmra.mrb[12].mxu1 %vm1479_vm10, %v1450_v33  ;;  %1310 = vrot.lane.b32.xlu1 %v1263_v40, %s13626_s25 }
 0x10d   :  { %1406 = vrot.lane.b32.xlu0 %v14646_v63, %s13627_s14 }
 0x10e   :  { %v909_v31 = vpop.permute.xlu1 %908 }
 0x10f   :  { %v1004_v52 = vpop.permute.xlu0 %1003  ;;  %948 = vst.msk [vmem:[#allocation4 + $0x48] sm:$0xff] %vm938_vm14, %v909_v31  ;;  %v246_v31 = vld [vmem:[#allocation3 + $0x160] sm:$0x80] }
 0x110   :  { %1044 = vst.msk [vmem:[#allocation4 + $0x40] sm:$0xff] %vm1035_vm15, %v1004_v52  ;;  %1408 = vrot.lane.b32.xlu1 %v1361_v29, %s13627_s14  ;;  %v189_v29 = vld [vmem:[#allocation3 + $0x40] sm:$0x1] }
 0x112   :  { %v1006_v49 = vpop.permute.xlu1 %1005 }
 0x113   :  { %v1101_v53 = vpop.permute.xlu0 %1100  ;;  %1045 = vst.msk [vmem:[#allocation4 + $0x48] sm:$0xff] %vm1035_vm15, %v1006_v49  ;;  %v190_v49 = vsel %vm14873_vm0, 0, %v189_v29 }
 0x114   :  { %1141 = vst.msk [vmem:[#allocation4 + $0x40] sm:$0xff] %vm1132_vm1, %v1101_v53  ;;  %v186_v53 = vld [vmem:[#allocation3 + $0x38] sm:$0x1]  ;;  %191 = vst [vmem:[#allocation3 + $0x40] sm:$0x1] %v190_v49 }
 0x115   :  { %v264_v49 = vld [vmem:[#allocation3 + $0x190] sm:$0x80] }
 0x116   :  { %v1103_v63 = vpop.permute.xlu1 %1102 }
 0x117   :  { %v1199_v56 = vpop.permute.xlu0 %1198  ;;  %1142 = vst.msk [vmem:[#allocation4 + $0x48] sm:$0xff] %vm1132_vm1, %v1103_v63  ;;  %v187_v63 = vsel %vm14873_vm0, 0, %v186_v53  ;;  %v207_v53 = vld [vmem:[#allocation3 + $0x70] sm:$0x1] }
 0x118   :  { %1239 = vst.msk [vmem:[#allocation4 + $0x40] sm:$0xff] %vm1230_vm3, %v1199_v56  ;;  %v247_v56 = vsel %vm14880_vm8, 0, %v246_v31  ;;  %188 = vst [vmem:[#allocation3 + $0x38] sm:$0x1] %v187_v63  ;;  %v208_v63 = vsel %vm14873_vm0, 0, %v207_v53 }
 0x119   :  { %248 = vst [vmem:[#allocation3 + $0x160] sm:$0x80] %v247_v56  ;;  %209 = vst [vmem:[#allocation3 + $0x70] sm:$0x1] %v208_v63 }
 0x11a   :  { %v1201_v4 = vpop.permute.xlu1 %1200 }
 0x11b   :  { %v1297_v43 = vpop.permute.xlu0 %1296  ;;  %1240 = vst.msk [vmem:[#allocation4 + $0x48] sm:$0xff] %vm1230_vm3, %v1201_v4 }
 0x11c   :  { %1337 = vst.msk [vmem:[#allocation4 + $0x40] sm:$0xff] %vm1328_vm5, %v1297_v43  ;;  %v243_v43 = vld [vmem:[#allocation3 + $0x158] sm:$0x80] }
 0x11e   :  { %v1299_v9 = vpop.permute.xlu1 %1298 }
 0x11f   :  { %v1395_v54 = vpop.permute.xlu0 %1394  ;;  %1338 = vst.msk [vmem:[#allocation4 + $0x48] sm:$0xff] %vm1328_vm5, %v1299_v9 }
 0x120   :  { %1435 = vst.msk [vmem:[#allocation4 + $0x40] sm:$0xff] %vm1426_vm7, %v1395_v54  ;;  %v244_v54 = vsel %vm14880_vm8, 0, %v243_v43  ;;  %v265_v43 = vsel %vm14880_vm8, 0, %v264_v49 }
 0x121   :  { %245 = vst [vmem:[#allocation3 + $0x158] sm:$0x80] %v244_v54  ;;  %266 = vst [vmem:[#allocation3 + $0x190] sm:$0x80] %v265_v43 }
 0x122   :  { %v717_v14 = vpop.permute.xlu1 %716 }
 0x123   :  { %v1397_v32 = vpop.permute.xlu0 %1396  ;;  %755 = vst.msk [vmem:[#allocation4 + $0x50] sm:$0xff] %vm744_vm12, %v717_v14 }
 0x124   :  { %1436 = vst.msk [vmem:[#allocation4 + $0x48] sm:$0xff] %vm1426_vm7, %v1397_v32 }
 0x126   :  { %v719_v1 = vpop.permute.xlu1 %718 }
 0x127   :  { %v814_v47 = vpop.permute.xlu0 %813  ;;  %v1451_v50 = vld [vmem:[#allocation4 + $0x40] sm:$0xff]  ;;  %756 = vst.msk [vmem:[#allocation4 + $0x58] sm:$0xff] %vm744_vm12, %v719_v1 }
 0x128   :  { %852 = vst.msk [vmem:[#allocation4 + $0x50] sm:$0xff] %vm841_vm13, %v814_v47  ;;  %11971 = vmatprep.mubr.msk.bf16.mxu1 %vm1479_vm10, %v1451_v50 }
 0x12a   :  { %v816_v20 = vpop.permute.xlu1 %815 }
 0x12b   :  { %v911_v36 = vpop.permute.xlu0 %910  ;;  %v1452_v39 = vld [vmem:[#allocation4 + $0x48] sm:$0xff]  ;;  %853 = vst.msk [vmem:[#allocation4 + $0x58] sm:$0xff] %vm841_vm13, %v816_v20 }
 0x12c   :  { %949 = vst.msk [vmem:[#allocation4 + $0x50] sm:$0xff] %vm938_vm14, %v911_v36  ;;  %11972 = vmatmul.mubr.msk.bf16.gmra.mrb[16].mxu1 %vm1479_vm10, %v1452_v39 }
 0x12e   :  { %v913_v7 = vpop.permute.xlu1 %912 }
 0x12f   :  { %v1008_v41 = vpop.permute.xlu0 %1007  ;;  %950 = vst.msk [vmem:[#allocation4 + $0x58] sm:$0xff] %vm938_vm14, %v913_v7 }
 0x130   :  { %1046 = vst.msk [vmem:[#allocation4 + $0x50] sm:$0xff] %vm1035_vm15, %v1008_v41 }
 0x132   :  { %v1010_v12 = vpop.permute.xlu1 %1009 }
 0x133   :  { %v1105_v34 = vpop.permute.xlu0 %1104  ;;  %1047 = vst.msk [vmem:[#allocation4 + $0x58] sm:$0xff] %vm1035_vm15, %v1010_v12  ;;  %v195_v12 = vld [vmem:[#allocation3 + $0x50] sm:$0x1] }
 0x134   :  { %1143 = vst.msk [vmem:[#allocation4 + $0x50] sm:$0xff] %vm1132_vm1, %v1105_v34 }
 0x136   :  { %v1107_v25 = vpop.permute.xlu1 %1106 }
 0x137   :  { %v1203_v30 = vpop.permute.xlu0 %1202  ;;  %1144 = vst.msk [vmem:[#allocation4 + $0x58] sm:$0xff] %vm1132_vm1, %v1107_v25 }
 0x138   :  { %1241 = vst.msk [vmem:[#allocation4 + $0x50] sm:$0xff] %vm1230_vm3, %v1203_v30  ;;  %v252_v30 = vld [vmem:[#allocation3 + $0x170] sm:$0x80] }
 0x13a   :  { %v1205_v24 = vpop.permute.xlu1 %1204 }
 0x13b   :  { %v1301_v38 = vpop.permute.xlu0 %1300  ;;  %1242 = vst.msk [vmem:[#allocation4 + $0x58] sm:$0xff] %vm1230_vm3, %v1205_v24  ;;  %v253_v24 = vsel %vm14880_vm8, 0, %v252_v30 }
 0x13c   :  { %1339 = vst.msk [vmem:[#allocation4 + $0x50] sm:$0xff] %vm1328_vm5, %v1301_v38  ;;  %v196_v38 = vsel %vm14873_vm0, 0, %v195_v12  ;;  %254 = vst [vmem:[#allocation3 + $0x170] sm:$0x80] %v253_v24 }
 0x13d   :  { %197 = vst [vmem:[#allocation3 + $0x50] sm:$0x1] %v196_v38 }
 0x13e   :  { %v1303_v48 = vpop.permute.xlu1 %1302 }
 0x13f   :  { %v1399_v59 = vpop.permute.xlu0 %1398  ;;  %1340 = vst.msk [vmem:[#allocation4 + $0x58] sm:$0xff] %vm1328_vm5, %v1303_v48 }
 0x140   :  { %1437 = vst.msk [vmem:[#allocation4 + $0x50] sm:$0xff] %vm1426_vm7, %v1399_v59  ;;  %v192_v59 = vld [vmem:[#allocation3 + $0x48] sm:$0x1] }
 0x141   :  { %v193_v55 = vsel %vm14873_vm0, 0, %v192_v59 }
 0x142   :  { %v721_v62 = vpop.permute.xlu1 %720  ;;  %194 = vst [vmem:[#allocation3 + $0x48] sm:$0x1] %v193_v55 }
 0x143   :  { %v1401_v23 = vpop.permute.xlu0 %1400  ;;  %757 = vst.msk [vmem:[#allocation4 + $0x60] sm:$0xff] %vm744_vm12, %v721_v62 }
 0x144   :  { %1438 = vst.msk [vmem:[#allocation4 + $0x58] sm:$0xff] %vm1426_vm7, %v1401_v23 }
 0x146   :  { %v723_v61 = vpop.permute.xlu1 %722 }
 0x147   :  { %v818_v8 = vpop.permute.xlu0 %817  ;;  %v1453_v58 = vld [vmem:[#allocation4 + $0x50] sm:$0xff]  ;;  %758 = vst.msk [vmem:[#allocation4 + $0x68] sm:$0xff] %vm744_vm12, %v723_v61 }
 0x148   :  { %854 = vst.msk [vmem:[#allocation4 + $0x60] sm:$0xff] %vm841_vm13, %v818_v8  ;;  %11975 = vmatprep.mubr.msk.bf16.mxu1 %vm1479_vm10, %v1453_v58  ;;  %v201_v61 = vld [vmem:[#allocation3 + $0x60] sm:$0x1] }
 0x14a   :  { %v820_v18 = vpop.permute.xlu1 %819 }
 0x14b   :  { %v915_v26 = vpop.permute.xlu0 %914  ;;  %v1454_v21 = vld [vmem:[#allocation4 + $0x58] sm:$0xff]  ;;  %855 = vst.msk [vmem:[#allocation4 + $0x68] sm:$0xff] %vm841_vm13, %v820_v18  ;;  %v202_v18 = vsel %vm14873_vm0, 0, %v201_v61 }
 0x14c   :  { %951 = vst.msk [vmem:[#allocation4 + $0x60] sm:$0xff] %vm938_vm14, %v915_v26  ;;  %11976 = vmatmul.mubr.msk.bf16.gmra.mrb[20].mxu1 %vm1479_vm10, %v1454_v21  ;;  %v258_v26 = vld [vmem:[#allocation3 + $0x180] sm:$0x80]  ;;  %203 = vst [vmem:[#allocation3 + $0x60] sm:$0x1] %v202_v18 }
 0x14e   :  { %v917_v16 = vpop.permute.xlu1 %916 }
 0x14f   :  { %v1012_v6 = vpop.permute.xlu0 %1011  ;;  %952 = vst.msk [vmem:[#allocation4 + $0x68] sm:$0xff] %vm938_vm14, %v917_v16  ;;  %v198_v16 = vld [vmem:[#allocation3 + $0x58] sm:$0x1] }
 0x150   :  { %1048 = vst.msk [vmem:[#allocation4 + $0x60] sm:$0xff] %vm1035_vm15, %v1012_v6  ;;  %v259_v6 = vsel %vm14880_vm8, 0, %v258_v26 }
 0x151   :  { %260 = vst [vmem:[#allocation3 + $0x180] sm:$0x80] %v259_v6 }
 0x152   :  { %v1014_v57 = vpop.permute.xlu1 %1013 }
 0x153   :  { %v1109_v28 = vpop.permute.xlu0 %1108  ;;  %1049 = vst.msk [vmem:[#allocation4 + $0x68] sm:$0xff] %vm1035_vm15, %v1014_v57  ;;  %v199_v57 = vsel %vm14873_vm0, 0, %v198_v16 }
 0x154   :  { %1145 = vst.msk [vmem:[#allocation4 + $0x60] sm:$0xff] %vm1132_vm1, %v1109_v28  ;;  %200 = vst [vmem:[#allocation3 + $0x58] sm:$0x1] %v199_v57 }
 0x156   :  { %v1111_v60 = vpop.permute.xlu1 %1110 }
 0x157   :  { %v1207_v2 = vpop.permute.xlu0 %1206  ;;  %1146 = vst.msk [vmem:[#allocation4 + $0x68] sm:$0xff] %vm1132_vm1, %v1111_v60 }
 0x158   :  { %1243 = vst.msk [vmem:[#allocation4 + $0x60] sm:$0xff] %vm1230_vm3, %v1207_v2  ;;  %v255_v2 = vld [vmem:[#allocation3 + $0x178] sm:$0x80] }
 0x159   :  { %v256_v60 = vsel %vm14880_vm8, 0, %v255_v2 }
 0x15a   :  { %v1209_v40 = vpop.permute.xlu1 %1208  ;;  %257 = vst [vmem:[#allocation3 + $0x178] sm:$0x80] %v256_v60 }
 0x15b   :  { %v1305_v33 = vpop.permute.xlu0 %1304  ;;  %1244 = vst.msk [vmem:[#allocation4 + $0x68] sm:$0xff] %vm1230_vm3, %v1209_v40 }
 0x15c   :  { %1341 = vst.msk [vmem:[#allocation4 + $0x60] sm:$0xff] %vm1328_vm5, %v1305_v33 }
 0x15e   :  { %v1307_v52 = vpop.permute.xlu1 %1306 }
 0x15f   :  { %v1403_v35 = vpop.permute.xlu0 %1402  ;;  %1342 = vst.msk [vmem:[#allocation4 + $0x68] sm:$0xff] %vm1328_vm5, %v1307_v52 }
 0x160   :  { %1439 = vst.msk [vmem:[#allocation4 + $0x60] sm:$0xff] %vm1426_vm7, %v1403_v35 }
 0x162   :  { %v725_v9 = vpop.permute.xlu1 %724 }
 0x163   :  { %v1405_v4 = vpop.permute.xlu0 %1404  ;;  %759 = vst.msk [vmem:[#allocation4 + $0x70] sm:$0xff] %vm744_vm12, %v725_v9 }
 0x164   :  { %1440 = vst.msk [vmem:[#allocation4 + $0x68] sm:$0xff] %vm1426_vm7, %v1405_v4  ;;  %v204_v4 = vld [vmem:[#allocation3 + $0x68] sm:$0x1] }
 0x165   :  { %v205_v9 = vsel %vm14873_vm0, 0, %v204_v4 }
 0x166   :  { %v727_v17 = vpop.permute.xlu1 %726  ;;  %206 = vst [vmem:[#allocation3 + $0x68] sm:$0x1] %v205_v9 }
 0x167   :  { %v1455_v3 = vld [vmem:[#allocation4 + $0x60] sm:$0xff]  ;;  %v822_v10 = vpop.permute.xlu0 %821  ;;  %760 = vst.msk [vmem:[#allocation4 + $0x78] sm:$0xff] %vm744_vm12, %v727_v17 }
 0x168   :  { %11979 = vmatprep.mubr.msk.bf16.mxu1 %vm1479_vm10, %v1455_v3  ;;  %856 = vst.msk [vmem:[#allocation4 + $0x70] sm:$0xff] %vm841_vm13, %v822_v10  ;;  %v261_v3 = vld [vmem:[#allocation3 + $0x188] sm:$0x80] }
 0x169   :  { %v262_v10 = vsel %vm14880_vm8, 0, %v261_v3 }
 0x16a   :  { %v824_v46 = vpop.permute.xlu1 %823  ;;  %263 = vst [vmem:[#allocation3 + $0x188] sm:$0x80] %v262_v10 }
 0x16b   :  { %v1456_v27 = vld [vmem:[#allocation4 + $0x68] sm:$0xff]  ;;  %v919_v11 = vpop.permute.xlu0 %918  ;;  %857 = vst.msk [vmem:[#allocation4 + $0x78] sm:$0xff] %vm841_vm13, %v824_v46 }
 0x16c   :  { %11980 = vmatmul.mubr.msk.bf16.gmra.mrb[24].mxu1 %vm1479_vm10, %v1456_v27  ;;  %953 = vst.msk [vmem:[#allocation4 + $0x70] sm:$0xff] %vm938_vm14, %v919_v11 }
 0x16e   :  { %v921_v32 = vpop.permute.xlu1 %920 }
 0x16f   :  { %v1016_v44 = vpop.permute.xlu0 %1015  ;;  %954 = vst.msk [vmem:[#allocation4 + $0x78] sm:$0xff] %vm938_vm14, %v921_v32 }
 0x170   :  { %1050 = vst.msk [vmem:[#allocation4 + $0x70] sm:$0xff] %vm1035_vm15, %v1016_v44 }
 0x172   :  { %v1018_v14 = vpop.permute.xlu1 %1017 }
 0x173   :  { %v1113_v22 = vpop.permute.xlu0 %1112  ;;  %1051 = vst.msk [vmem:[#allocation4 + $0x78] sm:$0xff] %vm1035_vm15, %v1018_v14  ;;  %v213_v14 = vld [vmem:[#allocation3 + $0x80] sm:$0x1] }
 0x174   :  { %1147 = vst.msk [vmem:[#allocation4 + $0x70] sm:$0xff] %vm1132_vm1, %v1113_v22 }
 0x176   :  { %v1115_v50 = vpop.permute.xlu1 %1114 }
 0x177   :  { %v1211_v47 = vpop.permute.xlu0 %1210  ;;  %1148 = vst.msk [vmem:[#allocation4 + $0x78] sm:$0xff] %vm1132_vm1, %v1115_v50 }
 0x178   :  { %1245 = vst.msk [vmem:[#allocation4 + $0x70] sm:$0xff] %vm1230_vm3, %v1211_v47  ;;  %v270_v47 = vld [vmem:[#allocation3 + $0x1a0] sm:$0x80] }
 0x17a   :  { %v1213_v36 = vpop.permute.xlu1 %1212 }
 0x17b   :  { %v1309_v1 = vpop.permute.xlu0 %1308  ;;  %1246 = vst.msk [vmem:[#allocation4 + $0x78] sm:$0xff] %vm1230_vm3, %v1213_v36  ;;  %v271_v36 = vsel %vm14880_vm8, 0, %v270_v47 }
 0x17c   :  { %1343 = vst.msk [vmem:[#allocation4 + $0x70] sm:$0xff] %vm1328_vm5, %v1309_v1  ;;  %v214_v1 = vsel %vm14873_vm0, 0, %v213_v14  ;;  %272 = vst [vmem:[#allocation3 + $0x1a0] sm:$0x80] %v271_v36  ;;  %v276_v36 = vlaneseq }
 0x17d   :  { %215 = vst [vmem:[#allocation3 + $0x80] sm:$0x1] %v214_v1 }
 0x17e   :  { %v1311_v41 = vpop.permute.xlu1 %1310 }
 0x17f   :  { %v14995_v39 = vpop.f32.mrb[0].mxu1  ;;  %v1407_v20 = vpop.permute.xlu0 %1406  ;;  %1344 = vst.msk [vmem:[#allocation4 + $0x78] sm:$0xff] %vm1328_vm5, %v1311_v41  ;;  %v267_v41 = vld [vmem:[#allocation3 + $0x198] sm:$0x80] }
 0x180   :  { %v14997_v7 = vpop.f32.mrb[1].mxu1  ;;  %1441 = vst.msk [vmem:[#allocation4 + $0x70] sm:$0xff] %vm1426_vm7, %v1407_v20  ;;  %v210_v20 = vld [vmem:[#allocation3 + $0x78] sm:$0x1]  ;;  %v268_v30 = vsel %vm14880_vm8, 0, %v267_v41  ;;  %v277_v41 = vand.u32 127, %v276_v36 }
 0x181   :  { %v15001_v34 = vpop.f32.mrb[2].mxu1  ;;  %v211_v12 = vsel %vm14873_vm0, 0, %v210_v20  ;;  %269 = vst [vmem:[#allocation3 + $0x198] sm:$0x80] %v268_v30 }
 0x182   :  { %v15003_v25 = vpop.f32.mrb[3].mxu1  ;;  %v1409_v19 = vpop.permute.xlu1 %1408  ;;  %212 = vst [vmem:[#allocation3 + $0x78] sm:$0x1] %v211_v12  ;;  %vm278_vm2 = vcmp.lt.s32.totalorder %v277_v41, 8 }
 0x183   :  { %v1693_v48 = vadd.f32 %v15003_v25, %v14997_v7  ;;  %1442 = vst.msk [vmem:[#allocation4 + $0x78] sm:$0xff] %vm1426_vm7, %v1409_v19 }
 0x185   :  { %v1694_v0 = vadd.f32 %v14995_v39, %v1693_v48 }
 0x187   :  { %v1457_v45 = vld [vmem:[#allocation4 + $0x70] sm:$0xff]  ;;  %v1695_v5 = vadd.f32 %v15001_v34, %v1694_v0 }
 0x188   :  { %11983 = vmatprep.mubr.msk.bf16.mxu1 %vm1479_vm10, %v1457_v45 }
 0x18a   :  { %v1458_v23 = vld [vmem:[#allocation4 + $0x78] sm:$0xff] }
 0x18b   :  { %11984 = vmatmul.mubr.msk.bf16.gmra.mrb[28].mxu1 %vm1479_vm10, %v1458_v23 }
 0x19f   :  { %v15020_v13 = vpop.f32.mrb[4].mxu1 }
 0x1a0   :  { %v15022_v62 = vpop.f32.mrb[5].mxu1 }
 0x1a1   :  { %v1696_v8 = vadd.f32 %v1695_v5, %v15022_v62  ;;  %v15025_v58 = vpop.f32.mrb[6].mxu1 }
 0x1a2   :  { %v15027_v21 = vpop.f32.mrb[7].mxu1 }
 0x1a3   :  { %v1697_v28 = vadd.f32 %v1696_v8, %v15027_v21 }
 0x1a5   :  { %v1698_v33 = vadd.f32 %v15020_v13, %v1697_v28 }
 0x1a7   :  { %v1699_v40 = vadd.f32 %v15025_v58, %v1698_v33 }
 0x1bf   :  { %v15040_v35 = vpop.f32.mrb[8].mxu1 }
 0x1c0   :  { %v15042_v52 = vpop.f32.mrb[9].mxu1 }
 0x1c1   :  { %v1700_v29 = vadd.f32 %v1699_v40, %v15042_v52  ;;  %v15045_v31 = vpop.f32.mrb[10].mxu1 }
 0x1c2   :  { %v15047_v56 = vpop.f32.mrb[11].mxu1 }
 0x1c3   :  { %v1701_v54 = vadd.f32 %v1700_v29, %v15047_v56 }
 0x1c5   :  { %v1702_v17 = vadd.f32 %v15040_v35, %v1701_v54 }
 0x1c7   :  { %v1703_v27 = vadd.f32 %v15045_v31, %v1702_v17 }
 0x1df   :  { %v15060_v11 = vpop.f32.mrb[12].mxu1 }
 0x1e0   :  { %v15062_v46 = vpop.f32.mrb[13].mxu1 }
 0x1e1   :  { %v1704_v44 = vadd.f32 %v1703_v27, %v15062_v46  ;;  %v15065_v32 = vpop.f32.mrb[14].mxu1 }
 0x1e2   :  { %v15067_v22 = vpop.f32.mrb[15].mxu1 }
 0x1e3   :  { %v1705_v50 = vadd.f32 %v1704_v44, %v15067_v22 }
 0x1e5   :  { %v1706_v38 = vadd.f32 %v15060_v11, %v1705_v50 }
 0x1e7   :  { %v1707_v24 = vadd.f32 %v15065_v32, %v1706_v38 }
 0x1ff   :  { %v15080_v59 = vpop.f32.mrb[16].mxu1 }
 0x200   :  { %v15082_v48 = vpop.f32.mrb[17].mxu1 }
 0x201   :  { %v1708_v55 = vadd.f32 %v1707_v24, %v15082_v48  ;;  %v15085_v42 = vpop.f32.mrb[18].mxu1 }
 0x202   :  { %v15087_v19 = vpop.f32.mrb[19].mxu1 }
 0x203   :  { %v1709_v37 = vadd.f32 %v1708_v55, %v15087_v19 }
 0x205   :  { %v1710_v0 = vadd.f32 %v15080_v59, %v1709_v37  ;;  %v13628_v37 = vmov 0.0  }
 0x207   :  { %v1711_v45 = vadd.f32 %v15085_v42, %v1710_v0  ;;  %v15137_v0 = vsel %vm278_vm2, 1.0, %v13628_v37  ;;  %vm18361_vm2 = vcmask 31744  }
 0x208   :  { %18294 = vst [vmem:[#allocation7_spill] sm:$0xff] %v15137_v0  ;;  %vm18362_vm4 = vmmov %vm18361_vm2 }
 0x209   :  { %vm18363_vm6 = vmmov %vm18361_vm2 }
 0x21f   :  { %v15092_v5 = vpop.f32.mrb[20].mxu1 }
 0x220   :  { %v15094_v23 = vpop.f32.mrb[21].mxu1 }
 0x221   :  { %v1712_v8 = vadd.f32 %v1711_v45, %v15094_v23  ;;  %v15097_v61 = vpop.f32.mrb[22].mxu1 }
 0x222   :  { %v15099_v26 = vpop.f32.mrb[23].mxu1 }
 0x223   :  { %v1713_v18 = vadd.f32 %v1712_v8, %v15099_v26 }
 0x225   :  { %v1714_v6 = vadd.f32 %v15092_v5, %v1713_v18 }
 0x227   :  { %v1715_v16 = vadd.f32 %v15097_v61, %v1714_v6 }
 0x23f   :  { %v15104_v28 = vpop.f32.mrb[24].mxu1 }
 0x240   :  { %v15106_v57 = vpop.f32.mrb[25].mxu1 }
 0x241   :  { %v1716_v2 = vadd.f32 %v1715_v16, %v15106_v57  ;;  %v15109_v60 = vpop.f32.mrb[26].mxu1 }
 0x242   :  { %v15111_v33 = vpop.f32.mrb[27].mxu1 }
 0x243   :  { %v1717_v40 = vadd.f32 %v1716_v2, %v15111_v33 }
 0x245   :  { %v1718_v29 = vadd.f32 %v15104_v28, %v1717_v40 }
 0x247   :  { %v1719_v53 = vadd.f32 %v15109_v60, %v1718_v29 }
 0x25e   :  { %v15116_v49 = vpop.f32.mrb[28].mxu1 }
 0x25f   :  { %v15118_v63 = vpop.f32.mrb[29].mxu1 }
 0x260   :  { %v1720_v43 = vadd.f32 %v1719_v53, %v15118_v63  ;;  %v15121_v4 = vpop.f32.mrb[30].mxu1 }
 0x261   :  { %v15123_v54 = vpop.f32.mrb[31].mxu1 }
 0x262   :  { %v1721_v9 = vadd.f32 %v1720_v43, %v15123_v54 }
 0x264   :  { %v1722_v3 = vadd.f32 %v15116_v49, %v1721_v9 }
 0x266   :  { %v1723_v10 = vadd.f32 %v15121_v4, %v1722_v3 }
 0x268   :  { %1724 = vadd.xlane.f32.xlu0 %v1723_v10 }
 0x2f5   :  { %v1725_v17 = vpop.xlane.xlu0 %1724 }
 0x2f6   :  { %v1726_v27 = vrot.slane %v1725_v17, 4 }
 0x2f8   :  { %v1727_v44 = vadd.f32 %v1726_v27, %v1725_v17 }
 0x2fa   :  { %v1728_v14 = vrot.slane %v1727_v44, 2 }
 0x2fc   :  { %v1729_v47 = vadd.f32 %v1728_v14, %v1727_v44 }
 0x2fe   :  { %v1730_v50 = vrot.slane %v1729_v47, 1 }
 0x300   :  { %v1731_v1 = vadd.f32 %v1730_v50, %v1729_v47 }
 0x302   :  { %13403 = vpush %v1731_v1 }
 0x333   :  { %s13404_s0 = spop %13403 }
 0x334   :  { %s1733_s10 = smul.f32 0.00048828125, %s13404_s0 }
 0x336   :  { %v15128_v20 = vstv %s1733_s10 }
 0x337   :  { %v1735_v12 = vsub.f32 %v14997_v7, %v15128_v20  ;;  %v1736_v30 = vsub.f32 %v15003_v25, %v15128_v20  ;;  %v1737_v38 = vsub.f32 %v14995_v39, %v15128_v20  ;;  %v1738_v45 = vsub.f32 %v15001_v34, %v15128_v20 }
 0x338   :  { %v1739_v8 = vsub.f32 %v15022_v62, %v15128_v20  ;;  %v1740_v2 = vsub.f32 %v15027_v21, %v15128_v20  ;;  %v1741_v29 = vsub.f32 %v15020_v13, %v15128_v20  ;;  %v1742_v3 = vsub.f32 %v15025_v58, %v15128_v20 }
 0x339   :  { %v1767_v24 = vmul.f32 %v1735_v12, %v1735_v12  ;;  %v1768_v55 = vmul.f32 %v1736_v30, %v1736_v30  ;;  %v1769_v18 = vmul.f32 %v1737_v38, %v1737_v38  ;;  %v1770_v40 = vmul.f32 %v1738_v45, %v1738_v45 }
 0x33a   :  { %v1771_v53 = vmul.f32 %v1739_v8, %v1739_v8  ;;  %v1772_v10 = vmul.f32 %v1740_v2, %v1740_v2  ;;  %v1743_v44 = vsub.f32 %v15042_v52, %v15128_v20  ;;  %v1773_v14 = vmul.f32 %v1741_v29, %v1741_v29 }
 0x33b   :  { %v1799_v6 = vmul.f32 %v15137_v0, %v1767_v24  ;;  %v1800_v16 = vmul.f32 %v15137_v0, %v1768_v55  ;;  %v1801_v43 = vmul.f32 %v15137_v0, %v1769_v18  ;;  %v1802_v17 = vmul.f32 %v15137_v0, %v1770_v40 }
 0x33c   :  { %v1803_v47 = vmul.f32 %v15137_v0, %v1771_v53  ;;  %v1744_v1 = vsub.f32 %v15047_v56, %v15128_v20  ;;  %v1774_v41 = vmul.f32 %v1742_v3, %v1742_v3  ;;  %v1804_v12 = vmul.f32 %v15137_v0, %v1772_v10 }
 0x33d   :  { %v1831_v9 = vadd.f32 %v1800_v16, %v1799_v6  ;;  %v1745_v38 = vsub.f32 %v15040_v35, %v15128_v20  ;;  %v1775_v24 = vmul.f32 %v1743_v44, %v1743_v44  ;;  %v1805_v55 = vmul.f32 %v15137_v0, %v1773_v14 }
 0x33e   :  { %v1746_v45 = vsub.f32 %v15045_v31, %v15128_v20  ;;  %v1776_v8 = vmul.f32 %v1744_v1, %v1744_v1  ;;  %v1806_v18 = vmul.f32 %v15137_v0, %v1774_v41  ;;  %v1747_v16 = vsub.f32 %v15062_v46, %v15128_v20 }
 0x33f   :  { %v1832_v27 = vadd.f32 %v1831_v9, %v1801_v43  ;;  %v1777_v2 = vmul.f32 %v1745_v38, %v1745_v38  ;;  %v1807_v40 = vmul.f32 %v15137_v0, %v1775_v24  ;;  %v1748_v53 = vsub.f32 %v15067_v22, %v15128_v20 }
 0x340   :  { %v1778_v43 = vmul.f32 %v1746_v45, %v1746_v45  ;;  %v1808_v9 = vmul.f32 %v15137_v0, %v1776_v8  ;;  %v1749_v10 = vsub.f32 %v15060_v11, %v15128_v20  ;;  %v1750_v14 = vsub.f32 %v15065_v32, %v15128_v20 }
 0x341   :  { %v1833_v50 = vadd.f32 %v1832_v27, %v1802_v17  ;;  %v1779_v17 = vmul.f32 %v1747_v16, %v1747_v16  ;;  %v1809_v27 = vmul.f32 %v15137_v0, %v1777_v2  ;;  %v1751_v41 = vsub.f32 %v15082_v48, %v15128_v20 }
 0x342   :  { %v1752_v24 = vsub.f32 %v15087_v19, %v15128_v20  ;;  %v1753_v8 = vsub.f32 %v15080_v59, %v15128_v20  ;;  %v1754_v2 = vsub.f32 %v15085_v42, %v15128_v20 }
 0x343   :  { %v1834_v30 = vadd.f32 %v1833_v50, %v1803_v47  ;;  %v1780_v47 = vmul.f32 %v1748_v53, %v1748_v53  ;;  %v1810_v50 = vmul.f32 %v15137_v0, %v1778_v43  ;;  %v1755_v43 = vsub.f32 %v15094_v23, %v15128_v20 }
 0x345   :  { %v1835_v37 = vadd.f32 %v1834_v30, %v1804_v12  ;;  %v1781_v12 = vmul.f32 %v1749_v10, %v1749_v10  ;;  %v1811_v30 = vmul.f32 %v15137_v0, %v1779_v17  ;;  %v1756_v17 = vsub.f32 %v15099_v26, %v15128_v20 }
 0x347   :  { %v1836_v6 = vadd.f32 %v1835_v37, %v1805_v55  ;;  %v1782_v55 = vmul.f32 %v1750_v14, %v1750_v14  ;;  %v1812_v37 = vmul.f32 %v15137_v0, %v1780_v47  ;;  %v1757_v47 = vsub.f32 %v15092_v5, %v15128_v20 }
 0x349   :  { %v1837_v29 = vadd.f32 %v1836_v6, %v1806_v18  ;;  %v1783_v18 = vmul.f32 %v1751_v41, %v1751_v41  ;;  %v1813_v6 = vmul.f32 %v15137_v0, %v1781_v12  ;;  %v1758_v12 = vsub.f32 %v15097_v61, %v15128_v20 }
 0x34b   :  { %v1838_v3 = vadd.f32 %v1837_v29, %v1807_v40  ;;  %v1784_v40 = vmul.f32 %v1752_v24, %v1752_v24  ;;  %v1814_v29 = vmul.f32 %v15137_v0, %v1782_v55  ;;  %v1759_v55 = vsub.f32 %v15106_v57, %v15128_v20 }
 0x34d   :  { %v1839_v44 = vadd.f32 %v1838_v3, %v1808_v9  ;;  %v1785_v9 = vmul.f32 %v1753_v8, %v1753_v8  ;;  %v1815_v3 = vmul.f32 %v15137_v0, %v1783_v18  ;;  %v1760_v18 = vsub.f32 %v15111_v33, %v15128_v20 }
 0x34f   :  { %v1840_v1 = vadd.f32 %v1839_v44, %v1809_v27  ;;  %v1786_v27 = vmul.f32 %v1754_v2, %v1754_v2  ;;  %v1816_v44 = vmul.f32 %v15137_v0, %v1784_v40  ;;  %v1761_v40 = vsub.f32 %v15104_v28, %v15128_v20 }
 0x351   :  { %v1841_v38 = vadd.f32 %v1840_v1, %v1810_v50  ;;  %v1787_v50 = vmul.f32 %v1755_v43, %v1755_v43  ;;  %v1817_v1 = vmul.f32 %v15137_v0, %v1785_v9  ;;  %v1762_v9 = vsub.f32 %v15109_v60, %v15128_v20 }
 0x353   :  { %v1842_v45 = vadd.f32 %v1841_v38, %v1811_v30  ;;  %v1788_v30 = vmul.f32 %v1756_v17, %v1756_v17  ;;  %v1818_v38 = vmul.f32 %v15137_v0, %v1786_v27  ;;  %v1763_v27 = vsub.f32 %v15118_v63, %v15128_v20 }
 0x355   :  { %v1843_v16 = vadd.f32 %v1842_v45, %v1812_v37  ;;  %v1789_v37 = vmul.f32 %v1757_v47, %v1757_v47  ;;  %v1819_v45 = vmul.f32 %v15137_v0, %v1787_v50  ;;  %v1764_v50 = vsub.f32 %v15123_v54, %v15128_v20 }
 0x357   :  { %v1844_v53 = vadd.f32 %v1843_v16, %v1813_v6  ;;  %v1790_v6 = vmul.f32 %v1758_v12, %v1758_v12  ;;  %v1820_v16 = vmul.f32 %v15137_v0, %v1788_v30  ;;  %v1765_v30 = vsub.f32 %v15116_v49, %v15128_v20 }
 0x359   :  { %v1845_v10 = vadd.f32 %v1844_v53, %v1814_v29  ;;  %v1791_v29 = vmul.f32 %v1759_v55, %v1759_v55  ;;  %v1821_v53 = vmul.f32 %v15137_v0, %v1789_v37  ;;  %v1766_v37 = vsub.f32 %v15121_v4, %v15128_v20 }
 0x35b   :  { %v1846_v14 = vadd.f32 %v1845_v10, %v1815_v3  ;;  %v1792_v3 = vmul.f32 %v1760_v18, %v1760_v18  ;;  %v1822_v10 = vmul.f32 %v15137_v0, %v1790_v6  ;;  %v1797_v6 = vmul.f32 %v1765_v30, %v1765_v30 }
 0x35d   :  { %v1847_v41 = vadd.f32 %v1846_v14, %v1816_v44  ;;  %v1793_v44 = vmul.f32 %v1761_v40, %v1761_v40  ;;  %v1823_v14 = vmul.f32 %v15137_v0, %v1791_v29  ;;  %v1798_v40 = vmul.f32 %v1766_v37, %v1766_v37  ;;  %v13445_v37 = vld [vmem:[%s18123_s2 + $0x28] sm:$0xff]  }
 0x35f   :  { %v1848_v24 = vadd.f32 %v1847_v41, %v1817_v1  ;;  %v1794_v1 = vmul.f32 %v1762_v9, %v1762_v9  ;;  %v1824_v41 = vmul.f32 %v15137_v0, %v1792_v3  ;;  %v1830_v3 = vmul.f32 %v15137_v0, %v1798_v40  ;;  %v15258_v40 = vld [vmem:[%s18123_s2 + $0x40] sm:$0xff]  }
 0x361   :  { %v1849_v8 = vadd.f32 %v1848_v24, %v1818_v38  ;;  %v1795_v38 = vmul.f32 %v1763_v27, %v1763_v27  ;;  %v1825_v24 = vmul.f32 %v15137_v0, %v1793_v44  ;;  %v13440_v27 = vld [vmem:[%s18123_s2] sm:$0xff]   ;;  %v13441_v44 = vld [vmem:[%s18123_s2 + $0x8] sm:$0xff]  }
 0x362   :  { %11987 = vmatprep.subr.bf16.mxu1 %v13440_v27 }
 0x363   :  { %v1850_v2 = vadd.f32 %v1849_v8, %v1819_v45  ;;  %v1796_v45 = vmul.f32 %v1764_v50, %v1764_v50  ;;  %v1826_v8 = vmul.f32 %v15137_v0, %v1794_v1  ;;  %11988 = vmatpush3.bf16.msra.mxu1 %v13440_v27  ;;  %v13444_v50 = vld [vmem:[%s18123_s2 + $0x20] sm:$0xff]  }
 0x364   :  { %11989 = vmatprep.subr.bf16.mxu1 %v13441_v44 }
 0x365   :  { %v1851_v43 = vadd.f32 %v1850_v2, %v1820_v16  ;;  %v1827_v16 = vmul.f32 %v15137_v0, %v1795_v38  ;;  %v1828_v29 = vmul.f32 %v15137_v0, %v1796_v45  ;;  %v165_v45 = vld [vmem:[#allocation3] sm:$0x1] }
 0x367   :  { %v1852_v17 = vadd.f32 %v1851_v43, %v1821_v53  ;;  %v1829_v43 = vmul.f32 %v15137_v0, %v1797_v6  ;;  %11990 = vmatpush3.bf16.msra.mxu1 %v13441_v44  ;;  %v13447_v6 = vld [vmem:[%s18123_s2 + $0x38] sm:$0xff]   ;;  %v286_v44 = vld [vmem:[%s18127_s8] sm:$0x1] }
 0x369   :  { %v1853_v47 = vadd.f32 %v1852_v17, %v1822_v10 }
 0x36b   :  { %v1854_v12 = vadd.f32 %v1853_v47, %v1823_v14  ;;  %v13442_v14 = vld [vmem:[%s18123_s2 + $0x10] sm:$0xff]   ;;  %v13443_v47 = vld [vmem:[%s18123_s2 + $0x18] sm:$0xff]  }
 0x36c   :  { %11991 = vmatprep.subr.bf16.mxu1 %v13442_v14 }
 0x36d   :  { %v1855_v55 = vadd.f32 %v1854_v12, %v1824_v41  ;;  %11992 = vmatpush3.bf16.msra.mxu1 %v13442_v14 }
 0x36e   :  { %11993 = vmatprep.subr.bf16.mxu1 %v13443_v47 }
 0x36f   :  { %v1856_v18 = vadd.f32 %v1855_v55, %v1825_v24 }
 0x371   :  { %v1857_v2 = vadd.f32 %v1856_v18, %v1826_v8  ;;  %11994 = vmatpush3.bf16.msra.mxu1 %v13443_v47  ;;  %v13446_v8 = vld [vmem:[%s18123_s2 + $0x30] sm:$0xff]   ;;  %v166_v18 = vsel %vm14873_vm0, 0, %v165_v45 }
 0x372   :  { %11995 = vmatprep.subr.bf16.mxu1 %v13444_v50  ;;  %167 = vst [vmem:[#allocation3] sm:$0x1] %v166_v18 }
 0x373   :  { %v1858_v53 = vadd.f32 %v1857_v2, %v1827_v16 }
 0x375   :  { %v1859_v9 = vadd.f32 %v1858_v53, %v1828_v29  ;;  %11996 = vmatpush3.bf16.msra.mxu1 %v13444_v50  ;;  %v285_v53 = vld [vmem:[%s18124_s7] sm:$0x1] }
 0x376   :  { %11997 = vmatprep.subr.bf16.mxu1 %v13445_v37 }
 0x377   :  { %v1860_v10 = vadd.f32 %v1859_v9, %v1829_v43  ;;  %v15264_v43 = vadd.f32 1.0, %v285_v53  ;;  %v281_v9 = vld [vmem:[%s18125_s3] sm:$0x1] }
 0x379   :  { %v1861_v17 = vadd.f32 %v1860_v10, %v1830_v3  ;;  %11998 = vmatpush3.bf16.msra.mxu1 %v13445_v37  ;;  %v2302_v16 = vld [vmem:[#allocation3] sm:$0xff]  ;;  %18295 = vst [vmem:[#allocation8_spill] sm:$0xff] %v15264_v43  ;;  %v282_v3 = vld [vmem:[%s18126_s4] sm:$0x1]  ;;  %v1886_v10 = vshrl.u32 %v276_v36, 7 }
 0x37a   :  { %11999 = vmatprep.subr.bf16.mxu1 %v13446_v8  ;;  %12003 = vmatprep.mubr.bf16.mxu1 %v2302_v16  ;;  %v1880_v27 = vmul.f32 %v15264_v43, %v282_v3 }
 0x37b   :  { %1862 = vadd.xlane.f32.xlu1 %v1861_v17  ;;  %v1877_v17 = vmul.f32 %v15264_v43, %v281_v9  ;;  %v15278_v14 = vsub.s32 0, %v1886_v10  ;;  %v2272_v43 = vld [vmem:[#allocation3 + $0x158] sm:$0xff] }
 0x37d   :  { %12000 = vmatpush3.bf16.msra.mxu1 %v13446_v8  ;;  %18296 = vst [vmem:[#allocation9_spill] sm:$0xff] %v15278_v14 }
 0x37e   :  { %12001 = vmatprep.subr.bf16.mxu1 %v13447_v6 }
 0x381   :  { %12002 = vmatpush3.bf16.msra.mxu1 %v13447_v6 }
 0x382   :  { %12035 = vmatprep.subr.bf16.mxu1 %v15258_v40 }
 0x408   :  { %v1863_v1 = vpop.xlane.xlu1 %1862 }
 0x409   :  { %v1864_v41 = vrot.slane %v1863_v1, 4 }
 0x40b   :  { %v1865_v12 = vadd.f32 %v1864_v41, %v1863_v1  ;;  %v1881_v1 = vadd.f32 %v1880_v27, %v286_v44 }
 0x40d   :  { %v1866_v30 = vrot.slane %v1865_v12, 2 }
 0x40f   :  { %v1867_v38 = vadd.f32 %v1866_v30, %v1865_v12 }
 0x411   :  { %v1868_v24 = vrot.slane %v1867_v38, 1 }
 0x413   :  { %v1869_v55 = vadd.f32 %v1868_v24, %v1867_v38 }
 0x415   :  { %13405 = vpush %v1869_v55 }
 0x446   :  { %s13406_s16 = spop %13405 }
 0x447   :  { %s1871_s18 = smul.f32 0.00048828125, %s13406_s16 }
 0x449   :  { %s1872_s19 = sadd.f32 1e-05, %s1871_s18 }
 0x44b   :  { %v1873_v2 = vstv %s1872_s19 }
 0x44c   :  { %13587 = vrsqrt.f32 %v1873_v2 }
 0x456   :  { %v13588_v29 = vpop.eup %13587 }
 0x457   :  { %13407 = vpush %v13588_v29 }
 0x488   :  { %s13408_s12 = spop %13407 }
 0x489   :  { %v1878_v47 = vstv %s13408_s12 }
 0x48a   :  { %v1879_v50 = vmul.f32 %v1878_v47, %v1877_v17 }
 0x48c   :  { %v1882_v41 = vmul.f32 %v1879_v50, %v15128_v20  ;;  %v1888_v12 = vrot.slane %v1879_v50, %v15278_v14 }
 0x48e   :  { %v1883_v30 = vsub.f32 %v1881_v1, %v1882_v41  ;;  %v1890_v36 = vmul.f32 %v1888_v12, %v14997_v7  ;;  %v1891_v38 = vmul.f32 %v1888_v12, %v15003_v25  ;;  %v1892_v24 = vmul.f32 %v14995_v39, %v1888_v12 }
 0x48f   :  { %v1893_v55 = vmul.f32 %v15001_v34, %v1888_v12  ;;  %v1894_v37 = vmul.f32 %v1888_v12, %v15022_v62  ;;  %v1895_v45 = vmul.f32 %v1888_v12, %v15027_v21  ;;  %v1896_v8 = vmul.f32 %v15020_v13, %v1888_v12 }
 0x490   :  { %v1926_v18 = vrot.slane %v1883_v30, %v15278_v14  ;;  %v1897_v20 = vmul.f32 %v15025_v58, %v1888_v12  ;;  %v1898_v6 = vmul.f32 %v1888_v12, %v15042_v52  ;;  %v1899_v7 = vmul.f32 %v1888_v12, %v15047_v56  ;;  %v2275_v14 = vld [vmem:[#allocation3 + $0x160] sm:$0xff] }
 0x491   :  { %v1900_v25 = vmul.f32 %v15040_v35, %v1888_v12  ;;  %v1901_v39 = vmul.f32 %v15045_v31, %v1888_v12  ;;  %v1902_v34 = vmul.f32 %v1888_v12, %v15062_v46  ;;  %v1903_v62 = vmul.f32 %v1888_v12, %v15067_v22 }
 0x492   :  { %v1904_v21 = vmul.f32 %v15060_v11, %v1888_v12  ;;  %v1905_v13 = vmul.f32 %v15065_v32, %v1888_v12  ;;  %v1906_v16 = vmul.f32 %v1888_v12, %v15082_v48  ;;  %v1907_v58 = vmul.f32 %v1888_v12, %v15087_v19 }
 0x493   :  { %v1908_v52 = vmul.f32 %v15080_v59, %v1888_v12  ;;  %v1909_v56 = vmul.f32 %v15085_v42, %v1888_v12  ;;  %v1910_v35 = vmul.f32 %v1888_v12, %v15094_v23  ;;  %v1911_v31 = vmul.f32 %v1888_v12, %v15099_v26 }
 0x494   :  { %v1912_v46 = vmul.f32 %v15092_v5, %v1888_v12  ;;  %v1913_v22 = vmul.f32 %v15097_v61, %v1888_v12  ;;  %v1914_v11 = vmul.f32 %v1888_v12, %v15106_v57  ;;  %v1915_v32 = vmul.f32 %v1888_v12, %v15111_v33 }
 0x495   :  { %v1916_v48 = vmul.f32 %v15104_v28, %v1888_v12  ;;  %v1917_v19 = vmul.f32 %v15109_v60, %v1888_v12  ;;  %v1918_v59 = vmul.f32 %v1888_v12, %v15118_v63  ;;  %v1919_v42 = vmul.f32 %v1888_v12, %v15123_v54 }
 0x496   :  { %v1920_v23 = vmul.f32 %v15116_v49, %v1888_v12  ;;  %v1921_v26 = vmul.f32 %v15121_v4, %v1888_v12  ;;  %v15315_v2 = vadd.f32 %v1926_v18, %v1890_v36  ;;  %v15317_v5 = vadd.f32 %v1926_v18, %v1891_v38 }
 0x497   :  { %v15319_v61 = vadd.f32 %v1926_v18, %v1892_v24  ;;  %v15321_v57 = vadd.f32 %v1926_v18, %v1893_v55  ;;  %v15323_v33 = vadd.f32 %v1926_v18, %v1894_v37  ;;  %v1933_v28 = vadd.f32 %v1926_v18, %v1895_v45 }
 0x498   :  { %v1934_v60 = vadd.f32 %v1926_v18, %v1896_v8  ;;  %v1935_v29 = vadd.f32 %v1926_v18, %v1897_v20  ;;  %v1936_v63 = vadd.f32 %v1926_v18, %v1898_v6  ;;  %v1937_v53 = vadd.f32 %v1926_v18, %v1899_v7 }
 0x499   :  { %v1938_v54 = vadd.f32 %v1926_v18, %v1900_v25  ;;  %v1939_v9 = vadd.f32 %v1926_v18, %v1901_v39  ;;  %v1940_v49 = vadd.f32 %v1926_v18, %v1902_v34  ;;  %v1941_v3 = vadd.f32 %v1926_v18, %v1903_v62 }
 0x49a   :  { %v1942_v4 = vadd.f32 %v1926_v18, %v1904_v21  ;;  %v1943_v10 = vadd.f32 %v1926_v18, %v1905_v13  ;;  %v1944_v17 = vadd.f32 %v1926_v18, %v1906_v16  ;;  %v1945_v27 = vadd.f32 %v1926_v18, %v1907_v58 }
 0x49b   :  { %v1946_v44 = vadd.f32 %v1926_v18, %v1908_v52  ;;  %v1947_v47 = vadd.f32 %v1926_v18, %v1909_v56  ;;  %v1948_v50 = vadd.f32 %v1926_v18, %v1910_v35  ;;  %v1949_v1 = vadd.f32 %v1926_v18, %v1911_v31 }
 0x49c   :  { %v1950_v41 = vadd.f32 %v1926_v18, %v1912_v46  ;;  %v1951_v12 = vadd.f32 %v1926_v18, %v1913_v22  ;;  %v1952_v30 = vadd.f32 %v1926_v18, %v1914_v11  ;;  %v1953_v36 = vadd.f32 %v1926_v18, %v1915_v32 }
 0x49d   :  { %v1954_v38 = vadd.f32 %v1926_v18, %v1916_v48  ;;  %v1955_v24 = vadd.f32 %v1926_v18, %v1917_v19  ;;  %v1956_v55 = vadd.f32 %v1926_v18, %v1918_v59  ;;  %v1957_v37 = vadd.f32 %v1926_v18, %v1919_v42 }
 0x49e   :  { %v1958_v45 = vadd.f32 %v1926_v18, %v1920_v23  ;;  %v1959_v8 = vadd.f32 %v1926_v18, %v1921_v26  ;;  %v1960_v20 = vmax.f32 %v15315_v2, 0.0  ;;  %v1961_v6 = vmax.f32 %v15317_v5, 0.0 }
 0x49f   :  { %v1962_v7 = vmax.f32 %v15319_v61, 0.0  ;;  %v1963_v25 = vmax.f32 %v15321_v57, 0.0  ;;  %v1964_v39 = vmax.f32 %v15323_v33, 0.0  ;;  %v1965_v34 = vmax.f32 %v1933_v28, 0.0 }
 0x4a0   :  { %v1966_v62 = vmax.f32 %v1934_v60, 0.0  ;;  %v1967_v21 = vmax.f32 %v1935_v29, 0.0  ;;  %v1968_v13 = vmax.f32 %v1936_v63, 0.0  ;;  %v1969_v16 = vmax.f32 %v1937_v53, 0.0 }
 0x4a1   :  { %v1970_v58 = vmax.f32 %v1938_v54, 0.0  ;;  %v1971_v52 = vmax.f32 %v1939_v9, 0.0  ;;  %v1972_v56 = vmax.f32 %v1940_v49, 0.0  ;;  %v1973_v35 = vmax.f32 %v1941_v3, 0.0 }
 0x4a2   :  { %v1974_v18 = vmax.f32 %v1942_v4, 0.0  ;;  %v1975_v31 = vmax.f32 %v1943_v10, 0.0  ;;  %v1976_v46 = vmax.f32 %v1944_v17, 0.0  ;;  %v1977_v22 = vmax.f32 %v1945_v27, 0.0 }
 0x4a3   :  { %v1978_v11 = vmax.f32 %v1946_v44, 0.0  ;;  %v1979_v32 = vmax.f32 %v1947_v47, 0.0  ;;  %v1980_v48 = vmax.f32 %v1948_v50, 0.0  ;;  %v1981_v19 = vmax.f32 %v1949_v1, 0.0 }
 0x4a4   :  { %v1982_v59 = vmax.f32 %v1950_v41, 0.0  ;;  %v1983_v42 = vmax.f32 %v1951_v12, 0.0  ;;  %v1984_v23 = vmax.f32 %v1952_v30, 0.0  ;;  %v1985_v26 = vmax.f32 %v1953_v36, 0.0 }
 0x4a5   :  { %v1986_v2 = vmax.f32 %v1954_v38, 0.0  ;;  %v1987_v5 = vmax.f32 %v1955_v24, 0.0  ;;  %v1988_v61 = vmax.f32 %v1956_v55, 0.0  ;;  %v1989_v57 = vmax.f32 %v1957_v37, 0.0 }
 0x4a6   :  { %v1990_v33 = vmax.f32 %v1958_v45, 0.0  ;;  %v1991_v28 = vmax.f32 %v1959_v8, 0.0  ;;  %v15330_v60 = vpack.c.bf16 %v1961_v6, %v1960_v20  ;;  %v15332_v29 = vpack.c.bf16 %v1963_v25, %v1962_v7 }
 0x4a7   :  { %v15334_v63 = vpack.c.bf16 %v1965_v34, %v1964_v39  ;;  %v15336_v53 = vpack.c.bf16 %v1967_v21, %v1966_v62  ;;  %v15338_v54 = vpack.c.bf16 %v1969_v16, %v1968_v13  ;;  %v15340_v9 = vpack.c.bf16 %v1971_v52, %v1970_v58 }
 0x4a8   :  { %18297 = vst [vmem:[#allocation10_spill] sm:$0xff] %v15332_v29  ;;  %v15342_v49 = vpack.c.bf16 %v1973_v35, %v1972_v56  ;;  %v15344_v3 = vpack.c.bf16 %v1975_v31, %v1974_v18  ;;  %v15346_v4 = vpack.c.bf16 %v1977_v22, %v1976_v46  ;;  %v15348_v10 = vpack.c.bf16 %v1979_v32, %v1978_v11 }
 0x4a9   :  { %18298 = vst [vmem:[#allocation11_spill] sm:$0xff] %v15334_v63  ;;  %18299 = vst [vmem:[#allocation12_spill] sm:$0xff] %v15336_v53  ;;  %v15351_v17 = vpack.c.bf16 %v1981_v19, %v1980_v48  ;;  %v15353_v27 = vpack.c.bf16 %v1983_v42, %v1982_v59  ;;  %v15355_v44 = vpack.c.bf16 %v1985_v26, %v1984_v23  ;;  %v18156_v41 = vshrl.u32 %v15330_v60, 16 }
 0x4aa   :  { %18300 = vst [vmem:[#allocation13_spill] sm:$0xff] %v15338_v54  ;;  %18301 = vst [vmem:[#allocation14_spill] sm:$0xff] %v15340_v9  ;;  %v15357_v47 = vpack.c.bf16 %v1987_v5, %v1986_v2  ;;  %v15363_v50 = vpack.c.bf16 %v1989_v57, %v1988_v61  ;;  %v15365_v1 = vpack.c.bf16 %v1991_v28, %v1990_v33  ;;  %v2029_v12 = vshll.u32 %v15330_v60, 16 }
 0x4ab   :  { %18302 = vst [vmem:[#allocation15_spill] sm:$0xff] %v15342_v49  ;;  %18303 = vst [vmem:[#allocation16_spill] sm:$0xff] %v15344_v3  ;;  %v18154_v30 = vshrl.u32 %v15332_v29, 16  ;;  %v2036_v36 = vshll.u32 %v15332_v29, 16  ;;  %v18150_v38 = vshrl.u32 %v15334_v63, 16  ;;  %v18163_v24 = vshll.u32 %v15334_v63, 16 }
 0x4ac   :  { %18304 = vst [vmem:[#allocation17_spill] sm:$0xff] %v15346_v4  ;;  %18305 = vst [vmem:[#allocation18_spill] sm:$0xff] %v15348_v10  ;;  %v2028_v55 = vrot.slane %v18156_v41, 7  ;;  %v18148_v37 = vshrl.u32 %v15336_v53, 16  ;;  %v18162_v45 = vshll.u32 %v15336_v53, 16  ;;  %v18147_v8 = vshrl.u32 %v15338_v54, 16 }
 0x4ad   :  { %2010 = vst [vmem:[#allocation3 + $0xa0] sm:$0xff] %v15332_v29  ;;  %2011 = vst [vmem:[#allocation3 + $0xa8] sm:$0xff] %v15334_v63  ;;  %v2035_v20 = vrot.slane %v18154_v30, 7  ;;  %v2042_v6 = vrot.slane %v18150_v38, 7  ;;  %v18159_v7 = vshll.u32 %v15338_v54, 16  ;;  %v18146_v25 = vshrl.u32 %v15340_v9, 16 }
 0x4ae   :  { %2012 = vst [vmem:[#allocation3 + $0xb0] sm:$0xff] %v15336_v53  ;;  %2013 = vst [vmem:[#allocation3 + $0xb8] sm:$0xff] %v15338_v54  ;;  %v2031_v39 = vor.u32 %v2029_v12, %v2028_v55  ;;  %v2049_v34 = vrot.slane %v18148_v37, 7  ;;  %v2056_v62 = vrot.slane %v18147_v8, 7  ;;  %v18158_v21 = vshll.u32 %v15340_v9, 16  ;;  %v2174_v38 = vld [vmem:[#allocation3 + $0x38] sm:$0xff] }
 0x4af   :  { %2014 = vst [vmem:[#allocation3 + $0xc0] sm:$0xff] %v15340_v9  ;;  %2015 = vst [vmem:[#allocation3 + $0xc8] sm:$0xff] %v15342_v49  ;;  %v2038_v13 = vor.u32 %v2036_v36, %v2035_v20  ;;  %v15405_v16 = vor.u32 %v18163_v24, %v2042_v6  ;;  %v2063_v58 = vrot.slane %v18146_v25, 7  ;;  %v18144_v52 = vshrl.u32 %v15342_v49, 16  ;;  %v2189_v41 = vld [vmem:[#allocation3 + $0x60] sm:$0xff]  ;;  %v2192_v24 = vld [vmem:[#allocation3 + $0x68] sm:$0xff] }
 0x4b0   :  { %2016 = vst [vmem:[#allocation3 + $0xd0] sm:$0xff] %v15344_v3  ;;  %2017 = vst [vmem:[#allocation3 + $0xd8] sm:$0xff] %v15346_v4  ;;  %v2052_v56 = vor.u32 %v18162_v45, %v2049_v34  ;;  %v15414_v35 = vor.u32 %v18159_v7, %v2056_v62  ;;  %v18153_v18 = vshll.u32 %v15342_v49, 16  ;;  %v18142_v31 = vshrl.u32 %v15344_v3, 16  ;;  %v2195_v45 = vld [vmem:[#allocation3 + $0x70] sm:$0xff] }
 0x4b1   :  { %2018 = vst [vmem:[#allocation3 + $0xe0] sm:$0xff] %v15348_v10  ;;  %2019 = vst [vmem:[#allocation3 + $0xe8] sm:$0xff] %v15351_v17  ;;  %v15420_v46 = vor.u32 %v18158_v21, %v2063_v58  ;;  %v2070_v22 = vrot.slane %v18144_v52, 7  ;;  %v18152_v11 = vshll.u32 %v15344_v3, 16  ;;  %v18141_v32 = vshrl.u32 %v15346_v4, 16  ;;  %v2159_v58 = vld [vmem:[#allocation3 + $0x10] sm:$0xff] }
 0x4b2   :  { %2020 = vst [vmem:[#allocation3 + $0xf0] sm:$0xff] %v15353_v27  ;;  %2021 = vst [vmem:[#allocation3 + $0xf8] sm:$0xff] %v15355_v44  ;;  %v2077_v48 = vrot.slane %v18142_v31, 7  ;;  %v18143_v19 = vshll.u32 %v15346_v4, 16  ;;  %v18140_v59 = vshrl.u32 %v15348_v10, 16  ;;  %v18149_v42 = vshll.u32 %v15348_v10, 16 }
 0x4b3   :  { %2022 = vst [vmem:[#allocation3 + $0x100] sm:$0xff] %v15357_v47  ;;  %2023 = vst [vmem:[#allocation3 + $0x108] sm:$0xff] %v15363_v50  ;;  %v2073_v23 = vor.u32 %v18153_v18, %v2070_v22  ;;  %v2084_v26 = vrot.slane %v18141_v32, 7  ;;  %v18145_v2 = vshrl.u32 %v15351_v17, 16  ;;  %v18155_v5 = vshll.u32 %v15351_v17, 16  ;;  %v2156_v22 = vld [vmem:[#allocation3 + $0x8] sm:$0xff] }
 0x4b4   :  { %2024 = vst [vmem:[#allocation3 + $0x110] sm:$0xff] %v15365_v1  ;;  %v2080_v61 = vor.u32 %v18152_v11, %v2077_v48  ;;  %v2091_v57 = vrot.slane %v18140_v59, 7  ;;  %v18151_v33 = vshrl.u32 %v15353_v27, 16  ;;  %v18161_v28 = vshll.u32 %v15353_v27, 16  ;;  %v2165_v48 = vld [vmem:[#allocation3 + $0x20] sm:$0xff]  ;;  %v2171_v52 = vld [vmem:[#allocation3 + $0x30] sm:$0xff] }
 0x4b5   :  { %v18306_v55 = vmov 0  ;;  %v2087_v20 = vor.u32 %v18143_v19, %v2084_v26  ;;  %v2098_v6 = vrot.slane %v18145_v2, 7  ;;  %v18157_v34 = vshrl.u32 %v15355_v44, 16  ;;  %v2162_v19 = vld [vmem:[#allocation3 + $0x18] sm:$0xff]  ;;  %v2168_v2 = vld [vmem:[#allocation3 + $0x28] sm:$0xff] }
 0x4b6   :  { %v18307_v55 = vsel %vm15445_vm11, 4294967295, %v18306_v55  ;;  %v18169_v62 = vshll.u32 %v15355_v44, 16  ;;  %v2094_v59 = vor.u32 %v18149_v42, %v2091_v57  ;;  %v2105_v32 = vrot.slane %v18151_v33, 7  ;;  %v2177_v42 = vld [vmem:[#allocation3 + $0x40] sm:$0xff]  ;;  %v2183_v33 = vld [vmem:[#allocation3 + $0x50] sm:$0xff] }
 0x4b7   :  { %18308 = vst [vmem:[#allocation19_spill] sm:$0xff] %v18307_v55  ;;  %v18160_v31 = vshrl.u32 %v15357_v47, 16  ;;  %v18168_v26 = vshll.u32 %v15357_v47, 16  ;;  %v2101_v25 = vor.u32 %v18155_v5, %v2098_v6  ;;  %v2112_v8 = vrot.slane %v18157_v34, 7  ;;  %v2180_v5 = vld [vmem:[#allocation3 + $0x48] sm:$0xff] }
 0x4b8   :  { %v18164_v37 = vshrl.u32 %v15363_v50, 16  ;;  %v18167_v57 = vshll.u32 %v15363_v50, 16  ;;  %v2108_v11 = vor.u32 %v18161_v28, %v2105_v32  ;;  %v18165_v30 = vshrl.u32 %v15365_v1, 16  ;;  %v2186_v28 = vld [vmem:[#allocation3 + $0x58] sm:$0xff] }
 0x4b9   :  { %v2119_v18 = vrot.slane %v18160_v31, 7  ;;  %v18166_v6 = vshll.u32 %v15365_v1, 16  ;;  %v2115_v34 = vor.u32 %v18169_v62, %v2112_v8  ;;  %v15479_v7 = vsel %vm15445_vm11, %v2031_v39, %v2156_v22  ;;  %v13449_v31 = vld [vmem:[%s18123_s2 + $0x48] sm:$0xff]  }
 0x4ba   :  { %v2126_v21 = vrot.slane %v18164_v37, 7  ;;  %18309 = vst [vmem:[#allocation20_spill] sm:$0xff] %v15479_v7  ;;  %v15483_v32 = vsel %vm15445_vm11, %v2038_v13, %v2159_v58  ;;  %v2133_v37 = vrot.slane %v18165_v30, 7  ;;  %2158 = vst [vmem:[#allocation3 + $0x8] sm:$0xff] %v15479_v7  ;;  %v15497_v39 = vsel %vm15445_vm11, %v15405_v16, %v2162_v19  ;;  %12004 = vmatmul.mubr.bf16.vlgmr.msra.gmra.mrb[32].mxu1 %v15479_v7  ;;  %v2201_v58 = vld [vmem:[#allocation3 + $0x80] sm:$0xff]  ;;  %v2260_v30 = vld [vmem:[#allocation3 + $0x138] sm:$0xff] }
 0x4bb   :  { %18310 = vst [vmem:[#allocation21_spill] sm:$0xff] %v15483_v32  ;;  %v2122_v8 = vor.u32 %v18168_v26, %v2119_v18  ;;  %2161 = vst [vmem:[#allocation3 + $0x10] sm:$0xff] %v15483_v32  ;;  %v15501_v13 = vsel %vm15445_vm11, %v2052_v56, %v2165_v48  ;;  %v2198_v18 = vld [vmem:[#allocation3 + $0x78] sm:$0xff]  ;;  %v15511_v16 = vsel %vm15445_vm11, %v15414_v35, %v2168_v2  ;;  %12036 = vmatpush3.bf16.msra.mxu1 %v15258_v40  ;;  %v2287_v7 = vld [vmem:[#allocation3 + $0x180] sm:$0xff] }
 0x4bc   :  { %18311 = vst [vmem:[#allocation22_spill] sm:$0xff] %v15497_v39  ;;  %18312 = vst [vmem:[#allocation23_spill] sm:$0xff] %v15501_v13  ;;  %v2129_v22 = vor.u32 %v18167_v57, %v2126_v21  ;;  %v15516_v56 = vsel %vm15445_vm11, %v15420_v46, %v2171_v52  ;;  %v15520_v19 = vsel %vm15445_vm11, %v2073_v23, %v2174_v38  ;;  %12007 = vmatprep.mubr.bf16.mxu1 %v15483_v32  ;;  %v13450_v38 = vld [vmem:[%s18123_s2 + $0x50] sm:$0xff]  }
 0x4bd   :  { %2164 = vst [vmem:[#allocation3 + $0x18] sm:$0xff] %v15497_v39  ;;  %2167 = vst [vmem:[#allocation3 + $0x20] sm:$0xff] %v15501_v13  ;;  %v2136_v21 = vor.u32 %v18166_v6, %v2133_v37  ;;  %v15530_v35 = vsel %vm15445_vm11, %v2080_v61, %v2177_v42  ;;  %v15534_v52 = vsel %vm15445_vm11, %v2087_v20, %v2180_v5  ;;  %12037 = vmatprep.subr.bf16.mxu1 %v13449_v31 }
 0x4be   :  { %2170 = vst [vmem:[#allocation3 + $0x28] sm:$0xff] %v15511_v16  ;;  %2173 = vst [vmem:[#allocation3 + $0x30] sm:$0xff] %v15516_v56  ;;  %v15538_v40 = vsel %vm15445_vm11, %v2094_v59, %v2183_v33  ;;  %v15549_v37 = vsel %vm15445_vm11, %v2101_v25, %v2186_v28  ;;  %v15553_v46 = vsel %vm15445_vm11, %v2108_v11, %v2189_v41  ;;  %v2206_v25 = vrot.slane %v2036_v36, 1 }
 0x4bf   :  { %2176 = vst [vmem:[#allocation3 + $0x38] sm:$0xff] %v15520_v19  ;;  %2179 = vst [vmem:[#allocation3 + $0x40] sm:$0xff] %v15530_v35  ;;  %v15557_v59 = vsel %vm15445_vm11, %v2115_v34, %v2192_v24  ;;  %v15561_v42 = vsel %vm15445_vm11, %v2122_v8, %v2195_v45  ;;  %v15569_v41 = vsel %vm15445_vm11, %v2129_v22, %v2198_v18  ;;  %v2204_v45 = vrot.slane %v2029_v12, 1 }
 0x4c0   :  { %2182 = vst [vmem:[#allocation3 + $0x48] sm:$0xff] %v15534_v52  ;;  %2185 = vst [vmem:[#allocation3 + $0x50] sm:$0xff] %v15538_v40  ;;  %v15573_v24 = vsel %vm15445_vm11, %v2136_v21, %v2201_v58  ;;  %v18314_v11 = vshll.u32 %v15334_v63, 16  ;;  %v18315_v2 = vshll.u32 %v15336_v53, 16  ;;  %v18316_v61 = vshll.u32 %v15338_v54, 16  ;;  %12038 = vmatpush3.bf16.msra.mxu1 %v13449_v31  ;;  %v13451_v21 = vld [vmem:[%s18123_s2 + $0x58] sm:$0xff]  }
 0x4c1   :  { %2188 = vst [vmem:[#allocation3 + $0x58] sm:$0xff] %v15549_v37  ;;  %2191 = vst [vmem:[#allocation3 + $0x60] sm:$0xff] %v15553_v46  ;;  %v18317_v28 = vshll.u32 %v15340_v9, 16  ;;  %v18318_v12 = vshrl.u32 %v15330_v60, 16  ;;  %v18319_v34 = vshrl.u32 %v15332_v29, 16  ;;  %v18320_v8 = vshll.u32 %v15342_v49, 16  ;;  %12039 = vmatprep.subr.bf16.mxu1 %v13450_v38 }
 0x4c2   :  { %2194 = vst [vmem:[#allocation3 + $0x68] sm:$0xff] %v15557_v59  ;;  %2197 = vst [vmem:[#allocation3 + $0x70] sm:$0xff] %v15561_v42  ;;  %v2208_v23 = vrot.slane %v18314_v11, 1  ;;  %v2210_v5 = vrot.slane %v18315_v2, 1  ;;  %v2212_v33 = vrot.slane %v18316_v61, 1  ;;  %v18321_v18 = vshll.u32 %v15344_v3, 16  ;;  %12008 = vmatmul.mubr.bf16.gmra.mrb[36].mxu1 %v15497_v39 }
 0x4c3   :  { %18313 = vst [vmem:[#allocation24_spill] sm:$0xff] %v15573_v24  ;;  %2200 = vst [vmem:[#allocation3 + $0x78] sm:$0xff] %v15569_v41  ;;  %v2214_v20 = vrot.slane %v18317_v28, 1  ;;  %v2205_v36 = vor.u32 %v2204_v45, %v18318_v12  ;;  %v2207_v48 = vor.u32 %v2206_v25, %v18319_v34  ;;  %v2216_v58 = vrot.slane %v18320_v8, 1  ;;  %v2257_v11 = vld [vmem:[#allocation3 + $0x130] sm:$0xff]  ;;  %v2254_v8 = vld [vmem:[#allocation3 + $0x128] sm:$0xff]  ;;  %12011 = vmatprep.mubr.bf16.mxu1 %v15501_v13 }
 0x4c4   :  { %2203 = vst [vmem:[#allocation3 + $0x80] sm:$0xff] %v15573_v24  ;;  %v2218_v22 = vrot.slane %v18321_v18, 1  ;;  %v18322_v31 = vshrl.u32 %v15334_v63, 16  ;;  %v18323_v45 = vshrl.u32 %v15336_v53, 16  ;;  %v18324_v25 = vshrl.u32 %v15338_v54, 16  ;;  %v2263_v18 = vld [vmem:[#allocation3 + $0x140] sm:$0xff]  ;;  %12040 = vmatpush3.bf16.msra.mxu1 %v13450_v38 }
 0x4c5   :  { %v18325_v12 = vshrl.u32 %v15340_v9, 16  ;;  %v18326_v6 = vshrl.u32 %v15342_v49, 16  ;;  %v18327_v26 = vshrl.u32 %v15344_v3, 16  ;;  %v18338_v0 = vshrl.u32 %v15346_v4, 16  ;;  %12041 = vmatprep.subr.bf16.mxu1 %v13451_v21  ;;  %v2281_v38 = vld [vmem:[#allocation3 + $0x170] sm:$0xff]  ;;  %v2278_v13 = vld [vmem:[#allocation3 + $0x168] sm:$0xff] }
 0x4c6   :  { %v2209_v2 = vor.u32 %v2208_v23, %v18322_v31  ;;  %v2211_v61 = vor.u32 %v2210_v5, %v18323_v45  ;;  %v2213_v28 = vor.u32 %v2212_v33, %v18324_v25  ;;  %v18328_v23 = vshll.u32 %v15346_v4, 16  ;;  %v2266_v25 = vld [vmem:[#allocation3 + $0x148] sm:$0xff]  ;;  %v2284_v3 = vld [vmem:[#allocation3 + $0x178] sm:$0xff]  ;;  %v2293_v49 = vld [vmem:[#allocation3 + $0x190] sm:$0xff] }
 0x4c7   :  { %v2215_v34 = vor.u32 %v2214_v20, %v18325_v12  ;;  %v2217_v57 = vor.u32 %v2216_v58, %v18326_v6  ;;  %v2219_v62 = vor.u32 %v2218_v22, %v18327_v26  ;;  %v18329_v5 = vshll.u32 %v15348_v10, 16  ;;  %v2269_v20 = vld [vmem:[#allocation3 + $0x150] sm:$0xff]  ;;  %v2290_v9 = vld [vmem:[#allocation3 + $0x188] sm:$0xff] }
 0x4c8   :  { %v2220_v31 = vrot.slane %v18328_v23, 1  ;;  %v18331_v33 = vmov 0  ;;  %v18334_v6 = vshll.u32 %v15351_v17, 16  ;;  %v18335_v26 = vshll.u32 %v15353_v27, 16  ;;  %12042 = vmatpush3.bf16.msra.mxu1 %v13451_v21 }
 0x4c9   :  { %v2222_v45 = vrot.slane %v18329_v5, 1  ;;  %v18332_v33 = vsel %vm15619_vm9, 4294967295, %v18331_v33  ;;  %v18336_v12 = vshll.u32 %v15355_v44, 16  ;;  %v18337_v5 = vshll.u32 %v15357_v47, 16 }
 0x4ca   :  { %18333 = vst [vmem:[#allocation25_spill] sm:$0xff] %v18332_v33  ;;  %v2224_v58 = vrot.slane %v18334_v6, 1  ;;  %v2226_v22 = vrot.slane %v18335_v26, 1  ;;  %v2221_v51 = vor.u32 %v2220_v31, %v18338_v0  ;;  %v18339_v24 = vshrl.u32 %v15348_v10, 16  ;;  %12012 = vmatmul.mubr.bf16.gmra.mrb[40].mxu1 %v15511_v16 }
 0x4cb   :  { %v2228_v23 = vrot.slane %v18336_v12, 1  ;;  %v2230_v55 = vrot.slane %v18337_v5, 1  ;;  %v18340_v39 = vshll.u32 %v15363_v50, 16  ;;  %v18341_v32 = vshll.u32 %v15365_v1, 16  ;;  %v13452_v5 = vld [vmem:[%s18123_s2 + $0x60] sm:$0xff]   ;;  %12015 = vmatprep.mubr.bf16.mxu1 %v15516_v56 }
 0x4cc   :  { %v2223_v6 = vor.u32 %v2222_v45, %v18339_v24  ;;  %v18342_v4 = vshrl.u32 %v15351_v17, 16  ;;  %v18343_v31 = vshrl.u32 %v15353_v27, 16  ;;  %v18344_v45 = vshrl.u32 %v15355_v44, 16  ;;  %12043 = vmatprep.subr.bf16.mxu1 %v13452_v5 }
 0x4cd   :  { %v2232_v26 = vrot.slane %v18340_v39, 1  ;;  %v2234_v12 = vrot.slane %v18341_v32, 1  ;;  %v18345_v10 = vshrl.u32 %v15357_v47, 16  ;;  %v18346_v54 = vshrl.u32 %v15363_v50, 16  ;;  %12044 = vmatpush3.bf16.msra.mxu1 %v13452_v5  ;;  %v18353_v5 = vld [vmem:[#allocation15_spill] sm:$0xff] }
 0x4ce   :  { %v2225_v0 = vor.u32 %v2224_v58, %v18342_v4  ;;  %v2227_v24 = vor.u32 %v2226_v22, %v18343_v31  ;;  %v2229_v39 = vor.u32 %v2228_v23, %v18344_v45  ;;  %v18347_v63 = vshrl.u32 %v15365_v1, 16  ;;  %v2299_v22 = vld [vmem:[#allocation3 + $0x1a0] sm:$0xff]  ;;  %v2296_v23 = vld [vmem:[#allocation3 + $0x198] sm:$0xff]  ;;  %v18355_v31 = vld [vmem:[#allocation17_spill] sm:$0xff] }
 0x4cf   :  { %v2231_v32 = vor.u32 %v2230_v55, %v18345_v10  ;;  %v2233_v53 = vor.u32 %v2232_v26, %v18346_v54  ;;  %v15657_v4 = vsel %vm15619_vm9, %v2205_v36, %v2254_v8  ;;  %v15661_v58 = vsel %vm15619_vm9, %v2207_v48, %v2257_v11  ;;  %v222_v55 = vld [vmem:[#allocation3 + $0x120] sm:$0x80]  ;;  %v13453_v11 = vld [vmem:[%s18123_s2 + $0x68] sm:$0xff]  }
 0x4d0   :  { %v2235_v29 = vor.u32 %v2234_v12, %v18347_v63  ;;  %2256 = vst [vmem:[#allocation3 + $0x128] sm:$0xff] %v15657_v4  ;;  %2259 = vst [vmem:[#allocation3 + $0x130] sm:$0xff] %v15661_v58  ;;  %v15667_v54 = vsel %vm15619_vm9, %v2209_v2, %v2260_v30  ;;  %v15671_v63 = vsel %vm15619_vm9, %v2211_v61, %v2263_v18  ;;  %12045 = vmatprep.subr.bf16.mxu1 %v13453_v11  ;;  %v18348_v2 = vld [vmem:[#allocation10_spill] sm:$0xff]  ;;  %v13458_v61 = vld [vmem:[%s18123_s2 + $0x90] sm:$0xff]  }
 0x4d1   :  { %v15675_v10 = vsel %vm15619_vm9, %v2213_v28, %v2266_v25  ;;  %v15679_v1 = vsel %vm15619_vm9, %v2215_v34, %v2269_v20  ;;  %2262 = vst [vmem:[#allocation3 + $0x138] sm:$0xff] %v15667_v54  ;;  %2265 = vst [vmem:[#allocation3 + $0x140] sm:$0xff] %v15671_v63  ;;  %v15687_v30 = vsel %vm15619_vm9, %v2217_v57, %v2272_v43  ;;  %12046 = vmatpush3.bf16.msra.mxu1 %v13453_v11  ;;  %v13595_v57 = vld [vmem:[#allocation3 + $0x90] sm:$0xff]  ;;  %v13459_v28 = vld [vmem:[%s18123_s2 + $0x98] sm:$0xff]  }
 0x4d2   :  { %2268 = vst [vmem:[#allocation3 + $0x148] sm:$0xff] %v15675_v10  ;;  %2271 = vst [vmem:[#allocation3 + $0x150] sm:$0xff] %v15679_v1  ;;  %v15691_v36 = vsel %vm15619_vm9, %v2219_v62, %v2275_v14  ;;  %v15695_v48 = vsel %vm15619_vm9, %v2221_v51, %v2278_v13  ;;  %v15699_v21 = vsel %vm15619_vm9, %v2223_v6, %v2281_v38  ;;  %12016 = vmatmul.mubr.bf16.gmra.mrb[44].mxu1 %v15520_v19  ;;  %v13457_v13 = vld [vmem:[%s18123_s2 + $0x88] sm:$0xff]   ;;  %v18350_v8 = vld [vmem:[#allocation12_spill] sm:$0xff] }
 0x4d3   :  { %2274 = vst [vmem:[#allocation3 + $0x158] sm:$0xff] %v15687_v30  ;;  %2277 = vst [vmem:[#allocation3 + $0x160] sm:$0xff] %v15691_v36  ;;  %v15710_v51 = vsel %vm15619_vm9, %v2225_v0, %v2284_v3  ;;  %v15714_v43 = vsel %vm15619_vm9, %v2227_v24, %v2287_v7  ;;  %v15718_v14 = vsel %vm15619_vm9, %v2229_v39, %v2290_v9  ;;  %12019 = vmatprep.mubr.bf16.mxu1 %v15530_v35  ;;  %v13456_v7 = vld [vmem:[%s18123_s2 + $0x80] sm:$0xff]   ;;  %v18349_v34 = vld [vmem:[#allocation11_spill] sm:$0xff] }
 0x4d4   :  { %2280 = vst [vmem:[#allocation3 + $0x168] sm:$0xff] %v15695_v48  ;;  %2283 = vst [vmem:[#allocation3 + $0x170] sm:$0xff] %v15699_v21  ;;  %v15722_v62 = vsel %vm15619_vm9, %v2231_v32, %v2293_v49  ;;  %v15730_v3 = vsel %vm15619_vm9, %v2233_v53, %v2296_v23  ;;  %v15734_v9 = vsel %vm15619_vm9, %v2235_v29, %v2299_v22  ;;  %v223_v49 = vsel %vm14880_vm8, 0, %v222_v55  ;;  %v13454_v53 = vld [vmem:[%s18123_s2 + $0x70] sm:$0xff]   ;;  %v13455_v29 = vld [vmem:[%s18123_s2 + $0x78] sm:$0xff]  }
 0x4d5   :  { %2286 = vst [vmem:[#allocation3 + $0x178] sm:$0xff] %v15710_v51  ;;  %2289 = vst [vmem:[#allocation3 + $0x180] sm:$0xff] %v15714_v43  ;;  %12047 = vmatprep.subr.bf16.mxu1 %v13454_v53  ;;  %v13460_v18 = vld [vmem:[%s18123_s2 + $0xa0] sm:$0xff]   ;;  %v13461_v20 = vld [vmem:[%s18123_s2 + $0xa8] sm:$0xff]  }
 0x4d6   :  { %2292 = vst [vmem:[#allocation3 + $0x188] sm:$0xff] %v15718_v14  ;;  %2295 = vst [vmem:[#allocation3 + $0x190] sm:$0xff] %v15722_v62  ;;  %12048 = vmatpush3.bf16.msra.mxu1 %v13454_v53  ;;  %v18351_v25 = vld [vmem:[#allocation13_spill] sm:$0xff]  ;;  %v18352_v6 = vld [vmem:[#allocation14_spill] sm:$0xff] }
 0x4d7   :  { %2298 = vst [vmem:[#allocation3 + $0x198] sm:$0xff] %v15730_v3  ;;  %2301 = vst [vmem:[#allocation3 + $0x1a0] sm:$0xff] %v15734_v9  ;;  %12049 = vmatprep.subr.bf16.mxu1 %v13455_v29  ;;  %v13462_v26 = vld [vmem:[%s18123_s2 + $0xb0] sm:$0xff]   ;;  %v13463_v12 = vld [vmem:[%s18123_s2 + $0xb8] sm:$0xff]  }
 0x4d8   :  { %224 = vst [vmem:[#allocation3 + $0x120] sm:$0x80] %v223_v49  ;;  %v18354_v38 = vld [vmem:[#allocation16_spill] sm:$0xff]  ;;  %v13464_v0 = vld [vmem:[%s18123_s2 + $0xc0] sm:$0xff]   ;;  %v13465_v39 = vld [vmem:[%s18123_s2 + $0xc8] sm:$0xff]  }
 0x4d9   :  { %v18356_v24 = vld [vmem:[#allocation18_spill] sm:$0xff]  ;;  %v13471_v32 = vld [vmem:[%s18123_s2 + $0xf8] sm:$0xff]   ;;  %v18357_v23 = vld [vmem:[#allocation20_spill] sm:$0xff] }
 0x4da   :  { %12050 = vmatpush3.bf16.msra.mxu1 %v13455_v29  ;;  %v13472_v22 = vld [vmem:[%s18123_s2 + $0x100] sm:$0xff]   ;;  %v13473_v55 = vld [vmem:[%s18123_s2 + $0x108] sm:$0xff]   ;;  %v18358_v11 = vld [vmem:[#allocation21_spill] sm:$0xff] }
 0x4db   :  { %12083 = vmatprep.subr.bf16.mxu1 %v13456_v7  ;;  %12020 = vmatmul.mubr.bf16.gmra.mrb[48].mxu1 %v15534_v52  ;;  %v18359_v49 = vld [vmem:[#allocation22_spill] sm:$0xff]  ;;  %v13474_v53 = vld [vmem:[%s18123_s2 + $0x110] sm:$0xff]  }
 0x4dc   :  { %12023 = vmatprep.mubr.bf16.mxu1 %v15538_v40  ;;  %v6019_v29 = vld [vmem:[#allocation2 + $0x90] sm:$0xff] }
 0x4dd   :  { %6051 = vrot.lane.b32.xlu0 %v6019_v29, %s13620_s23  ;;  %v6218_v29 = vld [vmem:[#allocation2 + $0x40] sm:$0xff] }
 0x4df   :  { %v2914_v45 = vld [vmem:[#allocation3 + $0x120] sm:$0xff] }
 0x4e3   :  { %12024 = vmatmul.mubr.bf16.gmra.mrb[52].mxu1 %v15549_v37 }
 0x4e4   :  { %12027 = vmatprep.mubr.bf16.mxu1 %v15553_v46 }
 0x4eb   :  { %12028 = vmatmul.mubr.bf16.gmra.mrb[56].mxu1 %v15557_v59 }
 0x4ec   :  { %12031 = vmatprep.mubr.bf16.mxu1 %v15561_v42 }
 0x4f3   :  { %12032 = vmatmul.mubr.bf16.gmra.mrb[60].mxu1 %v15569_v41 }
 0x4f4   :  { %12051 = vmatprep.mubr.bf16.mxu1 %v13595_v57  ;;  %v18360_v57 = vld [vmem:[#allocation23_spill] sm:$0xff] }
 0x4fb   :  { %12052 = vmatmul.mubr.bf16.vlgmr.msra.gmra.mrb[32].mxu1 %v15330_v60 }
 0x4fc   :  { %12084 = vmatpush3.bf16.msra.mxu1 %v13456_v7  ;;  %12055 = vmatprep.mubr.bf16.mxu1 %v18348_v2  ;;  %v13475_v7 = vld [vmem:[%s18123_s2 + $0x118] sm:$0xff]  }
 0x4fd   :  { %12085 = vmatprep.subr.bf16.mxu1 %v13457_v13 }
 0x500   :  { %12086 = vmatpush3.bf16.msra.mxu1 %v13457_v13  ;;  %v6020_v13 = vld [vmem:[#allocation2 + $0x98] sm:$0xff] }
 0x501   :  { %12087 = vmatprep.subr.bf16.mxu1 %v13458_v61  ;;  %6053 = vrot.lane.b32.xlu1 %v6020_v13, %s13620_s23 }
 0x503   :  { %12056 = vmatmul.mubr.bf16.gmra.mrb[36].mxu1 %v18349_v34 }
 0x504   :  { %12059 = vmatprep.mubr.bf16.mxu1 %v18350_v8  ;;  %12088 = vmatpush3.bf16.msra.mxu1 %v13458_v61  ;;  %v6115_v61 = vld [vmem:[#allocation2 + $0x120] sm:$0xff] }
 0x505   :  { %12089 = vmatprep.subr.bf16.mxu1 %v13459_v28  ;;  %6147 = vrot.lane.b32.xlu0 %v6115_v61, %s13622_s29  ;;  %v6314_v61 = vld [vmem:[#allocation2 + $0xd0] sm:$0xff] }
 0x508   :  { %12090 = vmatpush3.bf16.msra.mxu1 %v13459_v28  ;;  %v13476_v28 = vld [vmem:[%s18123_s2 + $0x120] sm:$0xff]  }
 0x509   :  { %12091 = vmatprep.subr.bf16.mxu1 %v13460_v18 }
 0x50b   :  { %12060 = vmatmul.mubr.bf16.gmra.mrb[40].mxu1 %v18351_v25 }
 0x50c   :  { %12063 = vmatprep.mubr.bf16.mxu1 %v18352_v6  ;;  %12092 = vmatpush3.bf16.msra.mxu1 %v13460_v18  ;;  %v6211_v18 = vld [vmem:[#allocation2 + $0x8] sm:$0xff] }
 0x50d   :  { %12093 = vmatprep.subr.bf16.mxu1 %v13461_v20  ;;  %6004 = vst.msk [vmem:[#allocation4 + $0x8] sm:$0xff] %vm18361_vm2, %v6211_v18  ;;  %6243 = vrot.lane.b32.xlu0 %v6211_v18, %s13623_s15  ;;  %v6410_v18 = vld [vmem:[#allocation2 + $0x160] sm:$0xff] }
 0x510   :  { %12094 = vmatpush3.bf16.msra.mxu1 %v13461_v20  ;;  %v6116_v20 = vld [vmem:[#allocation2 + $0x128] sm:$0xff] }
 0x511   :  { %12095 = vmatprep.subr.bf16.mxu1 %v13462_v26  ;;  %6149 = vrot.lane.b32.xlu1 %v6116_v20, %s13622_s29 }
 0x512   :  { %6339 = vrot.lane.b32.xlu0 %v6020_v13, %s13621_s17 }
 0x513   :  { %12064 = vmatmul.mubr.bf16.gmra.mrb[44].mxu1 %v18353_v5 }
 0x514   :  { %12067 = vmatprep.mubr.bf16.mxu1 %v18354_v38  ;;  %12096 = vmatpush3.bf16.msra.mxu1 %v13462_v26  ;;  %v6212_v26 = vld [vmem:[#allocation2 + $0x10] sm:$0xff] }
 0x515   :  { %12097 = vmatprep.subr.bf16.mxu1 %v13463_v12  ;;  %6245 = vrot.lane.b32.xlu1 %v6212_v26, %s13623_s15  ;;  %6005 = vst.msk [vmem:[#allocation4 + $0x10] sm:$0xff] %vm18362_vm4, %v6212_v26  ;;  %vm18365_vm4 = vmmov %vm18361_vm2 }
 0x516   :  { %6435 = vrot.lane.b32.xlu0 %v6116_v20, %s13624_s26  ;;  %v5987_v20 = vld [vmem:[#allocation2] sm:$0xff] }
 0x518   :  { %12098 = vmatpush3.bf16.msra.mxu1 %v13463_v12  ;;  %v13478_v12 = vld [vmem:[%s18123_s2 + $0x130] sm:$0xff]  }
 0x519   :  { %12131 = vmatprep.subr.bf16.mxu1 %v13464_v0 }
 0x51a   :  { %6531 = vrot.lane.b32.xlu0 %v6212_v26, %s13625_s13  ;;  %v16001_v26 = vld [vmem:[#allocation2 + $0x48] sm:$0xff] }
 0x51b   :  { %12068 = vmatmul.mubr.bf16.gmra.mrb[48].mxu1 %v18355_v31  ;;  %v6500_v31 = vld [vmem:[#allocation2 + $0x18] sm:$0xff] }
 0x51c   :  { %12071 = vmatprep.mubr.bf16.mxu1 %v18356_v24  ;;  %v13480_v24 = vld [vmem:[%s18123_s2 + $0x140] sm:$0xff]   ;;  %6006 = vst.msk [vmem:[#allocation4 + $0x18] sm:$0xff] %vm18363_vm6, %v6500_v31  ;;  %vm18366_vm6 = vmmov %vm18361_vm2 }
 0x523   :  { %12072 = vmatmul.mubr.bf16.gmra.mrb[52].mxu1 %v15351_v17  ;;  %v13466_v17 = vld [vmem:[%s18123_s2 + $0xd0] sm:$0xff]  }
 0x524   :  { %12075 = vmatprep.mubr.bf16.mxu1 %v15353_v27  ;;  %v13467_v27 = vld [vmem:[%s18123_s2 + $0xd8] sm:$0xff]  }
 0x52b   :  { %12076 = vmatmul.mubr.bf16.gmra.mrb[56].mxu1 %v15355_v44  ;;  %v13468_v44 = vld [vmem:[%s18123_s2 + $0xe0] sm:$0xff]  }
 0x52c   :  { %12079 = vmatprep.mubr.bf16.mxu1 %v15357_v47  ;;  %v13469_v47 = vld [vmem:[%s18123_s2 + $0xe8] sm:$0xff]  }
 0x533   :  { %12080 = vmatmul.mubr.bf16.gmra.mrb[60].mxu1 %v15363_v50  ;;  %v13470_v50 = vld [vmem:[%s18123_s2 + $0xf0] sm:$0xff]  }
 0x534   :  { %12099 = vmatprep.mubr.bf16.mxu1 %v2914_v45  ;;  %v13482_v45 = vld [vmem:[%s18123_s2 + $0x150] sm:$0xff]  }
 0x53b   :  { %12100 = vmatmul.mubr.bf16.vlgmr.msra.gmra.mrb[32].mxu1 %v15657_v4 }
 0x53c   :  { %12132 = vmatpush3.bf16.msra.mxu1 %v13464_v0  ;;  %12103 = vmatprep.mubr.bf16.mxu1 %v15661_v58  ;;  %v6308_v0 = vld [vmem:[#allocation2 + $0xa0] sm:$0xff] }
 0x53d   :  { %12133 = vmatprep.subr.bf16.mxu1 %v13465_v39  ;;  %6341 = vrot.lane.b32.xlu1 %v6308_v0, %s13621_s17 }
 0x53e   :  { %6627 = vrot.lane.b32.xlu0 %v6308_v0, %s13626_s25 }
 0x540   :  { %12134 = vmatpush3.bf16.msra.mxu1 %v13465_v39  ;;  %v13483_v39 = vld [vmem:[%s18123_s2 + $0x158] sm:$0xff]  }
 0x541   :  { %12135 = vmatprep.subr.bf16.mxu1 %v13466_v17 }
 0x543   :  { %12104 = vmatmul.mubr.bf16.gmra.mrb[36].mxu1 %v15667_v54 }
 0x544   :  { %12107 = vmatprep.mubr.bf16.mxu1 %v15671_v63  ;;  %12136 = vmatpush3.bf16.msra.mxu1 %v13466_v17  ;;  %v13485_v17 = vld [vmem:[%s18123_s2 + $0x168] sm:$0xff]  }
 0x545   :  { %12137 = vmatprep.subr.bf16.mxu1 %v13467_v27 }
 0x548   :  { %12138 = vmatpush3.bf16.msra.mxu1 %v13467_v27  ;;  %v6312_v27 = vld [vmem:[#allocation2 + $0xc0] sm:$0xff] }
 0x549   :  { %12139 = vmatprep.subr.bf16.mxu1 %v13468_v44 }
 0x54b   :  { %12108 = vmatmul.mubr.bf16.gmra.mrb[40].mxu1 %v15675_v10 }
 0x54c   :  { %12111 = vmatprep.mubr.bf16.mxu1 %v15679_v1  ;;  %12140 = vmatpush3.bf16.msra.mxu1 %v13468_v44  ;;  %v6408_v44 = vld [vmem:[#allocation2 + $0x150] sm:$0xff] }
 0x54d   :  { %12141 = vmatprep.subr.bf16.mxu1 %v13469_v47 }
 0x550   :  { %12142 = vmatpush3.bf16.msra.mxu1 %v13469_v47  ;;  %v6504_v47 = vld [vmem:[#allocation2 + $0x38] sm:$0xff] }
 0x551   :  { %12143 = vmatprep.subr.bf16.mxu1 %v13470_v50  ;;  %6010 = vst.msk [vmem:[#allocation4 + $0x38] sm:$0xff] %vm18361_vm2, %v6504_v47 }
 0x553   :  { %12112 = vmatmul.mubr.bf16.gmra.mrb[44].mxu1 %v15687_v30 }
 0x554   :  { %12115 = vmatprep.mubr.bf16.mxu1 %v15691_v36  ;;  %12144 = vmatpush3.bf16.msra.mxu1 %v13470_v50  ;;  %v13488_v50 = vld [vmem:[%s18123_s2 + $0x180] sm:$0xff]  }
 0x555   :  { %12145 = vmatprep.subr.bf16.mxu1 %v13471_v32 }
 0x558   :  { %12146 = vmatpush3.bf16.msra.mxu1 %v13471_v32  ;;  %v15967_v32 = vld [vmem:[#allocation3 + $0xe8] sm:$0xff] }
 0x559   :  { %12179 = vmatprep.subr.bf16.mxu1 %v13472_v22 }
 0x55b   :  { %12116 = vmatmul.mubr.bf16.gmra.mrb[48].mxu1 %v15695_v48 }
 0x55c   :  { %12119 = vmatprep.mubr.bf16.mxu1 %v15699_v21 }
 0x563   :  { %12120 = vmatmul.mubr.bf16.gmra.mrb[52].mxu1 %v15710_v51 }
 0x564   :  { %12123 = vmatprep.mubr.bf16.mxu1 %v15714_v43 }
 0x56b   :  { %12124 = vmatmul.mubr.bf16.gmra.mrb[56].mxu1 %v15718_v14 }
 0x56c   :  { %12127 = vmatprep.mubr.bf16.mxu1 %v15722_v62 }
 0x573   :  { %12128 = vmatmul.mubr.bf16.gmra.mrb[60].mxu1 %v15730_v3 }
 0x574   :  { %12147 = vmatprep.mubr.bf16.mxu1 %v18357_v23  ;;  %v15973_v23 = vld [vmem:[#allocation3 + $0xf0] sm:$0xff] }
 0x57b   :  { %12148 = vmatmul.mubr.bf16.vlgmr.msra.gmra.mrb[32].mxu1 %v18358_v11  ;;  %v6696_v11 = vld [vmem:[#allocation2 + $0x158] sm:$0xff] }
 0x57c   :  { %12180 = vmatpush3.bf16.msra.mxu1 %v13472_v22  ;;  %12151 = vmatprep.mubr.bf16.mxu1 %v18359_v49  ;;  %v6600_v22 = vld [vmem:[#allocation2 + $0xc8] sm:$0xff]  ;;  %v15983_v49 = vld [vmem:[#allocation3 + $0x100] sm:$0xff] }
 0x57d   :  { %12181 = vmatprep.subr.bf16.mxu1 %v13473_v55 }
 0x580   :  { %12182 = vmatpush3.bf16.msra.mxu1 %v13473_v55  ;;  %v15977_v55 = vld [vmem:[#allocation3 + $0xf8] sm:$0xff] }
 0x581   :  { %12183 = vmatprep.subr.bf16.mxu1 %v13474_v53 }
 0x583   :  { %12152 = vmatmul.mubr.bf16.gmra.mrb[36].mxu1 %v18360_v57 }
 0x584   :  { %12155 = vmatprep.mubr.bf16.mxu1 %v15511_v16  ;;  %12184 = vmatpush3.bf16.msra.mxu1 %v13474_v53  ;;  %v13477_v16 = vld [vmem:[%s18123_s2 + $0x128] sm:$0xff]   ;;  %v15987_v53 = vld [vmem:[#allocation3 + $0x108] sm:$0xff] }
 0x585   :  { %12185 = vmatprep.subr.bf16.mxu1 %v13475_v7 }
 0x588   :  { %12186 = vmatpush3.bf16.msra.mxu1 %v13475_v7  ;;  %v216_v7 = vld [vmem:[#allocation3 + $0x88] sm:$0x1] }
 0x589   :  { %12187 = vmatprep.subr.bf16.mxu1 %v13476_v28  ;;  %v217_v13 = vsel %vm14873_vm0, 0, %v216_v7  ;;  %vm18369_vm0 = vmmov %vm18361_vm2  ;;  %v6222_v7 = vld [vmem:[#allocation2 + $0x60] sm:$0xff] }
 0x58a   :  { %218 = vst [vmem:[#allocation3 + $0x88] sm:$0x1] %v217_v13  ;;  %6003 = vst.msk [vmem:[#allocation4] sm:$0xff] %vm18369_vm0, %v5987_v20  ;;  %v6318_v13 = vld [vmem:[#allocation2 + $0xf0] sm:$0xff]  ;;  %v6414_v20 = vld [vmem:[#allocation2 + $0x180] sm:$0xff] }
 0x58b   :  { %12156 = vmatmul.mubr.bf16.gmra.mrb[40].mxu1 %v15516_v56  ;;  %v13479_v56 = vld [vmem:[%s18123_s2 + $0x138] sm:$0xff]   ;;  %6015 = vst.msk [vmem:[#allocation4 + $0x60] sm:$0xff] %vm18369_vm0, %v6222_v7 }
 0x58c   :  { %12159 = vmatprep.mubr.bf16.mxu1 %v15520_v19  ;;  %12188 = vmatpush3.bf16.msra.mxu1 %v13476_v28  ;;  %v6404_v19 = vld [vmem:[#allocation2 + $0x130] sm:$0xff]  ;;  %v15996_v28 = vld [vmem:[#allocation3 + $0x110] sm:$0xff] }
 0x58d   :  { %12189 = vmatprep.subr.bf16.mxu1 %v13477_v16  ;;  %6437 = vrot.lane.b32.xlu1 %v6404_v19, %s13624_s26 }
 0x58e   :  { %6723 = vrot.lane.b32.xlu0 %v6404_v19, %s13627_s14 }
 0x590   :  { %12190 = vmatpush3.bf16.msra.mxu1 %v13477_v16  ;;  %v6052_v16 = vpop.permute.xlu0 %6051 }
 0x591   :  { %12191 = vmatprep.subr.bf16.mxu1 %v13478_v12  ;;  %6533 = vrot.lane.b32.xlu1 %v6500_v31, %s13625_s13  ;;  %6099 = vst.msk [vmem:[#allocation4] sm:$0xff] %vm744_vm12, %v6052_v16  ;;  %v16116_v16 = vld [vmem:[#allocation2 + $0x68] sm:$0xff] }
 0x593   :  { %12160 = vmatmul.mubr.bf16.gmra.mrb[44].mxu1 %v15530_v35  ;;  %v6596_v35 = vld [vmem:[#allocation2 + $0xa8] sm:$0xff] }
 0x594   :  { %12163 = vmatprep.mubr.bf16.mxu1 %v15534_v52  ;;  %12192 = vmatpush3.bf16.msra.mxu1 %v13478_v12  ;;  %v6692_v52 = vld [vmem:[#allocation2 + $0x138] sm:$0xff]  ;;  %v6054_v12 = vpop.permute.xlu1 %6053 }
 0x595   :  { %12193 = vmatprep.subr.bf16.mxu1 %v13479_v56  ;;  %6629 = vrot.lane.b32.xlu1 %v6596_v35, %s13626_s25  ;;  %6100 = vst.msk [vmem:[#allocation4 + $0x8] sm:$0xff] %vm744_vm12, %v6054_v12  ;;  %v13497_v12 = vld [vmem:[%s18123_s2 + $0x1c8] sm:$0xff]  }
 0x596   :  { %6725 = vrot.lane.b32.xlu0 %v6692_v52, %s13627_s14 }
 0x598   :  { %12194 = vmatpush3.bf16.msra.mxu1 %v13479_v56  ;;  %v6150_v56 = vpop.permute.xlu1 %6149 }
 0x599   :  { %12227 = vmatprep.subr.bf16.mxu1 %v13480_v24  ;;  %6055 = vrot.lane.b32.xlu1 %v6308_v0, %s13620_s23  ;;  %v13489_v0 = vld [vmem:[%s18123_s2 + $0x188] sm:$0xff]   ;;  %6196 = vst.msk [vmem:[#allocation4 + $0x8] sm:$0xff] %vm841_vm13, %v6150_v56 }
 0x59a   :  { %6151 = vrot.lane.b32.xlu0 %v6404_v19, %s13622_s29  ;;  %v6602_v19 = vld [vmem:[#allocation2 + $0xd8] sm:$0xff] }
 0x59b   :  { %12164 = vmatmul.mubr.bf16.gmra.mrb[48].mxu1 %v15538_v40  ;;  %v6214_v40 = vld [vmem:[#allocation2 + $0x20] sm:$0xff] }
 0x59c   :  { %12167 = vmatprep.mubr.bf16.mxu1 %v15549_v37  ;;  %6007 = vst.msk [vmem:[#allocation4 + $0x20] sm:$0xff] %vm18361_vm2, %v6214_v40  ;;  %v6310_v37 = vld [vmem:[#allocation2 + $0xb0] sm:$0xff] }
 0x59d   :  { %6057 = vrot.lane.b32.xlu1 %v6596_v35, %s13620_s23 }
 0x59e   :  { %6247 = vrot.lane.b32.xlu0 %v6500_v31, %s13623_s15 }
 0x5a1   :  { %6153 = vrot.lane.b32.xlu1 %v6692_v52, %s13622_s29 }
 0x5a2   :  { %6343 = vrot.lane.b32.xlu0 %v6596_v35, %s13621_s17  ;;  %v13491_v35 = vld [vmem:[%s18123_s2 + $0x198] sm:$0xff]  }
 0x5a3   :  { %12168 = vmatmul.mubr.bf16.gmra.mrb[52].mxu1 %v15553_v46  ;;  %v18364_v46 = vld [vmem:[#allocation24_spill] sm:$0xff] }
 0x5a4   :  { %12171 = vmatprep.mubr.bf16.mxu1 %v15557_v59  ;;  %v6406_v59 = vld [vmem:[#allocation2 + $0x140] sm:$0xff] }
 0x5a5   :  { %6249 = vrot.lane.b32.xlu1 %v6214_v40, %s13623_s15 }
 0x5a6   :  { %6439 = vrot.lane.b32.xlu0 %v6692_v52, %s13624_s26 }
 0x5a9   :  { %6345 = vrot.lane.b32.xlu1 %v6310_v37, %s13621_s17 }
 0x5aa   :  { %6535 = vrot.lane.b32.xlu0 %v6214_v40, %s13625_s13  ;;  %v6698_v40 = vld [vmem:[#allocation2 + $0x168] sm:$0xff] }
 0x5ab   :  { %12172 = vmatmul.mubr.bf16.gmra.mrb[56].mxu1 %v15561_v42  ;;  %v6502_v42 = vld [vmem:[#allocation2 + $0x28] sm:$0xff] }
 0x5ac   :  { %12175 = vmatprep.mubr.bf16.mxu1 %v15569_v41  ;;  %6008 = vst.msk [vmem:[#allocation4 + $0x28] sm:$0xff] %vm18365_vm4, %v6502_v42  ;;  %v13481_v41 = vld [vmem:[%s18123_s2 + $0x148] sm:$0xff]   ;;  %vm18367_vm4 = vmmov %vm18361_vm2 }
 0x5ad   :  { %6441 = vrot.lane.b32.xlu1 %v6406_v59, %s13624_s26  ;;  %6011 = vst.msk [vmem:[#allocation4 + $0x40] sm:$0xff] %vm18367_vm4, %v6218_v29  ;;  %vm18371_vm2 = vmmov %vm18369_vm0 }
 0x5ae   :  { %6631 = vrot.lane.b32.xlu0 %v6310_v37, %s13626_s25  ;;  %vm18372_vm4 = vmmov %vm18369_vm0 }
 0x5b1   :  { %6537 = vrot.lane.b32.xlu1 %v6502_v42, %s13625_s13 }
 0x5b2   :  { %6727 = vrot.lane.b32.xlu0 %v6406_v59, %s13627_s14 }
 0x5b3   :  { %12176 = vmatmul.mubr.bf16.gmra.mrb[60].mxu1 %v18364_v46  ;;  %v13492_v46 = vld [vmem:[%s18123_s2 + $0x1a0] sm:$0xff]  }
 0x5b4   :  { %12195 = vmatprep.mubr.bf16.mxu1 %v15330_v60  ;;  %v6598_v60 = vld [vmem:[#allocation2 + $0xb8] sm:$0xff] }
 0x5b5   :  { %6633 = vrot.lane.b32.xlu1 %v6598_v60, %s13626_s25 }
 0x5b9   :  { %6059 = vrot.lane.b32.xlu1 %v6310_v37, %s13620_s23 }
 0x5bb   :  { %12196 = vmatmul.mubr.bf16.vlgmr.msra.gmra.mrb[32].mxu1 %v18348_v2  ;;  %v6694_v2 = vld [vmem:[#allocation2 + $0x148] sm:$0xff] }
 0x5bc   :  { %12228 = vmatpush3.bf16.msra.mxu1 %v13480_v24  ;;  %12199 = vmatprep.mubr.bf16.mxu1 %v18349_v34  ;;  %v13484_v34 = vld [vmem:[%s18123_s2 + $0x160] sm:$0xff]   ;;  %v13490_v24 = vld [vmem:[%s18123_s2 + $0x190] sm:$0xff]  }
 0x5bd   :  { %12229 = vmatprep.subr.bf16.mxu1 %v13481_v41  ;;  %6729 = vrot.lane.b32.xlu0 %v6694_v2, %s13627_s14 }
 0x5be   :  { %6061 = vrot.lane.b32.xlu1 %v6598_v60, %s13620_s23 }
 0x5c0   :  { %12230 = vmatpush3.bf16.msra.mxu1 %v13481_v41  ;;  %v6220_v41 = vld [vmem:[#allocation2 + $0x50] sm:$0xff] }
 0x5c1   :  { %12231 = vmatprep.subr.bf16.mxu1 %v13482_v45  ;;  %6155 = vrot.lane.b32.xlu0 %v6406_v59, %s13622_s29  ;;  %v13493_v59 = vld [vmem:[%s18123_s2 + $0x1a8] sm:$0xff]   ;;  %6013 = vst.msk [vmem:[#allocation4 + $0x50] sm:$0xff] %vm18371_vm2, %v6220_v41  ;;  %vm18374_vm2 = vmmov %vm18369_vm0 }
 0x5c2   :  { %6157 = vrot.lane.b32.xlu1 %v6694_v2, %s13622_s29 }
 0x5c3   :  { %12200 = vmatmul.mubr.bf16.gmra.mrb[36].mxu1 %v18350_v8  ;;  %v6216_v8 = vld [vmem:[#allocation2 + $0x30] sm:$0xff] }
 0x5c4   :  { %12203 = vmatprep.mubr.bf16.mxu1 %v18351_v25  ;;  %12232 = vmatpush3.bf16.msra.mxu1 %v13482_v45  ;;  %v13486_v25 = vld [vmem:[%s18123_s2 + $0x170] sm:$0xff]   ;;  %6009 = vst.msk [vmem:[#allocation4 + $0x30] sm:$0xff] %vm18366_vm6, %v6216_v8  ;;  %vm18370_vm6 = vmmov %vm18369_vm0 }
 0x5c5   :  { %12233 = vmatprep.subr.bf16.mxu1 %v13483_v39  ;;  %6251 = vrot.lane.b32.xlu0 %v6502_v42, %s13623_s15  ;;  %6012 = vst.msk [vmem:[#allocation4 + $0x48] sm:$0xff] %vm18370_vm6, %v16001_v26  ;;  %v13494_v45 = vld [vmem:[%s18123_s2 + $0x1b0] sm:$0xff]   ;;  %vm18373_vm6 = vmmov %vm18369_vm0 }
 0x5c6   :  { %6253 = vrot.lane.b32.xlu1 %v6216_v8, %s13623_s15  ;;  %6016 = vst.msk [vmem:[#allocation4 + $0x68] sm:$0xff] %vm18373_vm6, %v16116_v16 }
 0x5c8   :  { %12234 = vmatpush3.bf16.msra.mxu1 %v13483_v39 }
 0x5c9   :  { %12235 = vmatprep.subr.bf16.mxu1 %v13484_v34  ;;  %6347 = vrot.lane.b32.xlu0 %v6598_v60, %s13621_s17 }
 0x5ca   :  { %6349 = vrot.lane.b32.xlu1 %v6312_v27, %s13621_s17 }
 0x5cb   :  { %12204 = vmatmul.mubr.bf16.gmra.mrb[40].mxu1 %v18352_v6  ;;  %v13487_v6 = vld [vmem:[%s18123_s2 + $0x178] sm:$0xff]  }
 0x5cc   :  { %12207 = vmatprep.mubr.bf16.mxu1 %v18353_v5  ;;  %12236 = vmatpush3.bf16.msra.mxu1 %v13484_v34  ;;  %v15953_v5 = vld [vmem:[#allocation3 + $0xd8] sm:$0xff] }
 0x5cd   :  { %12237 = vmatprep.subr.bf16.mxu1 %v13485_v17  ;;  %6443 = vrot.lane.b32.xlu0 %v6694_v2, %s13624_s26  ;;  %v13495_v2 = vld [vmem:[%s18123_s2 + $0x1b8] sm:$0xff]  }
 0x5ce   :  { %6445 = vrot.lane.b32.xlu1 %v6408_v44, %s13624_s26 }
 0x5d0   :  { %12238 = vmatpush3.bf16.msra.mxu1 %v13485_v17  ;;  %v6412_v17 = vld [vmem:[#allocation2 + $0x170] sm:$0xff] }
 0x5d1   :  { %12239 = vmatprep.subr.bf16.mxu1 %v13486_v25  ;;  %6539 = vrot.lane.b32.xlu0 %v6216_v8, %s13625_s13  ;;  %v6508_v8 = vld [vmem:[#allocation2 + $0x58] sm:$0xff] }
 0x5d2   :  { %6541 = vrot.lane.b32.xlu1 %v6504_v47, %s13625_s13  ;;  %6014 = vst.msk [vmem:[#allocation4 + $0x58] sm:$0xff] %vm18372_vm4, %v6508_v8  ;;  %vm18375_vm4 = vmmov %vm18369_vm0 }
 0x5d3   :  { %12208 = vmatmul.mubr.bf16.gmra.mrb[44].mxu1 %v18354_v38  ;;  %v15963_v38 = vld [vmem:[#allocation3 + $0xe0] sm:$0xff] }
 0x5d4   :  { %12211 = vmatprep.mubr.bf16.mxu1 %v15953_v5  ;;  %12240 = vmatpush3.bf16.msra.mxu1 %v13486_v25  ;;  %v16073_v25 = vld [vmem:[%s18123_s2 + $0x1c0] sm:$0xff]  }
 0x5d5   :  { %12241 = vmatprep.subr.bf16.mxu1 %v13487_v6  ;;  %6635 = vrot.lane.b32.xlu0 %v6312_v27, %s13626_s25 }
 0x5d6   :  { %6637 = vrot.lane.b32.xlu1 %v6600_v22, %s13626_s25 }
 0x5d8   :  { %12242 = vmatpush3.bf16.msra.mxu1 %v13487_v6 }
 0x5d9   :  { %12275 = vmatprep.subr.bf16.mxu1 %v13488_v50  ;;  %6731 = vrot.lane.b32.xlu0 %v6408_v44, %s13627_s14 }
 0x5da   :  { %6063 = vrot.lane.b32.xlu1 %v6312_v27, %s13620_s23 }
 0x5db   :  { %12212 = vmatmul.mubr.bf16.gmra.mrb[48].mxu1 %v15963_v38 }
 0x5dc   :  { %12215 = vmatprep.mubr.bf16.mxu1 %v15967_v32 }
 0x5dd   :  { %6733 = vrot.lane.b32.xlu0 %v6696_v11, %s13627_s14 }
 0x5de   :  { %6065 = vrot.lane.b32.xlu1 %v6600_v22, %s13620_s23 }
 0x5e1   :  { %6159 = vrot.lane.b32.xlu0 %v6408_v44, %s13622_s29  ;;  %v6604_v44 = vld [vmem:[#allocation2 + $0xe8] sm:$0xff] }
 0x5e2   :  { %6161 = vrot.lane.b32.xlu1 %v6696_v11, %s13622_s29 }
 0x5e3   :  { %12216 = vmatmul.mubr.bf16.gmra.mrb[52].mxu1 %v15973_v23 }
 0x5e4   :  { %12219 = vmatprep.mubr.bf16.mxu1 %v15977_v55 }
 0x5e5   :  { %6255 = vrot.lane.b32.xlu0 %v6504_v47, %s13623_s15 }
 0x5e6   :  { %6257 = vrot.lane.b32.xlu1 %v6218_v29, %s13623_s15 }
 0x5e9   :  { %6351 = vrot.lane.b32.xlu0 %v6600_v22, %s13621_s17  ;;  %v6700_v22 = vld [vmem:[#allocation2 + $0x178] sm:$0xff] }
 0x5ea   :  { %6353 = vrot.lane.b32.xlu1 %v6314_v61, %s13621_s17 }
 0x5eb   :  { %12220 = vmatmul.mubr.bf16.gmra.mrb[56].mxu1 %v15983_v49 }
 0x5ec   :  { %12223 = vmatprep.mubr.bf16.mxu1 %v15987_v53 }
 0x5ed   :  { %6447 = vrot.lane.b32.xlu0 %v6696_v11, %s13624_s26 }
 0x5ee   :  { %6449 = vrot.lane.b32.xlu1 %v6410_v18, %s13624_s26 }
 0x5f1   :  { %6543 = vrot.lane.b32.xlu0 %v6218_v29, %s13625_s13 }
 0x5f2   :  { %6545 = vrot.lane.b32.xlu1 %v16001_v26, %s13625_s13 }
 0x5f3   :  { %12224 = vmatmul.mubr.bf16.gmra.mrb[60].mxu1 %v15996_v28 }
 0x5f4   :  { %12243 = vmatprep.mubr.bf16.mxu1 %v15657_v4  ;;  %v6148_v4 = vpop.permute.xlu0 %6147 }
 0x5f5   :  { %6195 = vst.msk [vmem:[#allocation4] sm:$0xff] %vm841_vm13, %v6148_v4  ;;  %6639 = vrot.lane.b32.xlu0 %v6314_v61, %s13626_s25  ;;  %v4268_v4 = vld [vmem:[#allocation3 + $0x18] sm:$0xff] }
 0x5f6   :  { %6641 = vrot.lane.b32.xlu1 %v6602_v19, %s13626_s25 }
 0x5f8   :  { %v6244_v31 = vpop.permute.xlu0 %6243 }
 0x5f9   :  { %6291 = vst.msk [vmem:[#allocation4] sm:$0xff] %vm938_vm14, %v6244_v31  ;;  %6735 = vrot.lane.b32.xlu0 %v6410_v18, %s13627_s14  ;;  %v6606_v31 = vld [vmem:[#allocation2 + $0xf8] sm:$0xff] }
 0x5fa   :  { %6067 = vrot.lane.b32.xlu1 %v6314_v61, %s13620_s23 }
 0x5fb   :  { %12244 = vmatmul.mubr.bf16.vlgmr.msra.gmra.mrb[32].mxu1 %v15661_v58  ;;  %v6246_v58 = vpop.permute.xlu1 %6245 }
 0x5fc   :  { %12276 = vmatpush3.bf16.msra.mxu1 %v13488_v50  ;;  %12247 = vmatprep.mubr.bf16.mxu1 %v15667_v54  ;;  %6292 = vst.msk [vmem:[#allocation4 + $0x8] sm:$0xff] %vm938_vm14, %v6246_v58  ;;  %v6340_v54 = vpop.permute.xlu0 %6339 }
 0x5fd   :  { %12277 = vmatprep.subr.bf16.mxu1 %v13489_v0  ;;  %6387 = vst.msk [vmem:[#allocation4] sm:$0xff] %vm1035_vm15, %v6340_v54  ;;  %6737 = vrot.lane.b32.xlu0 %v6698_v40, %s13627_s14 }
 0x5fe   :  { %6069 = vrot.lane.b32.xlu1 %v6602_v19, %s13620_s23 }
 0x5ff   :  { %v6342_v52 = vpop.permute.xlu1 %6341 }
 0x600   :  { %12278 = vmatpush3.bf16.msra.mxu1 %v13489_v0  ;;  %6388 = vst.msk [vmem:[#allocation4 + $0x8] sm:$0xff] %vm1035_vm15, %v6342_v52  ;;  %v6436_v37 = vpop.permute.xlu0 %6435  ;;  %v4269_v0 = vld [vmem:[#allocation3 + $0x20] sm:$0xff]  ;;  %v4270_v52 = vld [vmem:[#allocation3 + $0x28] sm:$0xff] }
 0x601   :  { %12279 = vmatprep.subr.bf16.mxu1 %v13490_v24  ;;  %6483 = vst.msk [vmem:[#allocation4] sm:$0xff] %vm1132_vm1, %v6436_v37  ;;  %6163 = vrot.lane.b32.xlu0 %v6410_v18, %s13622_s29 }
 0x602   :  { %6165 = vrot.lane.b32.xlu1 %v6698_v40, %s13622_s29 }
 0x603   :  { %12248 = vmatmul.mubr.bf16.gmra.mrb[36].mxu1 %v15671_v63  ;;  %v6438_v63 = vpop.permute.xlu1 %6437 }
 0x604   :  { %12251 = vmatprep.mubr.bf16.mxu1 %v15675_v10  ;;  %12280 = vmatpush3.bf16.msra.mxu1 %v13490_v24  ;;  %6484 = vst.msk [vmem:[#allocation4 + $0x8] sm:$0xff] %vm1132_vm1, %v6438_v63  ;;  %v6532_v10 = vpop.permute.xlu0 %6531  ;;  %v13498_v24 = vld [vmem:[%s18123_s2 + $0x1d0] sm:$0xff]  }
 0x605   :  { %12281 = vmatprep.subr.bf16.mxu1 %v13491_v35  ;;  %6579 = vst.msk [vmem:[#allocation4] sm:$0xff] %vm1230_vm3, %v6532_v10  ;;  %6259 = vrot.lane.b32.xlu0 %v16001_v26, %s13623_s15  ;;  %v13500_v10 = vld [vmem:[%s18123_s2 + $0x1e0] sm:$0xff]  }
 0x606   :  { %6261 = vrot.lane.b32.xlu1 %v6220_v41, %s13623_s15 }
 0x607   :  { %v6534_v42 = vpop.permute.xlu1 %6533 }
 0x608   :  { %12282 = vmatpush3.bf16.msra.mxu1 %v13491_v35  ;;  %6580 = vst.msk [vmem:[#allocation4 + $0x8] sm:$0xff] %vm1230_vm3, %v6534_v42  ;;  %v6628_v60 = vpop.permute.xlu0 %6627  ;;  %v13499_v35 = vld [vmem:[%s18123_s2 + $0x1d8] sm:$0xff]  }
 0x609   :  { %12283 = vmatprep.subr.bf16.mxu1 %v13492_v46  ;;  %6675 = vst.msk [vmem:[#allocation4] sm:$0xff] %vm1328_vm5, %v6628_v60  ;;  %6355 = vrot.lane.b32.xlu0 %v6602_v19, %s13621_s17  ;;  %v4272_v60 = vld [vmem:[#allocation3 + $0x38] sm:$0xff] }
 0x60b   :  { %12252 = vmatmul.mubr.bf16.gmra.mrb[40].mxu1 %v15679_v1  ;;  %v6630_v1 = vpop.permute.xlu1 %6629 }
 0x60c   :  { %12255 = vmatprep.mubr.bf16.mxu1 %v15687_v30  ;;  %12284 = vmatpush3.bf16.msra.mxu1 %v13492_v46  ;;  %v6316_v30 = vld [vmem:[#allocation2 + $0xe0] sm:$0xff]  ;;  %6676 = vst.msk [vmem:[#allocation4 + $0x8] sm:$0xff] %vm1328_vm5, %v6630_v1  ;;  %v6724_v39 = vpop.permute.xlu0 %6723  ;;  %v6702_v46 = vld [vmem:[#allocation2 + $0x188] sm:$0xff] }
 0x60d   :  { %12285 = vmatprep.subr.bf16.mxu1 %v13493_v59  ;;  %6771 = vst.msk [vmem:[#allocation4] sm:$0xff] %vm1426_vm7, %v6724_v39  ;;  %6357 = vrot.lane.b32.xlu1 %v6316_v30, %s13621_s17  ;;  %v6224_v39 = vld [vmem:[#allocation2 + $0x70] sm:$0xff] }
 0x60e   :  { %6451 = vrot.lane.b32.xlu0 %v6698_v40, %s13624_s26  ;;  %v4271_v40 = vld [vmem:[#allocation3 + $0x30] sm:$0xff]  ;;  %6017 = vst.msk [vmem:[#allocation4 + $0x70] sm:$0xff] %vm18374_vm2, %v6224_v39 }
 0x60f   :  { %v6056_v34 = vpop.permute.xlu1 %6055 }
 0x610   :  { %12286 = vmatpush3.bf16.msra.mxu1 %v13493_v59  ;;  %6101 = vst.msk [vmem:[#allocation4 + $0x10] sm:$0xff] %vm744_vm12, %v6056_v34 }
 0x611   :  { %12287 = vmatprep.subr.bf16.mxu1 %v13494_v45  ;;  %6453 = vrot.lane.b32.xlu1 %v6412_v17, %s13624_s26 }
 0x612   :  { %6547 = vrot.lane.b32.xlu0 %v6220_v41, %s13625_s13  ;;  %v13501_v41 = vld [vmem:[%s18123_s2 + $0x1e8] sm:$0xff]  }
 0x613   :  { %12256 = vmatmul.mubr.bf16.gmra.mrb[44].mxu1 %v15691_v36  ;;  %v6726_v36 = vpop.permute.xlu0 %6725 }
 0x614   :  { %12259 = vmatprep.mubr.bf16.mxu1 %v15695_v48  ;;  %12288 = vmatpush3.bf16.msra.mxu1 %v13494_v45  ;;  %6772 = vst.msk [vmem:[#allocation4 + $0x8] sm:$0xff] %vm1426_vm7, %v6726_v36  ;;  %v6058_v48 = vpop.permute.xlu1 %6057  ;;  %v4273_v45 = vld [vmem:[#allocation3 + $0x40] sm:$0xff]  ;;  %v4274_v36 = vld [vmem:[#allocation3 + $0x48] sm:$0xff] }
 0x615   :  { %12289 = vmatprep.subr.bf16.mxu1 %v13495_v2  ;;  %6102 = vst.msk [vmem:[#allocation4 + $0x18] sm:$0xff] %vm744_vm12, %v6058_v48  ;;  %6549 = vrot.lane.b32.xlu1 %v6508_v8, %s13625_s13  ;;  %v4275_v48 = vld [vmem:[#allocation3 + $0x50] sm:$0xff] }
 0x616   :  { %6643 = vrot.lane.b32.xlu0 %v6316_v30, %s13626_s25 }
 0x617   :  { %v6152_v27 = vpop.permute.xlu0 %6151 }
 0x618   :  { %12290 = vmatpush3.bf16.msra.mxu1 %v13495_v2  ;;  %6197 = vst.msk [vmem:[#allocation4 + $0x10] sm:$0xff] %vm841_vm13, %v6152_v27  ;;  %v6154_v6 = vpop.permute.xlu1 %6153  ;;  %v13502_v2 = vld [vmem:[%s18123_s2 + $0x1f0] sm:$0xff]  }
 0x619   :  { %12323 = vmatprep.subr.bf16.mxu1 %v16073_v25  ;;  %6198 = vst.msk [vmem:[#allocation4 + $0x18] sm:$0xff] %vm841_vm13, %v6154_v6  ;;  %6645 = vrot.lane.b32.xlu1 %v6604_v44, %s13626_s25 }
 0x61a   :  { %6739 = vrot.lane.b32.xlu0 %v6412_v17, %s13627_s14 }
 0x61b   :  { %12260 = vmatmul.mubr.bf16.gmra.mrb[48].mxu1 %v15699_v21  ;;  %v6248_v47 = vpop.permute.xlu0 %6247 }
 0x61c   :  { %12263 = vmatprep.mubr.bf16.mxu1 %v15710_v51  ;;  %6293 = vst.msk [vmem:[#allocation4 + $0x10] sm:$0xff] %vm938_vm14, %v6248_v47  ;;  %v6250_v50 = vpop.permute.xlu1 %6249  ;;  %v6512_v47 = vld [vmem:[#allocation2 + $0x78] sm:$0xff] }
 0x61d   :  { %6294 = vst.msk [vmem:[#allocation4 + $0x18] sm:$0xff] %vm938_vm14, %v6250_v50  ;;  %6071 = vrot.lane.b32.xlu1 %v6316_v30, %s13620_s23  ;;  %v16180_v50 = vld [vmem:[%s18123_s2 + $0x200] sm:$0xff]  }
 0x61e   :  { %6741 = vrot.lane.b32.xlu0 %v6700_v22, %s13627_s14  ;;  %6018 = vst.msk [vmem:[#allocation4 + $0x78] sm:$0xff] %vm18375_vm4, %v6512_v47 }
 0x61f   :  { %v6344_v21 = vpop.permute.xlu0 %6343 }
 0x620   :  { %6389 = vst.msk [vmem:[#allocation4 + $0x10] sm:$0xff] %vm1035_vm15, %v6344_v21  ;;  %v6346_v51 = vpop.permute.xlu1 %6345 }
 0x621   :  { %6390 = vst.msk [vmem:[#allocation4 + $0x18] sm:$0xff] %vm1035_vm15, %v6346_v51  ;;  %6073 = vrot.lane.b32.xlu1 %v6604_v44, %s13620_s23 }
 0x622   :  { %6167 = vrot.lane.b32.xlu0 %v6412_v17, %s13622_s29  ;;  %v6320_v17 = vld [vmem:[#allocation2 + $0x100] sm:$0xff] }
 0x623   :  { %12264 = vmatmul.mubr.bf16.gmra.mrb[52].mxu1 %v15714_v43  ;;  %v6440_v11 = vpop.permute.xlu0 %6439 }
 0x624   :  { %12267 = vmatprep.mubr.bf16.mxu1 %v15718_v14  ;;  %6485 = vst.msk [vmem:[#allocation4 + $0x10] sm:$0xff] %vm1132_vm1, %v6440_v11  ;;  %v6442_v29 = vpop.permute.xlu1 %6441  ;;  %v4277_v11 = vld [vmem:[#allocation3 + $0x60] sm:$0xff] }
 0x625   :  { %6486 = vst.msk [vmem:[#allocation4 + $0x18] sm:$0xff] %vm1132_vm1, %v6442_v29  ;;  %6169 = vrot.lane.b32.xlu1 %v6700_v22, %s13622_s29 }
 0x626   :  { %6263 = vrot.lane.b32.xlu0 %v6508_v8, %s13623_s15 }
 0x627   :  { %v6536_v43 = vpop.permute.xlu0 %6535 }
 0x628   :  { %6581 = vst.msk [vmem:[#allocation4 + $0x10] sm:$0xff] %vm1230_vm3, %v6536_v43  ;;  %v6538_v14 = vpop.permute.xlu1 %6537 }
 0x629   :  { %6582 = vst.msk [vmem:[#allocation4 + $0x18] sm:$0xff] %vm1230_vm3, %v6538_v14  ;;  %6265 = vrot.lane.b32.xlu1 %v6222_v7, %s13623_s15  ;;  %v6608_v14 = vld [vmem:[#allocation2 + $0x108] sm:$0xff] }
 0x62a   :  { %6359 = vrot.lane.b32.xlu0 %v6604_v44, %s13621_s17  ;;  %v6416_v44 = vld [vmem:[#allocation2 + $0x190] sm:$0xff] }
 0x62b   :  { %12268 = vmatmul.mubr.bf16.gmra.mrb[56].mxu1 %v15722_v62  ;;  %v6632_v57 = vpop.permute.xlu0 %6631  ;;  %v4267_v62 = vld [vmem:[#allocation3 + $0x10] sm:$0xff] }
 0x62c   :  { %12271 = vmatprep.mubr.bf16.mxu1 %v15730_v3  ;;  %6677 = vst.msk [vmem:[#allocation4 + $0x10] sm:$0xff] %vm1328_vm5, %v6632_v57  ;;  %v6634_v61 = vpop.permute.xlu1 %6633 }
 0x62d   :  { %6678 = vst.msk [vmem:[#allocation4 + $0x18] sm:$0xff] %vm1328_vm5, %v6634_v61  ;;  %6361 = vrot.lane.b32.xlu1 %v6318_v13, %s13621_s17  ;;  %v4279_v61 = vld [vmem:[#allocation3 + $0x70] sm:$0xff] }
 0x62e   :  { %6455 = vrot.lane.b32.xlu0 %v6700_v22, %s13624_s26  ;;  %v4276_v22 = vld [vmem:[#allocation3 + $0x58] sm:$0xff] }
 0x62f   :  { %v6728_v3 = vpop.permute.xlu0 %6727 }
 0x630   :  { %6773 = vst.msk [vmem:[#allocation4 + $0x10] sm:$0xff] %vm1426_vm7, %v6728_v3  ;;  %v6060_v18 = vpop.permute.xlu1 %6059  ;;  %v6704_v3 = vld [vmem:[#allocation2 + $0x198] sm:$0xff] }
 0x631   :  { %6103 = vst.msk [vmem:[#allocation4 + $0x20] sm:$0xff] %vm744_vm12, %v6060_v18  ;;  %6457 = vrot.lane.b32.xlu1 %v6414_v20, %s13624_s26 }
 0x632   :  { %6551 = vrot.lane.b32.xlu0 %v6222_v7, %s13625_s13 }
 0x633   :  { %12272 = vmatmul.mubr.bf16.gmra.mrb[60].mxu1 %v15734_v9  ;;  %v6730_v26 = vpop.permute.xlu0 %6729 }
 0x634   :  { %12291 = vmatprep.mubr.bf16.mxu1 %v4267_v62  ;;  %6774 = vst.msk [vmem:[#allocation4 + $0x18] sm:$0xff] %vm1426_vm7, %v6730_v26  ;;  %v6062_v9 = vpop.permute.xlu1 %6061  ;;  %v4280_v26 = vld [vmem:[#allocation3 + $0x78] sm:$0xff] }
 0x635   :  { %6104 = vst.msk [vmem:[#allocation4 + $0x28] sm:$0xff] %vm744_vm12, %v6062_v9  ;;  %6553 = vrot.lane.b32.xlu1 %v16116_v16, %s13625_s13  ;;  %v4281_v9 = vld [vmem:[#allocation3 + $0x80] sm:$0xff] }
 0x636   :  { %6647 = vrot.lane.b32.xlu0 %v6318_v13, %s13626_s25 }
 0x637   :  { %v6156_v56 = vpop.permute.xlu0 %6155 }
 0x638   :  { %6199 = vst.msk [vmem:[#allocation4 + $0x20] sm:$0xff] %vm841_vm13, %v6156_v56  ;;  %v6158_v19 = vpop.permute.xlu1 %6157  ;;  %v273_v56 = vld [vmem:[#allocation3 + $0x1a8] sm:$0x80] }
 0x639   :  { %6200 = vst.msk [vmem:[#allocation4 + $0x28] sm:$0xff] %vm841_vm13, %v6158_v19  ;;  %6649 = vrot.lane.b32.xlu1 %v6606_v31, %s13626_s25  ;;  %v274_v19 = vsel %vm14880_vm8, 0, %v273_v56  ;;  %vm18376_vm8 = vcmask 1041408  }
 0x63a   :  { %6743 = vrot.lane.b32.xlu0 %v6414_v20, %s13627_s14  ;;  %275 = vst [vmem:[#allocation3 + $0x1a8] sm:$0x80] %v274_v19  ;;  %vm18377_vm0 = vmmov %vm18376_vm8 }
 0x63b   :  { %12292 = vmatmul.mubr.bf16.vlgmr.msra.gmra.mrb[32].mxu1 %v4268_v4  ;;  %v6252_v58 = vpop.permute.xlu0 %6251 }
 0x63c   :  { %12324 = vmatpush3.bf16.msra.mxu1 %v16073_v25  ;;  %12295 = vmatprep.mubr.bf16.mxu1 %v4269_v0  ;;  %6295 = vst.msk [vmem:[#allocation4 + $0x20] sm:$0xff] %vm938_vm14, %v6252_v58  ;;  %v6254_v54 = vpop.permute.xlu1 %6253  ;;  %v13503_v25 = vld [vmem:[%s18123_s2 + $0x1f8] sm:$0xff]   ;;  %v6226_v0 = vld [vmem:[#allocation2 + $0x80] sm:$0xff] }
 0x63d   :  { %12325 = vmatprep.subr.bf16.mxu1 %v13497_v12  ;;  %6296 = vst.msk [vmem:[#allocation4 + $0x28] sm:$0xff] %vm938_vm14, %v6254_v54  ;;  %6075 = vrot.lane.b32.xlu1 %v6318_v13, %s13620_s23  ;;  %v4278_v13 = vld [vmem:[#allocation3 + $0x68] sm:$0xff] }
 0x63e   :  { %6745 = vrot.lane.b32.xlu0 %v6702_v46, %s13627_s14  ;;  %v4282_v58 = vld [vmem:[#allocation3 + $0x88] sm:$0xff] }
 0x63f   :  { %v6348_v37 = vpop.permute.xlu0 %6347 }
 0x640   :  { %12326 = vmatpush3.bf16.msra.mxu1 %v13497_v12  ;;  %6391 = vst.msk [vmem:[#allocation4 + $0x20] sm:$0xff] %vm1035_vm15, %v6348_v37  ;;  %v6350_v63 = vpop.permute.xlu1 %6349  ;;  %v13512_v37 = vld [vmem:[%s18122_s1] sm:$0xff]  }
 0x641   :  { %12327 = vmatprep.subr.bf16.mxu1 %v13498_v24  ;;  %6392 = vst.msk [vmem:[#allocation4 + $0x28] sm:$0xff] %vm1035_vm15, %v6350_v63  ;;  %6077 = vrot.lane.b32.xlu1 %v6606_v31, %s13620_s23  ;;  %v6787_v63 = vld [vmem:[#allocation4] sm:$0xff] }
 0x642   :  { %6171 = vrot.lane.b32.xlu0 %v6414_v20, %s13622_s29  ;;  %12419 = vmatprep.subr.bf16.mxu0 %v13512_v37 }
 0x643   :  { %12296 = vmatmul.mubr.bf16.gmra.mrb[36].mxu1 %v4270_v52  ;;  %v6444_v59 = vpop.permute.xlu0 %6443  ;;  %12420 = vmatpush3.bf16.msra.mxu0 %v13512_v37  ;;  %v4945_v37 = vld [vmem:[#allocation3 + $0x130] sm:$0xff] }
 0x644   :  { %12299 = vmatprep.mubr.bf16.mxu1 %v4271_v40  ;;  %12328 = vmatpush3.bf16.msra.mxu1 %v13498_v24  ;;  %6487 = vst.msk [vmem:[#allocation4 + $0x20] sm:$0xff] %vm1132_vm1, %v6444_v59  ;;  %v6446_v42 = vpop.permute.xlu1 %6445  ;;  %v6322_v24 = vld [vmem:[#allocation2 + $0x110] sm:$0xff]  ;;  %v6514_v59 = vld [vmem:[#allocation2 + $0x88] sm:$0xff] }
 0x645   :  { %12329 = vmatprep.subr.bf16.mxu1 %v13499_v35  ;;  %6488 = vst.msk [vmem:[#allocation4 + $0x28] sm:$0xff] %vm1132_vm1, %v6446_v42  ;;  %6173 = vrot.lane.b32.xlu1 %v6702_v46, %s13622_s29 }
 0x646   :  { %6267 = vrot.lane.b32.xlu0 %v16116_v16, %s13623_s15  ;;  %12425 = vmatprep.mubr.msk.bf16.mxu0 %vm1479_vm10, %v6787_v63 }
 0x647   :  { %v6540_v1 = vpop.permute.xlu0 %6539 }
 0x648   :  { %12330 = vmatpush3.bf16.msra.mxu1 %v13499_v35  ;;  %6583 = vst.msk [vmem:[#allocation4 + $0x20] sm:$0xff] %vm1230_vm3, %v6540_v1  ;;  %v6542_v30 = vpop.permute.xlu1 %6541  ;;  %v4606_v35 = vld [vmem:[#allocation3 + $0xa0] sm:$0xff]  ;;  %v4608_v1 = vld [vmem:[#allocation3 + $0xb0] sm:$0xff] }
 0x649   :  { %12331 = vmatprep.subr.bf16.mxu1 %v13500_v10  ;;  %6584 = vst.msk [vmem:[#allocation4 + $0x28] sm:$0xff] %vm1230_vm3, %v6542_v30  ;;  %6269 = vrot.lane.b32.xlu1 %v6224_v39, %s13623_s15 }
 0x64a   :  { %6363 = vrot.lane.b32.xlu0 %v6606_v31, %s13621_s17 }
 0x64b   :  { %12300 = vmatmul.mubr.bf16.gmra.mrb[40].mxu1 %v4272_v60  ;;  %v6636_v34 = vpop.permute.xlu0 %6635  ;;  %v13505_v60 = vld [vmem:[%s18123_s2 + $0x208] sm:$0xff]  }
 0x64c   :  { %12303 = vmatprep.mubr.bf16.mxu1 %v4273_v45  ;;  %12332 = vmatpush3.bf16.msra.mxu1 %v13500_v10  ;;  %6679 = vst.msk [vmem:[#allocation4 + $0x20] sm:$0xff] %vm1328_vm5, %v6636_v34  ;;  %v6638_v8 = vpop.permute.xlu1 %6637  ;;  %v4607_v45 = vld [vmem:[#allocation3 + $0xa8] sm:$0xff] }
 0x64d   :  { %12333 = vmatprep.subr.bf16.mxu1 %v13501_v41  ;;  %6680 = vst.msk [vmem:[#allocation4 + $0x28] sm:$0xff] %vm1328_vm5, %v6638_v8  ;;  %6365 = vrot.lane.b32.xlu1 %v6320_v17, %s13621_s17 }
 0x64e   :  { %6459 = vrot.lane.b32.xlu0 %v6702_v46, %s13624_s26  ;;  %v13513_v46 = vld [vmem:[%s18122_s1 + $0x8] sm:$0xff]  }
 0x64f   :  { %v6732_v27 = vpop.permute.xlu0 %6731  ;;  %12421 = vmatprep.subr.bf16.mxu0 %v13513_v46 }
 0x650   :  { %12334 = vmatpush3.bf16.msra.mxu1 %v13501_v41  ;;  %6775 = vst.msk [vmem:[#allocation4 + $0x20] sm:$0xff] %vm1426_vm7, %v6732_v27  ;;  %v6064_v6 = vpop.permute.xlu1 %6063  ;;  %v13514_v41 = vld [vmem:[%s18122_s1 + $0x10] ss:$0 sps:$4 sm:$0x33]   ;;  %12422 = vmatpush3.bf16.msra.mxu0 %v13513_v46 }
 0x651   :  { %12335 = vmatprep.subr.bf16.mxu1 %v13502_v2  ;;  %6105 = vst.msk [vmem:[#allocation4 + $0x30] sm:$0xff] %vm744_vm12, %v6064_v6  ;;  %6461 = vrot.lane.b32.xlu1 %v6416_v44, %s13624_s26  ;;  %v6872_v34 = vsel %vm18376_vm8, %v13514_v41, 0  ;;  %v6789_v27 = vld [vmem:[#allocation4 + $0x10] sm:$0xff]  ;;  %v13507_v6 = vld [vmem:[%s18123_s2 + $0x218] sm:$0xff]  }
 0x652   :  { %6555 = vrot.lane.b32.xlu0 %v6224_v39, %s13625_s13  ;;  %v6610_v39 = vld [vmem:[#allocation2 + $0x118] sm:$0xff]  ;;  %13402 = vmatprep.subr.msk.bf16.mxu0 %vm18377_vm0, %v13514_v41 }
 0x653   :  { %12304 = vmatmul.mubr.bf16.gmra.mrb[44].mxu1 %v4274_v36  ;;  %v6734_v21 = vpop.permute.xlu0 %6733  ;;  %v6788_v36 = vld [vmem:[#allocation4 + $0x8] sm:$0xff] }
 0x654   :  { %12307 = vmatprep.mubr.bf16.mxu1 %v4275_v48  ;;  %12336 = vmatpush3.bf16.msra.mxu1 %v13502_v2  ;;  %6776 = vst.msk [vmem:[#allocation4 + $0x28] sm:$0xff] %vm1426_vm7, %v6734_v21  ;;  %v6066_v51 = vpop.permute.xlu1 %6065 }
 0x655   :  { %12337 = vmatprep.subr.bf16.mxu1 %v13503_v25  ;;  %6106 = vst.msk [vmem:[#allocation4 + $0x38] sm:$0xff] %vm744_vm12, %v6066_v51  ;;  %6557 = vrot.lane.b32.xlu1 %v6512_v47, %s13625_s13  ;;  %v13508_v51 = vld [vmem:[%s18123_s2 + $0x220] sm:$0xff]  }
 0x656   :  { %6651 = vrot.lane.b32.xlu0 %v6320_v17, %s13626_s25  ;;  %12424 = vmatpush3.bf16.msra.mxu0 %v6872_v34 }
 0x657   :  { %v6160_v29 = vpop.permute.xlu0 %6159 }
 0x658   :  { %12338 = vmatpush3.bf16.msra.mxu1 %v13503_v25  ;;  %6201 = vst.msk [vmem:[#allocation4 + $0x30] sm:$0xff] %vm841_vm13, %v6160_v29  ;;  %v6162_v43 = vpop.permute.xlu1 %6161  ;;  %v6706_v25 = vld [vmem:[#allocation2 + $0x1a8] sm:$0xff] }
 0x659   :  { %12371 = vmatprep.subr.bf16.mxu1 %v16180_v50  ;;  %6202 = vst.msk [vmem:[#allocation4 + $0x38] sm:$0xff] %vm841_vm13, %v6162_v43  ;;  %6653 = vrot.lane.b32.xlu1 %v6608_v14, %s13626_s25  ;;  %v6791_v43 = vld [vmem:[#allocation4 + $0x20] sm:$0xff] }
 0x65a   :  { %6747 = vrot.lane.b32.xlu0 %v6416_v44, %s13627_s14  ;;  %12426 = vmatmul.mubr.msk.bf16.vlgmr.msra.gmra.mrb[0].mxu0 %vm1479_vm10, %v6788_v36  ;;  %v4950_v36 = vld [vmem:[#allocation3 + $0x158] sm:$0xff] }
 0x65b   :  { %12308 = vmatmul.mubr.bf16.gmra.mrb[48].mxu1 %v4276_v22  ;;  %v6256_v7 = vpop.permute.xlu0 %6255  ;;  %12429 = vmatprep.mubr.msk.bf16.mxu0 %vm1479_vm10, %v6789_v27 }
 0x65c   :  { %12311 = vmatprep.mubr.bf16.mxu1 %v4277_v11  ;;  %6297 = vst.msk [vmem:[#allocation4 + $0x30] sm:$0xff] %vm938_vm14, %v6256_v7  ;;  %v6258_v57 = vpop.permute.xlu1 %6257  ;;  %v6790_v11 = vld [vmem:[#allocation4 + $0x18] sm:$0xff] }
 0x65d   :  { %6298 = vst.msk [vmem:[#allocation4 + $0x38] sm:$0xff] %vm938_vm14, %v6258_v57  ;;  %6079 = vrot.lane.b32.xlu1 %v6320_v17, %s13620_s23  ;;  %v13506_v17 = vld [vmem:[%s18123_s2 + $0x210] sm:$0xff]   ;;  %v4611_v7 = vld [vmem:[#allocation3 + $0xc8] sm:$0xff]  ;;  %v4612_v57 = vld [vmem:[#allocation3 + $0xd0] sm:$0xff] }
 0x65e   :  { %6749 = vrot.lane.b32.xlu0 %v6704_v3, %s13627_s14 }
 0x65f   :  { %v6352_v62 = vpop.permute.xlu0 %6351 }
 0x660   :  { %6393 = vst.msk [vmem:[#allocation4 + $0x30] sm:$0xff] %vm1035_vm15, %v6352_v62  ;;  %v6354_v18 = vpop.permute.xlu1 %6353  ;;  %v13510_v62 = vld [vmem:[%s18123_s2 + $0x230] sm:$0xff]  }
 0x661   :  { %6394 = vst.msk [vmem:[#allocation4 + $0x38] sm:$0xff] %vm1035_vm15, %v6354_v18  ;;  %6081 = vrot.lane.b32.xlu1 %v6608_v14, %s13620_s23  ;;  %v6792_v18 = vld [vmem:[#allocation4 + $0x28] sm:$0xff] }
 0x662   :  { %6175 = vrot.lane.b32.xlu0 %v6416_v44, %s13622_s29  ;;  %v4609_v44 = vld [vmem:[#allocation3 + $0xb8] sm:$0xff]  ;;  %12430 = vmatmul.mubr.msk.bf16.gmra.mrb[4].mxu0 %vm1479_vm10, %v6790_v11 }
 0x663   :  { %12312 = vmatmul.mubr.bf16.gmra.mrb[52].mxu1 %v4278_v13  ;;  %v6448_v20 = vpop.permute.xlu0 %6447  ;;  %12433 = vmatprep.mubr.msk.bf16.mxu0 %vm1479_vm10, %v6791_v43  ;;  %v4954_v43 = vld [vmem:[#allocation3 + $0x178] sm:$0xff] }
 0x664   :  { %12315 = vmatprep.mubr.bf16.mxu1 %v4279_v61  ;;  %6489 = vst.msk [vmem:[#allocation4 + $0x30] sm:$0xff] %vm1132_vm1, %v6448_v20  ;;  %v6450_v16 = vpop.permute.xlu1 %6449 }
 0x665   :  { %6490 = vst.msk [vmem:[#allocation4 + $0x38] sm:$0xff] %vm1132_vm1, %v6450_v16  ;;  %6177 = vrot.lane.b32.xlu1 %v6704_v3, %s13622_s29 }
 0x666   :  { %6271 = vrot.lane.b32.xlu0 %v6512_v47, %s13623_s15  ;;  %v4610_v47 = vld [vmem:[#allocation3 + $0xc0] sm:$0xff] }
 0x667   :  { %v6544_v12 = vpop.permute.xlu0 %6543 }
 0x668   :  { %6585 = vst.msk [vmem:[#allocation4 + $0x30] sm:$0xff] %vm1230_vm3, %v6544_v12  ;;  %v6546_v4 = vpop.permute.xlu1 %6545 }
 0x669   :  { %6586 = vst.msk [vmem:[#allocation4 + $0x38] sm:$0xff] %vm1230_vm3, %v6546_v4  ;;  %6273 = vrot.lane.b32.xlu1 %v6226_v0, %s13623_s15 }
 0x66a   :  { %6367 = vrot.lane.b32.xlu0 %v6608_v14, %s13621_s17  ;;  %v13509_v14 = vld [vmem:[%s18123_s2 + $0x228] sm:$0xff]   ;;  %12434 = vmatmul.mubr.msk.bf16.gmra.mrb[8].mxu0 %vm1479_vm10, %v6792_v18  ;;  %v4956_v18 = vld [vmem:[#allocation3 + $0x188] sm:$0xff] }
 0x66b   :  { %12316 = vmatmul.mubr.bf16.gmra.mrb[56].mxu1 %v4280_v26  ;;  %v6640_v31 = vpop.permute.xlu0 %6639  ;;  %v13511_v26 = vld [vmem:[%s18123_s2 + $0x238] sm:$0xff]  }
 0x66c   :  { %12319 = vmatprep.mubr.bf16.mxu1 %v4281_v9  ;;  %6681 = vst.msk [vmem:[#allocation4 + $0x30] sm:$0xff] %vm1328_vm5, %v6640_v31  ;;  %v6642_v54 = vpop.permute.xlu1 %6641 }
 0x66d   :  { %6682 = vst.msk [vmem:[#allocation4 + $0x38] sm:$0xff] %vm1328_vm5, %v6642_v54  ;;  %6369 = vrot.lane.b32.xlu1 %v6322_v24, %s13621_s17 }
 0x66e   :  { %6463 = vrot.lane.b32.xlu0 %v6704_v3, %s13624_s26 }
 0x66f   :  { %v6736_v52 = vpop.permute.xlu0 %6735 }
 0x670   :  { %6777 = vst.msk [vmem:[#allocation4 + $0x30] sm:$0xff] %vm1426_vm7, %v6736_v52  ;;  %v6068_v40 = vpop.permute.xlu1 %6067 }
 0x671   :  { %6107 = vst.msk [vmem:[#allocation4 + $0x40] sm:$0xff] %vm744_vm12, %v6068_v40  ;;  %6465 = vrot.lane.b32.xlu1 %v6418_v15, %s13624_s26  ;;  %v13596_v40 = vld [vmem:[#allocation3 + $0x90] sm:$0xff] }
 0x672   :  { %6559 = vrot.lane.b32.xlu0 %v6226_v0, %s13625_s13 }
 0x673   :  { %12320 = vmatmul.mubr.bf16.gmra.mrb[60].mxu1 %v4282_v58  ;;  %v6738_v10 = vpop.permute.xlu0 %6737 }
 0x674   :  { %12339 = vmatprep.mubr.bf16.mxu1 %v4606_v35  ;;  %6778 = vst.msk [vmem:[#allocation4 + $0x38] sm:$0xff] %vm1426_vm7, %v6738_v10  ;;  %v6070_v42 = vpop.permute.xlu1 %6069  ;;  %v4946_v10 = vld [vmem:[#allocation3 + $0x138] sm:$0xff] }
 0x675   :  { %6108 = vst.msk [vmem:[#allocation4 + $0x48] sm:$0xff] %vm744_vm12, %v6070_v42  ;;  %6561 = vrot.lane.b32.xlu1 %v6514_v59, %s13625_s13  ;;  %v4947_v59 = vld [vmem:[#allocation3 + $0x140] sm:$0xff] }
 0x676   :  { %6655 = vrot.lane.b32.xlu0 %v6322_v24, %s13626_s25 }
 0x677   :  { %v6164_v30 = vpop.permute.xlu0 %6163  ;;  %v6793_v16 = vld [vmem:[#allocation4 + $0x30] sm:$0xff] }
 0x678   :  { %6203 = vst.msk [vmem:[#allocation4 + $0x40] sm:$0xff] %vm841_vm13, %v6164_v30  ;;  %v6166_v2 = vpop.permute.xlu1 %6165  ;;  %12437 = vmatprep.mubr.msk.bf16.mxu0 %vm1479_vm10, %v6793_v16 }
 0x679   :  { %6204 = vst.msk [vmem:[#allocation4 + $0x48] sm:$0xff] %vm841_vm13, %v6166_v2  ;;  %6657 = vrot.lane.b32.xlu1 %v6610_v39, %s13626_s25  ;;  %v4948_v39 = vld [vmem:[#allocation3 + $0x148] sm:$0xff]  ;;  %v4949_v2 = vld [vmem:[#allocation3 + $0x150] sm:$0xff] }
 0x67a   :  { %6751 = vrot.lane.b32.xlu0 %v6418_v15, %s13627_s14 }
 0x67b   :  { %12340 = vmatmul.mubr.bf16.vlgmr.msra.gmra.mrb[32].mxu1 %v4607_v45  ;;  %v6260_v8 = vpop.permute.xlu0 %6259  ;;  %v6794_v0 = vld [vmem:[#allocation4 + $0x38] sm:$0xff] }
 0x67c   :  { %12372 = vmatpush3.bf16.msra.mxu1 %v16180_v50  ;;  %12343 = vmatprep.mubr.bf16.mxu1 %v4608_v1  ;;  %6299 = vst.msk [vmem:[#allocation4 + $0x40] sm:$0xff] %vm938_vm14, %v6260_v8  ;;  %v6262_v48 = vpop.permute.xlu1 %6261 }
 0x67d   :  { %12373 = vmatprep.subr.bf16.mxu1 %v13505_v60  ;;  %6300 = vst.msk [vmem:[#allocation4 + $0x48] sm:$0xff] %vm938_vm14, %v6262_v48  ;;  %6753 = vrot.lane.b32.xlu1 %v6706_v25, %s13627_s14  ;;  %v4951_v48 = vld [vmem:[#allocation3 + $0x160] sm:$0xff] }
 0x67e   :  { %12438 = vmatmul.mubr.msk.bf16.gmra.mrb[12].mxu0 %vm1479_vm10, %v6794_v0  ;;  %v4959_v0 = vld [vmem:[#allocation3 + $0x1a0] sm:$0xff] }
 0x67f   :  { %v6356_v50 = vpop.permute.xlu0 %6355 }
 0x680   :  { %12374 = vmatpush3.bf16.msra.mxu1 %v13505_v60  ;;  %6395 = vst.msk [vmem:[#allocation4 + $0x40] sm:$0xff] %vm1035_vm15, %v6356_v50  ;;  %v6358_v21 = vpop.permute.xlu1 %6357  ;;  %v4952_v50 = vld [vmem:[#allocation3 + $0x168] sm:$0xff] }
 0x681   :  { %12375 = vmatprep.subr.bf16.mxu1 %v13506_v17  ;;  %6396 = vst.msk [vmem:[#allocation4 + $0x48] sm:$0xff] %vm1035_vm15, %v6358_v21  ;;  %v4953_v21 = vld [vmem:[#allocation3 + $0x170] sm:$0xff] }
 0x683   :  { %12344 = vmatmul.mubr.bf16.gmra.mrb[36].mxu1 %v4609_v44  ;;  %v6452_v22 = vpop.permute.xlu0 %6451 }
 0x684   :  { %12347 = vmatprep.mubr.bf16.mxu1 %v4610_v47  ;;  %12376 = vmatpush3.bf16.msra.mxu1 %v13506_v17  ;;  %6491 = vst.msk [vmem:[#allocation4 + $0x40] sm:$0xff] %vm1132_vm1, %v6452_v22  ;;  %v6454_v29 = vpop.permute.xlu1 %6453 }
 0x685   :  { %12377 = vmatprep.subr.bf16.mxu1 %v13507_v6  ;;  %6492 = vst.msk [vmem:[#allocation4 + $0x48] sm:$0xff] %vm1132_vm1, %v6454_v29 }
 0x687   :  { %v6548_v13 = vpop.permute.xlu0 %6547 }
 0x688   :  { %12378 = vmatpush3.bf16.msra.mxu1 %v13507_v6  ;;  %6587 = vst.msk [vmem:[#allocation4 + $0x40] sm:$0xff] %vm1230_vm3, %v6548_v13  ;;  %v6550_v61 = vpop.permute.xlu1 %6549 }
 0x689   :  { %12379 = vmatprep.subr.bf16.mxu1 %v13508_v51  ;;  %6588 = vst.msk [vmem:[#allocation4 + $0x48] sm:$0xff] %vm1230_vm3, %v6550_v61 }
 0x68b   :  { %12348 = vmatmul.mubr.bf16.gmra.mrb[40].mxu1 %v4611_v7  ;;  %v6644_v3 = vpop.permute.xlu0 %6643 }
 0x68c   :  { %12351 = vmatprep.mubr.bf16.mxu1 %v4612_v57  ;;  %12380 = vmatpush3.bf16.msra.mxu1 %v13508_v51  ;;  %6683 = vst.msk [vmem:[#allocation4 + $0x40] sm:$0xff] %vm1328_vm5, %v6644_v3  ;;  %v6646_v20 = vpop.permute.xlu1 %6645 }
 0x68d   :  { %12381 = vmatprep.subr.bf16.mxu1 %v13509_v14  ;;  %6684 = vst.msk [vmem:[#allocation4 + $0x48] sm:$0xff] %vm1328_vm5, %v6646_v20  ;;  %v4957_v20 = vld [vmem:[#allocation3 + $0x190] sm:$0xff] }
 0x68f   :  { %v6740_v9 = vpop.permute.xlu0 %6739 }
 0x690   :  { %12382 = vmatpush3.bf16.msra.mxu1 %v13509_v14  ;;  %6779 = vst.msk [vmem:[#allocation4 + $0x40] sm:$0xff] %vm1426_vm7, %v6740_v9  ;;  %v6072_v12 = vpop.permute.xlu1 %6071  ;;  %v4955_v14 = vld [vmem:[#allocation3 + $0x180] sm:$0xff] }
 0x691   :  { %12383 = vmatprep.subr.bf16.mxu1 %v13510_v62  ;;  %6109 = vst.msk [vmem:[#allocation4 + $0x50] sm:$0xff] %vm744_vm12, %v6072_v12 }
 0x693   :  { %12352 = vmatmul.mubr.bf16.gmra.mrb[44].mxu1 %v15953_v5  ;;  %v6742_v4 = vpop.permute.xlu0 %6741 }
 0x694   :  { %12355 = vmatprep.mubr.bf16.mxu1 %v15963_v38  ;;  %12384 = vmatpush3.bf16.msra.mxu1 %v13510_v62  ;;  %6780 = vst.msk [vmem:[#allocation4 + $0x48] sm:$0xff] %vm1426_vm7, %v6742_v4  ;;  %v6074_v56 = vpop.permute.xlu1 %6073  ;;  %v4958_v4 = vld [vmem:[#allocation3 + $0x198] sm:$0xff] }
 0x695   :  { %12385 = vmatprep.subr.bf16.mxu1 %v13511_v26  ;;  %6110 = vst.msk [vmem:[#allocation4 + $0x58] sm:$0xff] %vm744_vm12, %v6074_v56 }
 0x697   :  { %v6168_v5 = vpop.permute.xlu0 %6167  ;;  %v6795_v38 = vld [vmem:[#allocation4 + $0x40] sm:$0xff] }
 0x698   :  { %12386 = vmatpush3.bf16.msra.mxu1 %v13511_v26  ;;  %6205 = vst.msk [vmem:[#allocation4 + $0x50] sm:$0xff] %vm841_vm13, %v6168_v5  ;;  %v6170_v19 = vpop.permute.xlu1 %6169  ;;  %12441 = vmatprep.mubr.msk.bf16.mxu0 %vm1479_vm10, %v6795_v38 }
 0x699   :  { %6206 = vst.msk [vmem:[#allocation4 + $0x58] sm:$0xff] %vm841_vm13, %v6170_v19  ;;  %v4960_v19 = vld [vmem:[#allocation3 + $0x1a8] sm:$0xff] }
 0x69b   :  { %12356 = vmatmul.mubr.bf16.gmra.mrb[48].mxu1 %v15967_v32  ;;  %v6264_v31 = vpop.permute.xlu0 %6263  ;;  %v6796_v24 = vld [vmem:[#allocation4 + $0x48] sm:$0xff] }
 0x69c   :  { %12359 = vmatprep.mubr.bf16.mxu1 %v15973_v23  ;;  %6301 = vst.msk [vmem:[#allocation4 + $0x50] sm:$0xff] %vm938_vm14, %v6264_v31  ;;  %v6266_v58 = vpop.permute.xlu1 %6265  ;;  %12442 = vmatmul.mubr.msk.bf16.gmra.mrb[16].mxu0 %vm1479_vm10, %v6796_v24 }
 0x69d   :  { %6302 = vst.msk [vmem:[#allocation4 + $0x58] sm:$0xff] %vm938_vm14, %v6266_v58 }
 0x69f   :  { %v6360_v32 = vpop.permute.xlu0 %6359 }
 0x6a0   :  { %6397 = vst.msk [vmem:[#allocation4 + $0x50] sm:$0xff] %vm1035_vm15, %v6360_v32  ;;  %v6362_v23 = vpop.permute.xlu1 %6361 }
 0x6a1   :  { %6398 = vst.msk [vmem:[#allocation4 + $0x58] sm:$0xff] %vm1035_vm15, %v6362_v23 }
 0x6a3   :  { %12360 = vmatmul.mubr.bf16.gmra.mrb[52].mxu1 %v15977_v55  ;;  %v6456_v54 = vpop.permute.xlu0 %6455 }
 0x6a4   :  { %12363 = vmatprep.mubr.bf16.mxu1 %v15983_v49  ;;  %6493 = vst.msk [vmem:[#allocation4 + $0x50] sm:$0xff] %vm1132_vm1, %v6456_v54  ;;  %v6458_v35 = vpop.permute.xlu1 %6457 }
 0x6a5   :  { %6494 = vst.msk [vmem:[#allocation4 + $0x58] sm:$0xff] %vm1132_vm1, %v6458_v35 }
 0x6a7   :  { %v6552_v52 = vpop.permute.xlu0 %6551 }
 0x6a8   :  { %6589 = vst.msk [vmem:[#allocation4 + $0x50] sm:$0xff] %vm1230_vm3, %v6552_v52  ;;  %v6554_v55 = vpop.permute.xlu1 %6553 }
 0x6a9   :  { %6590 = vst.msk [vmem:[#allocation4 + $0x58] sm:$0xff] %vm1230_vm3, %v6554_v55 }
 0x6ab   :  { %12364 = vmatmul.mubr.bf16.gmra.mrb[56].mxu1 %v15987_v53  ;;  %v6648_v49 = vpop.permute.xlu0 %6647 }
 0x6ac   :  { %12367 = vmatprep.mubr.bf16.mxu1 %v15996_v28  ;;  %6685 = vst.msk [vmem:[#allocation4 + $0x50] sm:$0xff] %vm1328_vm5, %v6648_v49  ;;  %v6650_v15 = vpop.permute.xlu1 %6649 }
 0x6ad   :  { %6686 = vst.msk [vmem:[#allocation4 + $0x58] sm:$0xff] %vm1328_vm5, %v6650_v15 }
 0x6af   :  { %v6744_v46 = vpop.permute.xlu0 %6743 }
 0x6b0   :  { %6781 = vst.msk [vmem:[#allocation4 + $0x50] sm:$0xff] %vm1426_vm7, %v6744_v46  ;;  %v6076_v53 = vpop.permute.xlu1 %6075 }
 0x6b1   :  { %6111 = vst.msk [vmem:[#allocation4 + $0x60] sm:$0xff] %vm744_vm12, %v6076_v53 }
 0x6b3   :  { %12368 = vmatmul.mubr.bf16.gmra.mrb[60].mxu1 %v13596_v40  ;;  %v6746_v28 = vpop.permute.xlu0 %6745 }
 0x6b4   :  { %12387 = vmatprep.mubr.bf16.mxu1 %v4945_v37  ;;  %6782 = vst.msk [vmem:[#allocation4 + $0x58] sm:$0xff] %vm1426_vm7, %v6746_v28  ;;  %v6078_v63 = vpop.permute.xlu1 %6077 }
 0x6b5   :  { %6112 = vst.msk [vmem:[#allocation4 + $0x68] sm:$0xff] %vm744_vm12, %v6078_v63 }
 0x6b7   :  { %v6172_v42 = vpop.permute.xlu0 %6171  ;;  %v6797_v41 = vld [vmem:[#allocation4 + $0x50] sm:$0xff] }
 0x6b8   :  { %6207 = vst.msk [vmem:[#allocation4 + $0x60] sm:$0xff] %vm841_vm13, %v6172_v42  ;;  %v6174_v60 = vpop.permute.xlu1 %6173  ;;  %12445 = vmatprep.mubr.msk.bf16.mxu0 %vm1479_vm10, %v6797_v41 }
 0x6b9   :  { %6208 = vst.msk [vmem:[#allocation4 + $0x68] sm:$0xff] %vm841_vm13, %v6174_v60 }
 0x6bb   :  { %12388 = vmatmul.mubr.bf16.vlgmr.msra.gmra.mrb[32].mxu1 %v4946_v10  ;;  %v6268_v45 = vpop.permute.xlu0 %6267  ;;  %v6798_v1 = vld [vmem:[#allocation4 + $0x58] sm:$0xff] }
 0x6bc   :  { %12391 = vmatprep.mubr.bf16.mxu1 %v4947_v59  ;;  %6303 = vst.msk [vmem:[#allocation4 + $0x60] sm:$0xff] %vm938_vm14, %v6268_v45  ;;  %v6270_v30 = vpop.permute.xlu1 %6269  ;;  %12446 = vmatmul.mubr.msk.bf16.gmra.mrb[20].mxu0 %vm1479_vm10, %v6798_v1 }
 0x6bd   :  { %6304 = vst.msk [vmem:[#allocation4 + $0x68] sm:$0xff] %vm938_vm14, %v6270_v30 }
 0x6bf   :  { %v6364_v34 = vpop.permute.xlu0 %6363 }
 0x6c0   :  { %6399 = vst.msk [vmem:[#allocation4 + $0x60] sm:$0xff] %vm1035_vm15, %v6364_v34  ;;  %v6366_v17 = vpop.permute.xlu1 %6365 }
 0x6c1   :  { %6400 = vst.msk [vmem:[#allocation4 + $0x68] sm:$0xff] %vm1035_vm15, %v6366_v17 }
 0x6c3   :  { %12392 = vmatmul.mubr.bf16.gmra.mrb[36].mxu1 %v4948_v39  ;;  %v6460_v8 = vpop.permute.xlu0 %6459 }
 0x6c4   :  { %12395 = vmatprep.mubr.bf16.mxu1 %v4949_v2  ;;  %6495 = vst.msk [vmem:[#allocation4 + $0x60] sm:$0xff] %vm1132_vm1, %v6460_v8  ;;  %v6462_v25 = vpop.permute.xlu1 %6461 }
 0x6c5   :  { %6496 = vst.msk [vmem:[#allocation4 + $0x68] sm:$0xff] %vm1132_vm1, %v6462_v25 }
 0x6c7   :  { %v6556_v27 = vpop.permute.xlu0 %6555 }
 0x6c8   :  { %6591 = vst.msk [vmem:[#allocation4 + $0x60] sm:$0xff] %vm1230_vm3, %v6556_v27  ;;  %v6558_v6 = vpop.permute.xlu1 %6557 }
 0x6c9   :  { %6592 = vst.msk [vmem:[#allocation4 + $0x68] sm:$0xff] %vm1230_vm3, %v6558_v6 }
 0x6cb   :  { %12396 = vmatmul.mubr.bf16.gmra.mrb[40].mxu1 %v4950_v36  ;;  %v6652_v44 = vpop.permute.xlu0 %6651 }
 0x6cc   :  { %12399 = vmatprep.mubr.bf16.mxu1 %v4951_v48  ;;  %6687 = vst.msk [vmem:[#allocation4 + $0x60] sm:$0xff] %vm1328_vm5, %v6652_v44  ;;  %v6654_v47 = vpop.permute.xlu1 %6653 }
 0x6cd   :  { %6688 = vst.msk [vmem:[#allocation4 + $0x68] sm:$0xff] %vm1328_vm5, %v6654_v47 }
 0x6cf   :  { %v6748_v51 = vpop.permute.xlu0 %6747 }
 0x6d0   :  { %6783 = vst.msk [vmem:[#allocation4 + $0x60] sm:$0xff] %vm1426_vm7, %v6748_v51  ;;  %v6080_v22 = vpop.permute.xlu1 %6079 }
 0x6d1   :  { %6113 = vst.msk [vmem:[#allocation4 + $0x70] sm:$0xff] %vm744_vm12, %v6080_v22 }
 0x6d3   :  { %12400 = vmatmul.mubr.bf16.gmra.mrb[44].mxu1 %v4952_v50  ;;  %v6750_v11 = vpop.permute.xlu0 %6749 }
 0x6d4   :  { %12403 = vmatprep.mubr.bf16.mxu1 %v4953_v21  ;;  %6784 = vst.msk [vmem:[#allocation4 + $0x68] sm:$0xff] %vm1426_vm7, %v6750_v11  ;;  %v6082_v29 = vpop.permute.xlu1 %6081 }
 0x6d5   :  { %6114 = vst.msk [vmem:[#allocation4 + $0x78] sm:$0xff] %vm744_vm12, %v6082_v29  ;;  %vm5613_vm12 = vcmask 64512  }
 0x6d7   :  { %v6176_v7 = vpop.permute.xlu0 %6175  ;;  %v6799_v57 = vld [vmem:[#allocation4 + $0x60] sm:$0xff] }
 0x6d8   :  { %6209 = vst.msk [vmem:[#allocation4 + $0x70] sm:$0xff] %vm841_vm13, %v6176_v7  ;;  %v6178_v13 = vpop.permute.xlu1 %6177  ;;  %12449 = vmatprep.mubr.msk.bf16.mxu0 %vm1479_vm10, %v6799_v57 }
 0x6d9   :  { %6210 = vst.msk [vmem:[#allocation4 + $0x78] sm:$0xff] %vm841_vm13, %v6178_v13 }
 0x6db   :  { %12404 = vmatmul.mubr.bf16.gmra.mrb[48].mxu1 %v4954_v43  ;;  %v6272_v61 = vpop.permute.xlu0 %6271  ;;  %v6800_v62 = vld [vmem:[#allocation4 + $0x68] sm:$0xff] }
 0x6dc   :  { %12407 = vmatprep.mubr.bf16.mxu1 %v4955_v14  ;;  %6305 = vst.msk [vmem:[#allocation4 + $0x70] sm:$0xff] %vm938_vm14, %v6272_v61  ;;  %v6274_v3 = vpop.permute.xlu1 %6273  ;;  %12450 = vmatmul.mubr.msk.bf16.gmra.mrb[24].mxu0 %vm1479_vm10, %v6800_v62 }
 0x6dd   :  { %6306 = vst.msk [vmem:[#allocation4 + $0x78] sm:$0xff] %vm938_vm14, %v6274_v3 }
 0x6df   :  { %v6368_v16 = vpop.permute.xlu0 %6367 }
 0x6e0   :  { %6401 = vst.msk [vmem:[#allocation4 + $0x70] sm:$0xff] %vm1035_vm15, %v6368_v16  ;;  %v6370_v26 = vpop.permute.xlu1 %6369 }
 0x6e1   :  { %6402 = vst.msk [vmem:[#allocation4 + $0x78] sm:$0xff] %vm1035_vm15, %v6370_v26 }
 0x6e3   :  { %12408 = vmatmul.mubr.bf16.gmra.mrb[52].mxu1 %v4956_v18  ;;  %v6464_v9 = vpop.permute.xlu0 %6463 }
 0x6e4   :  { %12411 = vmatprep.mubr.bf16.mxu1 %v4957_v20  ;;  %6497 = vst.msk [vmem:[#allocation4 + $0x70] sm:$0xff] %vm1132_vm1, %v6464_v9  ;;  %v6466_v12 = vpop.permute.xlu1 %6465 }
 0x6e5   :  { %6498 = vst.msk [vmem:[#allocation4 + $0x78] sm:$0xff] %vm1132_vm1, %v6466_v12 }
 0x6e7   :  { %v6560_v56 = vpop.permute.xlu0 %6559 }
 0x6e8   :  { %6593 = vst.msk [vmem:[#allocation4 + $0x70] sm:$0xff] %vm1230_vm3, %v6560_v56  ;;  %v6562_v5 = vpop.permute.xlu1 %6561 }
 0x6e9   :  { %6594 = vst.msk [vmem:[#allocation4 + $0x78] sm:$0xff] %vm1230_vm3, %v6562_v5 }
 0x6eb   :  { %12412 = vmatmul.mubr.bf16.gmra.mrb[56].mxu1 %v4958_v4  ;;  %v6656_v38 = vpop.permute.xlu0 %6655 }
 0x6ec   :  { %12415 = vmatprep.mubr.bf16.mxu1 %v4959_v0  ;;  %6689 = vst.msk [vmem:[#allocation4 + $0x70] sm:$0xff] %vm1328_vm5, %v6656_v38  ;;  %v6658_v31 = vpop.permute.xlu1 %6657 }
 0x6ed   :  { %6690 = vst.msk [vmem:[#allocation4 + $0x78] sm:$0xff] %vm1328_vm5, %v6658_v31 }
 0x6ef   :  { %v6752_v24 = vpop.permute.xlu0 %6751 }
 0x6f0   :  { %6785 = vst.msk [vmem:[#allocation4 + $0x70] sm:$0xff] %vm1426_vm7, %v6752_v24  ;;  %v6754_v58 = vpop.permute.xlu1 %6753 }
 0x6f1   :  { %6786 = vst.msk [vmem:[#allocation4 + $0x78] sm:$0xff] %vm1426_vm7, %v6754_v58 }
 0x6f3   :  { %12416 = vmatmul.mubr.bf16.gmra.mrb[60].mxu1 %v4960_v19 }
 0x6f7   :  { %v6801_v32 = vld [vmem:[#allocation4 + $0x70] sm:$0xff] }
 0x6f8   :  { %12453 = vmatprep.mubr.msk.bf16.mxu0 %vm1479_vm10, %v6801_v32  ;;  %v6802_v23 = vld [vmem:[#allocation4 + $0x78] sm:$0xff] }
 0x6f9   :  { %12454 = vmatmul.mubr.msk.bf16.gmra.mrb[28].mxu0 %vm1479_vm10, %v6802_v23 }
 0x72d   :  { %v16348_v54 = vpop.f32.mrb[0].mxu0 }
 0x72e   :  { %v16350_v35 = vpop.f32.mrb[1].mxu0 }
 0x72f   :  { %v16352_v52 = vpop.f32.mrb[2].mxu0 }
 0x730   :  { %v16354_v55 = vpop.f32.mrb[3].mxu0 }
 0x731   :  { %v7035_v49 = vadd.f32 %v16354_v55, %v16350_v35 }
 0x733   :  { %v7036_v15 = vadd.f32 %v16348_v54, %v7035_v49 }
 0x735   :  { %v16359_v40 = vpop.f32.mrb[4].mxu0  ;;  %v7037_v37 = vadd.f32 %v16352_v52, %v7036_v15 }
 0x736   :  { %v16362_v46 = vpop.f32.mrb[5].mxu0 }
 0x737   :  { %v7038_v53 = vadd.f32 %v7037_v37, %v16362_v46  ;;  %v16365_v28 = vpop.f32.mrb[6].mxu0 }
 0x738   :  { %v16367_v63 = vpop.f32.mrb[7].mxu0 }
 0x739   :  { %v7039_v10 = vadd.f32 %v7038_v53, %v16367_v63 }
 0x73b   :  { %v7040_v59 = vadd.f32 %v16359_v40, %v7039_v10 }
 0x73d   :  { %v16371_v42 = vpop.f32.mrb[8].mxu0  ;;  %v7041_v41 = vadd.f32 %v16365_v28, %v7040_v59 }
 0x73e   :  { %18378 = vst [vmem:[#allocation10_spill] sm:$0xff] %v16371_v42  ;;  %v16374_v60 = vpop.f32.mrb[9].mxu0 }
 0x73f   :  { %18379 = vst [vmem:[#allocation11_spill] sm:$0xff] %v16374_v60  ;;  %v7042_v45 = vadd.f32 %v7041_v41, %v16374_v60  ;;  %v16377_v1 = vpop.f32.mrb[10].mxu0 }
 0x740   :  { %18380 = vst [vmem:[#allocation12_spill] sm:$0xff] %v16377_v1  ;;  %v16379_v30 = vpop.f32.mrb[11].mxu0 }
 0x741   :  { %18381 = vst [vmem:[#allocation13_spill] sm:$0xff] %v16379_v30  ;;  %v7043_v39 = vadd.f32 %v7042_v45, %v16379_v30 }
 0x743   :  { %v7044_v2 = vadd.f32 %v16371_v42, %v7043_v39 }
 0x745   :  { %v7045_v17 = vadd.f32 %v16377_v1, %v7044_v2 }
 0x751   :  { %v16383_v34 = vpop.f32.mrb[12].mxu0 }
 0x752   :  { %18382 = vst [vmem:[#allocation14_spill] sm:$0xff] %v16383_v34  ;;  %v16386_v8 = vpop.f32.mrb[13].mxu0 }
 0x753   :  { %18383 = vst [vmem:[#allocation15_spill] sm:$0xff] %v16386_v8  ;;  %v7046_v25 = vadd.f32 %v7045_v17, %v16386_v8  ;;  %v16389_v36 = vpop.f32.mrb[14].mxu0 }
 0x754   :  { %18384 = vst [vmem:[#allocation16_spill] sm:$0xff] %v16389_v36  ;;  %v16391_v48 = vpop.f32.mrb[15].mxu0 }
 0x755   :  { %18385 = vst [vmem:[#allocation17_spill] sm:$0xff] %v16391_v48  ;;  %v7047_v27 = vadd.f32 %v7046_v25, %v16391_v48 }
 0x757   :  { %v7048_v6 = vadd.f32 %v16383_v34, %v7047_v27 }
 0x759   :  { %v7049_v47 = vadd.f32 %v16389_v36, %v7048_v6 }
 0x76f   :  { %v16395_v44 = vpop.f32.mrb[16].mxu0 }
 0x770   :  { %18386 = vst [vmem:[#allocation18_spill] sm:$0xff] %v16395_v44  ;;  %v16398_v50 = vpop.f32.mrb[17].mxu0 }
 0x771   :  { %18387 = vst [vmem:[#allocation20_spill] sm:$0xff] %v16398_v50  ;;  %v7050_v21 = vadd.f32 %v7049_v47, %v16398_v50  ;;  %v16401_v51 = vpop.f32.mrb[18].mxu0 }
 0x772   :  { %18388 = vst [vmem:[#allocation21_spill] sm:$0xff] %v16401_v51  ;;  %v16403_v22 = vpop.f32.mrb[19].mxu0 }
 0x773   :  { %18389 = vst [vmem:[#allocation22_spill] sm:$0xff] %v16403_v22  ;;  %v7051_v11 = vadd.f32 %v7050_v21, %v16403_v22 }
 0x775   :  { %v7052_v29 = vadd.f32 %v16395_v44, %v7051_v11 }
 0x777   :  { %v7053_v43 = vadd.f32 %v16401_v51, %v7052_v29 }
 0x78e   :  { %v16408_v14 = vpop.f32.mrb[32].mxu1 }
 0x78f   :  { %v16410_v7 = vpop.f32.mrb[33].mxu1  ;;  %v16418_v62 = vpop.f32.mrb[20].mxu0 }
 0x790   :  { %v16412_v57 = vpop.f32.mrb[34].mxu1  ;;  %18390 = vst [vmem:[#allocation23_spill] sm:$0xff] %v16418_v62  ;;  %v16421_v18 = vpop.f32.mrb[21].mxu0 }
 0x791   :  { %v16414_v13 = vpop.f32.mrb[35].mxu1  ;;  %18391 = vst [vmem:[#allocation24_spill] sm:$0xff] %v16421_v18  ;;  %v7054_v20 = vadd.f32 %v7053_v43, %v16421_v18  ;;  %v16424_v16 = vpop.f32.mrb[22].mxu0 }
 0x792   :  { %v5315_v61 = vadd.f32 %v16414_v13, %v16410_v7  ;;  %18392 = vst [vmem:[#allocation6_spill] sm:$0xff] %v16424_v16  ;;  %v16429_v12 = vpop.f32.mrb[23].mxu0 }
 0x793   :  { %18393 = vst [vmem:[#allocation26_spill] sm:$0xff] %v16429_v12  ;;  %v7055_v0 = vadd.f32 %v7054_v20, %v16429_v12 }
 0x794   :  { %v5316_v3 = vadd.f32 %v16408_v14, %v5315_v61 }
 0x795   :  { %v7056_v19 = vadd.f32 %v16418_v62, %v7055_v0 }
 0x796   :  { %v16426_v26 = vpop.f32.mrb[36].mxu1  ;;  %v5317_v9 = vadd.f32 %v16412_v57, %v5316_v3 }
 0x797   :  { %v16431_v4 = vpop.f32.mrb[37].mxu1  ;;  %v7057_v24 = vadd.f32 %v16424_v16, %v7056_v19 }
 0x798   :  { %v5318_v56 = vadd.f32 %v5317_v9, %v16431_v4  ;;  %v16435_v5 = vpop.f32.mrb[38].mxu1 }
 0x799   :  { %v16437_v38 = vpop.f32.mrb[39].mxu1 }
 0x79a   :  { %v5319_v31 = vadd.f32 %v5318_v56, %v16437_v38 }
 0x79c   :  { %v5320_v58 = vadd.f32 %v16426_v26, %v5319_v31 }
 0x79e   :  { %v16443_v32 = vpop.f32.mrb[40].mxu1  ;;  %v5321_v23 = vadd.f32 %v16435_v5, %v5320_v58 }
 0x79f   :  { %v16446_v49 = vpop.f32.mrb[41].mxu1 }
 0x7a0   :  { %v5322_v15 = vadd.f32 %v5321_v23, %v16446_v49  ;;  %v16449_v37 = vpop.f32.mrb[42].mxu1 }
 0x7a1   :  { %v16451_v53 = vpop.f32.mrb[43].mxu1 }
 0x7a2   :  { %v5323_v10 = vadd.f32 %v5322_v15, %v16451_v53 }
 0x7a4   :  { %v5324_v59 = vadd.f32 %v16443_v32, %v5323_v10 }
 0x7a6   :  { %v16455_v41 = vpop.f32.mrb[44].mxu1  ;;  %v5325_v45 = vadd.f32 %v16449_v37, %v5324_v59 }
 0x7a7   :  { %v16458_v39 = vpop.f32.mrb[45].mxu1 }
 0x7a8   :  { %v5326_v2 = vadd.f32 %v5325_v45, %v16458_v39  ;;  %v16461_v17 = vpop.f32.mrb[46].mxu1 }
 0x7a9   :  { %v16463_v25 = vpop.f32.mrb[47].mxu1 }
 0x7aa   :  { %v5327_v27 = vadd.f32 %v5326_v2, %v16463_v25 }
 0x7ac   :  { %v5328_v6 = vadd.f32 %v16455_v41, %v5327_v27 }
 0x7ae   :  { %v16467_v47 = vpop.f32.mrb[48].mxu1  ;;  %v5329_v21 = vadd.f32 %v16461_v17, %v5328_v6 }
 0x7af   :  { %v16470_v11 = vpop.f32.mrb[49].mxu1  ;;  %v16478_v20 = vpop.f32.mrb[24].mxu0 }
 0x7b0   :  { %v5330_v29 = vadd.f32 %v5329_v21, %v16470_v11  ;;  %v16473_v43 = vpop.f32.mrb[50].mxu1  ;;  %18394 = vst [vmem:[#allocation27_spill] sm:$0xff] %v16478_v20  ;;  %v16481_v0 = vpop.f32.mrb[25].mxu0 }
 0x7b1   :  { %v16475_v61 = vpop.f32.mrb[51].mxu1  ;;  %18395 = vst [vmem:[#allocation28_spill] sm:$0xff] %v16481_v0  ;;  %v7058_v56 = vadd.f32 %v7057_v24, %v16481_v0  ;;  %v16484_v19 = vpop.f32.mrb[26].mxu0 }
 0x7b2   :  { %v5331_v3 = vadd.f32 %v5330_v29, %v16475_v61  ;;  %18396 = vst [vmem:[#allocation29_spill] sm:$0xff] %v16484_v19  ;;  %v16489_v23 = vpop.f32.mrb[27].mxu0 }
 0x7b3   :  { %18397 = vst [vmem:[#allocation30_spill] sm:$0xff] %v16489_v23  ;;  %v7059_v10 = vadd.f32 %v7058_v56, %v16489_v23 }
 0x7b4   :  { %v5332_v9 = vadd.f32 %v16467_v47, %v5331_v3 }
 0x7b5   :  { %v7060_v24 = vadd.f32 %v16478_v20, %v7059_v10 }
 0x7b6   :  { %v16486_v31 = vpop.f32.mrb[52].mxu1  ;;  %v5333_v58 = vadd.f32 %v16473_v43, %v5332_v9 }
 0x7b7   :  { %v16491_v15 = vpop.f32.mrb[53].mxu1  ;;  %v7061_v6 = vadd.f32 %v16484_v19, %v7060_v24 }
 0x7b8   :  { %v5334_v59 = vadd.f32 %v5333_v58, %v16491_v15  ;;  %v16495_v45 = vpop.f32.mrb[54].mxu1 }
 0x7b9   :  { %v16497_v2 = vpop.f32.mrb[55].mxu1 }
 0x7ba   :  { %v5335_v27 = vadd.f32 %v5334_v59, %v16497_v2 }
 0x7bc   :  { %v5336_v21 = vadd.f32 %v16486_v31, %v5335_v27 }
 0x7be   :  { %v16503_v29 = vpop.f32.mrb[56].mxu1  ;;  %v5337_v3 = vadd.f32 %v16495_v45, %v5336_v21 }
 0x7bf   :  { %v16506_v9 = vpop.f32.mrb[57].mxu1 }
 0x7c0   :  { %v5338_v56 = vadd.f32 %v5337_v3, %v16506_v9  ;;  %v16509_v58 = vpop.f32.mrb[58].mxu1 }
 0x7c1   :  { %v16511_v33 = vpop.f32.mrb[59].mxu1 }
 0x7c2   :  { %v5339_v10 = vadd.f32 %v5338_v56, %v16511_v33 }
 0x7c4   :  { %v5340_v59 = vadd.f32 %v16503_v29, %v5339_v10 }
 0x7c6   :  { %v16515_v20 = vpop.f32.mrb[60].mxu1  ;;  %v5341_v24 = vadd.f32 %v16509_v58, %v5340_v59 }
 0x7c7   :  { %v16518_v27 = vpop.f32.mrb[61].mxu1 }
 0x7c8   :  { %v5342_v21 = vadd.f32 %v5341_v24, %v16518_v27  ;;  %v16521_v19 = vpop.f32.mrb[62].mxu1 }
 0x7c9   :  { %v16523_v23 = vpop.f32.mrb[63].mxu1 }
 0x7ca   :  { %v5343_v3 = vadd.f32 %v5342_v21, %v16523_v23 }
 0x7cc   :  { %v5344_v0 = vadd.f32 %v16515_v20, %v5343_v3  ;;  %v16528_v10 = vpop.f32.mrb[28].mxu0 }
 0x7cd   :  { %18398 = vst [vmem:[#allocation31_spill] sm:$0xff] %v16528_v10  ;;  %v16530_v16 = vpop.f32.mrb[29].mxu0 }
 0x7ce   :  { %v5345_v56 = vadd.f32 %v16521_v19, %v5344_v0  ;;  %18399 = vst [vmem:[#allocation32_spill] sm:$0xff] %v16530_v16  ;;  %v7062_v59 = vadd.f32 %v7061_v6, %v16530_v16  ;;  %v16533_v62 = vpop.f32.mrb[30].mxu0 }
 0x7cf   :  { %18400 = vst [vmem:[#allocation33_spill] sm:$0xff] %v16533_v62  ;;  %v16535_v24 = vpop.f32.mrb[31].mxu0 }
 0x7d0   :  { %5346 = vadd.xlane.f32.xlu0 %v5345_v56  ;;  %18401 = vst [vmem:[#allocation34_spill] sm:$0xff] %v16535_v24  ;;  %v7063_v12 = vadd.f32 %v7062_v59, %v16535_v24 }
 0x7d2   :  { %v7064_v18 = vadd.f32 %v16528_v10, %v7063_v12 }
 0x7d4   :  { %v7065_v21 = vadd.f32 %v16533_v62, %v7064_v18 }
 0x7d6   :  { %7066 = vadd.xlane.f32.xlu0 %v7065_v21 }
 0x85d   :  { %v5347_v3 = vpop.xlane.xlu0 %5346 }
 0x85e   :  { %v5348_v0 = vrot.slane %v5347_v3, 4 }
 0x860   :  { %v5349_v56 = vadd.f32 %v5348_v0, %v5347_v3 }
 0x862   :  { %v5350_v51 = vrot.slane %v5349_v56, 2 }
 0x864   :  { %v5351_v44 = vadd.f32 %v5350_v51, %v5349_v56 }
 0x866   :  { %v5352_v22 = vrot.slane %v5351_v44, 1 }
 0x868   :  { %v5353_v50 = vadd.f32 %v5352_v22, %v5351_v44  ;;  %v18402_v22 = vld [vmem:[#allocation7_spill] sm:$0xff] }
 0x86a   :  { %13409 = vpush %v5353_v50 }
 0x89b   :  { %s13410_s10 = spop %13409 }
 0x89c   :  { %s5355_s11 = smul.f32 0.00048828125, %s13410_s10 }
 0x89e   :  { %v16540_v6 = vstv %s5355_s11 }
 0x89f   :  { %v5357_v59 = vsub.f32 %v16410_v7, %v16540_v6  ;;  %v5358_v12 = vsub.f32 %v16414_v13, %v16540_v6  ;;  %v5359_v18 = vsub.f32 %v16408_v14, %v16540_v6  ;;  %v5360_v51 = vsub.f32 %v16412_v57, %v16540_v6 }
 0x8a0   :  { %v5361_v44 = vsub.f32 %v16431_v4, %v16540_v6  ;;  %v5362_v62 = vsub.f32 %v16437_v38, %v16540_v6  ;;  %v5363_v24 = vsub.f32 %v16426_v26, %v16540_v6  ;;  %v5364_v36 = vsub.f32 %v16435_v5, %v16540_v6 }
 0x8a1   :  { %v5389_v21 = vmul.f32 %v5357_v59, %v5357_v59  ;;  %v5390_v3 = vmul.f32 %v5358_v12, %v5358_v12  ;;  %v5391_v50 = vmul.f32 %v5359_v18, %v5359_v18  ;;  %v5392_v10 = vmul.f32 %v5360_v51, %v5360_v51 }
 0x8a2   :  { %v5393_v59 = vmul.f32 %v5361_v44, %v5361_v44  ;;  %v5394_v34 = vmul.f32 %v5362_v62, %v5362_v62  ;;  %v5395_v48 = vmul.f32 %v5363_v24, %v5363_v24  ;;  %v5366_v44 = vsub.f32 %v16451_v53, %v16540_v6 }
 0x8a3   :  { %v5421_v0 = vmul.f32 %v18402_v22, %v5389_v21  ;;  %v5422_v56 = vmul.f32 %v18402_v22, %v5390_v3  ;;  %v5423_v12 = vmul.f32 %v18402_v22, %v5391_v50  ;;  %v5424_v18 = vmul.f32 %v18402_v22, %v5392_v10 }
 0x8a4   :  { %v5365_v3 = vsub.f32 %v16446_v49, %v16540_v6  ;;  %v5425_v51 = vmul.f32 %v18402_v22, %v5393_v59  ;;  %v5396_v1 = vmul.f32 %v5364_v36, %v5364_v36  ;;  %v5426_v50 = vmul.f32 %v18402_v22, %v5394_v34 }
 0x8a5   :  { %v5453_v16 = vadd.f32 %v5422_v56, %v5421_v0  ;;  %v5367_v62 = vsub.f32 %v16443_v32, %v16540_v6  ;;  %v5368_v24 = vsub.f32 %v16449_v37, %v16540_v6  ;;  %v5369_v36 = vsub.f32 %v16458_v39, %v16540_v6 }
 0x8a6   :  { %v5397_v56 = vmul.f32 %v5365_v3, %v5365_v3  ;;  %v5428_v59 = vmul.f32 %v18402_v22, %v5396_v1  ;;  %v5370_v3 = vsub.f32 %v16463_v25, %v16540_v6 }
 0x8a7   :  { %v5454_v21 = vadd.f32 %v5453_v16, %v5423_v12  ;;  %v5427_v16 = vmul.f32 %v18402_v22, %v5395_v48  ;;  %v5398_v12 = vmul.f32 %v5366_v44, %v5366_v44  ;;  %v5371_v44 = vsub.f32 %v16455_v41, %v16540_v6 }
 0x8a8   :  { %v5429_v34 = vmul.f32 %v18402_v22, %v5397_v56 }
 0x8a9   :  { %v5455_v8 = vadd.f32 %v5454_v21, %v5424_v18  ;;  %v5399_v21 = vmul.f32 %v5367_v62, %v5367_v62  ;;  %v5430_v48 = vmul.f32 %v18402_v22, %v5398_v12  ;;  %v5372_v62 = vsub.f32 %v16461_v17, %v16540_v6 }
 0x8ab   :  { %v5456_v0 = vadd.f32 %v5455_v8, %v5425_v51  ;;  %v5400_v51 = vmul.f32 %v5368_v24, %v5368_v24  ;;  %v5431_v1 = vmul.f32 %v18402_v22, %v5399_v21  ;;  %v5373_v24 = vsub.f32 %v16470_v11, %v16540_v6 }
 0x8ad   :  { %v5457_v10 = vadd.f32 %v5456_v0, %v5426_v50  ;;  %v5401_v0 = vmul.f32 %v5369_v36, %v5369_v36  ;;  %v5432_v56 = vmul.f32 %v18402_v22, %v5400_v51  ;;  %v5374_v36 = vsub.f32 %v16475_v61, %v16540_v6 }
 0x8af   :  { %v5458_v18 = vadd.f32 %v5457_v10, %v5427_v16  ;;  %v5402_v10 = vmul.f32 %v5370_v3, %v5370_v3  ;;  %v5433_v12 = vmul.f32 %v18402_v22, %v5401_v0  ;;  %v5375_v3 = vsub.f32 %v16467_v47, %v16540_v6 }
 0x8b1   :  { %v5459_v8 = vadd.f32 %v5458_v18, %v5428_v59  ;;  %v5403_v18 = vmul.f32 %v5371_v44, %v5371_v44  ;;  %v5434_v21 = vmul.f32 %v18402_v22, %v5402_v10  ;;  %v5376_v44 = vsub.f32 %v16473_v43, %v16540_v6 }
 0x8b3   :  { %v5460_v50 = vadd.f32 %v5459_v8, %v5429_v34  ;;  %v5404_v8 = vmul.f32 %v5372_v62, %v5372_v62  ;;  %v5435_v51 = vmul.f32 %v18402_v22, %v5403_v18  ;;  %v5377_v62 = vsub.f32 %v16491_v15, %v16540_v6 }
 0x8b5   :  { %v5461_v16 = vadd.f32 %v5460_v50, %v5430_v48  ;;  %v5405_v50 = vmul.f32 %v5373_v24, %v5373_v24  ;;  %v5436_v0 = vmul.f32 %v18402_v22, %v5404_v8  ;;  %v5378_v24 = vsub.f32 %v16497_v2, %v16540_v6 }
 0x8b7   :  { %v5462_v59 = vadd.f32 %v5461_v16, %v5431_v1  ;;  %v5406_v16 = vmul.f32 %v5374_v36, %v5374_v36  ;;  %v5437_v10 = vmul.f32 %v18402_v22, %v5405_v50  ;;  %v5379_v36 = vsub.f32 %v16486_v31, %v16540_v6 }
 0x8b9   :  { %v5463_v34 = vadd.f32 %v5462_v59, %v5432_v56  ;;  %v5407_v59 = vmul.f32 %v5375_v3, %v5375_v3  ;;  %v5438_v18 = vmul.f32 %v18402_v22, %v5406_v16  ;;  %v5380_v3 = vsub.f32 %v16495_v45, %v16540_v6 }
 0x8bb   :  { %v5464_v48 = vadd.f32 %v5463_v34, %v5433_v12  ;;  %v5408_v34 = vmul.f32 %v5376_v44, %v5376_v44  ;;  %v5439_v8 = vmul.f32 %v18402_v22, %v5407_v59  ;;  %v5381_v44 = vsub.f32 %v16506_v9, %v16540_v6 }
 0x8bd   :  { %v5465_v1 = vadd.f32 %v5464_v48, %v5434_v21  ;;  %v5409_v48 = vmul.f32 %v5377_v62, %v5377_v62  ;;  %v5440_v50 = vmul.f32 %v18402_v22, %v5408_v34  ;;  %v5382_v62 = vsub.f32 %v16511_v33, %v16540_v6 }
 0x8bf   :  { %v5466_v56 = vadd.f32 %v5465_v1, %v5435_v51  ;;  %v5410_v1 = vmul.f32 %v5378_v24, %v5378_v24  ;;  %v5441_v16 = vmul.f32 %v18402_v22, %v5409_v48  ;;  %v5383_v24 = vsub.f32 %v16503_v29, %v16540_v6 }
 0x8c1   :  { %v5467_v12 = vadd.f32 %v5466_v56, %v5436_v0  ;;  %v5411_v56 = vmul.f32 %v5379_v36, %v5379_v36  ;;  %v5442_v59 = vmul.f32 %v18402_v22, %v5410_v1  ;;  %v5384_v36 = vsub.f32 %v16509_v58, %v16540_v6 }
 0x8c3   :  { %v5468_v21 = vadd.f32 %v5467_v12, %v5437_v10  ;;  %v5412_v12 = vmul.f32 %v5380_v3, %v5380_v3  ;;  %v5443_v34 = vmul.f32 %v18402_v22, %v5411_v56  ;;  %v5385_v3 = vsub.f32 %v16518_v27, %v16540_v6 }
 0x8c5   :  { %v5469_v51 = vadd.f32 %v5468_v21, %v5438_v18  ;;  %v5413_v21 = vmul.f32 %v5381_v44, %v5381_v44  ;;  %v5444_v48 = vmul.f32 %v18402_v22, %v5412_v12  ;;  %v5386_v44 = vsub.f32 %v16523_v23, %v16540_v6 }
 0x8c7   :  { %v5470_v0 = vadd.f32 %v5469_v51, %v5439_v8  ;;  %v5414_v51 = vmul.f32 %v5382_v62, %v5382_v62  ;;  %v5445_v1 = vmul.f32 %v18402_v22, %v5413_v21  ;;  %v5387_v62 = vsub.f32 %v16515_v20, %v16540_v6 }
 0x8c9   :  { %v5471_v10 = vadd.f32 %v5470_v0, %v5440_v50  ;;  %v5415_v0 = vmul.f32 %v5383_v24, %v5383_v24  ;;  %v5446_v56 = vmul.f32 %v18402_v22, %v5414_v51  ;;  %v5388_v24 = vsub.f32 %v16521_v19, %v16540_v6 }
 0x8cb   :  { %v5472_v18 = vadd.f32 %v5471_v10, %v5441_v16  ;;  %v5416_v10 = vmul.f32 %v5384_v36, %v5384_v36  ;;  %v5447_v12 = vmul.f32 %v18402_v22, %v5415_v0  ;;  %v5420_v51 = vmul.f32 %v5388_v24, %v5388_v24  ;;  %v7067_v24 = vpop.xlane.xlu0 %7066 }
 0x8cd   :  { %v5473_v8 = vadd.f32 %v5472_v18, %v5442_v59  ;;  %v5417_v18 = vmul.f32 %v5385_v3, %v5385_v3  ;;  %v5448_v21 = vmul.f32 %v18402_v22, %v5416_v10  ;;  %v5452_v0 = vmul.f32 %v18402_v22, %v5420_v51 }
 0x8cf   :  { %v5474_v50 = vadd.f32 %v5473_v8, %v5443_v34  ;;  %v5418_v8 = vmul.f32 %v5386_v44, %v5386_v44  ;;  %v5449_v36 = vmul.f32 %v18402_v22, %v5417_v18 }
 0x8d1   :  { %v5475_v16 = vadd.f32 %v5474_v50, %v5444_v48  ;;  %v5419_v50 = vmul.f32 %v5387_v62, %v5387_v62 }
 0x8d3   :  { %v5476_v59 = vadd.f32 %v5475_v16, %v5445_v1  ;;  %v5450_v1 = vmul.f32 %v18402_v22, %v5418_v8  ;;  %v5451_v3 = vmul.f32 %v18402_v22, %v5419_v50 }
 0x8d5   :  { %v5477_v34 = vadd.f32 %v5476_v59, %v5446_v56 }
 0x8d7   :  { %v5478_v48 = vadd.f32 %v5477_v34, %v5447_v12 }
 0x8d9   :  { %v5479_v42 = vadd.f32 %v5478_v48, %v5448_v21  ;;  %v7068_v21 = vrot.slane %v7067_v24, 4 }
 0x8db   :  { %v5480_v16 = vadd.f32 %v5479_v42, %v5449_v36  ;;  %v7069_v8 = vadd.f32 %v7068_v21, %v7067_v24 }
 0x8dd   :  { %v5481_v30 = vadd.f32 %v5480_v16, %v5450_v1  ;;  %v7070_v42 = vrot.slane %v7069_v8, 2  ;;  %v284_v1 = vld [vmem:[%s18129_s6] sm:$0x1]  ;;  %v18403_v16 = vld [vmem:[#allocation8_spill] sm:$0xff] }
 0x8df   :  { %v5482_v56 = vadd.f32 %v5481_v30, %v5451_v3  ;;  %v7071_v30 = vadd.f32 %v7070_v42, %v7069_v8 }
 0x8e1   :  { %v5483_v59 = vadd.f32 %v5482_v56, %v5452_v0  ;;  %v7072_v50 = vrot.slane %v7071_v30, 1  ;;  %v5501_v0 = vmul.f32 %v18403_v16, %v284_v1 }
 0x8e3   :  { %5484 = vadd.xlane.f32.xlu1 %v5483_v59  ;;  %v7073_v51 = vadd.f32 %v7072_v50, %v7071_v30 }
 0x970   :  { %v5485_v44 = vpop.xlane.xlu1 %5484 }
 0x971   :  { %v5486_v60 = vrot.slane %v5485_v44, 4 }
 0x973   :  { %v5487_v10 = vadd.f32 %v5486_v60, %v5485_v44  ;;  %v283_v60 = vld [vmem:[%s18128_s5] sm:$0x1] }
 0x974   :  { %v5498_v3 = vmul.f32 %v18403_v16, %v283_v60  ;;  %v13597_v44 = vld [vmem:[%s18127_s8] sm:$0x1] }
 0x975   :  { %v5488_v12 = vrot.slane %v5487_v10, 2 }
 0x977   :  { %v5489_v62 = vadd.f32 %v5488_v12, %v5487_v10  ;;  %v5502_v10 = vadd.f32 %v13597_v44, %v5501_v0 }
 0x979   :  { %v5490_v34 = vrot.slane %v5489_v62, 1 }
 0x97b   :  { %v5491_v18 = vadd.f32 %v5490_v34, %v5489_v62  ;;  %v18404_v62 = vld [vmem:[#allocation9_spill] sm:$0xff] }
 0x97d   :  { %13411 = vpush %v5491_v18 }
 0x9ae   :  { %s13412_s12 = spop %13411 }
 0x9af   :  { %s5493_s23 = smul.f32 0.00048828125, %s13412_s12 }
 0x9b1   :  { %s5494_s29 = sadd.f32 1e-05, %s5493_s23 }
 0x9b3   :  { %v5495_v48 = vstv %s5494_s29 }
 0x9b4   :  { %13589 = vrsqrt.f32 %v5495_v48 }
 0x9be   :  { %v13590_v36 = vpop.eup %13589 }
 0x9bf   :  { %13413 = vpush %v13590_v36 }
 0x9c0   :  { %13415 = vpush %v7073_v51 }
 0x9f0   :  { %s13414_s19 = spop %13413 }
 0x9f1   :  { %v5499_v56 = vstv %s13414_s19  ;;  %s13416_s21 = spop %13415 }
 0x9f2   :  { %v5500_v59 = vmul.f32 %v5499_v56, %v5498_v3  ;;  %s7075_s18 = smul.f32 0.00048828125, %s13416_s21 }
 0x9f4   :  { %v5503_v12 = vmul.f32 %v5500_v59, %v16540_v6  ;;  %v5509_v34 = vrot.slane %v5500_v59, %v18404_v62 }
 0x9f6   :  { %v5504_v18 = vsub.f32 %v5502_v10, %v5503_v12  ;;  %v5511_v24 = vmul.f32 %v5509_v34, %v16410_v7  ;;  %v5512_v21 = vmul.f32 %v5509_v34, %v16414_v13  ;;  %v5513_v8 = vmul.f32 %v16408_v14, %v5509_v34 }
 0x9f7   :  { %v5514_v42 = vmul.f32 %v16412_v57, %v5509_v34  ;;  %v5515_v48 = vmul.f32 %v5509_v34, %v16431_v4  ;;  %v5516_v30 = vmul.f32 %v5509_v34, %v16437_v38  ;;  %v5517_v50 = vmul.f32 %v16426_v26, %v5509_v34 }
 0x9f8   :  { %v5518_v36 = vmul.f32 %v16435_v5, %v5509_v34  ;;  %v5519_v6 = vmul.f32 %v5509_v34, %v16446_v49  ;;  %v5520_v51 = vmul.f32 %v5509_v34, %v16451_v53  ;;  %v5521_v7 = vmul.f32 %v16443_v32, %v5509_v34 }
 0x9f9   :  { %v5522_v13 = vmul.f32 %v16449_v37, %v5509_v34  ;;  %v5523_v14 = vmul.f32 %v5509_v34, %v16458_v39  ;;  %v5524_v57 = vmul.f32 %v5509_v34, %v16463_v25  ;;  %v5525_v4 = vmul.f32 %v16455_v41, %v5509_v34 }
 0x9fa   :  { %v5526_v38 = vmul.f32 %v16461_v17, %v5509_v34  ;;  %v5527_v26 = vmul.f32 %v5509_v34, %v16470_v11  ;;  %v5528_v5 = vmul.f32 %v5509_v34, %v16475_v61  ;;  %v5529_v49 = vmul.f32 %v16467_v47, %v5509_v34 }
 0x9fb   :  { %v5530_v53 = vmul.f32 %v16473_v43, %v5509_v34  ;;  %v5531_v32 = vmul.f32 %v5509_v34, %v16491_v15  ;;  %v5532_v37 = vmul.f32 %v5509_v34, %v16497_v2  ;;  %v5533_v39 = vmul.f32 %v16486_v31, %v5509_v34 }
 0x9fc   :  { %v5534_v25 = vmul.f32 %v16495_v45, %v5509_v34  ;;  %v5535_v41 = vmul.f32 %v5509_v34, %v16506_v9  ;;  %v5536_v17 = vmul.f32 %v5509_v34, %v16511_v33  ;;  %v5537_v11 = vmul.f32 %v16503_v29, %v5509_v34 }
 0x9fd   :  { %v5538_v61 = vmul.f32 %v16509_v58, %v5509_v34  ;;  %v5547_v47 = vrot.slane %v5504_v18, %v18404_v62  ;;  %v5539_v43 = vmul.f32 %v5509_v34, %v16518_v27  ;;  %v5540_v15 = vmul.f32 %v5509_v34, %v16523_v23 }
 0x9fe   :  { %v5541_v2 = vmul.f32 %v16515_v20, %v5509_v34  ;;  %v5542_v31 = vmul.f32 %v16521_v19, %v5509_v34 }
 0x9ff   :  { %v5549_v45 = vadd.f32 %v5547_v47, %v5511_v24  ;;  %v5550_v60 = vadd.f32 %v5547_v47, %v5512_v21  ;;  %v5551_v9 = vadd.f32 %v5547_v47, %v5513_v8  ;;  %v5552_v1 = vadd.f32 %v5547_v47, %v5514_v42 }
 0xa00   :  { %v5553_v33 = vadd.f32 %v5547_v47, %v5515_v48  ;;  %v5554_v16 = vadd.f32 %v5547_v47, %v5516_v30  ;;  %v5555_v29 = vadd.f32 %v5547_v47, %v5517_v50  ;;  %v5556_v3 = vadd.f32 %v5547_v47, %v5518_v36 }
 0xa01   :  { %v5557_v58 = vadd.f32 %v5547_v47, %v5519_v6  ;;  %v5558_v0 = vadd.f32 %v5547_v47, %v5520_v51  ;;  %v5559_v56 = vadd.f32 %v5547_v47, %v5521_v7  ;;  %v5560_v59 = vadd.f32 %v5547_v47, %v5522_v13 }
 0xa02   :  { %v5561_v27 = vadd.f32 %v5547_v47, %v5523_v14  ;;  %v5562_v44 = vadd.f32 %v5547_v47, %v5524_v57  ;;  %v5563_v23 = vadd.f32 %v5547_v47, %v5525_v4  ;;  %v5564_v10 = vadd.f32 %v5547_v47, %v5526_v38 }
 0xa03   :  { %v5565_v20 = vadd.f32 %v5547_v47, %v5527_v26  ;;  %v5566_v12 = vadd.f32 %v5547_v47, %v5528_v5  ;;  %v5567_v19 = vadd.f32 %v5547_v47, %v5529_v49  ;;  %v5568_v34 = vadd.f32 %v5547_v47, %v5530_v53 }
 0xa04   :  { %v16684_v18 = vadd.f32 %v5547_v47, %v5531_v32  ;;  %v16686_v24 = vadd.f32 %v5547_v47, %v5532_v37  ;;  %v16688_v21 = vadd.f32 %v5547_v47, %v5533_v39  ;;  %v16690_v8 = vadd.f32 %v5547_v47, %v5534_v25 }
 0xa05   :  { %v16692_v42 = vadd.f32 %v5547_v47, %v5535_v41  ;;  %v16694_v48 = vadd.f32 %v5547_v47, %v5536_v17  ;;  %v16696_v30 = vadd.f32 %v5547_v47, %v5537_v11  ;;  %v16698_v50 = vadd.f32 %v5547_v47, %v5538_v61 }
 0xa06   :  { %v16700_v36 = vadd.f32 %v5547_v47, %v5539_v43  ;;  %v16702_v6 = vadd.f32 %v5547_v47, %v5540_v15  ;;  %v16704_v51 = vadd.f32 %v5547_v47, %v5541_v2  ;;  %v16706_v7 = vadd.f32 %v5547_v47, %v5542_v31 }
 0xa07   :  { %v5581_v13 = vmax.f32 %v5549_v45, 0.0  ;;  %v5582_v14 = vmax.f32 %v5550_v60, 0.0  ;;  %v5583_v57 = vmax.f32 %v5551_v9, 0.0  ;;  %v5584_v4 = vmax.f32 %v5552_v1, 0.0 }
 0xa08   :  { %v5585_v38 = vmax.f32 %v5553_v33, 0.0  ;;  %v5586_v26 = vmax.f32 %v5554_v16, 0.0  ;;  %v5587_v5 = vmax.f32 %v5555_v29, 0.0  ;;  %v5588_v49 = vmax.f32 %v5556_v3, 0.0 }
 0xa09   :  { %v5589_v53 = vmax.f32 %v5557_v58, 0.0  ;;  %v5590_v32 = vmax.f32 %v5558_v0, 0.0  ;;  %v5591_v37 = vmax.f32 %v5559_v56, 0.0  ;;  %v5592_v39 = vmax.f32 %v5560_v59, 0.0  ;;  %5614 = vst.msk [vmem:[%s18130_s9] sm:$0xff] %vm5613_vm12, %v5581_v13  ;;  %5615 = vst.msk [vmem:[%s18130_s9 + $0x8] sm:$0xff] %vm5613_vm12, %v5582_v14 }
 0xa0a   :  { %5616 = vst.msk [vmem:[%s18130_s9 + $0x10] sm:$0xff] %vm5613_vm12, %v5583_v57  ;;  %5617 = vst.msk [vmem:[%s18130_s9 + $0x18] sm:$0xff] %vm5613_vm12, %v5584_v4  ;;  %v5593_v25 = vmax.f32 %v5561_v27, 0.0  ;;  %v5594_v41 = vmax.f32 %v5562_v44, 0.0  ;;  %v5595_v17 = vmax.f32 %v5563_v23, 0.0  ;;  %v5596_v11 = vmax.f32 %v5564_v10, 0.0 }
 0xa0b   :  { %5618 = vst.msk [vmem:[%s18130_s9 + $0x20] sm:$0xff] %vm5613_vm12, %v5585_v38  ;;  %5619 = vst.msk [vmem:[%s18130_s9 + $0x28] sm:$0xff] %vm5613_vm12, %v5586_v26  ;;  %v5597_v61 = vmax.f32 %v5565_v20, 0.0  ;;  %v5598_v47 = vmax.f32 %v5566_v12, 0.0  ;;  %v5599_v43 = vmax.f32 %v5567_v19, 0.0  ;;  %v5600_v15 = vmax.f32 %v5568_v34, 0.0 }
 0xa0c   :  { %5620 = vst.msk [vmem:[%s18130_s9 + $0x30] sm:$0xff] %vm5613_vm12, %v5587_v5  ;;  %5621 = vst.msk [vmem:[%s18130_s9 + $0x38] sm:$0xff] %vm5613_vm12, %v5588_v49  ;;  %v5601_v2 = vmax.f32 %v16684_v18, 0.0  ;;  %v5602_v31 = vmax.f32 %v16686_v24, 0.0  ;;  %v5603_v45 = vmax.f32 %v16688_v21, 0.0  ;;  %v5604_v60 = vmax.f32 %v16690_v8, 0.0 }
 0xa0d   :  { %5622 = vst.msk [vmem:[%s18130_s9 + $0x40] sm:$0xff] %vm5613_vm12, %v5589_v53  ;;  %5623 = vst.msk [vmem:[%s18130_s9 + $0x48] sm:$0xff] %vm5613_vm12, %v5590_v32  ;;  %v5605_v9 = vmax.f32 %v16692_v42, 0.0  ;;  %v5606_v1 = vmax.f32 %v16694_v48, 0.0  ;;  %v5607_v33 = vmax.f32 %v16696_v30, 0.0  ;;  %v5608_v16 = vmax.f32 %v16698_v50, 0.0 }
 0xa0e   :  { %5624 = vst.msk [vmem:[%s18130_s9 + $0x50] sm:$0xff] %vm5613_vm12, %v5591_v37  ;;  %5625 = vst.msk [vmem:[%s18130_s9 + $0x58] sm:$0xff] %vm5613_vm12, %v5592_v39  ;;  %v5609_v29 = vmax.f32 %v16700_v36, 0.0  ;;  %v5610_v3 = vmax.f32 %v16702_v6, 0.0  ;;  %v5611_v58 = vmax.f32 %v16704_v51, 0.0  ;;  %v5612_v0 = vmax.f32 %v16706_v7, 0.0 }
 0xa0f   :  { %5626 = vst.msk [vmem:[%s18130_s9 + $0x60] sm:$0xff] %vm5613_vm12, %v5593_v25  ;;  %5627 = vst.msk [vmem:[%s18130_s9 + $0x68] sm:$0xff] %vm5613_vm12, %v5594_v41  ;;  %v16848_v56 = vstv %s7075_s18  ;;  %v18405_v7 = vld [vmem:[#allocation11_spill] sm:$0xff]  ;;  %v18406_v38 = vld [vmem:[#allocation13_spill] sm:$0xff] }
 0xa10   :  { %5628 = vst.msk [vmem:[%s18130_s9 + $0x70] sm:$0xff] %vm5613_vm12, %v5595_v17  ;;  %5629 = vst.msk [vmem:[%s18130_s9 + $0x78] sm:$0xff] %vm5613_vm12, %v5596_v11  ;;  %v7077_v59 = vsub.f32 %v16350_v35, %v16848_v56  ;;  %v7078_v27 = vsub.f32 %v16354_v55, %v16848_v56  ;;  %v7079_v44 = vsub.f32 %v16348_v54, %v16848_v56  ;;  %v18407_v32 = vld [vmem:[#allocation10_spill] sm:$0xff]  ;;  %v18408_v17 = vld [vmem:[#allocation12_spill] sm:$0xff] }
 0xa11   :  { %5630 = vst.msk [vmem:[%s18130_s9 + $0x80] sm:$0xff] %vm5613_vm12, %v5597_v61  ;;  %5631 = vst.msk [vmem:[%s18130_s9 + $0x88] sm:$0xff] %vm5613_vm12, %v5598_v47  ;;  %v7080_v20 = vsub.f32 %v16352_v52, %v16848_v56  ;;  %v7081_v12 = vsub.f32 %v16362_v46, %v16848_v56  ;;  %v7082_v24 = vsub.f32 %v16367_v63, %v16848_v56 }
 0xa12   :  { %5632 = vst.msk [vmem:[%s18130_s9 + $0x90] sm:$0xff] %vm5613_vm12, %v5599_v43  ;;  %5633 = vst.msk [vmem:[%s18130_s9 + $0x98] sm:$0xff] %vm5613_vm12, %v5600_v15  ;;  %v7109_v23 = vmul.f32 %v7077_v59, %v7077_v59  ;;  %v7110_v10 = vmul.f32 %v7078_v27, %v7078_v27  ;;  %v7111_v19 = vmul.f32 %v7079_v44, %v7079_v44  ;;  %v18409_v15 = vld [vmem:[#allocation15_spill] sm:$0xff]  ;;  %v18412_v44 = vld [vmem:[#allocation16_spill] sm:$0xff] }
 0xa13   :  { %5634 = vst.msk [vmem:[%s18130_s9 + $0xa0] sm:$0xff] %vm5613_vm12, %v5601_v2  ;;  %5635 = vst.msk [vmem:[%s18130_s9 + $0xa8] sm:$0xff] %vm5613_vm12, %v5602_v31  ;;  %v7112_v21 = vmul.f32 %v7080_v20, %v7080_v20  ;;  %v7083_v8 = vsub.f32 %v16359_v40, %v16848_v56  ;;  %v7113_v42 = vmul.f32 %v7081_v12, %v7081_v12 }
 0xa14   :  { %5636 = vst.msk [vmem:[%s18130_s9 + $0xb0] sm:$0xff] %vm5613_vm12, %v5603_v45  ;;  %5637 = vst.msk [vmem:[%s18130_s9 + $0xb8] sm:$0xff] %vm5613_vm12, %v5604_v60  ;;  %v7141_v34 = vmul.f32 %v18402_v22, %v7109_v23  ;;  %v7142_v18 = vmul.f32 %v18402_v22, %v7110_v10  ;;  %v7143_v48 = vmul.f32 %v18402_v22, %v7111_v19  ;;  %v18413_v19 = vld [vmem:[#allocation20_spill] sm:$0xff] }
 0xa15   :  { %5638 = vst.msk [vmem:[%s18130_s9 + $0xc0] sm:$0xff] %vm5613_vm12, %v5605_v9  ;;  %5639 = vst.msk [vmem:[%s18130_s9 + $0xc8] sm:$0xff] %vm5613_vm12, %v5606_v1  ;;  %v7084_v50 = vsub.f32 %v16365_v28, %v16848_v56  ;;  %v7114_v36 = vmul.f32 %v7082_v24, %v7082_v24  ;;  %v7144_v6 = vmul.f32 %v18402_v22, %v7112_v21  ;;  %v18410_v9 = vld [vmem:[#allocation17_spill] sm:$0xff] }
 0xa16   :  { %5640 = vst.msk [vmem:[%s18130_s9 + $0xd0] sm:$0xff] %vm5613_vm12, %v5607_v33  ;;  %5641 = vst.msk [vmem:[%s18130_s9 + $0xd8] sm:$0xff] %vm5613_vm12, %v5608_v16  ;;  %v7173_v30 = vadd.f32 %v7142_v18, %v7141_v34  ;;  %v7085_v13 = vsub.f32 %v18405_v7, %v16848_v56  ;;  %v7115_v14 = vmul.f32 %v7083_v8, %v7083_v8  ;;  %v18414_v8 = vld [vmem:[#allocation22_spill] sm:$0xff] }
 0xa17   :  { %5642 = vst.msk [vmem:[%s18130_s9 + $0xe0] sm:$0xff] %vm5613_vm12, %v5609_v29  ;;  %5643 = vst.msk [vmem:[%s18130_s9 + $0xe8] sm:$0xff] %vm5613_vm12, %v5610_v3  ;;  %v7145_v57 = vmul.f32 %v18402_v22, %v7113_v42  ;;  %v7086_v26 = vsub.f32 %v18406_v38, %v16848_v56  ;;  %v7116_v5 = vmul.f32 %v7084_v50, %v7084_v50  ;;  %v18411_v3 = vld [vmem:[#allocation14_spill] sm:$0xff] }
 0xa18   :  { %5644 = vst.msk [vmem:[%s18130_s9 + $0xf0] sm:$0xff] %vm5613_vm12, %v5611_v58  ;;  %5645 = vst.msk [vmem:[%s18130_s9 + $0xf8] sm:$0xff] %vm5613_vm12, %v5612_v0  ;;  %v7174_v51 = vadd.f32 %v7173_v30, %v7143_v48  ;;  %v7146_v49 = vmul.f32 %v18402_v22, %v7114_v36  ;;  %v7087_v37 = vsub.f32 %v18407_v32, %v16848_v56  ;;  %v18415_v36 = vld [vmem:[#allocation18_spill] sm:$0xff] }
 0xa19   :  { %v7117_v39 = vmul.f32 %v7085_v13, %v7085_v13  ;;  %v7147_v25 = vmul.f32 %v18402_v22, %v7115_v14  ;;  %v7088_v11 = vsub.f32 %v18408_v17, %v16848_v56  ;;  %v7118_v61 = vmul.f32 %v7086_v26, %v7086_v26 }
 0xa1a   :  { %v7175_v4 = vadd.f32 %v7174_v51, %v7144_v6  ;;  %v7148_v47 = vmul.f32 %v18402_v22, %v7116_v5  ;;  %v7089_v2 = vsub.f32 %v18409_v15, %v16848_v56  ;;  %v7119_v31 = vmul.f32 %v7087_v37, %v7087_v37 }
 0xa1b   :  { %v7149_v45 = vmul.f32 %v18402_v22, %v7117_v39  ;;  %v7090_v1 = vsub.f32 %v18410_v9, %v16848_v56  ;;  %v7120_v33 = vmul.f32 %v7088_v11, %v7088_v11  ;;  %v7150_v16 = vmul.f32 %v18402_v22, %v7118_v61  ;;  %v18418_v11 = vld [vmem:[#allocation26_spill] sm:$0xff] }
 0xa1c   :  { %v7176_v53 = vadd.f32 %v7175_v4, %v7145_v57  ;;  %v7091_v58 = vsub.f32 %v18411_v3, %v16848_v56  ;;  %v7121_v0 = vmul.f32 %v7089_v2, %v7089_v2  ;;  %v7151_v59 = vmul.f32 %v18402_v22, %v7119_v31  ;;  %v18416_v57 = vld [vmem:[#allocation21_spill] sm:$0xff]  ;;  %v18419_v31 = vld [vmem:[#allocation23_spill] sm:$0xff] }
 0xa1d   :  { %v7092_v23 = vsub.f32 %v18412_v44, %v16848_v56  ;;  %v7122_v10 = vmul.f32 %v7090_v1, %v7090_v1  ;;  %v7152_v20 = vmul.f32 %v18402_v22, %v7120_v33  ;;  %v7093_v34 = vsub.f32 %v18413_v19, %v16848_v56 }
 0xa1e   :  { %v7177_v41 = vadd.f32 %v7176_v53, %v7146_v49  ;;  %v7123_v18 = vmul.f32 %v7091_v58, %v7091_v58  ;;  %v7153_v24 = vmul.f32 %v18402_v22, %v7121_v0  ;;  %v7094_v42 = vsub.f32 %v18414_v8, %v16848_v56  ;;  %v18417_v53 = vld [vmem:[#allocation24_spill] sm:$0xff] }
 0xa1f   :  { %v7124_v48 = vmul.f32 %v7092_v23, %v7092_v23  ;;  %v7154_v30 = vmul.f32 %v18402_v22, %v7122_v10  ;;  %v7095_v6 = vsub.f32 %v18415_v36, %v16848_v56  ;;  %v7125_v51 = vmul.f32 %v7093_v34, %v7093_v34  ;;  %v18422_v34 = vld [vmem:[#allocation30_spill] sm:$0xff] }
 0xa20   :  { %v7178_v43 = vadd.f32 %v7177_v41, %v7147_v25  ;;  %v7155_v13 = vmul.f32 %v18402_v22, %v7123_v18  ;;  %v7096_v4 = vsub.f32 %v18416_v57, %v16848_v56  ;;  %v7126_v26 = vmul.f32 %v7094_v42, %v7094_v42 }
 0xa21   :  { %v7156_v5 = vmul.f32 %v18402_v22, %v7124_v48  ;;  %v7097_v37 = vsub.f32 %v18417_v53, %v16848_v56  ;;  %v7127_v39 = vmul.f32 %v7095_v6, %v7095_v6  ;;  %v7157_v25 = vmul.f32 %v18402_v22, %v7125_v51  ;;  %v18423_v48 = vld [vmem:[#allocation27_spill] sm:$0xff] }
 0xa22   :  { %v7179_v60 = vadd.f32 %v7178_v43, %v7148_v47  ;;  %v7098_v61 = vsub.f32 %v18418_v11, %v16848_v56  ;;  %v7128_v47 = vmul.f32 %v7096_v4, %v7096_v4  ;;  %v7158_v43 = vmul.f32 %v18402_v22, %v7126_v26 }
 0xa23   :  { %v7159_v1 = vmul.f32 %v18402_v22, %v7127_v39  ;;  %v7102_v18 = vsub.f32 %v18422_v34, %v16848_v56 }
 0xa24   :  { %v7180_v29 = vadd.f32 %v7179_v60, %v7149_v45  ;;  %v7099_v45 = vsub.f32 %v18419_v31, %v16848_v56  ;;  %v7129_v60 = vmul.f32 %v7097_v37, %v7097_v37  ;;  %v7130_v58 = vmul.f32 %v7098_v61, %v7098_v61  ;;  %v18426_v61 = vld [vmem:[#allocation34_spill] sm:$0xff] }
 0xa25   :  { %v7160_v0 = vmul.f32 %v18402_v22, %v7128_v47  ;;  %v7134_v4 = vmul.f32 %v7102_v18, %v7102_v18  ;;  %v7106_v47 = vsub.f32 %v18426_v61, %v16848_v56 }
 0xa26   :  { %v7181_v27 = vadd.f32 %v7180_v29, %v7150_v16  ;;  %v18420_v16 = vld [vmem:[#allocation6_spill] sm:$0xff]  ;;  %v7131_v10 = vmul.f32 %v7099_v45, %v7099_v45 }
 0xa27   :  { %v7100_v29 = vsub.f32 %v18420_v16, %v16848_v56 }
 0xa28   :  { %v7182_v12 = vadd.f32 %v7181_v27, %v7151_v59  ;;  %v18421_v27 = vld [vmem:[#allocation28_spill] sm:$0xff]  ;;  %v7163_v6 = vmul.f32 %v18402_v22, %v7131_v10 }
 0xa29   :  { %v7101_v23 = vsub.f32 %v18421_v27, %v16848_v56 }
 0xa2a   :  { %v7183_v21 = vadd.f32 %v7182_v12, %v7152_v20  ;;  %v7161_v20 = vmul.f32 %v18402_v22, %v7129_v60  ;;  %v18427_v60 = vld [vmem:[#allocation31_spill] sm:$0xff] }
 0xa2c   :  { %v7184_v50 = vadd.f32 %v7183_v21, %v7153_v24  ;;  %v7132_v24 = vmul.f32 %v7100_v29, %v7100_v29  ;;  %v7162_v21 = vmul.f32 %v18402_v22, %v7130_v58 }
 0xa2e   :  { %v7185_v14 = vadd.f32 %v7184_v50, %v7154_v30  ;;  %v7103_v30 = vsub.f32 %v18423_v48, %v16848_v56  ;;  %v7133_v50 = vmul.f32 %v7101_v23, %v7101_v23  ;;  %v7164_v26 = vmul.f32 %v18402_v22, %v7132_v24 }
 0xa2f   :  { %v7138_v23 = vmul.f32 %v7106_v47, %v7106_v47 }
 0xa30   :  { %v7186_v49 = vadd.f32 %v7185_v14, %v7155_v13  ;;  %v18424_v13 = vld [vmem:[#allocation29_spill] sm:$0xff]  ;;  %v7135_v39 = vmul.f32 %v7103_v30, %v7103_v30 }
 0xa31   :  { %v7104_v14 = vsub.f32 %v18424_v13, %v16848_v56 }
 0xa32   :  { %v7187_v41 = vadd.f32 %v7186_v49, %v7156_v5  ;;  %v18425_v49 = vld [vmem:[#allocation32_spill] sm:$0xff]  ;;  %v7167_v29 = vmul.f32 %v18402_v22, %v7135_v39  ;;  %v13518_v39 = vld [vmem:[%s18123_s2 + $0x18] sm:$0xff]  }
 0xa33   :  { %v7105_v37 = vsub.f32 %v18425_v49, %v16848_v56 }
 0xa34   :  { %v7188_v2 = vadd.f32 %v7187_v41, %v7157_v25  ;;  %v7165_v25 = vmul.f32 %v18402_v22, %v7133_v50 }
 0xa36   :  { %v7189_v33 = vadd.f32 %v7188_v2, %v7158_v43  ;;  %v7136_v43 = vmul.f32 %v7104_v14, %v7104_v14  ;;  %v7166_v2 = vmul.f32 %v18402_v22, %v7134_v4 }
 0xa38   :  { %v7190_v59 = vadd.f32 %v7189_v33, %v7159_v1  ;;  %v7107_v1 = vsub.f32 %v18427_v60, %v16848_v56  ;;  %v7137_v33 = vmul.f32 %v7105_v37, %v7105_v37  ;;  %v7168_v10 = vmul.f32 %v18402_v22, %v7136_v43  ;;  %v13517_v37 = vld [vmem:[%s18123_s2 + $0x10] sm:$0xff]  }
 0xa3a   :  { %v7191_v12 = vadd.f32 %v7190_v59, %v7160_v0  ;;  %v18428_v0 = vld [vmem:[#allocation33_spill] sm:$0xff]  ;;  %v7169_v18 = vmul.f32 %v18402_v22, %v7137_v33 }
 0xa3b   :  { %v7108_v59 = vsub.f32 %v18428_v0, %v16848_v56 }
 0xa3c   :  { %v7192_v42 = vadd.f32 %v7191_v12, %v7161_v20  ;;  %v7139_v12 = vmul.f32 %v7107_v1, %v7107_v1 }
 0xa3e   :  { %v7193_v51 = vadd.f32 %v7192_v42, %v7162_v21  ;;  %v7140_v21 = vmul.f32 %v7108_v59, %v7108_v59  ;;  %v7170_v42 = vmul.f32 %v18402_v22, %v7138_v23  ;;  %v7171_v50 = vmul.f32 %v18402_v22, %v7139_v12  ;;  %v13522_v59 = vld [vmem:[%s18123_s2 + $0x38] sm:$0xff]   ;;  %v7638_v23 = vld [vmem:[#allocation3] sm:$0xff] }
 0xa3f   :  { %12473 = vmatprep.mubr.bf16.mxu0 %v7638_v23 }
 0xa40   :  { %v7194_v5 = vadd.f32 %v7193_v51, %v7163_v6  ;;  %v7172_v51 = vmul.f32 %v18402_v22, %v7140_v21  ;;  %v13598_v21 = vld [vmem:[%s18125_s3] sm:$0x1]  ;;  %v13530_v22 = vld [vmem:[%s18123_s2 + $0x78] sm:$0xff]  }
 0xa42   :  { %v7195_v41 = vadd.f32 %v7194_v5, %v7164_v26  ;;  %v13515_v26 = vld [vmem:[%s18123_s2] sm:$0xff]   ;;  %v13516_v5 = vld [vmem:[%s18123_s2 + $0x8] sm:$0xff]  }
 0xa43   :  { %12457 = vmatprep.subr.bf16.mxu0 %v13515_v26 }
 0xa44   :  { %v7196_v45 = vadd.f32 %v7195_v41, %v7165_v25  ;;  %12458 = vmatpush3.bf16.msra.mxu0 %v13515_v26  ;;  %v13519_v25 = vld [vmem:[%s18123_s2 + $0x20] sm:$0xff]  }
 0xa45   :  { %12459 = vmatprep.subr.bf16.mxu0 %v13516_v5 }
 0xa46   :  { %v7197_v58 = vadd.f32 %v7196_v45, %v7166_v2 }
 0xa48   :  { %v7198_v20 = vadd.f32 %v7197_v58, %v7167_v29  ;;  %12460 = vmatpush3.bf16.msra.mxu0 %v13516_v5  ;;  %v13520_v29 = vld [vmem:[%s18123_s2 + $0x28] sm:$0xff]   ;;  %v13521_v58 = vld [vmem:[%s18123_s2 + $0x30] sm:$0xff]  }
 0xa49   :  { %12461 = vmatprep.subr.bf16.mxu0 %v13517_v37 }
 0xa4a   :  { %v7199_v24 = vadd.f32 %v7198_v20, %v7168_v10  ;;  %v16973_v20 = vld [vmem:[%s18123_s2 + $0x40] sm:$0xff]  }
 0xa4c   :  { %v7200_v30 = vadd.f32 %v7199_v24, %v7169_v18  ;;  %12462 = vmatpush3.bf16.msra.mxu0 %v13517_v37  ;;  %v11194_v18 = vld [vmem:[%s18124_s7 + $0x1] sm:$0x1] }
 0xa4d   :  { %12463 = vmatprep.subr.bf16.mxu0 %v13518_v39  ;;  %v16979_v24 = vadd.f32 1.0, %v11194_v18 }
 0xa4e   :  { %v7201_v6 = vadd.f32 %v7200_v30, %v7170_v42  ;;  %v13599_v30 = vld [vmem:[%s18126_s4] sm:$0x1] }
 0xa4f   :  { %18429 = vst [vmem:[#allocation8_spill] sm:$0xff] %v16979_v24  ;;  %v7219_v42 = vmul.f32 %v13598_v21, %v16979_v24 }
 0xa50   :  { %v7202_v14 = vadd.f32 %v7201_v6, %v7171_v50  ;;  %12464 = vmatpush3.bf16.msra.mxu0 %v13518_v39  ;;  %v7222_v50 = vmul.f32 %v13599_v30, %v16979_v24  ;;  %v11195_v6 = vld [vmem:[%s18127_s8 + $0x1] sm:$0x1] }
 0xa51   :  { %12465 = vmatprep.subr.bf16.mxu0 %v13519_v25 }
 0xa52   :  { %v7203_v4 = vadd.f32 %v7202_v14, %v7172_v51 }
 0xa54   :  { %7204 = vadd.xlane.f32.xlu0 %v7203_v4  ;;  %12466 = vmatpush3.bf16.msra.mxu0 %v13519_v25  ;;  %v7223_v4 = vadd.f32 %v11195_v6, %v7222_v50 }
 0xa55   :  { %12467 = vmatprep.subr.bf16.mxu0 %v13520_v29 }
 0xa58   :  { %12468 = vmatpush3.bf16.msra.mxu0 %v13520_v29 }
 0xa59   :  { %12469 = vmatprep.subr.bf16.mxu0 %v13521_v58 }
 0xa5c   :  { %12470 = vmatpush3.bf16.msra.mxu0 %v13521_v58 }
 0xa5d   :  { %12471 = vmatprep.subr.bf16.mxu0 %v13522_v59 }
 0xa60   :  { %12472 = vmatpush3.bf16.msra.mxu0 %v13522_v59 }
 0xa61   :  { %12505 = vmatprep.subr.bf16.mxu0 %v16973_v20 }
 0xae1   :  { %v7205_v41 = vpop.xlane.xlu0 %7204 }
 0xae2   :  { %v7206_v47 = vrot.slane %v7205_v41, 4 }
 0xae4   :  { %v7207_v43 = vadd.f32 %v7206_v47, %v7205_v41 }
 0xae6   :  { %v7208_v2 = vrot.slane %v7207_v43, 2 }
 0xae8   :  { %v7209_v45 = vadd.f32 %v7208_v2, %v7207_v43 }
 0xaea   :  { %v7210_v1 = vrot.slane %v7209_v45, 1 }
 0xaec   :  { %v7211_v33 = vadd.f32 %v7210_v1, %v7209_v45 }
 0xaee   :  { %13417 = vpush %v7211_v33 }
 0xb1f   :  { %s13418_s12 = spop %13417 }
 0xb20   :  { %s7213_s23 = smul.f32 0.00048828125, %s13418_s12 }
 0xb22   :  { %s7214_s29 = sadd.f32 1e-05, %s7213_s23 }
 0xb24   :  { %v7215_v10 = vstv %s7214_s29 }
 0xb25   :  { %13591 = vrsqrt.f32 %v7215_v10 }
 0xb2f   :  { %v13592_v12 = vpop.eup %13591 }
 0xb30   :  { %13419 = vpush %v13592_v12 }
 0xb61   :  { %s13420_s25 = spop %13419 }
 0xb62   :  { %v7220_v51 = vstv %s13420_s25 }
 0xb63   :  { %v7221_v14 = vmul.f32 %v7220_v51, %v7219_v42 }
 0xb65   :  { %v7224_v26 = vmul.f32 %v7221_v14, %v16848_v56  ;;  %v7230_v5 = vrot.slane %v7221_v14, %v18404_v62 }
 0xb67   :  { %v7225_v37 = vsub.f32 %v7223_v4, %v7224_v26  ;;  %v7232_v39 = vmul.f32 %v7230_v5, %v16350_v35  ;;  %v7233_v25 = vmul.f32 %v7230_v5, %v16354_v55  ;;  %v7234_v41 = vmul.f32 %v16348_v54, %v7230_v5 }
 0xb68   :  { %v7235_v47 = vmul.f32 %v16352_v52, %v7230_v5  ;;  %v7236_v43 = vmul.f32 %v7230_v5, %v16362_v46  ;;  %v7237_v2 = vmul.f32 %v7230_v5, %v16367_v63  ;;  %v7238_v45 = vmul.f32 %v16359_v40, %v7230_v5 }
 0xb69   :  { %v7268_v1 = vrot.slane %v7225_v37, %v18404_v62  ;;  %v7239_v56 = vmul.f32 %v16365_v28, %v7230_v5  ;;  %v7240_v33 = vmul.f32 %v7230_v5, %v18405_v7  ;;  %v7241_v35 = vmul.f32 %v7230_v5, %v18406_v38 }
 0xb6a   :  { %v7242_v55 = vmul.f32 %v18407_v32, %v7230_v5  ;;  %v7243_v54 = vmul.f32 %v18408_v17, %v7230_v5  ;;  %v7244_v52 = vmul.f32 %v7230_v5, %v18409_v15  ;;  %v7245_v46 = vmul.f32 %v7230_v5, %v18410_v9 }
 0xb6b   :  { %v7246_v63 = vmul.f32 %v18411_v3, %v7230_v5  ;;  %v7247_v40 = vmul.f32 %v18412_v44, %v7230_v5  ;;  %v7248_v29 = vmul.f32 %v7230_v5, %v18413_v19  ;;  %v7249_v28 = vmul.f32 %v7230_v5, %v18414_v8 }
 0xb6c   :  { %v7250_v7 = vmul.f32 %v18415_v36, %v7230_v5  ;;  %v7251_v38 = vmul.f32 %v18416_v57, %v7230_v5  ;;  %v7252_v32 = vmul.f32 %v7230_v5, %v18417_v53  ;;  %v7253_v17 = vmul.f32 %v7230_v5, %v18418_v11 }
 0xb6d   :  { %v7254_v15 = vmul.f32 %v18419_v31, %v7230_v5  ;;  %v7255_v9 = vmul.f32 %v18420_v16, %v7230_v5  ;;  %v7256_v3 = vmul.f32 %v7230_v5, %v18421_v27  ;;  %v7257_v44 = vmul.f32 %v7230_v5, %v18422_v34 }
 0xb6e   :  { %v7258_v19 = vmul.f32 %v18423_v48, %v7230_v5  ;;  %v7259_v8 = vmul.f32 %v18424_v13, %v7230_v5  ;;  %v7260_v36 = vmul.f32 %v7230_v5, %v18425_v49  ;;  %v7261_v57 = vmul.f32 %v7230_v5, %v18426_v61 }
 0xb6f   :  { %v7262_v53 = vmul.f32 %v18427_v60, %v7230_v5  ;;  %v7263_v11 = vmul.f32 %v18428_v0, %v7230_v5  ;;  %v17027_v58 = vadd.f32 %v7268_v1, %v7232_v39  ;;  %v17029_v31 = vadd.f32 %v7268_v1, %v7233_v25 }
 0xb70   :  { %v17031_v16 = vadd.f32 %v7268_v1, %v7234_v41  ;;  %v17033_v27 = vadd.f32 %v7268_v1, %v7235_v47  ;;  %v17035_v34 = vadd.f32 %v7268_v1, %v7236_v43  ;;  %v7275_v48 = vadd.f32 %v7268_v1, %v7237_v2 }
 0xb71   :  { %v7276_v13 = vadd.f32 %v7268_v1, %v7238_v45  ;;  %v7277_v59 = vadd.f32 %v7268_v1, %v7239_v56  ;;  %v7278_v49 = vadd.f32 %v7268_v1, %v7240_v33  ;;  %v7279_v23 = vadd.f32 %v7268_v1, %v7241_v35 }
 0xb72   :  { %v7280_v61 = vadd.f32 %v7268_v1, %v7242_v55  ;;  %v7281_v10 = vadd.f32 %v7268_v1, %v7243_v54  ;;  %v7282_v60 = vadd.f32 %v7268_v1, %v7244_v52  ;;  %v7283_v12 = vadd.f32 %v7268_v1, %v7245_v46 }
 0xb73   :  { %v7284_v0 = vadd.f32 %v7268_v1, %v7246_v63  ;;  %v7285_v18 = vadd.f32 %v7268_v1, %v7247_v40  ;;  %v7286_v21 = vadd.f32 %v7268_v1, %v7248_v29  ;;  %v7287_v42 = vadd.f32 %v7268_v1, %v7249_v28 }
 0xb74   :  { %v7288_v30 = vadd.f32 %v7268_v1, %v7250_v7  ;;  %v7289_v50 = vadd.f32 %v7268_v1, %v7251_v38  ;;  %v7290_v6 = vadd.f32 %v7268_v1, %v7252_v32  ;;  %v7291_v51 = vadd.f32 %v7268_v1, %v7253_v17 }
 0xb75   :  { %v7292_v14 = vadd.f32 %v7268_v1, %v7254_v15  ;;  %v7293_v4 = vadd.f32 %v7268_v1, %v7255_v9  ;;  %v7294_v26 = vadd.f32 %v7268_v1, %v7256_v3  ;;  %v7295_v5 = vadd.f32 %v7268_v1, %v7257_v44 }
 0xb76   :  { %v7296_v37 = vadd.f32 %v7268_v1, %v7258_v19  ;;  %v7297_v39 = vadd.f32 %v7268_v1, %v7259_v8  ;;  %v7298_v25 = vadd.f32 %v7268_v1, %v7260_v36  ;;  %v7299_v41 = vadd.f32 %v7268_v1, %v7261_v57 }
 0xb77   :  { %v7300_v47 = vadd.f32 %v7268_v1, %v7262_v53  ;;  %v7301_v43 = vadd.f32 %v7268_v1, %v7263_v11  ;;  %v7302_v2 = vmax.f32 %v17027_v58, 0.0  ;;  %v7303_v45 = vmax.f32 %v17029_v31, 0.0 }
 0xb78   :  { %v7304_v56 = vmax.f32 %v17031_v16, 0.0  ;;  %v7305_v33 = vmax.f32 %v17033_v27, 0.0  ;;  %v7306_v35 = vmax.f32 %v17035_v34, 0.0  ;;  %v7307_v55 = vmax.f32 %v7275_v48, 0.0 }
 0xb79   :  { %v7308_v54 = vmax.f32 %v7276_v13, 0.0  ;;  %v7309_v52 = vmax.f32 %v7277_v59, 0.0  ;;  %v7310_v46 = vmax.f32 %v7278_v49, 0.0  ;;  %v7311_v63 = vmax.f32 %v7279_v23, 0.0 }
 0xb7a   :  { %v7312_v40 = vmax.f32 %v7280_v61, 0.0  ;;  %v7313_v29 = vmax.f32 %v7281_v10, 0.0  ;;  %v7314_v28 = vmax.f32 %v7282_v60, 0.0  ;;  %v7315_v7 = vmax.f32 %v7283_v12, 0.0 }
 0xb7b   :  { %v7316_v1 = vmax.f32 %v7284_v0, 0.0  ;;  %v7317_v38 = vmax.f32 %v7285_v18, 0.0  ;;  %v7318_v32 = vmax.f32 %v7286_v21, 0.0  ;;  %v7319_v17 = vmax.f32 %v7287_v42, 0.0 }
 0xb7c   :  { %v7320_v15 = vmax.f32 %v7288_v30, 0.0  ;;  %v7321_v9 = vmax.f32 %v7289_v50, 0.0  ;;  %v7322_v3 = vmax.f32 %v7290_v6, 0.0  ;;  %v7323_v44 = vmax.f32 %v7291_v51, 0.0 }
 0xb7d   :  { %v7324_v19 = vmax.f32 %v7292_v14, 0.0  ;;  %v7325_v8 = vmax.f32 %v7293_v4, 0.0  ;;  %v7326_v36 = vmax.f32 %v7294_v26, 0.0  ;;  %v7327_v57 = vmax.f32 %v7295_v5, 0.0 }
 0xb7e   :  { %v7328_v53 = vmax.f32 %v7296_v37, 0.0  ;;  %v7329_v11 = vmax.f32 %v7297_v39, 0.0  ;;  %v7330_v58 = vmax.f32 %v7298_v25, 0.0  ;;  %v7331_v31 = vmax.f32 %v7299_v41, 0.0 }
 0xb7f   :  { %v7332_v16 = vmax.f32 %v7300_v47, 0.0  ;;  %v7333_v27 = vmax.f32 %v7301_v43, 0.0  ;;  %v17042_v34 = vpack.c.bf16 %v7303_v45, %v7302_v2  ;;  %v17044_v48 = vpack.c.bf16 %v7305_v33, %v7304_v56 }
 0xb80   :  { %v17046_v13 = vpack.c.bf16 %v7307_v55, %v7306_v35  ;;  %v17048_v59 = vpack.c.bf16 %v7309_v52, %v7308_v54  ;;  %v17050_v49 = vpack.c.bf16 %v7311_v63, %v7310_v46  ;;  %v17052_v23 = vpack.c.bf16 %v7313_v29, %v7312_v40 }
 0xb81   :  { %v17054_v61 = vpack.c.bf16 %v7315_v7, %v7314_v28  ;;  %v17056_v10 = vpack.c.bf16 %v7317_v38, %v7316_v1  ;;  %v17058_v60 = vpack.c.bf16 %v7319_v17, %v7318_v32  ;;  %v17060_v12 = vpack.c.bf16 %v7321_v9, %v7320_v15  ;;  %7351 = vst [vmem:[#allocation3 + $0xa0] sm:$0xff] %v17044_v48 }
 0xb82   :  { %v17063_v0 = vpack.c.bf16 %v7323_v44, %v7322_v3  ;;  %v17065_v18 = vpack.c.bf16 %v7325_v8, %v7324_v19  ;;  %v17067_v21 = vpack.c.bf16 %v7327_v57, %v7326_v36  ;;  %v17069_v42 = vpack.c.bf16 %v7329_v11, %v7328_v53  ;;  %7352 = vst [vmem:[#allocation3 + $0xa8] sm:$0xff] %v17046_v13 }
 0xb83   :  { %7353 = vst [vmem:[#allocation3 + $0xb0] sm:$0xff] %v17048_v59  ;;  %7354 = vst [vmem:[#allocation3 + $0xb8] sm:$0xff] %v17050_v49  ;;  %v17075_v30 = vpack.c.bf16 %v7331_v31, %v7330_v58  ;;  %v17077_v50 = vpack.c.bf16 %v7333_v27, %v7332_v16  ;;  %v7367_v6 = vshrl.u32 %v17042_v34, 16  ;;  %v7370_v51 = vshll.u32 %v17042_v34, 16 }
 0xb84   :  { %7355 = vst [vmem:[#allocation3 + $0xc0] sm:$0xff] %v17052_v23  ;;  %7356 = vst [vmem:[#allocation3 + $0xc8] sm:$0xff] %v17054_v61  ;;  %v7374_v14 = vshrl.u32 %v17044_v48, 16  ;;  %v7377_v4 = vshll.u32 %v17044_v48, 16  ;;  %v18265_v26 = vshrl.u32 %v17046_v13, 16  ;;  %v7384_v5 = vshll.u32 %v17046_v13, 16 }
 0xb85   :  { %7357 = vst [vmem:[#allocation3 + $0xd0] sm:$0xff] %v17056_v10  ;;  %7358 = vst [vmem:[#allocation3 + $0xd8] sm:$0xff] %v17058_v60  ;;  %v7369_v37 = vrot.slane %v7367_v6, 7  ;;  %v18262_v39 = vshrl.u32 %v17048_v59, 16  ;;  %v7391_v25 = vshll.u32 %v17048_v59, 16  ;;  %v18261_v41 = vshrl.u32 %v17050_v49, 16 }
 0xb86   :  { %7359 = vst [vmem:[#allocation3 + $0xe0] sm:$0xff] %v17060_v12  ;;  %7360 = vst [vmem:[#allocation3 + $0xe8] sm:$0xff] %v17063_v0  ;;  %v7376_v47 = vrot.slane %v7374_v14, 7  ;;  %v7383_v43 = vrot.slane %v18265_v26, 7  ;;  %v7398_v2 = vshll.u32 %v17050_v49, 16  ;;  %v18260_v45 = vshrl.u32 %v17052_v23, 16 }
 0xb87   :  { %7361 = vst [vmem:[#allocation3 + $0xf0] sm:$0xff] %v17065_v18  ;;  %7362 = vst [vmem:[#allocation3 + $0xf8] sm:$0xff] %v17067_v21  ;;  %v7372_v56 = vor.u32 %v7370_v51, %v7369_v37  ;;  %v7390_v33 = vrot.slane %v18262_v39, 7  ;;  %v7397_v35 = vrot.slane %v18261_v41, 7  ;;  %v7405_v55 = vshll.u32 %v17052_v23, 16  ;;  %v7512_v26 = vld [vmem:[#allocation3 + $0x38] sm:$0xff] }
 0xb88   :  { %7363 = vst [vmem:[#allocation3 + $0x100] sm:$0xff] %v17069_v42  ;;  %7364 = vst [vmem:[#allocation3 + $0x108] sm:$0xff] %v17075_v30  ;;  %v7379_v54 = vor.u32 %v7377_v4, %v7376_v47  ;;  %v7386_v52 = vor.u32 %v7384_v5, %v7383_v43  ;;  %v7404_v46 = vrot.slane %v18260_v45, 7  ;;  %v18258_v63 = vshrl.u32 %v17054_v61, 16 }
 0xb89   :  { %7365 = vst [vmem:[#allocation3 + $0x110] sm:$0xff] %v17077_v50  ;;  %v7393_v40 = vor.u32 %v7391_v25, %v7390_v33  ;;  %v17124_v29 = vor.u32 %v7398_v2, %v7397_v35  ;;  %v7412_v28 = vshll.u32 %v17054_v61, 16  ;;  %v18256_v7 = vshrl.u32 %v17056_v10, 16 }
 0xb8a   :  { %v7407_v1 = vor.u32 %v7405_v55, %v7404_v46  ;;  %v7411_v38 = vrot.slane %v18258_v63, 7  ;;  %v18266_v32 = vshll.u32 %v17056_v10, 16  ;;  %v18252_v17 = vshrl.u32 %v17058_v60, 16  ;;  %v7506_v63 = vld [vmem:[#allocation3 + $0x28] sm:$0xff] }
 0xb8b   :  { %v7418_v15 = vrot.slane %v18256_v7, 7  ;;  %v18255_v9 = vshll.u32 %v17058_v60, 16  ;;  %v18251_v3 = vshrl.u32 %v17060_v12, 16  ;;  %v18253_v44 = vshll.u32 %v17060_v12, 16 }
 0xb8c   :  { %v7414_v19 = vor.u32 %v7412_v28, %v7411_v38  ;;  %v7425_v8 = vrot.slane %v18252_v17, 7  ;;  %v18250_v36 = vshrl.u32 %v17063_v0, 16  ;;  %v18257_v57 = vshll.u32 %v17063_v0, 16  ;;  %v7497_v38 = vld [vmem:[#allocation3 + $0x10] sm:$0xff]  ;;  %v7494_v17 = vld [vmem:[#allocation3 + $0x8] sm:$0xff] }
 0xb8d   :  { %v7421_v53 = vor.u32 %v18266_v32, %v7418_v15  ;;  %v7432_v11 = vrot.slane %v18251_v3, 7  ;;  %v18254_v58 = vshrl.u32 %v17065_v18, 16  ;;  %v18264_v31 = vshll.u32 %v17065_v18, 16  ;;  %v7521_v32 = vld [vmem:[#allocation3 + $0x50] sm:$0xff] }
 0xb8e   :  { %v7428_v16 = vor.u32 %v18255_v9, %v7425_v8  ;;  %v7439_v27 = vrot.slane %v18250_v36, 7  ;;  %v18259_v37 = vshrl.u32 %v17067_v21, 16  ;;  %v7454_v47 = vshll.u32 %v17067_v21, 16 }
 0xb8f   :  { %v7435_v43 = vor.u32 %v18253_v44, %v7432_v11  ;;  %v7446_v33 = vrot.slane %v18254_v58, 7  ;;  %v18263_v35 = vshrl.u32 %v17069_v42, 16  ;;  %v7461_v46 = vshll.u32 %v17069_v42, 16  ;;  %v7503_v11 = vld [vmem:[#allocation3 + $0x20] sm:$0xff]  ;;  %v7500_v44 = vld [vmem:[#allocation3 + $0x18] sm:$0xff] }
 0xb90   :  { %v7442_v15 = vor.u32 %v18257_v57, %v7439_v27  ;;  %v7453_v8 = vrot.slane %v18259_v37, 7  ;;  %v18267_v36 = vshrl.u32 %v17075_v30, 16  ;;  %v18269_v3 = vshll.u32 %v17075_v30, 16  ;;  %v7509_v57 = vld [vmem:[#allocation3 + $0x30] sm:$0xff] }
 0xb91   :  { %v7449_v58 = vor.u32 %v18264_v31, %v7446_v33  ;;  %v7460_v9 = vrot.slane %v18263_v35, 7  ;;  %v18268_v7 = vshrl.u32 %v17077_v50, 16  ;;  %v7475_v27 = vshll.u32 %v17077_v50, 16  ;;  %v13524_v35 = vld [vmem:[%s18123_s2 + $0x48] sm:$0xff]   ;;  %v7515_v31 = vld [vmem:[#allocation3 + $0x40] sm:$0xff] }
 0xb92   :  { %v7456_v37 = vor.u32 %v7454_v47, %v7453_v8  ;;  %v7467_v45 = vrot.slane %v18267_v36, 7  ;;  %v17181_v39 = vsel %vm15445_vm11, %v7372_v56, %v7494_v17  ;;  %v17185_v33 = vsel %vm15445_vm11, %v7379_v54, %v7497_v38  ;;  %v7518_v17 = vld [vmem:[#allocation3 + $0x48] sm:$0xff]  ;;  %v7527_v38 = vld [vmem:[#allocation3 + $0x60] sm:$0xff] }
 0xb93   :  { %v7463_v8 = vor.u32 %v7461_v46, %v7460_v9  ;;  %v7474_v36 = vrot.slane %v18268_v7, 7  ;;  %7496 = vst [vmem:[#allocation3 + $0x8] sm:$0xff] %v17181_v39  ;;  %7499 = vst [vmem:[#allocation3 + $0x10] sm:$0xff] %v17185_v33  ;;  %v17198_v56 = vsel %vm15445_vm11, %v7386_v52, %v7500_v44  ;;  %v17202_v54 = vsel %vm15445_vm11, %v7393_v40, %v7503_v11  ;;  %v7524_v9 = vld [vmem:[#allocation3 + $0x58] sm:$0xff]  ;;  %v7530_v11 = vld [vmem:[#allocation3 + $0x68] sm:$0xff] }
 0xb94   :  { %12474 = vmatmul.mubr.bf16.vlgmr.msra.gmra.mrb[32].mxu0 %v17181_v39  ;;  %v7470_v7 = vor.u32 %v18269_v3, %v7467_v45  ;;  %7502 = vst [vmem:[#allocation3 + $0x18] sm:$0xff] %v17198_v56  ;;  %7505 = vst [vmem:[#allocation3 + $0x20] sm:$0xff] %v17202_v54  ;;  %v17212_v52 = vsel %vm15445_vm11, %v17124_v29, %v7506_v63  ;;  %v17216_v40 = vsel %vm15445_vm11, %v7407_v1, %v7509_v57  ;;  %v7533_v45 = vld [vmem:[#allocation3 + $0x70] sm:$0xff]  ;;  %v13525_v29 = vld [vmem:[%s18123_s2 + $0x50] sm:$0xff]  }
 0xb95   :  { %v17220_v44 = vsel %vm15445_vm11, %v7414_v19, %v7512_v26  ;;  %12506 = vmatpush3.bf16.msra.mxu0 %v16973_v20  ;;  %v7477_v3 = vor.u32 %v7475_v27, %v7474_v36  ;;  %7508 = vst [vmem:[#allocation3 + $0x28] sm:$0xff] %v17212_v52  ;;  %7511 = vst [vmem:[#allocation3 + $0x30] sm:$0xff] %v17216_v40  ;;  %v17230_v63 = vsel %vm15445_vm11, %v7421_v53, %v7515_v31  ;;  %v7539_v1 = vld [vmem:[#allocation3 + $0x80] sm:$0xff]  ;;  %v7536_v19 = vld [vmem:[#allocation3 + $0x78] sm:$0xff] }
 0xb96   :  { %7514 = vst [vmem:[#allocation3 + $0x38] sm:$0xff] %v17220_v44  ;;  %v17234_v26 = vsel %vm15445_vm11, %v7428_v16, %v7518_v17  ;;  %v17238_v20 = vsel %vm15445_vm11, %v7435_v43, %v7521_v32  ;;  %12477 = vmatprep.mubr.bf16.mxu0 %v17185_v33  ;;  %7517 = vst [vmem:[#allocation3 + $0x40] sm:$0xff] %v17230_v63  ;;  %v17249_v36 = vsel %vm15445_vm11, %v7442_v15, %v7524_v9 }
 0xb97   :  { %7520 = vst [vmem:[#allocation3 + $0x48] sm:$0xff] %v17234_v26  ;;  %7523 = vst [vmem:[#allocation3 + $0x50] sm:$0xff] %v17238_v20  ;;  %v17253_v32 = vsel %vm15445_vm11, %v7449_v58, %v7527_v38  ;;  %v17257_v57 = vsel %vm15445_vm11, %v7456_v37, %v7530_v11  ;;  %v17261_v53 = vsel %vm15445_vm11, %v7463_v8, %v7533_v45  ;;  %12507 = vmatprep.subr.bf16.mxu0 %v13524_v35 }
 0xb98   :  { %7526 = vst [vmem:[#allocation3 + $0x58] sm:$0xff] %v17249_v36  ;;  %7529 = vst [vmem:[#allocation3 + $0x60] sm:$0xff] %v17253_v32  ;;  %v17269_v58 = vsel %vm15445_vm11, %v7470_v7, %v7536_v19  ;;  %v17273_v31 = vsel %vm15445_vm11, %v7477_v3, %v7539_v1  ;;  %v7542_v16 = vrot.slane %v7370_v51, 1  ;;  %v7544_v37 = vrot.slane %v7377_v4, 1 }
 0xb99   :  { %7532 = vst [vmem:[#allocation3 + $0x68] sm:$0xff] %v17257_v57  ;;  %7535 = vst [vmem:[#allocation3 + $0x70] sm:$0xff] %v17261_v53  ;;  %v7546_v43 = vrot.slane %v7384_v5, 1  ;;  %v7548_v7 = vrot.slane %v7391_v25, 1  ;;  %v7550_v41 = vrot.slane %v7398_v2, 1  ;;  %v7552_v3 = vrot.slane %v7405_v55, 1  ;;  %12508 = vmatpush3.bf16.msra.mxu0 %v13524_v35 }
 0xb9a   :  { %18431 = vst [vmem:[#allocation11_spill] sm:$0xff] %v17273_v31  ;;  %7538 = vst [vmem:[#allocation3 + $0x78] sm:$0xff] %v17269_v58  ;;  %v7543_v51 = vor.u32 %v7542_v16, %v7367_v6  ;;  %v7545_v4 = vor.u32 %v7544_v37, %v7374_v14  ;;  %v7554_v15 = vrot.slane %v7412_v28, 1  ;;  %v18432_v5 = vshll.u32 %v17056_v10, 16  ;;  %12509 = vmatprep.subr.bf16.mxu0 %v13525_v29  ;;  %v13526_v25 = vld [vmem:[%s18123_s2 + $0x58] sm:$0xff]  }
 0xb9b   :  { %7541 = vst [vmem:[#allocation3 + $0x80] sm:$0xff] %v17273_v31  ;;  %v18433_v2 = vshrl.u32 %v17046_v13, 16  ;;  %v18434_v35 = vshrl.u32 %v17048_v59, 16  ;;  %v18435_v17 = vshrl.u32 %v17050_v49, 16  ;;  %v18436_v38 = vshrl.u32 %v17052_v23, 16 }
 0xb9c   :  { %v7556_v8 = vrot.slane %v18432_v5, 1  ;;  %v18437_v9 = vshrl.u32 %v17054_v61, 16  ;;  %v18438_v11 = vshrl.u32 %v17056_v10, 16  ;;  %v18439_v19 = vshll.u32 %v17058_v60, 16  ;;  %12478 = vmatmul.mubr.bf16.gmra.mrb[36].mxu0 %v17198_v56 }
 0xb9d   :  { %v7547_v55 = vor.u32 %v7546_v43, %v18433_v2  ;;  %v7549_v6 = vor.u32 %v7548_v7, %v18434_v35  ;;  %v7551_v14 = vor.u32 %v7550_v41, %v18435_v17  ;;  %v7553_v28 = vor.u32 %v7552_v3, %v18436_v38  ;;  %12481 = vmatprep.mubr.bf16.mxu0 %v17202_v54 }
 0xb9e   :  { %v7555_v45 = vor.u32 %v7554_v15, %v18437_v9  ;;  %v7557_v1 = vor.u32 %v7556_v8, %v18438_v11  ;;  %v7558_v16 = vrot.slane %v18439_v19, 1  ;;  %v18440_v37 = vshll.u32 %v17060_v12, 16  ;;  %12510 = vmatpush3.bf16.msra.mxu0 %v13525_v29 }
 0xb9f   :  { %v18441_v7 = vshll.u32 %v17063_v0, 16  ;;  %v18442_v5 = vshll.u32 %v17065_v18, 16  ;;  %v7566_v15 = vrot.slane %v7454_v47, 1  ;;  %v7568_v8 = vrot.slane %v7461_v46, 1  ;;  %12511 = vmatprep.subr.bf16.mxu0 %v13526_v25  ;;  %v13527_v47 = vld [vmem:[%s18123_s2 + $0x60] sm:$0xff]   ;;  %v7590_v46 = vld [vmem:[#allocation3 + $0x128] sm:$0xff] }
 0xba0   :  { %v7560_v43 = vrot.slane %v18440_v37, 1  ;;  %v18443_v2 = vshrl.u32 %v17058_v60, 16  ;;  %v18444_v17 = vshrl.u32 %v17060_v12, 16  ;;  %v18445_v9 = vshll.u32 %v17075_v30, 16 }
 0xba1   :  { %v7562_v41 = vrot.slane %v18441_v7, 1  ;;  %v7564_v3 = vrot.slane %v18442_v5, 1  ;;  %v7572_v19 = vrot.slane %v7475_v27, 1  ;;  %v18446_v29 = vshrl.u32 %v17063_v0, 16 }
 0xba2   :  { %v7559_v35 = vor.u32 %v7558_v16, %v18443_v2  ;;  %v7561_v38 = vor.u32 %v7560_v43, %v18444_v17  ;;  %v7570_v11 = vrot.slane %v18445_v9, 1  ;;  %v18447_v16 = vshrl.u32 %v17065_v18, 16  ;;  %12512 = vmatpush3.bf16.msra.mxu0 %v13526_v25 }
 0xba3   :  { %v7563_v37 = vor.u32 %v7562_v41, %v18446_v29  ;;  %v18448_v43 = vshrl.u32 %v17067_v21, 16  ;;  %v18449_v2 = vshrl.u32 %v17069_v42, 16  ;;  %v18450_v27 = vshrl.u32 %v17075_v30, 16  ;;  %v13600_v41 = vld [vmem:[#allocation3 + $0x130] sm:$0xff]  ;;  %12513 = vmatprep.subr.bf16.mxu0 %v13527_v47 }
 0xba4   :  { %v7565_v7 = vor.u32 %v7564_v3, %v18447_v16  ;;  %v18451_v62 = vshrl.u32 %v17077_v50, 16  ;;  %v17351_v31 = vsel %vm15619_vm9, %v7543_v51, %v7590_v46  ;;  %v17355_v3 = vsel %vm15619_vm9, %v7545_v4, %v13600_v41  ;;  %v13602_v50 = vld [vmem:[#allocation3 + $0x140] sm:$0xff]  ;;  %v13603_v51 = vld [vmem:[#allocation3 + $0x148] sm:$0xff]  ;;  %v13604_v4 = vld [vmem:[#allocation3 + $0x150] sm:$0xff]  ;;  %12482 = vmatmul.mubr.bf16.gmra.mrb[40].mxu0 %v17212_v52 }
 0xba5   :  { %v7567_v5 = vor.u32 %v7566_v15, %v18448_v43  ;;  %v7569_v17 = vor.u32 %v7568_v8, %v18449_v2  ;;  %v7571_v9 = vor.u32 %v7570_v11, %v18450_v27  ;;  %7592 = vst [vmem:[#allocation3 + $0x128] sm:$0xff] %v17351_v31  ;;  %7595 = vst [vmem:[#allocation3 + $0x130] sm:$0xff] %v17355_v3  ;;  %v13601_v15 = vld [vmem:[#allocation3 + $0x138] sm:$0xff]  ;;  %v13608_v29 = vld [vmem:[#allocation3 + $0x170] sm:$0xff]  ;;  %12485 = vmatprep.mubr.bf16.mxu0 %v17216_v40 }
 0xba6   :  { %v7573_v24 = vor.u32 %v7572_v19, %v18451_v62  ;;  %v17361_v8 = vsel %vm15619_vm9, %v7547_v55, %v13601_v15  ;;  %v17365_v62 = vsel %vm15619_vm9, %v7549_v6, %v13602_v50  ;;  %v17369_v11 = vsel %vm15619_vm9, %v7551_v14, %v13603_v51  ;;  %v13605_v55 = vld [vmem:[#allocation3 + $0x158] sm:$0xff]  ;;  %v13606_v14 = vld [vmem:[#allocation3 + $0x160] sm:$0xff]  ;;  %v13611_v2 = vld [vmem:[#allocation3 + $0x188] sm:$0xff]  ;;  %12514 = vmatpush3.bf16.msra.mxu0 %v13527_v47 }
 0xba7   :  { %v17373_v19 = vsel %vm15619_vm9, %v7553_v28, %v13604_v4  ;;  %7598 = vst [vmem:[#allocation3 + $0x138] sm:$0xff] %v17361_v8  ;;  %7601 = vst [vmem:[#allocation3 + $0x140] sm:$0xff] %v17365_v62  ;;  %v17381_v6 = vsel %vm15619_vm9, %v7555_v45, %v13605_v55  ;;  %v17385_v46 = vsel %vm15619_vm9, %v7557_v1, %v13606_v14  ;;  %v13607_v28 = vld [vmem:[#allocation3 + $0x168] sm:$0xff]  ;;  %v13528_v45 = vld [vmem:[%s18123_s2 + $0x68] sm:$0xff]  }
 0xba8   :  { %7604 = vst [vmem:[#allocation3 + $0x148] sm:$0xff] %v17369_v11  ;;  %7607 = vst [vmem:[#allocation3 + $0x150] sm:$0xff] %v17373_v19  ;;  %v17389_v25 = vsel %vm15619_vm9, %v7559_v35, %v13607_v28  ;;  %v17393_v16 = vsel %vm15619_vm9, %v7561_v38, %v13608_v29  ;;  %v13609_v1 = vld [vmem:[#allocation3 + $0x178] sm:$0xff]  ;;  %v13610_v38 = vld [vmem:[#allocation3 + $0x180] sm:$0xff]  ;;  %v17412_v27 = vsel %vm15619_vm9, %v7567_v5, %v13611_v2  ;;  %12515 = vmatprep.subr.bf16.mxu0 %v13528_v45 }
 0xba9   :  { %7610 = vst [vmem:[#allocation3 + $0x158] sm:$0xff] %v17381_v6  ;;  %7613 = vst [vmem:[#allocation3 + $0x160] sm:$0xff] %v17385_v46  ;;  %v17404_v35 = vsel %vm15619_vm9, %v7563_v37, %v13609_v1  ;;  %v17408_v43 = vsel %vm15619_vm9, %v7565_v7, %v13610_v38  ;;  %v13612_v41 = vld [vmem:[#allocation3 + $0x190] sm:$0xff]  ;;  %v13613_v37 = vld [vmem:[#allocation3 + $0x198] sm:$0xff] }
 0xbaa   :  { %7616 = vst [vmem:[#allocation3 + $0x168] sm:$0xff] %v17389_v25  ;;  %7619 = vst [vmem:[#allocation3 + $0x170] sm:$0xff] %v17393_v16  ;;  %v17416_v15 = vsel %vm15619_vm9, %v7569_v17, %v13612_v41  ;;  %v17424_v7 = vsel %vm15619_vm9, %v7571_v9, %v13613_v37  ;;  %v13614_v5 = vld [vmem:[#allocation3 + $0x1a0] sm:$0xff]  ;;  %12516 = vmatpush3.bf16.msra.mxu0 %v13528_v45  ;;  %v17452_v47 = vld [vmem:[#allocation3 + $0x90] sm:$0xff] }
 0xbab   :  { %7622 = vst [vmem:[#allocation3 + $0x178] sm:$0xff] %v17404_v35  ;;  %7625 = vst [vmem:[#allocation3 + $0x180] sm:$0xff] %v17408_v43  ;;  %v17428_v50 = vsel %vm15619_vm9, %v7573_v24, %v13614_v5  ;;  %v13529_v17 = vld [vmem:[%s18123_s2 + $0x70] sm:$0xff]   ;;  %v13531_v24 = vld [vmem:[%s18123_s2 + $0x80] sm:$0xff]  }
 0xbac   :  { %7628 = vst [vmem:[#allocation3 + $0x188] sm:$0xff] %v17412_v27  ;;  %7631 = vst [vmem:[#allocation3 + $0x190] sm:$0xff] %v17416_v15  ;;  %12517 = vmatprep.subr.bf16.mxu0 %v13529_v17  ;;  %12486 = vmatmul.mubr.bf16.gmra.mrb[44].mxu0 %v17220_v44  ;;  %v13532_v9 = vld [vmem:[%s18123_s2 + $0x88] sm:$0xff]   ;;  %v13533_v51 = vld [vmem:[%s18123_s2 + $0x90] sm:$0xff]  }
 0xbad   :  { %7634 = vst [vmem:[#allocation3 + $0x198] sm:$0xff] %v17424_v7  ;;  %7637 = vst [vmem:[#allocation3 + $0x1a0] sm:$0xff] %v17428_v50  ;;  %12489 = vmatprep.mubr.bf16.mxu0 %v17230_v63  ;;  %v13534_v4 = vld [vmem:[%s18123_s2 + $0x98] sm:$0xff]   ;;  %v13535_v55 = vld [vmem:[%s18123_s2 + $0xa0] sm:$0xff]  }
 0xbae   :  { %12518 = vmatpush3.bf16.msra.mxu0 %v13529_v17  ;;  %v13536_v14 = vld [vmem:[%s18123_s2 + $0xa8] sm:$0xff]   ;;  %v13537_v28 = vld [vmem:[%s18123_s2 + $0xb0] sm:$0xff]   ;;  %v13538_v29 = vld [vmem:[%s18123_s2 + $0xb8] sm:$0xff]  }
 0xbaf   :  { %12519 = vmatprep.subr.bf16.mxu0 %v13530_v22  ;;  %v13539_v45 = vld [vmem:[%s18123_s2 + $0xc0] sm:$0xff]   ;;  %v8248_v1 = vld [vmem:[#allocation3 + $0x120] sm:$0xff]  ;;  %v13540_v38 = vld [vmem:[%s18123_s2 + $0xc8] sm:$0xff]  }
 0xbb0   :  { %v13546_v2 = vld [vmem:[%s18123_s2 + $0xf8] sm:$0xff]   ;;  %v13547_v41 = vld [vmem:[%s18123_s2 + $0x100] sm:$0xff]   ;;  %v13548_v37 = vld [vmem:[%s18123_s2 + $0x108] sm:$0xff]  }
 0xbb1   :  { %v13549_v5 = vld [vmem:[%s18123_s2 + $0x110] sm:$0xff]  }
 0xbb2   :  { %12520 = vmatpush3.bf16.msra.mxu0 %v13530_v22  ;;  %v13577_v17 = vld [vmem:[%s18123_s2 + $0x1f0] sm:$0xff]   ;;  %v13578_v22 = vld [vmem:[%s18123_s2 + $0x1f8] sm:$0xff]  }
 0xbb3   :  { %12553 = vmatprep.subr.bf16.mxu0 %v13531_v24 }
 0xbb4   :  { %12490 = vmatmul.mubr.bf16.gmra.mrb[48].mxu0 %v17234_v26 }
 0xbb5   :  { %12493 = vmatprep.mubr.bf16.mxu0 %v17238_v20 }
 0xbbc   :  { %12494 = vmatmul.mubr.bf16.gmra.mrb[52].mxu0 %v17249_v36 }
 0xbbd   :  { %12497 = vmatprep.mubr.bf16.mxu0 %v17253_v32 }
 0xbc4   :  { %12498 = vmatmul.mubr.bf16.gmra.mrb[56].mxu0 %v17257_v57 }
 0xbc5   :  { %12501 = vmatprep.mubr.bf16.mxu0 %v17261_v53 }
 0xbcc   :  { %12502 = vmatmul.mubr.bf16.gmra.mrb[60].mxu0 %v17269_v58 }
 0xbcd   :  { %12521 = vmatprep.mubr.bf16.mxu0 %v17452_v47 }
 0xbd4   :  { %12522 = vmatmul.mubr.bf16.vlgmr.msra.gmra.mrb[32].mxu0 %v17042_v34 }
 0xbd5   :  { %12554 = vmatpush3.bf16.msra.mxu0 %v13531_v24  ;;  %12525 = vmatprep.mubr.bf16.mxu0 %v17044_v48  ;;  %v9603_v24 = vld [vmem:[#allocation3 + $0x48] sm:$0xff] }
 0xbd6   :  { %12555 = vmatprep.subr.bf16.mxu0 %v13532_v9 }
 0xbd9   :  { %12556 = vmatpush3.bf16.msra.mxu0 %v13532_v9  ;;  %v9604_v9 = vld [vmem:[#allocation3 + $0x50] sm:$0xff] }
 0xbda   :  { %12557 = vmatprep.subr.bf16.mxu0 %v13533_v51 }
 0xbdc   :  { %12526 = vmatmul.mubr.bf16.gmra.mrb[36].mxu0 %v17046_v13 }
 0xbdd   :  { %12529 = vmatprep.mubr.bf16.mxu0 %v17048_v59  ;;  %12558 = vmatpush3.bf16.msra.mxu0 %v13533_v51  ;;  %v13579_v51 = vld [vmem:[%s18123_s2 + $0x200] sm:$0xff]  }
 0xbde   :  { %12559 = vmatprep.subr.bf16.mxu0 %v13534_v4 }
 0xbe1   :  { %12560 = vmatpush3.bf16.msra.mxu0 %v13534_v4  ;;  %v9605_v4 = vld [vmem:[#allocation3 + $0x58] sm:$0xff] }
 0xbe2   :  { %12561 = vmatprep.subr.bf16.mxu0 %v13535_v55 }
 0xbe4   :  { %12530 = vmatmul.mubr.bf16.gmra.mrb[40].mxu0 %v17050_v49 }
 0xbe5   :  { %12533 = vmatprep.mubr.bf16.mxu0 %v17052_v23  ;;  %12562 = vmatpush3.bf16.msra.mxu0 %v13535_v55  ;;  %v9606_v55 = vld [vmem:[#allocation3 + $0x60] sm:$0xff] }
 0xbe6   :  { %12563 = vmatprep.subr.bf16.mxu0 %v13536_v14 }
 0xbe9   :  { %12564 = vmatpush3.bf16.msra.mxu0 %v13536_v14  ;;  %v9607_v14 = vld [vmem:[#allocation3 + $0x68] sm:$0xff] }
 0xbea   :  { %12565 = vmatprep.subr.bf16.mxu0 %v13537_v28 }
 0xbec   :  { %12534 = vmatmul.mubr.bf16.gmra.mrb[44].mxu0 %v17054_v61 }
 0xbed   :  { %12537 = vmatprep.mubr.bf16.mxu0 %v17056_v10  ;;  %12566 = vmatpush3.bf16.msra.mxu0 %v13537_v28  ;;  %v9608_v28 = vld [vmem:[#allocation3 + $0x70] sm:$0xff] }
 0xbee   :  { %12567 = vmatprep.subr.bf16.mxu0 %v13538_v29 }
 0xbf1   :  { %12568 = vmatpush3.bf16.msra.mxu0 %v13538_v29  ;;  %v9609_v29 = vld [vmem:[#allocation3 + $0x78] sm:$0xff] }
 0xbf2   :  { %12601 = vmatprep.subr.bf16.mxu0 %v13539_v45 }
 0xbf4   :  { %12538 = vmatmul.mubr.bf16.gmra.mrb[48].mxu0 %v17058_v60 }
 0xbf5   :  { %12541 = vmatprep.mubr.bf16.mxu0 %v17060_v12 }
 0xbfc   :  { %12542 = vmatmul.mubr.bf16.gmra.mrb[52].mxu0 %v17063_v0  ;;  %v13541_v0 = vld [vmem:[%s18123_s2 + $0xd0] sm:$0xff]  }
 0xbfd   :  { %12545 = vmatprep.mubr.bf16.mxu0 %v17065_v18  ;;  %v13542_v18 = vld [vmem:[%s18123_s2 + $0xd8] sm:$0xff]  }
 0xc04   :  { %12546 = vmatmul.mubr.bf16.gmra.mrb[56].mxu0 %v17067_v21  ;;  %v13543_v21 = vld [vmem:[%s18123_s2 + $0xe0] sm:$0xff]  }
 0xc05   :  { %12549 = vmatprep.mubr.bf16.mxu0 %v17069_v42  ;;  %v13544_v42 = vld [vmem:[%s18123_s2 + $0xe8] sm:$0xff]  }
 0xc0c   :  { %12550 = vmatmul.mubr.bf16.gmra.mrb[60].mxu0 %v17075_v30  ;;  %v13545_v30 = vld [vmem:[%s18123_s2 + $0xf0] sm:$0xff]  }
 0xc0d   :  { %12569 = vmatprep.mubr.bf16.mxu0 %v8248_v1  ;;  %v9611_v1 = vld [vmem:[#allocation3 + $0x88] sm:$0xff] }
 0xc14   :  { %12570 = vmatmul.mubr.bf16.vlgmr.msra.gmra.mrb[32].mxu0 %v17351_v31 }
 0xc15   :  { %12602 = vmatpush3.bf16.msra.mxu0 %v13539_v45  ;;  %12573 = vmatprep.mubr.bf16.mxu0 %v17355_v3  ;;  %v9610_v45 = vld [vmem:[#allocation3 + $0x80] sm:$0xff] }
 0xc16   :  { %12603 = vmatprep.subr.bf16.mxu0 %v13540_v38 }
 0xc19   :  { %12604 = vmatpush3.bf16.msra.mxu0 %v13540_v38  ;;  %v9933_v38 = vld [vmem:[#allocation3 + $0xa0] sm:$0xff] }
 0xc1a   :  { %12605 = vmatprep.subr.bf16.mxu0 %v13541_v0 }
 0xc1c   :  { %12574 = vmatmul.mubr.bf16.gmra.mrb[36].mxu0 %v17361_v8 }
 0xc1d   :  { %12577 = vmatprep.mubr.bf16.mxu0 %v17365_v62  ;;  %12606 = vmatpush3.bf16.msra.mxu0 %v13541_v0  ;;  %v13580_v0 = vld [vmem:[%s18123_s2 + $0x208] sm:$0xff]  }
 0xc1e   :  { %12607 = vmatprep.subr.bf16.mxu0 %v13542_v18 }
 0xc21   :  { %12608 = vmatpush3.bf16.msra.mxu0 %v13542_v18  ;;  %v9934_v18 = vld [vmem:[#allocation3 + $0xa8] sm:$0xff] }
 0xc22   :  { %12609 = vmatprep.subr.bf16.mxu0 %v13543_v21 }
 0xc24   :  { %12578 = vmatmul.mubr.bf16.gmra.mrb[40].mxu0 %v17369_v11 }
 0xc25   :  { %12581 = vmatprep.mubr.bf16.mxu0 %v17373_v19  ;;  %12610 = vmatpush3.bf16.msra.mxu0 %v13543_v21  ;;  %v9935_v21 = vld [vmem:[#allocation3 + $0xb0] sm:$0xff] }
 0xc26   :  { %12611 = vmatprep.subr.bf16.mxu0 %v13544_v42 }
 0xc29   :  { %12612 = vmatpush3.bf16.msra.mxu0 %v13544_v42  ;;  %v13581_v42 = vld [vmem:[%s18123_s2 + $0x210] sm:$0xff]  }
 0xc2a   :  { %12613 = vmatprep.subr.bf16.mxu0 %v13545_v30 }
 0xc2c   :  { %12582 = vmatmul.mubr.bf16.gmra.mrb[44].mxu0 %v17381_v6 }
 0xc2d   :  { %12585 = vmatprep.mubr.bf16.mxu0 %v17385_v46  ;;  %12614 = vmatpush3.bf16.msra.mxu0 %v13545_v30  ;;  %v13582_v30 = vld [vmem:[%s18123_s2 + $0x218] sm:$0xff]  }
 0xc2e   :  { %12615 = vmatprep.subr.bf16.mxu0 %v13546_v2 }
 0xc31   :  { %12616 = vmatpush3.bf16.msra.mxu0 %v13546_v2  ;;  %v9936_v2 = vld [vmem:[#allocation3 + $0xb8] sm:$0xff] }
 0xc32   :  { %12649 = vmatprep.subr.bf16.mxu0 %v13547_v41 }
 0xc34   :  { %12586 = vmatmul.mubr.bf16.gmra.mrb[48].mxu0 %v17389_v25 }
 0xc35   :  { %12589 = vmatprep.mubr.bf16.mxu0 %v17393_v16 }
 0xc3c   :  { %12590 = vmatmul.mubr.bf16.gmra.mrb[52].mxu0 %v17404_v35 }
 0xc3d   :  { %12593 = vmatprep.mubr.bf16.mxu0 %v17408_v43 }
 0xc44   :  { %12594 = vmatmul.mubr.bf16.gmra.mrb[56].mxu0 %v17412_v27 }
 0xc45   :  { %12597 = vmatprep.mubr.bf16.mxu0 %v17416_v15 }
 0xc4c   :  { %12598 = vmatmul.mubr.bf16.gmra.mrb[60].mxu0 %v17424_v7 }
 0xc4d   :  { %12617 = vmatprep.mubr.bf16.mxu0 %v17181_v39  ;;  %v13550_v39 = vld [vmem:[%s18123_s2 + $0x118] sm:$0xff]  }
 0xc54   :  { %12618 = vmatmul.mubr.bf16.vlgmr.msra.gmra.mrb[32].mxu0 %v17185_v33  ;;  %v13551_v33 = vld [vmem:[%s18123_s2 + $0x120] sm:$0xff]  }
 0xc55   :  { %12650 = vmatpush3.bf16.msra.mxu0 %v13547_v41  ;;  %12621 = vmatprep.mubr.bf16.mxu0 %v17198_v56  ;;  %v13552_v56 = vld [vmem:[%s18123_s2 + $0x128] sm:$0xff]   ;;  %v9937_v41 = vld [vmem:[#allocation3 + $0xc0] sm:$0xff] }
 0xc56   :  { %12651 = vmatprep.subr.bf16.mxu0 %v13548_v37 }
 0xc59   :  { %12652 = vmatpush3.bf16.msra.mxu0 %v13548_v37  ;;  %v13583_v37 = vld [vmem:[%s18123_s2 + $0x220] sm:$0xff]  }
 0xc5a   :  { %12653 = vmatprep.subr.bf16.mxu0 %v13549_v5 }
 0xc5c   :  { %12622 = vmatmul.mubr.bf16.gmra.mrb[36].mxu0 %v17202_v54  ;;  %v13553_v54 = vld [vmem:[%s18123_s2 + $0x130] sm:$0xff]  }
 0xc5d   :  { %12625 = vmatprep.mubr.bf16.mxu0 %v17212_v52  ;;  %12654 = vmatpush3.bf16.msra.mxu0 %v13549_v5  ;;  %v13554_v52 = vld [vmem:[%s18123_s2 + $0x138] sm:$0xff]   ;;  %v13584_v5 = vld [vmem:[%s18123_s2 + $0x228] sm:$0xff]  }
 0xc5e   :  { %12655 = vmatprep.subr.bf16.mxu0 %v13550_v39 }
 0xc61   :  { %12656 = vmatpush3.bf16.msra.mxu0 %v13550_v39  ;;  %v9938_v39 = vld [vmem:[#allocation3 + $0xc8] sm:$0xff] }
 0xc62   :  { %12657 = vmatprep.subr.bf16.mxu0 %v13551_v33 }
 0xc64   :  { %12626 = vmatmul.mubr.bf16.gmra.mrb[40].mxu0 %v17216_v40  ;;  %v13555_v40 = vld [vmem:[%s18123_s2 + $0x140] sm:$0xff]  }
 0xc65   :  { %12629 = vmatprep.mubr.bf16.mxu0 %v17220_v44  ;;  %12658 = vmatpush3.bf16.msra.mxu0 %v13551_v33  ;;  %v18453_v44 = vld [vmem:[#allocation11_spill] sm:$0xff]  ;;  %v9939_v33 = vld [vmem:[#allocation3 + $0xd0] sm:$0xff] }
 0xc66   :  { %12659 = vmatprep.subr.bf16.mxu0 %v13552_v56 }
 0xc69   :  { %12660 = vmatpush3.bf16.msra.mxu0 %v13552_v56  ;;  %v13585_v56 = vld [vmem:[%s18123_s2 + $0x230] sm:$0xff]  }
 0xc6a   :  { %12661 = vmatprep.subr.bf16.mxu0 %v13553_v54 }
 0xc6c   :  { %12630 = vmatmul.mubr.bf16.gmra.mrb[44].mxu0 %v17230_v63  ;;  %v13556_v63 = vld [vmem:[%s18123_s2 + $0x148] sm:$0xff]  }
 0xc6d   :  { %12633 = vmatprep.mubr.bf16.mxu0 %v17234_v26  ;;  %12662 = vmatpush3.bf16.msra.mxu0 %v13553_v54  ;;  %v13557_v26 = vld [vmem:[%s18123_s2 + $0x150] sm:$0xff]   ;;  %v13586_v54 = vld [vmem:[%s18123_s2 + $0x238] sm:$0xff]  }
 0xc6e   :  { %12663 = vmatprep.subr.bf16.mxu0 %v13554_v52 }
 0xc71   :  { %12664 = vmatpush3.bf16.msra.mxu0 %v13554_v52  ;;  %v9940_v52 = vld [vmem:[#allocation3 + $0xd8] sm:$0xff] }
 0xc72   :  { %12697 = vmatprep.subr.bf16.mxu0 %v13555_v40 }
 0xc74   :  { %12634 = vmatmul.mubr.bf16.gmra.mrb[48].mxu0 %v17238_v20  ;;  %v17610_v20 = vld [vmem:[#allocation3 + $0xf0] sm:$0xff] }
 0xc75   :  { %12637 = vmatprep.mubr.bf16.mxu0 %v17249_v36  ;;  %v17619_v36 = vld [vmem:[#allocation3 + $0x108] sm:$0xff] }
 0xc7c   :  { %12638 = vmatmul.mubr.bf16.gmra.mrb[52].mxu0 %v17253_v32  ;;  %v13564_v32 = vld [vmem:[%s18123_s2 + $0x188] sm:$0xff]  }
 0xc7d   :  { %12641 = vmatprep.mubr.bf16.mxu0 %v17257_v57  ;;  %v13565_v57 = vld [vmem:[%s18123_s2 + $0x190] sm:$0xff]  }
 0xc84   :  { %12642 = vmatmul.mubr.bf16.gmra.mrb[56].mxu0 %v17261_v53  ;;  %v13566_v53 = vld [vmem:[%s18123_s2 + $0x198] sm:$0xff]  }
 0xc85   :  { %12645 = vmatprep.mubr.bf16.mxu0 %v17269_v58  ;;  %v13567_v58 = vld [vmem:[%s18123_s2 + $0x1a0] sm:$0xff]  }
 0xc8c   :  { %12646 = vmatmul.mubr.bf16.gmra.mrb[60].mxu0 %v18453_v44  ;;  %v10270_v44 = vld [vmem:[#allocation3 + $0x130] sm:$0xff] }
 0xc8d   :  { %12665 = vmatprep.mubr.bf16.mxu0 %v17042_v34  ;;  %v13558_v34 = vld [vmem:[%s18123_s2 + $0x158] sm:$0xff]  }
 0xc94   :  { %12666 = vmatmul.mubr.bf16.vlgmr.msra.gmra.mrb[32].mxu0 %v17044_v48  ;;  %v13559_v48 = vld [vmem:[%s18123_s2 + $0x160] sm:$0xff]  }
 0xc95   :  { %12698 = vmatpush3.bf16.msra.mxu0 %v13555_v40  ;;  %12669 = vmatprep.mubr.bf16.mxu0 %v17046_v13  ;;  %v13560_v13 = vld [vmem:[%s18123_s2 + $0x168] sm:$0xff]   ;;  %v9941_v40 = vld [vmem:[#allocation3 + $0xe0] sm:$0xff] }
 0xc96   :  { %12699 = vmatprep.subr.bf16.mxu0 %v13556_v63 }
 0xc99   :  { %12700 = vmatpush3.bf16.msra.mxu0 %v13556_v63  ;;  %v10271_v63 = vld [vmem:[#allocation3 + $0x138] sm:$0xff] }
 0xc9a   :  { %12701 = vmatprep.subr.bf16.mxu0 %v13557_v26 }
 0xc9c   :  { %12670 = vmatmul.mubr.bf16.gmra.mrb[36].mxu0 %v17048_v59  ;;  %v13561_v59 = vld [vmem:[%s18123_s2 + $0x170] sm:$0xff]  }
 0xc9d   :  { %12673 = vmatprep.mubr.bf16.mxu0 %v17050_v49  ;;  %12702 = vmatpush3.bf16.msra.mxu0 %v13557_v26  ;;  %v13562_v49 = vld [vmem:[%s18123_s2 + $0x178] sm:$0xff]   ;;  %v10272_v26 = vld [vmem:[#allocation3 + $0x140] sm:$0xff] }
 0xc9e   :  { %12703 = vmatprep.subr.bf16.mxu0 %v13558_v34 }
 0xca1   :  { %12704 = vmatpush3.bf16.msra.mxu0 %v13558_v34  ;;  %v10273_v34 = vld [vmem:[#allocation3 + $0x148] sm:$0xff] }
 0xca2   :  { %12705 = vmatprep.subr.bf16.mxu0 %v13559_v48 }
 0xca4   :  { %12674 = vmatmul.mubr.bf16.gmra.mrb[40].mxu0 %v17052_v23  ;;  %v13563_v23 = vld [vmem:[%s18123_s2 + $0x180] sm:$0xff]  }
 0xca5   :  { %12677 = vmatprep.mubr.bf16.mxu0 %v17054_v61  ;;  %12706 = vmatpush3.bf16.msra.mxu0 %v13559_v48  ;;  %v17607_v61 = vld [vmem:[#allocation3 + $0xe8] sm:$0xff]  ;;  %v10274_v48 = vld [vmem:[#allocation3 + $0x150] sm:$0xff] }
 0xca6   :  { %12707 = vmatprep.subr.bf16.mxu0 %v13560_v13 }
 0xca9   :  { %12708 = vmatpush3.bf16.msra.mxu0 %v13560_v13  ;;  %v10275_v13 = vld [vmem:[#allocation3 + $0x158] sm:$0xff] }
 0xcaa   :  { %12709 = vmatprep.subr.bf16.mxu0 %v13561_v59 }
 0xcac   :  { %12678 = vmatmul.mubr.bf16.gmra.mrb[44].mxu0 %v17056_v10  ;;  %v17613_v10 = vld [vmem:[#allocation3 + $0xf8] sm:$0xff] }
 0xcad   :  { %12681 = vmatprep.mubr.bf16.mxu0 %v17058_v60  ;;  %12710 = vmatpush3.bf16.msra.mxu0 %v13561_v59  ;;  %v17616_v60 = vld [vmem:[#allocation3 + $0x100] sm:$0xff] }
 0xcae   :  { %12711 = vmatprep.subr.bf16.mxu0 %v13562_v49  ;;  %v10276_v59 = vld [vmem:[#allocation3 + $0x160] sm:$0xff] }
 0xcb1   :  { %12712 = vmatpush3.bf16.msra.mxu0 %v13562_v49  ;;  %v10277_v49 = vld [vmem:[#allocation3 + $0x168] sm:$0xff] }
 0xcb2   :  { %12745 = vmatprep.subr.bf16.mxu0 %v13563_v23 }
 0xcb4   :  { %12682 = vmatmul.mubr.bf16.gmra.mrb[48].mxu0 %v17060_v12  ;;  %v17622_v12 = vld [vmem:[#allocation3 + $0x110] sm:$0xff] }
 0xcb5   :  { %12685 = vmatprep.mubr.bf16.mxu0 %v17607_v61 }
 0xcbc   :  { %12686 = vmatmul.mubr.bf16.gmra.mrb[52].mxu0 %v17610_v20 }
 0xcbd   :  { %12689 = vmatprep.mubr.bf16.mxu0 %v17613_v10 }
 0xcc4   :  { %12690 = vmatmul.mubr.bf16.gmra.mrb[56].mxu0 %v17616_v60 }
 0xcc5   :  { %12693 = vmatprep.mubr.bf16.mxu0 %v17619_v36 }
 0xccc   :  { %12694 = vmatmul.mubr.bf16.gmra.mrb[60].mxu0 %v17622_v12 }
 0xccd   :  { %12713 = vmatprep.mubr.bf16.mxu0 %v17351_v31  ;;  %v13568_v31 = vld [vmem:[%s18123_s2 + $0x1a8] sm:$0xff]  }
 0xcd4   :  { %12714 = vmatmul.mubr.bf16.vlgmr.msra.gmra.mrb[32].mxu0 %v17355_v3  ;;  %v13569_v3 = vld [vmem:[%s18123_s2 + $0x1b0] sm:$0xff]  }
 0xcd5   :  { %12746 = vmatpush3.bf16.msra.mxu0 %v13563_v23  ;;  %12717 = vmatprep.mubr.bf16.mxu0 %v17361_v8  ;;  %v13570_v8 = vld [vmem:[%s18123_s2 + $0x1b8] sm:$0xff]   ;;  %v10278_v23 = vld [vmem:[#allocation3 + $0x170] sm:$0xff] }
 0xcd6   :  { %12747 = vmatprep.subr.bf16.mxu0 %v13564_v32 }
 0xcd9   :  { %12748 = vmatpush3.bf16.msra.mxu0 %v13564_v32 }
 0xcda   :  { %12749 = vmatprep.subr.bf16.mxu0 %v13565_v57 }
 0xcdc   :  { %12718 = vmatmul.mubr.bf16.gmra.mrb[36].mxu0 %v17365_v62  ;;  %v13571_v62 = vld [vmem:[%s18123_s2 + $0x1c0] sm:$0xff]  }
 0xcdd   :  { %12721 = vmatprep.mubr.bf16.mxu0 %v17369_v11  ;;  %12750 = vmatpush3.bf16.msra.mxu0 %v13565_v57  ;;  %v9596_v11 = vld [vmem:[#allocation3 + $0x10] sm:$0xff] }
 0xcde   :  { %12751 = vmatprep.subr.bf16.mxu0 %v13566_v53 }
 0xce1   :  { %12752 = vmatpush3.bf16.msra.mxu0 %v13566_v53 }
 0xce2   :  { %12753 = vmatprep.subr.bf16.mxu0 %v13567_v58 }
 0xce4   :  { %12722 = vmatmul.mubr.bf16.gmra.mrb[40].mxu0 %v17373_v19  ;;  %v13572_v19 = vld [vmem:[%s18123_s2 + $0x1c8] sm:$0xff]  }
 0xce5   :  { %12725 = vmatprep.mubr.bf16.mxu0 %v17381_v6  ;;  %12754 = vmatpush3.bf16.msra.mxu0 %v13567_v58  ;;  %v9597_v6 = vld [vmem:[#allocation3 + $0x18] sm:$0xff] }
 0xce6   :  { %12755 = vmatprep.subr.bf16.mxu0 %v13568_v31 }
 0xce9   :  { %12756 = vmatpush3.bf16.msra.mxu0 %v13568_v31 }
 0xcea   :  { %12757 = vmatprep.subr.bf16.mxu0 %v13569_v3 }
 0xcec   :  { %12726 = vmatmul.mubr.bf16.gmra.mrb[44].mxu0 %v17385_v46  ;;  %v9598_v46 = vld [vmem:[#allocation3 + $0x20] sm:$0xff] }
 0xced   :  { %12729 = vmatprep.mubr.bf16.mxu0 %v17389_v25  ;;  %12758 = vmatpush3.bf16.msra.mxu0 %v13569_v3  ;;  %v13573_v25 = vld [vmem:[%s18123_s2 + $0x1d0] sm:$0xff]  }
 0xcee   :  { %12759 = vmatprep.subr.bf16.mxu0 %v13570_v8 }
 0xcf1   :  { %12760 = vmatpush3.bf16.msra.mxu0 %v13570_v8 }
 0xcf2   :  { %12793 = vmatprep.subr.bf16.mxu0 %v13571_v62 }
 0xcf4   :  { %12730 = vmatmul.mubr.bf16.gmra.mrb[48].mxu0 %v17393_v16  ;;  %v13574_v16 = vld [vmem:[%s18123_s2 + $0x1d8] sm:$0xff]  }
 0xcf5   :  { %12733 = vmatprep.mubr.bf16.mxu0 %v17404_v35  ;;  %v9599_v35 = vld [vmem:[#allocation3 + $0x28] sm:$0xff] }
 0xcfc   :  { %12734 = vmatmul.mubr.bf16.gmra.mrb[52].mxu0 %v17408_v43  ;;  %v9600_v43 = vld [vmem:[#allocation3 + $0x30] sm:$0xff] }
 0xcfd   :  { %12737 = vmatprep.mubr.bf16.mxu0 %v17412_v27  ;;  %v13575_v27 = vld [vmem:[%s18123_s2 + $0x1e0] sm:$0xff]  }
 0xd04   :  { %12738 = vmatmul.mubr.bf16.gmra.mrb[56].mxu0 %v17416_v15  ;;  %v13576_v15 = vld [vmem:[%s18123_s2 + $0x1e8] sm:$0xff]  }
 0xd05   :  { %12741 = vmatprep.mubr.bf16.mxu0 %v17424_v7  ;;  %v9601_v7 = vld [vmem:[#allocation3 + $0x38] sm:$0xff] }
 0xd0c   :  { %12742 = vmatmul.mubr.bf16.gmra.mrb[60].mxu0 %v17428_v50  ;;  %v9602_v50 = vld [vmem:[#allocation3 + $0x40] sm:$0xff] }
 0xd0d   :  { %12761 = vmatprep.mubr.bf16.mxu0 %v9596_v11 }
 0xd14   :  { %12762 = vmatmul.mubr.bf16.vlgmr.msra.gmra.mrb[32].mxu0 %v9597_v6 }
 0xd15   :  { %12794 = vmatpush3.bf16.msra.mxu0 %v13571_v62  ;;  %12765 = vmatprep.mubr.bf16.mxu0 %v9598_v46 }
 0xd16   :  { %12795 = vmatprep.subr.bf16.mxu0 %v13572_v19 }
 0xd19   :  { %12796 = vmatpush3.bf16.msra.mxu0 %v13572_v19 }
 0xd1a   :  { %12797 = vmatprep.subr.bf16.mxu0 %v13573_v25 }
 0xd1c   :  { %12766 = vmatmul.mubr.bf16.gmra.mrb[36].mxu0 %v9599_v35 }
 0xd1d   :  { %12769 = vmatprep.mubr.bf16.mxu0 %v9600_v43  ;;  %12798 = vmatpush3.bf16.msra.mxu0 %v13573_v25 }
 0xd1e   :  { %12799 = vmatprep.subr.bf16.mxu0 %v13574_v16 }
 0xd21   :  { %12800 = vmatpush3.bf16.msra.mxu0 %v13574_v16 }
 0xd22   :  { %12801 = vmatprep.subr.bf16.mxu0 %v13575_v27 }
 0xd24   :  { %12770 = vmatmul.mubr.bf16.gmra.mrb[40].mxu0 %v9601_v7 }
 0xd25   :  { %12773 = vmatprep.mubr.bf16.mxu0 %v9602_v50  ;;  %12802 = vmatpush3.bf16.msra.mxu0 %v13575_v27 }
 0xd26   :  { %12803 = vmatprep.subr.bf16.mxu0 %v13576_v15 }
 0xd29   :  { %12804 = vmatpush3.bf16.msra.mxu0 %v13576_v15 }
 0xd2a   :  { %12805 = vmatprep.subr.bf16.mxu0 %v13577_v17 }
 0xd2c   :  { %12774 = vmatmul.mubr.bf16.gmra.mrb[44].mxu0 %v9603_v24 }
 0xd2d   :  { %12777 = vmatprep.mubr.bf16.mxu0 %v9604_v9  ;;  %12806 = vmatpush3.bf16.msra.mxu0 %v13577_v17 }
 0xd2e   :  { %12807 = vmatprep.subr.bf16.mxu0 %v13578_v22 }
 0xd31   :  { %12808 = vmatpush3.bf16.msra.mxu0 %v13578_v22 }
 0xd32   :  { %12841 = vmatprep.subr.bf16.mxu0 %v13579_v51 }
 0xd34   :  { %12778 = vmatmul.mubr.bf16.gmra.mrb[48].mxu0 %v9605_v4 }
 0xd35   :  { %12781 = vmatprep.mubr.bf16.mxu0 %v9606_v55 }
 0xd3c   :  { %12782 = vmatmul.mubr.bf16.gmra.mrb[52].mxu0 %v9607_v14 }
 0xd3d   :  { %12785 = vmatprep.mubr.bf16.mxu0 %v9608_v28 }
 0xd44   :  { %12786 = vmatmul.mubr.bf16.gmra.mrb[56].mxu0 %v9609_v29 }
 0xd45   :  { %12789 = vmatprep.mubr.bf16.mxu0 %v9610_v45 }
 0xd4c   :  { %12790 = vmatmul.mubr.bf16.gmra.mrb[60].mxu0 %v9611_v1 }
 0xd4d   :  { %12809 = vmatprep.mubr.bf16.mxu0 %v9933_v38 }
 0xd54   :  { %12810 = vmatmul.mubr.bf16.vlgmr.msra.gmra.mrb[32].mxu0 %v9934_v18 }
 0xd55   :  { %12842 = vmatpush3.bf16.msra.mxu0 %v13579_v51  ;;  %12813 = vmatprep.mubr.bf16.mxu0 %v9935_v21 }
 0xd56   :  { %12843 = vmatprep.subr.bf16.mxu0 %v13580_v0 }
 0xd59   :  { %12844 = vmatpush3.bf16.msra.mxu0 %v13580_v0 }
 0xd5a   :  { %12845 = vmatprep.subr.bf16.mxu0 %v13581_v42 }
 0xd5c   :  { %12814 = vmatmul.mubr.bf16.gmra.mrb[36].mxu0 %v9936_v2 }
 0xd5d   :  { %12817 = vmatprep.mubr.bf16.mxu0 %v9937_v41  ;;  %12846 = vmatpush3.bf16.msra.mxu0 %v13581_v42 }
 0xd5e   :  { %12847 = vmatprep.subr.bf16.mxu0 %v13582_v30 }
 0xd61   :  { %12848 = vmatpush3.bf16.msra.mxu0 %v13582_v30 }
 0xd62   :  { %12849 = vmatprep.subr.bf16.mxu0 %v13583_v37 }
 0xd64   :  { %12818 = vmatmul.mubr.bf16.gmra.mrb[40].mxu0 %v9938_v39 }
 0xd65   :  { %12821 = vmatprep.mubr.bf16.mxu0 %v9939_v33  ;;  %12850 = vmatpush3.bf16.msra.mxu0 %v13583_v37 }
 0xd66   :  { %12851 = vmatprep.subr.bf16.mxu0 %v13584_v5 }
 0xd69   :  { %12852 = vmatpush3.bf16.msra.mxu0 %v13584_v5 }
 0xd6a   :  { %12853 = vmatprep.subr.bf16.mxu0 %v13585_v56 }
 0xd6c   :  { %12822 = vmatmul.mubr.bf16.gmra.mrb[44].mxu0 %v9940_v52 }
 0xd6d   :  { %12825 = vmatprep.mubr.bf16.mxu0 %v9941_v40  ;;  %12854 = vmatpush3.bf16.msra.mxu0 %v13585_v56 }
 0xd6e   :  { %12855 = vmatprep.subr.bf16.mxu0 %v13586_v54 }
 0xd71   :  { %12856 = vmatpush3.bf16.msra.mxu0 %v13586_v54 }
 0xd74   :  { %12826 = vmatmul.mubr.bf16.gmra.mrb[48].mxu0 %v17607_v61  ;;  %v10279_v61 = vld [vmem:[#allocation3 + $0x178] sm:$0xff] }
 0xd75   :  { %12829 = vmatprep.mubr.bf16.mxu0 %v17610_v20  ;;  %v10281_v20 = vld [vmem:[#allocation3 + $0x188] sm:$0xff] }
 0xd7c   :  { %12830 = vmatmul.mubr.bf16.gmra.mrb[52].mxu0 %v17613_v10  ;;  %v10282_v10 = vld [vmem:[#allocation3 + $0x190] sm:$0xff] }
 0xd7d   :  { %12833 = vmatprep.mubr.bf16.mxu0 %v17616_v60  ;;  %v10283_v60 = vld [vmem:[#allocation3 + $0x198] sm:$0xff] }
 0xd84   :  { %12834 = vmatmul.mubr.bf16.gmra.mrb[56].mxu0 %v17619_v36  ;;  %v10284_v36 = vld [vmem:[#allocation3 + $0x1a0] sm:$0xff] }
 0xd85   :  { %12837 = vmatprep.mubr.bf16.mxu0 %v17622_v12  ;;  %v10285_v12 = vld [vmem:[#allocation3 + $0x1a8] sm:$0xff] }
 0xd8c   :  { %12838 = vmatmul.mubr.bf16.gmra.mrb[60].mxu0 %v17452_v47  ;;  %v10280_v47 = vld [vmem:[#allocation3 + $0x180] sm:$0xff] }
 0xd8d   :  { %12857 = vmatprep.mubr.bf16.mxu0 %v10270_v44 }
 0xd94   :  { %12858 = vmatmul.mubr.bf16.vlgmr.msra.gmra.mrb[32].mxu0 %v10271_v63 }
 0xd95   :  { %12861 = vmatprep.mubr.bf16.mxu0 %v10272_v26 }
 0xd9c   :  { %12862 = vmatmul.mubr.bf16.gmra.mrb[36].mxu0 %v10273_v34 }
 0xd9d   :  { %12865 = vmatprep.mubr.bf16.mxu0 %v10274_v48 }
 0xda4   :  { %12866 = vmatmul.mubr.bf16.gmra.mrb[40].mxu0 %v10275_v13 }
 0xda5   :  { %12869 = vmatprep.mubr.bf16.mxu0 %v10276_v59 }
 0xdac   :  { %12870 = vmatmul.mubr.bf16.gmra.mrb[44].mxu0 %v10277_v49 }
 0xdad   :  { %12873 = vmatprep.mubr.bf16.mxu0 %v10278_v23 }
 0xdb4   :  { %12874 = vmatmul.mubr.bf16.gmra.mrb[48].mxu0 %v10279_v61 }
 0xdb5   :  { %12877 = vmatprep.mubr.bf16.mxu0 %v10280_v47 }
 0xdbc   :  { %12878 = vmatmul.mubr.bf16.gmra.mrb[52].mxu0 %v10281_v20 }
 0xdbd   :  { %12881 = vmatprep.mubr.bf16.mxu0 %v10282_v10 }
 0xdc4   :  { %12882 = vmatmul.mubr.bf16.gmra.mrb[56].mxu0 %v10283_v60 }
 0xdc5   :  { %12885 = vmatprep.mubr.bf16.mxu0 %v10284_v36 }
 0xdcc   :  { %12886 = vmatmul.mubr.bf16.gmra.mrb[60].mxu0 %v10285_v12 }
 0xe67   :  { %v17717_v32 = vpop.f32.mrb[32].mxu0 }
 0xe68   :  { %v17719_v57 = vpop.f32.mrb[33].mxu0 }
 0xe69   :  { %v17721_v53 = vpop.f32.mrb[34].mxu0 }
 0xe6a   :  { %v17723_v58 = vpop.f32.mrb[35].mxu0 }
 0xe6b   :  { %v10639_v31 = vadd.f32 %v17723_v58, %v17719_v57 }
 0xe6d   :  { %v10640_v3 = vadd.f32 %v17717_v32, %v10639_v31 }
 0xe6f   :  { %v17728_v8 = vpop.f32.mrb[36].mxu0  ;;  %v10641_v62 = vadd.f32 %v17721_v53, %v10640_v3 }
 0xe70   :  { %v17731_v11 = vpop.f32.mrb[37].mxu0 }
 0xe71   :  { %v10642_v19 = vadd.f32 %v10641_v62, %v17731_v11  ;;  %v17734_v6 = vpop.f32.mrb[38].mxu0 }
 0xe72   :  { %v17736_v46 = vpop.f32.mrb[39].mxu0 }
 0xe73   :  { %v10643_v25 = vadd.f32 %v10642_v19, %v17736_v46 }
 0xe75   :  { %v10644_v16 = vadd.f32 %v17728_v8, %v10643_v25 }
 0xe77   :  { %v17740_v35 = vpop.f32.mrb[40].mxu0  ;;  %v10645_v43 = vadd.f32 %v17734_v6, %v10644_v16 }
 0xe78   :  { %v17743_v27 = vpop.f32.mrb[41].mxu0 }
 0xe79   :  { %v10646_v15 = vadd.f32 %v10645_v43, %v17743_v27  ;;  %v17746_v7 = vpop.f32.mrb[42].mxu0 }
 0xe7a   :  { %v17748_v50 = vpop.f32.mrb[43].mxu0 }
 0xe7b   :  { %v10647_v17 = vadd.f32 %v10646_v15, %v17748_v50 }
 0xe7d   :  { %v10648_v22 = vadd.f32 %v17740_v35, %v10647_v17 }
 0xe7f   :  { %v17752_v24 = vpop.f32.mrb[44].mxu0  ;;  %v10649_v9 = vadd.f32 %v17746_v7, %v10648_v22 }
 0xe80   :  { %v17755_v51 = vpop.f32.mrb[45].mxu0 }
 0xe81   :  { %v10650_v4 = vadd.f32 %v10649_v9, %v17755_v51  ;;  %v17758_v55 = vpop.f32.mrb[46].mxu0 }
 0xe82   :  { %v17760_v14 = vpop.f32.mrb[47].mxu0 }
 0xe83   :  { %v10651_v28 = vadd.f32 %v10650_v4, %v17760_v14 }
 0xe85   :  { %v10652_v29 = vadd.f32 %v17752_v24, %v10651_v28 }
 0xe87   :  { %v17764_v45 = vpop.f32.mrb[48].mxu0  ;;  %v10653_v1 = vadd.f32 %v17758_v55, %v10652_v29 }
 0xe88   :  { %v17767_v38 = vpop.f32.mrb[49].mxu0 }
 0xe89   :  { %v10654_v0 = vadd.f32 %v10653_v1, %v17767_v38  ;;  %v17770_v18 = vpop.f32.mrb[50].mxu0 }
 0xe8a   :  { %v17772_v21 = vpop.f32.mrb[51].mxu0 }
 0xe8b   :  { %v10655_v42 = vadd.f32 %v10654_v0, %v17772_v21  ;;  %v18454_v0 = vld [vmem:[#allocation7_spill] sm:$0xff] }
 0xe8d   :  { %v10656_v30 = vadd.f32 %v17764_v45, %v10655_v42 }
 0xe8f   :  { %v17776_v2 = vpop.f32.mrb[52].mxu0  ;;  %v10657_v41 = vadd.f32 %v17770_v18, %v10656_v30 }
 0xe90   :  { %v17779_v37 = vpop.f32.mrb[53].mxu0 }
 0xe91   :  { %v10658_v5 = vadd.f32 %v10657_v41, %v17779_v37  ;;  %v17782_v39 = vpop.f32.mrb[54].mxu0 }
 0xe92   :  { %v17784_v33 = vpop.f32.mrb[55].mxu0 }
 0xe93   :  { %v10659_v56 = vadd.f32 %v10658_v5, %v17784_v33 }
 0xe95   :  { %v10660_v54 = vadd.f32 %v17776_v2, %v10659_v56 }
 0xe97   :  { %v17788_v52 = vpop.f32.mrb[56].mxu0  ;;  %v10661_v40 = vadd.f32 %v17782_v39, %v10660_v54 }
 0xe98   :  { %v17791_v44 = vpop.f32.mrb[57].mxu0 }
 0xe99   :  { %v10662_v63 = vadd.f32 %v10661_v40, %v17791_v44  ;;  %v17794_v26 = vpop.f32.mrb[58].mxu0 }
 0xe9a   :  { %v17796_v34 = vpop.f32.mrb[59].mxu0 }
 0xe9b   :  { %v10663_v48 = vadd.f32 %v10662_v63, %v17796_v34 }
 0xe9d   :  { %v10664_v13 = vadd.f32 %v17788_v52, %v10663_v48 }
 0xe9f   :  { %v17800_v59 = vpop.f32.mrb[60].mxu0  ;;  %v10665_v49 = vadd.f32 %v17794_v26, %v10664_v13 }
 0xea0   :  { %v17803_v23 = vpop.f32.mrb[61].mxu0 }
 0xea1   :  { %v10666_v61 = vadd.f32 %v10665_v49, %v17803_v23  ;;  %v17806_v47 = vpop.f32.mrb[62].mxu0 }
 0xea2   :  { %v17808_v20 = vpop.f32.mrb[63].mxu0 }
 0xea3   :  { %v10667_v10 = vadd.f32 %v10666_v61, %v17808_v20 }
 0xea5   :  { %v10668_v60 = vadd.f32 %v17800_v59, %v10667_v10 }
 0xea7   :  { %v10669_v36 = vadd.f32 %v17806_v47, %v10668_v60 }
 0xea9   :  { %10670 = vadd.xlane.f32.xlu1 %v10669_v36 }
 0xf36   :  { %v10671_v12 = vpop.xlane.xlu1 %10670 }
 0xf37   :  { %v10672_v31 = vrot.slane %v10671_v12, 4 }
 0xf39   :  { %v10673_v3 = vadd.f32 %v10672_v31, %v10671_v12 }
 0xf3b   :  { %v10674_v62 = vrot.slane %v10673_v3, 2 }
 0xf3d   :  { %v10675_v19 = vadd.f32 %v10674_v62, %v10673_v3 }
 0xf3f   :  { %v10676_v25 = vrot.slane %v10675_v19, 1 }
 0xf41   :  { %v10677_v16 = vadd.f32 %v10676_v25, %v10675_v19 }
 0xf43   :  { %13421 = vpush %v10677_v16 }
 0xf74   :  { %s13422_s2 = spop %13421 }
 0xf75   :  { %s10679_s26 = smul.f32 0.00048828125, %s13422_s2 }
 0xf77   :  { %v17813_v43 = vstv %s10679_s26 }
 0xf78   :  { %v10681_v15 = vsub.f32 %v17719_v57, %v17813_v43  ;;  %v10682_v17 = vsub.f32 %v17723_v58, %v17813_v43  ;;  %v10683_v22 = vsub.f32 %v17717_v32, %v17813_v43  ;;  %v10684_v28 = vsub.f32 %v17721_v53, %v17813_v43 }
 0xf79   :  { %v10685_v29 = vsub.f32 %v17731_v11, %v17813_v43  ;;  %v10686_v41 = vsub.f32 %v17736_v46, %v17813_v43  ;;  %v10687_v56 = vsub.f32 %v17728_v8, %v17813_v43  ;;  %v10688_v48 = vsub.f32 %v17734_v6, %v17813_v43 }
 0xf7a   :  { %v10713_v9 = vmul.f32 %v10681_v15, %v10681_v15  ;;  %v10714_v4 = vmul.f32 %v10682_v17, %v10682_v17  ;;  %v10715_v1 = vmul.f32 %v10683_v22, %v10683_v22  ;;  %v10716_v5 = vmul.f32 %v10684_v28, %v10684_v28 }
 0xf7b   :  { %v10717_v54 = vmul.f32 %v10685_v29, %v10685_v29  ;;  %v10718_v13 = vmul.f32 %v10686_v41, %v10686_v41  ;;  %v10689_v10 = vsub.f32 %v17743_v27, %v17813_v43  ;;  %v10719_v60 = vmul.f32 %v10687_v56, %v10687_v56 }
 0xf7c   :  { %v10745_v42 = vmul.f32 %v18454_v0, %v10713_v9  ;;  %v10746_v30 = vmul.f32 %v18454_v0, %v10714_v4  ;;  %v10747_v40 = vmul.f32 %v18454_v0, %v10715_v1  ;;  %v10748_v49 = vmul.f32 %v18454_v0, %v10716_v5 }
 0xf7d   :  { %v10749_v36 = vmul.f32 %v18454_v0, %v10717_v54  ;;  %v10690_v31 = vsub.f32 %v17748_v50, %v17813_v43  ;;  %v10720_v3 = vmul.f32 %v10688_v48, %v10688_v48  ;;  %v10750_v62 = vmul.f32 %v18454_v0, %v10718_v13 }
 0xf7e   :  { %v10777_v63 = vadd.f32 %v10746_v30, %v10745_v42  ;;  %v10691_v25 = vsub.f32 %v17740_v35, %v17813_v43  ;;  %v10721_v16 = vmul.f32 %v10689_v10, %v10689_v10  ;;  %v10751_v15 = vmul.f32 %v18454_v0, %v10719_v60 }
 0xf7f   :  { %v10692_v22 = vsub.f32 %v17746_v7, %v17813_v43  ;;  %v10722_v9 = vmul.f32 %v10690_v31, %v10690_v31  ;;  %v10752_v4 = vmul.f32 %v18454_v0, %v10720_v3  ;;  %v10693_v29 = vsub.f32 %v17755_v51, %v17813_v43 }
 0xf80   :  { %v10778_v61 = vadd.f32 %v10777_v63, %v10747_v40  ;;  %v10723_v1 = vmul.f32 %v10691_v25, %v10691_v25  ;;  %v10753_v42 = vmul.f32 %v18454_v0, %v10721_v16  ;;  %v10694_v41 = vsub.f32 %v17760_v14, %v17813_v43 }
 0xf81   :  { %v10724_v5 = vmul.f32 %v10692_v22, %v10692_v22  ;;  %v10754_v56 = vmul.f32 %v18454_v0, %v10722_v9  ;;  %v10695_v40 = vsub.f32 %v17752_v24, %v17813_v43  ;;  %v10725_v63 = vmul.f32 %v10693_v29, %v10693_v29 }
 0xf82   :  { %v10779_v12 = vadd.f32 %v10778_v61, %v10748_v49  ;;  %v10755_v48 = vmul.f32 %v18454_v0, %v10723_v1  ;;  %v10696_v49 = vsub.f32 %v17758_v55, %v17813_v43  ;;  %v10726_v61 = vmul.f32 %v10694_v41, %v10694_v41 }
 0xf83   :  { %v10756_v10 = vmul.f32 %v18454_v0, %v10724_v5  ;;  %v10757_v31 = vmul.f32 %v18454_v0, %v10725_v63 }
 0xf84   :  { %v10780_v19 = vadd.f32 %v10779_v12, %v10749_v36  ;;  %v10697_v36 = vsub.f32 %v17767_v38, %v17813_v43  ;;  %v10727_v12 = vmul.f32 %v10695_v40, %v10695_v40  ;;  %v10758_v25 = vmul.f32 %v18454_v0, %v10726_v61 }
 0xf86   :  { %v10781_v17 = vadd.f32 %v10780_v19, %v10750_v62  ;;  %v10698_v62 = vsub.f32 %v17772_v21, %v17813_v43  ;;  %v10728_v19 = vmul.f32 %v10696_v49, %v10696_v49  ;;  %v10759_v22 = vmul.f32 %v18454_v0, %v10727_v12 }
 0xf88   :  { %v10782_v28 = vadd.f32 %v10781_v17, %v10751_v15  ;;  %v10699_v15 = vsub.f32 %v17764_v45, %v17813_v43  ;;  %v10729_v17 = vmul.f32 %v10697_v36, %v10697_v36  ;;  %v10760_v29 = vmul.f32 %v18454_v0, %v10728_v19 }
 0xf8a   :  { %v10783_v30 = vadd.f32 %v10782_v28, %v10752_v4  ;;  %v10700_v4 = vsub.f32 %v17770_v18, %v17813_v43  ;;  %v10730_v28 = vmul.f32 %v10698_v62, %v10698_v62  ;;  %v10761_v41 = vmul.f32 %v18454_v0, %v10729_v17 }
 0xf8c   :  { %v10784_v54 = vadd.f32 %v10783_v30, %v10753_v42  ;;  %v10701_v42 = vsub.f32 %v17779_v37, %v17813_v43  ;;  %v10731_v30 = vmul.f32 %v10699_v15, %v10699_v15  ;;  %v10762_v40 = vmul.f32 %v18454_v0, %v10730_v28 }
 0xf8e   :  { %v10785_v13 = vadd.f32 %v10784_v54, %v10754_v56  ;;  %v10702_v56 = vsub.f32 %v17784_v33, %v17813_v43  ;;  %v10732_v54 = vmul.f32 %v10700_v4, %v10700_v4  ;;  %v10763_v49 = vmul.f32 %v18454_v0, %v10731_v30 }
 0xf90   :  { %v10786_v60 = vadd.f32 %v10785_v13, %v10755_v48  ;;  %v10703_v48 = vsub.f32 %v17776_v2, %v17813_v43  ;;  %v10733_v13 = vmul.f32 %v10701_v42, %v10701_v42  ;;  %v10764_v36 = vmul.f32 %v18454_v0, %v10732_v54 }
 0xf92   :  { %v10787_v3 = vadd.f32 %v10786_v60, %v10756_v10  ;;  %v10704_v10 = vsub.f32 %v17782_v39, %v17813_v43  ;;  %v10734_v60 = vmul.f32 %v10702_v56, %v10702_v56  ;;  %v10765_v62 = vmul.f32 %v18454_v0, %v10733_v13 }
 0xf94   :  { %v10788_v16 = vadd.f32 %v10787_v3, %v10757_v31  ;;  %v10705_v31 = vsub.f32 %v17791_v44, %v17813_v43  ;;  %v10735_v3 = vmul.f32 %v10703_v48, %v10703_v48  ;;  %v10766_v15 = vmul.f32 %v18454_v0, %v10734_v60 }
 0xf96   :  { %v10789_v9 = vadd.f32 %v10788_v16, %v10758_v25  ;;  %v10706_v25 = vsub.f32 %v17796_v34, %v17813_v43  ;;  %v10736_v16 = vmul.f32 %v10704_v10, %v10704_v10  ;;  %v10767_v4 = vmul.f32 %v18454_v0, %v10735_v3 }
 0xf98   :  { %v10790_v1 = vadd.f32 %v10789_v9, %v10759_v22  ;;  %v10707_v22 = vsub.f32 %v17788_v52, %v17813_v43  ;;  %v10737_v9 = vmul.f32 %v10705_v31, %v10705_v31  ;;  %v10768_v42 = vmul.f32 %v18454_v0, %v10736_v16 }
 0xf9a   :  { %v10791_v5 = vadd.f32 %v10790_v1, %v10760_v29  ;;  %v10708_v29 = vsub.f32 %v17794_v26, %v17813_v43  ;;  %v10738_v1 = vmul.f32 %v10706_v25, %v10706_v25  ;;  %v10769_v56 = vmul.f32 %v18454_v0, %v10737_v9 }
 0xf9c   :  { %v10792_v63 = vadd.f32 %v10791_v5, %v10761_v41  ;;  %v10709_v41 = vsub.f32 %v17803_v23, %v17813_v43  ;;  %v10739_v5 = vmul.f32 %v10707_v22, %v10707_v22  ;;  %v10770_v48 = vmul.f32 %v18454_v0, %v10738_v1 }
 0xf9e   :  { %v10793_v61 = vadd.f32 %v10792_v63, %v10762_v40  ;;  %v10710_v40 = vsub.f32 %v17808_v20, %v17813_v43  ;;  %v10740_v63 = vmul.f32 %v10708_v29, %v10708_v29  ;;  %v10771_v10 = vmul.f32 %v18454_v0, %v10739_v5 }
 0xfa0   :  { %v10794_v12 = vadd.f32 %v10793_v61, %v10763_v49  ;;  %v10711_v49 = vsub.f32 %v17800_v59, %v17813_v43  ;;  %v10741_v61 = vmul.f32 %v10709_v41, %v10709_v41  ;;  %v10772_v31 = vmul.f32 %v18454_v0, %v10740_v63 }
 0xfa2   :  { %v10795_v19 = vadd.f32 %v10794_v12, %v10764_v36  ;;  %v10712_v36 = vsub.f32 %v17806_v47, %v17813_v43  ;;  %v10742_v12 = vmul.f32 %v10710_v40, %v10710_v40 }
 0xfa4   :  { %v10796_v17 = vadd.f32 %v10795_v19, %v10765_v62  ;;  %v10743_v62 = vmul.f32 %v10711_v49, %v10711_v49  ;;  %v10773_v19 = vmul.f32 %v18454_v0, %v10741_v61  ;;  %v10744_v16 = vmul.f32 %v10712_v36, %v10712_v36  ;;  %v13617_v49 = vld [vmem:[%s18129_s6] sm:$0x1]  ;;  %v13618_v36 = vld [vmem:[%s18127_s8 + $0x1] sm:$0x1] }
 0xfa6   :  { %v10797_v28 = vadd.f32 %v10796_v17, %v10766_v15  ;;  %v10774_v15 = vmul.f32 %v18454_v0, %v10742_v12  ;;  %v10775_v22 = vmul.f32 %v18454_v0, %v10743_v62 }
 0xfa8   :  { %v10798_v30 = vadd.f32 %v10797_v28, %v10767_v4  ;;  %v10776_v4 = vmul.f32 %v18454_v0, %v10744_v16  ;;  %v13616_v0 = vld [vmem:[%s18128_s5] sm:$0x1] }
 0xfaa   :  { %v10799_v54 = vadd.f32 %v10798_v30, %v10768_v42 }
 0xfac   :  { %v10800_v13 = vadd.f32 %v10799_v54, %v10769_v56 }
 0xfae   :  { %v10801_v60 = vadd.f32 %v10800_v13, %v10770_v48  ;;  %v18455_v48 = vld [vmem:[#allocation8_spill] sm:$0xff] }
 0xfaf   :  { %v10822_v13 = vmul.f32 %v13616_v0, %v18455_v48  ;;  %v10825_v61 = vmul.f32 %v13617_v49, %v18455_v48 }
 0xfb0   :  { %v10802_v3 = vadd.f32 %v10801_v60, %v10771_v10 }
 0xfb1   :  { %v10826_v12 = vadd.f32 %v13618_v36, %v10825_v61 }
 0xfb2   :  { %v10803_v25 = vadd.f32 %v10802_v3, %v10772_v31  ;;  %v18456_v3 = vld [vmem:[#allocation9_spill] sm:$0xff] }
 0xfb4   :  { %v10804_v17 = vadd.f32 %v10803_v25, %v10773_v19 }
 0xfb6   :  { %v10805_v9 = vadd.f32 %v10804_v17, %v10774_v15 }
 0xfb8   :  { %v10806_v28 = vadd.f32 %v10805_v9, %v10775_v22 }
 0xfba   :  { %v10807_v29 = vadd.f32 %v10806_v28, %v10776_v4 }
 0xfbc   :  { %10808 = vadd.xlane.f32.xlu0 %v10807_v29 }
0x1049   :  { %v10809_v1 = vpop.xlane.xlu0 %10808 }
0x104a   :  { %v10810_v42 = vrot.slane %v10809_v1, 4 }
0x104c   :  { %v10811_v30 = vadd.f32 %v10810_v42, %v10809_v1 }
0x104e   :  { %v10812_v41 = vrot.slane %v10811_v30, 2 }
0x1050   :  { %v10813_v5 = vadd.f32 %v10812_v41, %v10811_v30 }
0x1052   :  { %v10814_v56 = vrot.slane %v10813_v5, 1 }
0x1054   :  { %v10815_v54 = vadd.f32 %v10814_v56, %v10813_v5 }
0x1056   :  { %13423 = vpush %v10815_v54 }
0x1087   :  { %s13424_s13 = spop %13423 }
0x1088   :  { %s10817_s21 = smul.f32 0.00048828125, %s13424_s13 }
0x108a   :  { %s10818_s25 = sadd.f32 1e-05, %s10817_s21 }
0x108c   :  { %v10819_v40 = vstv %s10818_s25 }
0x108d   :  { %13593 = vrsqrt.f32 %v10819_v40 }
0x1097   :  { %v13594_v63 = vpop.eup %13593 }
0x1098   :  { %13425 = vpush %v13594_v63 }
0x10c9   :  { %s13426_s14 = spop %13425 }
0x10ca   :  { %v10823_v10 = vstv %s13426_s14 }
0x10cb   :  { %v10824_v60 = vmul.f32 %v10823_v10, %v10822_v13 }
0x10cd   :  { %v10827_v31 = vmul.f32 %v10824_v60, %v17813_v43  ;;  %v10833_v62 = vrot.slane %v10824_v60, %v18456_v3 }
0x10cf   :  { %v10828_v19 = vsub.f32 %v10826_v12, %v10827_v31  ;;  %v10835_v25 = vmul.f32 %v10833_v62, %v17719_v57  ;;  %v10836_v16 = vmul.f32 %v10833_v62, %v17723_v58  ;;  %v10837_v15 = vmul.f32 %v17717_v32, %v10833_v62 }
0x10d0   :  { %v10838_v17 = vmul.f32 %v17721_v53, %v10833_v62  ;;  %v10839_v22 = vmul.f32 %v10833_v62, %v17731_v11  ;;  %v10840_v9 = vmul.f32 %v10833_v62, %v17736_v46  ;;  %v10841_v4 = vmul.f32 %v17728_v8, %v10833_v62 }
0x10d1   :  { %v10842_v28 = vmul.f32 %v17734_v6, %v10833_v62  ;;  %v10843_v43 = vmul.f32 %v10833_v62, %v17743_v27  ;;  %v10844_v29 = vmul.f32 %v10833_v62, %v17748_v50  ;;  %v10845_v57 = vmul.f32 %v17740_v35, %v10833_v62 }
0x10d2   :  { %v10846_v58 = vmul.f32 %v17746_v7, %v10833_v62  ;;  %v10847_v32 = vmul.f32 %v10833_v62, %v17755_v51  ;;  %v10848_v53 = vmul.f32 %v10833_v62, %v17760_v14  ;;  %v10849_v11 = vmul.f32 %v17752_v24, %v10833_v62 }
0x10d3   :  { %v10850_v46 = vmul.f32 %v17758_v55, %v10833_v62  ;;  %v10851_v8 = vmul.f32 %v10833_v62, %v17767_v38  ;;  %v10852_v6 = vmul.f32 %v10833_v62, %v17772_v21  ;;  %v10853_v27 = vmul.f32 %v17764_v45, %v10833_v62 }
0x10d4   :  { %v10854_v50 = vmul.f32 %v17770_v18, %v10833_v62  ;;  %v10855_v35 = vmul.f32 %v10833_v62, %v17779_v37  ;;  %v10856_v7 = vmul.f32 %v10833_v62, %v17784_v33  ;;  %v10857_v51 = vmul.f32 %v17776_v2, %v10833_v62 }
0x10d5   :  { %v10858_v14 = vmul.f32 %v17782_v39, %v10833_v62  ;;  %v10859_v24 = vmul.f32 %v10833_v62, %v17791_v44  ;;  %v10860_v55 = vmul.f32 %v10833_v62, %v17796_v34  ;;  %v10861_v38 = vmul.f32 %v17788_v52, %v10833_v62 }
0x10d6   :  { %v10862_v21 = vmul.f32 %v17794_v26, %v10833_v62  ;;  %v10871_v45 = vrot.slane %v10828_v19, %v18456_v3  ;;  %v10863_v18 = vmul.f32 %v10833_v62, %v17803_v23  ;;  %v10864_v37 = vmul.f32 %v10833_v62, %v17808_v20 }
0x10d7   :  { %v10865_v33 = vmul.f32 %v17800_v59, %v10833_v62  ;;  %v10866_v2 = vmul.f32 %v17806_v47, %v10833_v62 }
0x10d8   :  { %v10873_v1 = vadd.f32 %v10871_v45, %v10835_v25  ;;  %v10874_v39 = vadd.f32 %v10871_v45, %v10836_v16  ;;  %v10875_v42 = vadd.f32 %v10871_v45, %v10837_v15  ;;  %v10876_v44 = vadd.f32 %v10871_v45, %v10838_v17 }
0x10d9   :  { %v10877_v30 = vadd.f32 %v10871_v45, %v10839_v22  ;;  %v10878_v34 = vadd.f32 %v10871_v45, %v10840_v9  ;;  %v10879_v41 = vadd.f32 %v10871_v45, %v10841_v4  ;;  %v10880_v52 = vadd.f32 %v10871_v45, %v10842_v28 }
0x10da   :  { %v10881_v5 = vadd.f32 %v10871_v45, %v10843_v43  ;;  %v10882_v26 = vadd.f32 %v10871_v45, %v10844_v29  ;;  %v10883_v56 = vadd.f32 %v10871_v45, %v10845_v57  ;;  %v10884_v54 = vadd.f32 %v10871_v45, %v10846_v58 }
0x10db   :  { %v10885_v40 = vadd.f32 %v10871_v45, %v10847_v32  ;;  %v10886_v23 = vadd.f32 %v10871_v45, %v10848_v53  ;;  %v10887_v63 = vadd.f32 %v10871_v45, %v10849_v11  ;;  %v10888_v20 = vadd.f32 %v10871_v45, %v10850_v46 }
0x10dc   :  { %v10889_v0 = vadd.f32 %v10871_v45, %v10851_v8  ;;  %v10890_v59 = vadd.f32 %v10871_v45, %v10852_v6  ;;  %v10891_v48 = vadd.f32 %v10871_v45, %v10853_v27  ;;  %v10892_v47 = vadd.f32 %v10871_v45, %v10854_v50 }
0x10dd   :  { %v17957_v13 = vadd.f32 %v10871_v45, %v10855_v35  ;;  %v17959_v49 = vadd.f32 %v10871_v45, %v10856_v7  ;;  %v17961_v61 = vadd.f32 %v10871_v45, %v10857_v51  ;;  %v17963_v10 = vadd.f32 %v10871_v45, %v10858_v14 }
0x10de   :  { %v17965_v60 = vadd.f32 %v10871_v45, %v10859_v24  ;;  %v17967_v36 = vadd.f32 %v10871_v45, %v10860_v55  ;;  %v17969_v12 = vadd.f32 %v10871_v45, %v10861_v38  ;;  %v17971_v31 = vadd.f32 %v10871_v45, %v10862_v21 }
0x10df   :  { %v17973_v3 = vadd.f32 %v10871_v45, %v10863_v18  ;;  %v17975_v62 = vadd.f32 %v10871_v45, %v10864_v37  ;;  %v17977_v19 = vadd.f32 %v10871_v45, %v10865_v33  ;;  %v17979_v25 = vadd.f32 %v10871_v45, %v10866_v2 }
0x10e0   :  { %v10905_v16 = vmax.f32 %v10873_v1, 0.0  ;;  %v10906_v15 = vmax.f32 %v10874_v39, 0.0  ;;  %v10907_v17 = vmax.f32 %v10875_v42, 0.0  ;;  %v10908_v22 = vmax.f32 %v10876_v44, 0.0 }
0x10e1   :  { %v10909_v9 = vmax.f32 %v10877_v30, 0.0  ;;  %v10910_v4 = vmax.f32 %v10878_v34, 0.0  ;;  %v10911_v28 = vmax.f32 %v10879_v41, 0.0  ;;  %v10912_v43 = vmax.f32 %v10880_v52, 0.0 }
0x10e2   :  { %v10913_v29 = vmax.f32 %v10881_v5, 0.0  ;;  %v10914_v57 = vmax.f32 %v10882_v26, 0.0  ;;  %v10915_v58 = vmax.f32 %v10883_v56, 0.0  ;;  %v10916_v32 = vmax.f32 %v10884_v54, 0.0  ;;  %11447 = vst.msk [vmem:[%s18130_s9 + $0x100] sm:$0xff] %vm5613_vm12, %v10905_v16  ;;  %11448 = vst.msk [vmem:[%s18130_s9 + $0x108] sm:$0xff] %vm5613_vm12, %v10906_v15 }
0x10e3   :  { %11449 = vst.msk [vmem:[%s18130_s9 + $0x110] sm:$0xff] %vm5613_vm12, %v10907_v17  ;;  %11450 = vst.msk [vmem:[%s18130_s9 + $0x118] sm:$0xff] %vm5613_vm12, %v10908_v22  ;;  %v10917_v53 = vmax.f32 %v10885_v40, 0.0  ;;  %v10918_v11 = vmax.f32 %v10886_v23, 0.0  ;;  %v10919_v46 = vmax.f32 %v10887_v63, 0.0  ;;  %v10920_v8 = vmax.f32 %v10888_v20, 0.0 }
0x10e4   :  { %11451 = vst.msk [vmem:[%s18130_s9 + $0x120] sm:$0xff] %vm5613_vm12, %v10909_v9  ;;  %11452 = vst.msk [vmem:[%s18130_s9 + $0x128] sm:$0xff] %vm5613_vm12, %v10910_v4  ;;  %v10921_v6 = vmax.f32 %v10889_v0, 0.0  ;;  %v10922_v27 = vmax.f32 %v10890_v59, 0.0  ;;  %v10923_v50 = vmax.f32 %v10891_v48, 0.0  ;;  %v10924_v35 = vmax.f32 %v10892_v47, 0.0 }
0x10e5   :  { %11453 = vst.msk [vmem:[%s18130_s9 + $0x130] sm:$0xff] %vm5613_vm12, %v10911_v28  ;;  %11454 = vst.msk [vmem:[%s18130_s9 + $0x138] sm:$0xff] %vm5613_vm12, %v10912_v43  ;;  %v10925_v7 = vmax.f32 %v17957_v13, 0.0  ;;  %v10926_v51 = vmax.f32 %v17959_v49, 0.0  ;;  %v10927_v14 = vmax.f32 %v17961_v61, 0.0  ;;  %v10928_v24 = vmax.f32 %v17963_v10, 0.0 }
0x10e6   :  { %11455 = vst.msk [vmem:[%s18130_s9 + $0x140] sm:$0xff] %vm5613_vm12, %v10913_v29  ;;  %11456 = vst.msk [vmem:[%s18130_s9 + $0x148] sm:$0xff] %vm5613_vm12, %v10914_v57  ;;  %v10929_v55 = vmax.f32 %v17965_v60, 0.0  ;;  %v10930_v38 = vmax.f32 %v17967_v36, 0.0  ;;  %v10931_v21 = vmax.f32 %v17969_v12, 0.0  ;;  %v10932_v45 = vmax.f32 %v17971_v31, 0.0 }
0x10e7   :  { %11457 = vst.msk [vmem:[%s18130_s9 + $0x150] sm:$0xff] %vm5613_vm12, %v10915_v58  ;;  %11458 = vst.msk [vmem:[%s18130_s9 + $0x158] sm:$0xff] %vm5613_vm12, %v10916_v32  ;;  %v10933_v18 = vmax.f32 %v17973_v3, 0.0  ;;  %v10934_v37 = vmax.f32 %v17975_v62, 0.0  ;;  %v10935_v33 = vmax.f32 %v17977_v19, 0.0  ;;  %v10936_v2 = vmax.f32 %v17979_v25, 0.0 }
0x10e8   :  { %11459 = vst.msk [vmem:[%s18130_s9 + $0x160] sm:$0xff] %vm5613_vm12, %v10917_v53  ;;  %11460 = vst.msk [vmem:[%s18130_s9 + $0x168] sm:$0xff] %vm5613_vm12, %v10918_v11 }
0x10e9   :  { %11461 = vst.msk [vmem:[%s18130_s9 + $0x170] sm:$0xff] %vm5613_vm12, %v10919_v46  ;;  %11462 = vst.msk [vmem:[%s18130_s9 + $0x178] sm:$0xff] %vm5613_vm12, %v10920_v8 }
0x10ea   :  { %11463 = vst.msk [vmem:[%s18130_s9 + $0x180] sm:$0xff] %vm5613_vm12, %v10921_v6  ;;  %11464 = vst.msk [vmem:[%s18130_s9 + $0x188] sm:$0xff] %vm5613_vm12, %v10922_v27 }
0x10eb   :  { %11465 = vst.msk [vmem:[%s18130_s9 + $0x190] sm:$0xff] %vm5613_vm12, %v10923_v50  ;;  %11466 = vst.msk [vmem:[%s18130_s9 + $0x198] sm:$0xff] %vm5613_vm12, %v10924_v35 }
0x10ec   :  { %11467 = vst.msk [vmem:[%s18130_s9 + $0x1a0] sm:$0xff] %vm5613_vm12, %v10925_v7  ;;  %11468 = vst.msk [vmem:[%s18130_s9 + $0x1a8] sm:$0xff] %vm5613_vm12, %v10926_v51 }
0x10ed   :  { %11469 = vst.msk [vmem:[%s18130_s9 + $0x1b0] sm:$0xff] %vm5613_vm12, %v10927_v14  ;;  %11470 = vst.msk [vmem:[%s18130_s9 + $0x1b8] sm:$0xff] %vm5613_vm12, %v10928_v24 }
0x10ee   :  { %11471 = vst.msk [vmem:[%s18130_s9 + $0x1c0] sm:$0xff] %vm5613_vm12, %v10929_v55  ;;  %11472 = vst.msk [vmem:[%s18130_s9 + $0x1c8] sm:$0xff] %vm5613_vm12, %v10930_v38 }
0x10ef   :  { %11473 = vst.msk [vmem:[%s18130_s9 + $0x1d0] sm:$0xff] %vm5613_vm12, %v10931_v21  ;;  %11474 = vst.msk [vmem:[%s18130_s9 + $0x1d8] sm:$0xff] %vm5613_vm12, %v10932_v45 }
0x10f0   :  { %11475 = vst.msk [vmem:[%s18130_s9 + $0x1e0] sm:$0xff] %vm5613_vm12, %v10933_v18  ;;  %11476 = vst.msk [vmem:[%s18130_s9 + $0x1e8] sm:$0xff] %vm5613_vm12, %v10934_v37 }
0x10f1   :  { %11477 = vst.msk [vmem:[%s18130_s9 + $0x1f0] sm:$0xff] %vm5613_vm12, %v10935_v33  ;;  %11478 = vst.msk [vmem:[%s18130_s9 + $0x1f8] sm:$0xff] %vm5613_vm12, %v10936_v2 }

</bundles_post_ra>
